<compile_context>
chip_gen: v5e
topology: v5e:2x2
jax: 0.10.0
libtpu: 0.0.40
codegen_flags: <defaults>
</compile_context>

<pallas_src>
import functools

import jax
import jax.numpy as jnp
from jax.experimental import pallas as pl
from jax.experimental.pallas import tpu as pltpu


# ----------------------------------------------------------------------------
# Fused kernel: conv1+bn1+relu -> conv2+bn2 -> SE -> residual add -> relu
# ----------------------------------------------------------------------------
def se_basic_block_kernel(x_ref, w1_ref, b1_ref, w2_ref, b2_ref,
                          f1_ref, f2_ref, o_ref, xpad_ref, acc_ref, *, H, W):
    # x_ref:   (H, W, C)       input tile for one batch element (also identity)
    # w*_ref:  (3, 3, C, C)    HWIO conv weights with BN scale folded in
    # b*_ref:  (1, C)          folded BatchNorm bias (f32)
    # f1_ref:  (C, C//r)       fc1.weight.T ; f2_ref: (C//r, C) fc2.weight.T
    # o_ref:   (H, W, C)       output tile
    # xpad_ref:(H+2, W+16, C)  zero-halo conv-input scratch (activation dtype)
    # acc_ref: (H*W, C)        f32 conv accumulator scratch (reused by both convs)
    C = x_ref.shape[-1]
    PAD = 8  # left halo offset: keeps the interior store sublane-aligned.

    # Zero the halo scratch; the interior is overwritten below and the border
    # rows/columns stay zero for both convs ("same" padding).
    xpad_ref[...] = jnp.zeros_like(xpad_ref)
    xpad_ref[1:H + 1, PAD:PAD + W, :] = x_ref[...]

    def conv3x3(w_ref):
        # 3x3 conv as 9 shifted (H*W, C) x (C, C) MXU matmuls accumulated
        # directly in the f32 VMEM scratch (keeps the accumulator out of vregs).
        for dy in range(3):
            for dx in range(3):
                patch = xpad_ref[dy:dy + H, PAD - 1 + dx:PAD - 1 + dx + W, :]
                contrib = jnp.dot(patch.reshape(H * W, C), w_ref[dy, dx],
                                  preferred_element_type=jnp.float32)
                if dy == 0 and dx == 0:
                    acc_ref[...] = contrib
                else:
                    acc_ref[...] += contrib

    # conv1 (+ folded bn1) + relu -> back into the zero-halo scratch for conv2.
    conv3x3(w1_ref)
    o1 = jnp.maximum(acc_ref[...] + b1_ref[...], 0.0)
    xpad_ref[1:H + 1, PAD:PAD + W, :] = o1.reshape(H, W, C).astype(xpad_ref.dtype)

    # conv2 (+ folded bn2 scale); bias b2 is applied lazily below.
    conv3x3(w2_ref)

    # SE block: global average pool -> fc1 -> relu -> fc2 -> sigmoid.
    pooled = (jnp.sum(acc_ref[...], axis=0, keepdims=True) * (1.0 / (H * W))
              + b2_ref[...])                                            # (1, C)
    h = jnp.maximum(
        jnp.dot(pooled, f1_ref[...], preferred_element_type=jnp.float32), 0.0)
    s = jax.nn.sigmoid(
        jnp.dot(h, f2_ref[...], preferred_element_type=jnp.float32))   # (1, C)

    # Channel scale + residual add (stride=1, no downsample -> identity = x) + ReLU.
    out = ((acc_ref[...] + b2_ref[...]) * s
           + x_ref[...].reshape(H * W, C).astype(jnp.float32))
    o_ref[...] = jnp.maximum(out, 0.0).astype(o_ref.dtype).reshape(H, W, C)


def se_basic_block_forward(x_nhwc, params):
    N, H, W, C = x_nhwc.shape
    Cr = params["w_fc1_t"].shape[1]
    kernel = functools.partial(se_basic_block_kernel, H=H, W=W)
    return pl.pallas_call(
        kernel,
        out_shape=jax.ShapeDtypeStruct((N, H, W, C), x_nhwc.dtype),
        grid=(N,),
        in_specs=[
            pl.BlockSpec((None, H, W, C), lambda b: (b, 0, 0, 0)),   # x (= identity)
            pl.BlockSpec((3, 3, C, C), lambda b: (0, 0, 0, 0)),      # conv1 * bn1 scale
            pl.BlockSpec((1, C), lambda b: (0, 0)),                  # bn1 bias
            pl.BlockSpec((3, 3, C, C), lambda b: (0, 0, 0, 0)),      # conv2 * bn2 scale
            pl.BlockSpec((1, C), lambda b: (0, 0)),                  # bn2 bias
            pl.BlockSpec((C, Cr), lambda b: (0, 0)),                 # fc1.weight.T
            pl.BlockSpec((Cr, C), lambda b: (0, 0)),                 # fc2.weight.T
        ],
        out_specs=pl.BlockSpec((None, H, W, C), lambda b: (b, 0, 0, 0)),
        scratch_shapes=[
            pltpu.VMEM((H + 2, W + 16, C), x_nhwc.dtype),  # zero-halo conv input
            pltpu.VMEM((H * W, C), jnp.float32),           # conv f32 accumulator
        ],
        compiler_params=pltpu.CompilerParams(
            dimension_semantics=("parallel",)),
    )(x_nhwc, params["w_conv1_f"], params["bn1_bias"],
      params["w_conv2_f"], params["bn2_bias"],
      params["w_fc1_t"], params["w_fc2_t"])


def fold_bn_into_conv(w_hwio, gamma, beta, mean, var, eps=1e-5):
    """Fold inference BatchNorm into the preceding conv (per output channel)."""
    scale = gamma / jnp.sqrt(var + eps)
    bias = beta - mean * scale
    return w_hwio * scale[None, None, None, :], bias.reshape(1, -1)


# ----------------------------------------------------------------------------
# Pure-JAX reference (unfolded BN, for correctness check)
# ----------------------------------------------------------------------------
def reference_forward(x, raw, eps=1e-5):
    def conv(x, w):
        return jax.lax.conv_general_dilated(
            x, w, window_strides=(1, 1), padding="SAME",
            dimension_numbers=("NHWC", "HWIO", "NHWC"))

    def bn(x, g, b, m, v):
        return (x - m) / jnp.sqrt(v + eps) * g + b

    identity = x
    out = jnp.maximum(bn(conv(x, raw["w_conv1"]), raw["bn1_gamma"],
                         raw["bn1_beta"], raw["bn1_mean"], raw["bn1_var"]), 0.0)
    out = bn(conv(out, raw["w_conv2"]), raw["bn2_gamma"],
             raw["bn2_beta"], raw["bn2_mean"], raw["bn2_var"])
    pooled = jnp.mean(out, axis=(1, 2))                               # (N, C)
    h = jnp.maximum(pooled @ raw["w_fc1"].T, 0.0)
    s = jax.nn.sigmoid(h @ raw["w_fc2"].T)                            # (N, C)
    out = out * s[:, None, None, :] + identity
    return jnp.maximum(out, 0.0)


if __name__ == "__main__":
    # Small shapes consistent with the module: reduction=16 => channels >= 16.
    N, C, H, W = 2, 32, 16, 16
    reduction = 16
    Cr = C // reduction

    key = jax.random.PRNGKey(0)
    keys = jax.random.split(key, 10)

    raw = {
        "w_conv1": jax.random.normal(keys[0], (3, 3, C, C), jnp.float32) * 0.05,
        "w_conv2": jax.random.normal(keys[1], (3, 3, C, C), jnp.float32) * 0.05,
        "bn1_gamma": 1.0 + 0.1 * jax.random.normal(keys[2], (C,), jnp.float32),
        "bn1_beta": 0.1 * jax.random.normal(keys[3], (C,), jnp.float32),
        "bn1_mean": 0.1 * jax.random.normal(keys[4], (C,), jnp.float32),
        "bn1_var": jnp.abs(jax.random.normal(keys[5], (C,), jnp.float32)) + 0.5,
        "bn2_gamma": 1.0 + 0.1 * jax.random.normal(keys[6], (C,), jnp.float32),
        "bn2_beta": 0.1 * jax.random.normal(keys[7], (C,), jnp.float32),
        "bn2_mean": jnp.zeros((C,), jnp.float32),
        "bn2_var": jnp.ones((C,), jnp.float32),
        # fc1.weight: (C//r, C), fc2.weight: (C, C//r); kernel uses transposes.
        "w_fc1": jax.random.normal(keys[8], (Cr, C), jnp.float32) * 0.1,
        "w_fc2": jax.random.normal(keys[9], (C, Cr), jnp.float32) * 0.1,
    }

    w1f, b1 = fold_bn_into_conv(raw["w_conv1"], raw["bn1_gamma"], raw["bn1_beta"],
                                raw["bn1_mean"], raw["bn1_var"])
    w2f, b2 = fold_bn_into_conv(raw["w_conv2"], raw["bn2_gamma"], raw["bn2_beta"],
                                raw["bn2_mean"], raw["bn2_var"])
    params = {
        "w_conv1_f": w1f, "bn1_bias": b1,
        "w_conv2_f": w2f, "bn2_bias": b2,
        "w_fc1_t": raw["w_fc1"].T, "w_fc2_t": raw["w_fc2"].T,
    }

    # Input: PyTorch would be NCHW (N, C, H, W); kernel layout is NHWC.
    x_nchw = jax.random.normal(jax.random.PRNGKey(0), (N, C, H, W), jnp.float32)
    x_nhwc = jnp.transpose(x_nchw, (0, 2, 3, 1))

    out = jax.block_until_ready(se_basic_block_forward(x_nhwc, params))
    ref = jax.block_until_ready(reference_forward(x_nhwc, raw))

    assert out.shape == (N, H, W, C)
    assert jnp.allclose(out, ref, atol=1e-3, rtol=1e-3), (
        float(jnp.max(jnp.abs(out - ref))))
    print("KERNEL_OK")
</pallas_src>

<mosaic_0001>
module attributes {stable_mosaic.version = 11 : i64} {
  func.func @se_basic_block_kernel(%arg0: i32, %arg1: memref<1x16x16x32xf32, #tpu.memory_space<vmem>>, %arg2: memref<3x3x32x32xf32, #tpu.memory_space<vmem>>, %arg3: memref<1x32xf32, #tpu.memory_space<vmem>>, %arg4: memref<3x3x32x32xf32, #tpu.memory_space<vmem>>, %arg5: memref<1x32xf32, #tpu.memory_space<vmem>>, %arg6: memref<32x2xf32, #tpu.memory_space<vmem>>, %arg7: memref<2x32xf32, #tpu.memory_space<vmem>>, %arg8: memref<1x16x16x32xf32, #tpu.memory_space<vmem>>, %arg9: memref<18x32x32xf32, #tpu.memory_space<vmem>>, %arg10: memref<256x32xf32, #tpu.memory_space<vmem>>) attributes {dimension_semantics = [#tpu.dimension_semantics<parallel>], iteration_bounds = array<i64: 2>, scalar_prefetch = 0 : i64, scratch_operands = 2 : i64, tpu.core_type = #tpu.core_type<tc>, window_params = [{transform_indices = @transform_0, window_bounds = array<i64: 1, 16, 16, 32>}, {pipeline_mode = #tpu.pipeline_mode<synchronous>, transform_indices = @transform_1, window_bounds = array<i64: 3, 3, 32, 32>}, {pipeline_mode = #tpu.pipeline_mode<synchronous>, transform_indices = @transform_2, window_bounds = array<i64: 1, 32>}, {pipeline_mode = #tpu.pipeline_mode<synchronous>, transform_indices = @transform_3, window_bounds = array<i64: 3, 3, 32, 32>}, {pipeline_mode = #tpu.pipeline_mode<synchronous>, transform_indices = @transform_4, window_bounds = array<i64: 1, 32>}, {pipeline_mode = #tpu.pipeline_mode<synchronous>, transform_indices = @transform_5, window_bounds = array<i64: 32, 2>}, {pipeline_mode = #tpu.pipeline_mode<synchronous>, transform_indices = @transform_6, window_bounds = array<i64: 2, 32>}, {transform_indices = @transform_7, window_bounds = array<i64: 1, 16, 16, 32>}]} {
    %cst = arith.constant 0.000000e+00 : f32
    %0 = vector.broadcast %cst : f32 to vector<18x32x32xf32>
    %c0 = arith.constant 0 : index
    %c0_0 = arith.constant 0 : index
    %c0_1 = arith.constant 0 : index
    %1 = vector.load %arg9[%c0, %c0_0, %c0_1] : memref<18x32x32xf32, #tpu.memory_space<vmem>>, vector<18x32x32xf32>
    tpu.vector_store %arg9[%c0, %c0_0, %c0_1], %0 {strides = array<i32>} : memref<18x32x32xf32, #tpu.memory_space<vmem>>, vector<18x32x32xf32>,
    %c0_2 = arith.constant 0 : index
    %c0_3 = arith.constant 0 : index
    %c0_4 = arith.constant 0 : index
    %c0_5 = arith.constant 0 : index
    %2 = vector.load %arg1[%c0_2, %c0_3, %c0_4, %c0_5] : memref<1x16x16x32xf32, #tpu.memory_space<vmem>>, vector<1x16x16x32xf32>
    %3 = vector.shape_cast %2 : vector<1x16x16x32xf32> to vector<16x16x32xf32>
    %c1 = arith.constant 1 : index
    %c8 = arith.constant 8 : index
    %c0_6 = arith.constant 0 : index
    %4 = vector.load %arg9[%c1, %c8, %c0_6] : memref<18x32x32xf32, #tpu.memory_space<vmem>>, vector<16x16x32xf32>
    tpu.vector_store %arg9[%c1, %c8, %c0_6], %3 {strides = array<i32>} : memref<18x32x32xf32, #tpu.memory_space<vmem>>, vector<16x16x32xf32>,
    %c0_7 = arith.constant 0 : index
    %c7 = arith.constant 7 : index
    %c0_8 = arith.constant 0 : index
    %5 = vector.load %arg9[%c0_7, %c7, %c0_8] : memref<18x32x32xf32, #tpu.memory_space<vmem>>, vector<16x16x32xf32>
    %6 = vector.shape_cast %5 : vector<16x16x32xf32> to vector<256x32xf32>
    %c0_9 = arith.constant 0 : index
    %c0_10 = arith.constant 0 : index
    %c0_11 = arith.constant 0 : index
    %c0_12 = arith.constant 0 : index
    %7 = vector.load %arg2[%c0_9, %c0_10, %c0_11, %c0_12] : memref<3x3x32x32xf32, #tpu.memory_space<vmem>>, vector<1x1x32x32xf32>
    %8 = vector.shape_cast %7 : vector<1x1x32x32xf32> to vector<32x32xf32>
    %cst_13 = arith.constant dense<0.000000e+00> : vector<256x32xf32>
    %9 = tpu.matmul %6, %8, %cst_13 {dimension_numbers = #tpu.dot_dimension_numbers<[1], [0], [0], [1], [0, 0, 1, 1], [], []>} : vector<256x32xf32>, vector<32x32xf32>, vector<256x32xf32> -> vector<256x32xf32>
    %c0_14 = arith.constant 0 : index
    %c0_15 = arith.constant 0 : index
    %10 = vector.load %arg10[%c0_14, %c0_15] : memref<256x32xf32, #tpu.memory_space<vmem>>, vector<256x32xf32>
    tpu.vector_store %arg10[%c0_14, %c0_15], %9 {strides = array<i32>} : memref<256x32xf32, #tpu.memory_space<vmem>>, vector<256x32xf32>,
    %c0_16 = arith.constant 0 : index
    %c8_17 = arith.constant 8 : index
    %c0_18 = arith.constant 0 : index
    %11 = vector.load %arg9[%c0_16, %c8_17, %c0_18] : memref<18x32x32xf32, #tpu.memory_space<vmem>>, vector<16x16x32xf32>
    %12 = vector.shape_cast %11 : vector<16x16x32xf32> to vector<256x32xf32>
    %c0_19 = arith.constant 0 : index
    %c1_20 = arith.constant 1 : index
    %c0_21 = arith.constant 0 : index
    %c0_22 = arith.constant 0 : index
    %13 = vector.load %arg2[%c0_19, %c1_20, %c0_21, %c0_22] : memref<3x3x32x32xf32, #tpu.memory_space<vmem>>, vector<1x1x32x32xf32>
    %14 = vector.shape_cast %13 : vector<1x1x32x32xf32> to vector<32x32xf32>
    %cst_23 = arith.constant dense<0.000000e+00> : vector<256x32xf32>
    %15 = tpu.matmul %12, %14, %cst_23 {dimension_numbers = #tpu.dot_dimension_numbers<[1], [0], [0], [1], [0, 0, 1, 1], [], []>} : vector<256x32xf32>, vector<32x32xf32>, vector<256x32xf32> -> vector<256x32xf32>
    %c0_24 = arith.constant 0 : index
    %c0_25 = arith.constant 0 : index
    %16 = vector.load %arg10[%c0_24, %c0_25] : memref<256x32xf32, #tpu.memory_space<vmem>>, vector<256x32xf32>
    %17 = arith.addf %16, %15 : vector<256x32xf32>
    %c0_26 = arith.constant 0 : index
    %c0_27 = arith.constant 0 : index
    %18 = vector.load %arg10[%c0_26, %c0_27] : memref<256x32xf32, #tpu.memory_space<vmem>>, vector<256x32xf32>
    tpu.vector_store %arg10[%c0_26, %c0_27], %17 {strides = array<i32>} : memref<256x32xf32, #tpu.memory_space<vmem>>, vector<256x32xf32>,
    %c0_28 = arith.constant 0 : index
    %c9 = arith.constant 9 : index
    %c0_29 = arith.constant 0 : index
    %19 = vector.load %arg9[%c0_28, %c9, %c0_29] : memref<18x32x32xf32, #tpu.memory_space<vmem>>, vector<16x16x32xf32>
    %20 = vector.shape_cast %19 : vector<16x16x32xf32> to vector<256x32xf32>
    %c0_30 = arith.constant 0 : index
    %c2 = arith.constant 2 : index
    %c0_31 = arith.constant 0 : index
    %c0_32 = arith.constant 0 : index
    %21 = vector.load %arg2[%c0_30, %c2, %c0_31, %c0_32] : memref<3x3x32x32xf32, #tpu.memory_space<vmem>>, vector<1x1x32x32xf32>
    %22 = vector.shape_cast %21 : vector<1x1x32x32xf32> to vector<32x32xf32>
    %cst_33 = arith.constant dense<0.000000e+00> : vector<256x32xf32>
    %23 = tpu.matmul %20, %22, %cst_33 {dimension_numbers = #tpu.dot_dimension_numbers<[1], [0], [0], [1], [0, 0, 1, 1], [], []>} : vector<256x32xf32>, vector<32x32xf32>, vector<256x32xf32> -> vector<256x32xf32>
    %c0_34 = arith.constant 0 : index
    %c0_35 = arith.constant 0 : index
    %24 = vector.load %arg10[%c0_34, %c0_35] : memref<256x32xf32, #tpu.memory_space<vmem>>, vector<256x32xf32>
    %25 = arith.addf %24, %23 : vector<256x32xf32>
    %c0_36 = arith.constant 0 : index
    %c0_37 = arith.constant 0 : index
    %26 = vector.load %arg10[%c0_36, %c0_37] : memref<256x32xf32, #tpu.memory_space<vmem>>, vector<256x32xf32>
    tpu.vector_store %arg10[%c0_36, %c0_37], %25 {strides = array<i32>} : memref<256x32xf32, #tpu.memory_space<vmem>>, vector<256x32xf32>,
    %c1_38 = arith.constant 1 : index
    %c7_39 = arith.constant 7 : index
    %c0_40 = arith.constant 0 : index
    %27 = vector.load %arg9[%c1_38, %c7_39, %c0_40] : memref<18x32x32xf32, #tpu.memory_space<vmem>>, vector<16x16x32xf32>
    %28 = vector.shape_cast %27 : vector<16x16x32xf32> to vector<256x32xf32>
    %c1_41 = arith.constant 1 : index
    %c0_42 = arith.constant 0 : index
    %c0_43 = arith.constant 0 : index
    %c0_44 = arith.constant 0 : index
    %29 = vector.load %arg2[%c1_41, %c0_42, %c0_43, %c0_44] : memref<3x3x32x32xf32, #tpu.memory_space<vmem>>, vector<1x1x32x32xf32>
    %30 = vector.shape_cast %29 : vector<1x1x32x32xf32> to vector<32x32xf32>
    %cst_45 = arith.constant dense<0.000000e+00> : vector<256x32xf32>
    %31 = tpu.matmul %28, %30, %cst_45 {dimension_numbers = #tpu.dot_dimension_numbers<[1], [0], [0], [1], [0, 0, 1, 1], [], []>} : vector<256x32xf32>, vector<32x32xf32>, vector<256x32xf32> -> vector<256x32xf32>
    %c0_46 = arith.constant 0 : index
    %c0_47 = arith.constant 0 : index
    %32 = vector.load %arg10[%c0_46, %c0_47] : memref<256x32xf32, #tpu.memory_space<vmem>>, vector<256x32xf32>
    %33 = arith.addf %32, %31 : vector<256x32xf32>
    %c0_48 = arith.constant 0 : index
    %c0_49 = arith.constant 0 : index
    %34 = vector.load %arg10[%c0_48, %c0_49] : memref<256x32xf32, #tpu.memory_space<vmem>>, vector<256x32xf32>
    tpu.vector_store %arg10[%c0_48, %c0_49], %33 {strides = array<i32>} : memref<256x32xf32, #tpu.memory_space<vmem>>, vector<256x32xf32>,
    %c1_50 = arith.constant 1 : index
    %c8_51 = arith.constant 8 : index
    %c0_52 = arith.constant 0 : index
    %35 = vector.load %arg9[%c1_50, %c8_51, %c0_52] : memref<18x32x32xf32, #tpu.memory_space<vmem>>, vector<16x16x32xf32>
    %36 = vector.shape_cast %35 : vector<16x16x32xf32> to vector<256x32xf32>
    %c1_53 = arith.constant 1 : index
    %c1_54 = arith.constant 1 : index
    %c0_55 = arith.constant 0 : index
    %c0_56 = arith.constant 0 : index
    %37 = vector.load %arg2[%c1_53, %c1_54, %c0_55, %c0_56] : memref<3x3x32x32xf32, #tpu.memory_space<vmem>>, vector<1x1x32x32xf32>
    %38 = vector.shape_cast %37 : vector<1x1x32x32xf32> to vector<32x32xf32>
    %cst_57 = arith.constant dense<0.000000e+00> : vector<256x32xf32>
    %39 = tpu.matmul %36, %38, %cst_57 {dimension_numbers = #tpu.dot_dimension_numbers<[1], [0], [0], [1], [0, 0, 1, 1], [], []>} : vector<256x32xf32>, vector<32x32xf32>, vector<256x32xf32> -> vector<256x32xf32>
    %c0_58 = arith.constant 0 : index
    %c0_59 = arith.constant 0 : index
    %40 = vector.load %arg10[%c0_58, %c0_59] : memref<256x32xf32, #tpu.memory_space<vmem>>, vector<256x32xf32>
    %41 = arith.addf %40, %39 : vector<256x32xf32>
    %c0_60 = arith.constant 0 : index
    %c0_61 = arith.constant 0 : index
    %42 = vector.load %arg10[%c0_60, %c0_61] : memref<256x32xf32, #tpu.memory_space<vmem>>, vector<256x32xf32>
    tpu.vector_store %arg10[%c0_60, %c0_61], %41 {strides = array<i32>} : memref<256x32xf32, #tpu.memory_space<vmem>>, vector<256x32xf32>,
    %c1_62 = arith.constant 1 : index
    %c9_63 = arith.constant 9 : index
    %c0_64 = arith.constant 0 : index
    %43 = vector.load %arg9[%c1_62, %c9_63, %c0_64] : memref<18x32x32xf32, #tpu.memory_space<vmem>>, vector<16x16x32xf32>
    %44 = vector.shape_cast %43 : vector<16x16x32xf32> to vector<256x32xf32>
    %c1_65 = arith.constant 1 : index
    %c2_66 = arith.constant 2 : index
    %c0_67 = arith.constant 0 : index
    %c0_68 = arith.constant 0 : index
    %45 = vector.load %arg2[%c1_65, %c2_66, %c0_67, %c0_68] : memref<3x3x32x32xf32, #tpu.memory_space<vmem>>, vector<1x1x32x32xf32>
    %46 = vector.shape_cast %45 : vector<1x1x32x32xf32> to vector<32x32xf32>
    %cst_69 = arith.constant dense<0.000000e+00> : vector<256x32xf32>
    %47 = tpu.matmul %44, %46, %cst_69 {dimension_numbers = #tpu.dot_dimension_numbers<[1], [0], [0], [1], [0, 0, 1, 1], [], []>} : vector<256x32xf32>, vector<32x32xf32>, vector<256x32xf32> -> vector<256x32xf32>
    %c0_70 = arith.constant 0 : index
    %c0_71 = arith.constant 0 : index
    %48 = vector.load %arg10[%c0_70, %c0_71] : memref<256x32xf32, #tpu.memory_space<vmem>>, vector<256x32xf32>
    %49 = arith.addf %48, %47 : vector<256x32xf32>
    %c0_72 = arith.constant 0 : index
    %c0_73 = arith.constant 0 : index
    %50 = vector.load %arg10[%c0_72, %c0_73] : memref<256x32xf32, #tpu.memory_space<vmem>>, vector<256x32xf32>
    tpu.vector_store %arg10[%c0_72, %c0_73], %49 {strides = array<i32>} : memref<256x32xf32, #tpu.memory_space<vmem>>, vector<256x32xf32>,
    %c2_74 = arith.constant 2 : index
    %c7_75 = arith.constant 7 : index
    %c0_76 = arith.constant 0 : index
    %51 = vector.load %arg9[%c2_74, %c7_75, %c0_76] : memref<18x32x32xf32, #tpu.memory_space<vmem>>, vector<16x16x32xf32>
    %52 = vector.shape_cast %51 : vector<16x16x32xf32> to vector<256x32xf32>
    %c2_77 = arith.constant 2 : index
    %c0_78 = arith.constant 0 : index
    %c0_79 = arith.constant 0 : index
    %c0_80 = arith.constant 0 : index
    %53 = vector.load %arg2[%c2_77, %c0_78, %c0_79, %c0_80] : memref<3x3x32x32xf32, #tpu.memory_space<vmem>>, vector<1x1x32x32xf32>
    %54 = vector.shape_cast %53 : vector<1x1x32x32xf32> to vector<32x32xf32>
    %cst_81 = arith.constant dense<0.000000e+00> : vector<256x32xf32>
    %55 = tpu.matmul %52, %54, %cst_81 {dimension_numbers = #tpu.dot_dimension_numbers<[1], [0], [0], [1], [0, 0, 1, 1], [], []>} : vector<256x32xf32>, vector<32x32xf32>, vector<256x32xf32> -> vector<256x32xf32>
    %c0_82 = arith.constant 0 : index
    %c0_83 = arith.constant 0 : index
    %56 = vector.load %arg10[%c0_82, %c0_83] : memref<256x32xf32, #tpu.memory_space<vmem>>, vector<256x32xf32>
    %57 = arith.addf %56, %55 : vector<256x32xf32>
    %c0_84 = arith.constant 0 : index
    %c0_85 = arith.constant 0 : index
    %58 = vector.load %arg10[%c0_84, %c0_85] : memref<256x32xf32, #tpu.memory_space<vmem>>, vector<256x32xf32>
    tpu.vector_store %arg10[%c0_84, %c0_85], %57 {strides = array<i32>} : memref<256x32xf32, #tpu.memory_space<vmem>>, vector<256x32xf32>,
    %c2_86 = arith.constant 2 : index
    %c8_87 = arith.constant 8 : index
    %c0_88 = arith.constant 0 : index
    %59 = vector.load %arg9[%c2_86, %c8_87, %c0_88] : memref<18x32x32xf32, #tpu.memory_space<vmem>>, vector<16x16x32xf32>
    %60 = vector.shape_cast %59 : vector<16x16x32xf32> to vector<256x32xf32>
    %c2_89 = arith.constant 2 : index
    %c1_90 = arith.constant 1 : index
    %c0_91 = arith.constant 0 : index
    %c0_92 = arith.constant 0 : index
    %61 = vector.load %arg2[%c2_89, %c1_90, %c0_91, %c0_92] : memref<3x3x32x32xf32, #tpu.memory_space<vmem>>, vector<1x1x32x32xf32>
    %62 = vector.shape_cast %61 : vector<1x1x32x32xf32> to vector<32x32xf32>
    %cst_93 = arith.constant dense<0.000000e+00> : vector<256x32xf32>
    %63 = tpu.matmul %60, %62, %cst_93 {dimension_numbers = #tpu.dot_dimension_numbers<[1], [0], [0], [1], [0, 0, 1, 1], [], []>} : vector<256x32xf32>, vector<32x32xf32>, vector<256x32xf32> -> vector<256x32xf32>
    %c0_94 = arith.constant 0 : index
    %c0_95 = arith.constant 0 : index
    %64 = vector.load %arg10[%c0_94, %c0_95] : memref<256x32xf32, #tpu.memory_space<vmem>>, vector<256x32xf32>
    %65 = arith.addf %64, %63 : vector<256x32xf32>
    %c0_96 = arith.constant 0 : index
    %c0_97 = arith.constant 0 : index
    %66 = vector.load %arg10[%c0_96, %c0_97] : memref<256x32xf32, #tpu.memory_space<vmem>>, vector<256x32xf32>
    tpu.vector_store %arg10[%c0_96, %c0_97], %65 {strides = array<i32>} : memref<256x32xf32, #tpu.memory_space<vmem>>, vector<256x32xf32>,
    %c2_98 = arith.constant 2 : index
    %c9_99 = arith.constant 9 : index
    %c0_100 = arith.constant 0 : index
    %67 = vector.load %arg9[%c2_98, %c9_99, %c0_100] : memref<18x32x32xf32, #tpu.memory_space<vmem>>, vector<16x16x32xf32>
    %68 = vector.shape_cast %67 : vector<16x16x32xf32> to vector<256x32xf32>
    %c2_101 = arith.constant 2 : index
    %c2_102 = arith.constant 2 : index
    %c0_103 = arith.constant 0 : index
    %c0_104 = arith.constant 0 : index
    %69 = vector.load %arg2[%c2_101, %c2_102, %c0_103, %c0_104] : memref<3x3x32x32xf32, #tpu.memory_space<vmem>>, vector<1x1x32x32xf32>
    %70 = vector.shape_cast %69 : vector<1x1x32x32xf32> to vector<32x32xf32>
    %cst_105 = arith.constant dense<0.000000e+00> : vector<256x32xf32>
    %71 = tpu.matmul %68, %70, %cst_105 {dimension_numbers = #tpu.dot_dimension_numbers<[1], [0], [0], [1], [0, 0, 1, 1], [], []>} : vector<256x32xf32>, vector<32x32xf32>, vector<256x32xf32> -> vector<256x32xf32>
    %c0_106 = arith.constant 0 : index
    %c0_107 = arith.constant 0 : index
    %72 = vector.load %arg10[%c0_106, %c0_107] : memref<256x32xf32, #tpu.memory_space<vmem>>, vector<256x32xf32>
    %73 = arith.addf %72, %71 : vector<256x32xf32>
    %c0_108 = arith.constant 0 : index
    %c0_109 = arith.constant 0 : index
    %74 = vector.load %arg10[%c0_108, %c0_109] : memref<256x32xf32, #tpu.memory_space<vmem>>, vector<256x32xf32>
    tpu.vector_store %arg10[%c0_108, %c0_109], %73 {strides = array<i32>} : memref<256x32xf32, #tpu.memory_space<vmem>>, vector<256x32xf32>,
    %c0_110 = arith.constant 0 : index
    %c0_111 = arith.constant 0 : index
    %75 = vector.load %arg10[%c0_110, %c0_111] : memref<256x32xf32, #tpu.memory_space<vmem>>, vector<256x32xf32>
    %c0_112 = arith.constant 0 : index
    %c0_113 = arith.constant 0 : index
    %76 = vector.load %arg3[%c0_112, %c0_113] : memref<1x32xf32, #tpu.memory_space<vmem>>, vector<1x32xf32>
    %77 = vector.broadcast %76 : vector<1x32xf32> to vector<256x32xf32>
    %78 = arith.addf %75, %77 : vector<256x32xf32>
    %cst_114 = arith.constant 0.000000e+00 : f32
    %79 = vector.broadcast %cst_114 : f32 to vector<256x32xf32>
    %80 = arith.maximumf %78, %79 : vector<256x32xf32>
    %81 = vector.shape_cast %80 : vector<256x32xf32> to vector<16x16x32xf32>
    %c1_115 = arith.constant 1 : index
    %c8_116 = arith.constant 8 : index
    %c0_117 = arith.constant 0 : index
    %82 = vector.load %arg9[%c1_115, %c8_116, %c0_117] : memref<18x32x32xf32, #tpu.memory_space<vmem>>, vector<16x16x32xf32>
    tpu.vector_store %arg9[%c1_115, %c8_116, %c0_117], %81 {strides = array<i32>} : memref<18x32x32xf32, #tpu.memory_space<vmem>>, vector<16x16x32xf32>,
    %c0_118 = arith.constant 0 : index
    %c7_119 = arith.constant 7 : index
    %c0_120 = arith.constant 0 : index
    %83 = vector.load %arg9[%c0_118, %c7_119, %c0_120] : memref<18x32x32xf32, #tpu.memory_space<vmem>>, vector<16x16x32xf32>
    %84 = vector.shape_cast %83 : vector<16x16x32xf32> to vector<256x32xf32>
    %c0_121 = arith.constant 0 : index
    %c0_122 = arith.constant 0 : index
    %c0_123 = arith.constant 0 : index
    %c0_124 = arith.constant 0 : index
    %85 = vector.load %arg4[%c0_121, %c0_122, %c0_123, %c0_124] : memref<3x3x32x32xf32, #tpu.memory_space<vmem>>, vector<1x1x32x32xf32>
    %86 = vector.shape_cast %85 : vector<1x1x32x32xf32> to vector<32x32xf32>
    %cst_125 = arith.constant dense<0.000000e+00> : vector<256x32xf32>
    %87 = tpu.matmul %84, %86, %cst_125 {dimension_numbers = #tpu.dot_dimension_numbers<[1], [0], [0], [1], [0, 0, 1, 1], [], []>} : vector<256x32xf32>, vector<32x32xf32>, vector<256x32xf32> -> vector<256x32xf32>
    %c0_126 = arith.constant 0 : index
    %c0_127 = arith.constant 0 : index
    %88 = vector.load %arg10[%c0_126, %c0_127] : memref<256x32xf32, #tpu.memory_space<vmem>>, vector<256x32xf32>
    tpu.vector_store %arg10[%c0_126, %c0_127], %87 {strides = array<i32>} : memref<256x32xf32, #tpu.memory_space<vmem>>, vector<256x32xf32>,
    %c0_128 = arith.constant 0 : index
    %c8_129 = arith.constant 8 : index
    %c0_130 = arith.constant 0 : index
    %89 = vector.load %arg9[%c0_128, %c8_129, %c0_130] : memref<18x32x32xf32, #tpu.memory_space<vmem>>, vector<16x16x32xf32>
    %90 = vector.shape_cast %89 : vector<16x16x32xf32> to vector<256x32xf32>
    %c0_131 = arith.constant 0 : index
    %c1_132 = arith.constant 1 : index
    %c0_133 = arith.constant 0 : index
    %c0_134 = arith.constant 0 : index
    %91 = vector.load %arg4[%c0_131, %c1_132, %c0_133, %c0_134] : memref<3x3x32x32xf32, #tpu.memory_space<vmem>>, vector<1x1x32x32xf32>
    %92 = vector.shape_cast %91 : vector<1x1x32x32xf32> to vector<32x32xf32>
    %cst_135 = arith.constant dense<0.000000e+00> : vector<256x32xf32>
    %93 = tpu.matmul %90, %92, %cst_135 {dimension_numbers = #tpu.dot_dimension_numbers<[1], [0], [0], [1], [0, 0, 1, 1], [], []>} : vector<256x32xf32>, vector<32x32xf32>, vector<256x32xf32> -> vector<256x32xf32>
    %c0_136 = arith.constant 0 : index
    %c0_137 = arith.constant 0 : index
    %94 = vector.load %arg10[%c0_136, %c0_137] : memref<256x32xf32, #tpu.memory_space<vmem>>, vector<256x32xf32>
    %95 = arith.addf %94, %93 : vector<256x32xf32>
    %c0_138 = arith.constant 0 : index
    %c0_139 = arith.constant 0 : index
    %96 = vector.load %arg10[%c0_138, %c0_139] : memref<256x32xf32, #tpu.memory_space<vmem>>, vector<256x32xf32>
    tpu.vector_store %arg10[%c0_138, %c0_139], %95 {strides = array<i32>} : memref<256x32xf32, #tpu.memory_space<vmem>>, vector<256x32xf32>,
    %c0_140 = arith.constant 0 : index
    %c9_141 = arith.constant 9 : index
    %c0_142 = arith.constant 0 : index
    %97 = vector.load %arg9[%c0_140, %c9_141, %c0_142] : memref<18x32x32xf32, #tpu.memory_space<vmem>>, vector<16x16x32xf32>
    %98 = vector.shape_cast %97 : vector<16x16x32xf32> to vector<256x32xf32>
    %c0_143 = arith.constant 0 : index
    %c2_144 = arith.constant 2 : index
    %c0_145 = arith.constant 0 : index
    %c0_146 = arith.constant 0 : index
    %99 = vector.load %arg4[%c0_143, %c2_144, %c0_145, %c0_146] : memref<3x3x32x32xf32, #tpu.memory_space<vmem>>, vector<1x1x32x32xf32>
    %100 = vector.shape_cast %99 : vector<1x1x32x32xf32> to vector<32x32xf32>
    %cst_147 = arith.constant dense<0.000000e+00> : vector<256x32xf32>
    %101 = tpu.matmul %98, %100, %cst_147 {dimension_numbers = #tpu.dot_dimension_numbers<[1], [0], [0], [1], [0, 0, 1, 1], [], []>} : vector<256x32xf32>, vector<32x32xf32>, vector<256x32xf32> -> vector<256x32xf32>
    %c0_148 = arith.constant 0 : index
    %c0_149 = arith.constant 0 : index
    %102 = vector.load %arg10[%c0_148, %c0_149] : memref<256x32xf32, #tpu.memory_space<vmem>>, vector<256x32xf32>
    %103 = arith.addf %102, %101 : vector<256x32xf32>
    %c0_150 = arith.constant 0 : index
    %c0_151 = arith.constant 0 : index
    %104 = vector.load %arg10[%c0_150, %c0_151] : memref<256x32xf32, #tpu.memory_space<vmem>>, vector<256x32xf32>
    tpu.vector_store %arg10[%c0_150, %c0_151], %103 {strides = array<i32>} : memref<256x32xf32, #tpu.memory_space<vmem>>, vector<256x32xf32>,
    %c1_152 = arith.constant 1 : index
    %c7_153 = arith.constant 7 : index
    %c0_154 = arith.constant 0 : index
    %105 = vector.load %arg9[%c1_152, %c7_153, %c0_154] : memref<18x32x32xf32, #tpu.memory_space<vmem>>, vector<16x16x32xf32>
    %106 = vector.shape_cast %105 : vector<16x16x32xf32> to vector<256x32xf32>
    %c1_155 = arith.constant 1 : index
    %c0_156 = arith.constant 0 : index
    %c0_157 = arith.constant 0 : index
    %c0_158 = arith.constant 0 : index
    %107 = vector.load %arg4[%c1_155, %c0_156, %c0_157, %c0_158] : memref<3x3x32x32xf32, #tpu.memory_space<vmem>>, vector<1x1x32x32xf32>
    %108 = vector.shape_cast %107 : vector<1x1x32x32xf32> to vector<32x32xf32>
    %cst_159 = arith.constant dense<0.000000e+00> : vector<256x32xf32>
    %109 = tpu.matmul %106, %108, %cst_159 {dimension_numbers = #tpu.dot_dimension_numbers<[1], [0], [0], [1], [0, 0, 1, 1], [], []>} : vector<256x32xf32>, vector<32x32xf32>, vector<256x32xf32> -> vector<256x32xf32>
    %c0_160 = arith.constant 0 : index
    %c0_161 = arith.constant 0 : index
    %110 = vector.load %arg10[%c0_160, %c0_161] : memref<256x32xf32, #tpu.memory_space<vmem>>, vector<256x32xf32>
    %111 = arith.addf %110, %109 : vector<256x32xf32>
    %c0_162 = arith.constant 0 : index
    %c0_163 = arith.constant 0 : index
    %112 = vector.load %arg10[%c0_162, %c0_163] : memref<256x32xf32, #tpu.memory_space<vmem>>, vector<256x32xf32>
    tpu.vector_store %arg10[%c0_162, %c0_163], %111 {strides = array<i32>} : memref<256x32xf32, #tpu.memory_space<vmem>>, vector<256x32xf32>,
    %c1_164 = arith.constant 1 : index
    %c8_165 = arith.constant 8 : index
    %c0_166 = arith.constant 0 : index
    %113 = vector.load %arg9[%c1_164, %c8_165, %c0_166] : memref<18x32x32xf32, #tpu.memory_space<vmem>>, vector<16x16x32xf32>
    %114 = vector.shape_cast %113 : vector<16x16x32xf32> to vector<256x32xf32>
    %c1_167 = arith.constant 1 : index
    %c1_168 = arith.constant 1 : index
    %c0_169 = arith.constant 0 : index
    %c0_170 = arith.constant 0 : index
    %115 = vector.load %arg4[%c1_167, %c1_168, %c0_169, %c0_170] : memref<3x3x32x32xf32, #tpu.memory_space<vmem>>, vector<1x1x32x32xf32>
    %116 = vector.shape_cast %115 : vector<1x1x32x32xf32> to vector<32x32xf32>
    %cst_171 = arith.constant dense<0.000000e+00> : vector<256x32xf32>
    %117 = tpu.matmul %114, %116, %cst_171 {dimension_numbers = #tpu.dot_dimension_numbers<[1], [0], [0], [1], [0, 0, 1, 1], [], []>} : vector<256x32xf32>, vector<32x32xf32>, vector<256x32xf32> -> vector<256x32xf32>
    %c0_172 = arith.constant 0 : index
    %c0_173 = arith.constant 0 : index
    %118 = vector.load %arg10[%c0_172, %c0_173] : memref<256x32xf32, #tpu.memory_space<vmem>>, vector<256x32xf32>
    %119 = arith.addf %118, %117 : vector<256x32xf32>
    %c0_174 = arith.constant 0 : index
    %c0_175 = arith.constant 0 : index
    %120 = vector.load %arg10[%c0_174, %c0_175] : memref<256x32xf32, #tpu.memory_space<vmem>>, vector<256x32xf32>
    tpu.vector_store %arg10[%c0_174, %c0_175], %119 {strides = array<i32>} : memref<256x32xf32, #tpu.memory_space<vmem>>, vector<256x32xf32>,
    %c1_176 = arith.constant 1 : index
    %c9_177 = arith.constant 9 : index
    %c0_178 = arith.constant 0 : index
    %121 = vector.load %arg9[%c1_176, %c9_177, %c0_178] : memref<18x32x32xf32, #tpu.memory_space<vmem>>, vector<16x16x32xf32>
    %122 = vector.shape_cast %121 : vector<16x16x32xf32> to vector<256x32xf32>
    %c1_179 = arith.constant 1 : index
    %c2_180 = arith.constant 2 : index
    %c0_181 = arith.constant 0 : index
    %c0_182 = arith.constant 0 : index
    %123 = vector.load %arg4[%c1_179, %c2_180, %c0_181, %c0_182] : memref<3x3x32x32xf32, #tpu.memory_space<vmem>>, vector<1x1x32x32xf32>
    %124 = vector.shape_cast %123 : vector<1x1x32x32xf32> to vector<32x32xf32>
    %cst_183 = arith.constant dense<0.000000e+00> : vector<256x32xf32>
    %125 = tpu.matmul %122, %124, %cst_183 {dimension_numbers = #tpu.dot_dimension_numbers<[1], [0], [0], [1], [0, 0, 1, 1], [], []>} : vector<256x32xf32>, vector<32x32xf32>, vector<256x32xf32> -> vector<256x32xf32>
    %c0_184 = arith.constant 0 : index
    %c0_185 = arith.constant 0 : index
    %126 = vector.load %arg10[%c0_184, %c0_185] : memref<256x32xf32, #tpu.memory_space<vmem>>, vector<256x32xf32>
    %127 = arith.addf %126, %125 : vector<256x32xf32>
    %c0_186 = arith.constant 0 : index
    %c0_187 = arith.constant 0 : index
    %128 = vector.load %arg10[%c0_186, %c0_187] : memref<256x32xf32, #tpu.memory_space<vmem>>, vector<256x32xf32>
    tpu.vector_store %arg10[%c0_186, %c0_187], %127 {strides = array<i32>} : memref<256x32xf32, #tpu.memory_space<vmem>>, vector<256x32xf32>,
    %c2_188 = arith.constant 2 : index
    %c7_189 = arith.constant 7 : index
    %c0_190 = arith.constant 0 : index
    %129 = vector.load %arg9[%c2_188, %c7_189, %c0_190] : memref<18x32x32xf32, #tpu.memory_space<vmem>>, vector<16x16x32xf32>
    %130 = vector.shape_cast %129 : vector<16x16x32xf32> to vector<256x32xf32>
    %c2_191 = arith.constant 2 : index
    %c0_192 = arith.constant 0 : index
    %c0_193 = arith.constant 0 : index
    %c0_194 = arith.constant 0 : index
    %131 = vector.load %arg4[%c2_191, %c0_192, %c0_193, %c0_194] : memref<3x3x32x32xf32, #tpu.memory_space<vmem>>, vector<1x1x32x32xf32>
    %132 = vector.shape_cast %131 : vector<1x1x32x32xf32> to vector<32x32xf32>
    %cst_195 = arith.constant dense<0.000000e+00> : vector<256x32xf32>
    %133 = tpu.matmul %130, %132, %cst_195 {dimension_numbers = #tpu.dot_dimension_numbers<[1], [0], [0], [1], [0, 0, 1, 1], [], []>} : vector<256x32xf32>, vector<32x32xf32>, vector<256x32xf32> -> vector<256x32xf32>
    %c0_196 = arith.constant 0 : index
    %c0_197 = arith.constant 0 : index
    %134 = vector.load %arg10[%c0_196, %c0_197] : memref<256x32xf32, #tpu.memory_space<vmem>>, vector<256x32xf32>
    %135 = arith.addf %134, %133 : vector<256x32xf32>
    %c0_198 = arith.constant 0 : index
    %c0_199 = arith.constant 0 : index
    %136 = vector.load %arg10[%c0_198, %c0_199] : memref<256x32xf32, #tpu.memory_space<vmem>>, vector<256x32xf32>
    tpu.vector_store %arg10[%c0_198, %c0_199], %135 {strides = array<i32>} : memref<256x32xf32, #tpu.memory_space<vmem>>, vector<256x32xf32>,
    %c2_200 = arith.constant 2 : index
    %c8_201 = arith.constant 8 : index
    %c0_202 = arith.constant 0 : index
    %137 = vector.load %arg9[%c2_200, %c8_201, %c0_202] : memref<18x32x32xf32, #tpu.memory_space<vmem>>, vector<16x16x32xf32>
    %138 = vector.shape_cast %137 : vector<16x16x32xf32> to vector<256x32xf32>
    %c2_203 = arith.constant 2 : index
    %c1_204 = arith.constant 1 : index
    %c0_205 = arith.constant 0 : index
    %c0_206 = arith.constant 0 : index
    %139 = vector.load %arg4[%c2_203, %c1_204, %c0_205, %c0_206] : memref<3x3x32x32xf32, #tpu.memory_space<vmem>>, vector<1x1x32x32xf32>
    %140 = vector.shape_cast %139 : vector<1x1x32x32xf32> to vector<32x32xf32>
    %cst_207 = arith.constant dense<0.000000e+00> : vector<256x32xf32>
    %141 = tpu.matmul %138, %140, %cst_207 {dimension_numbers = #tpu.dot_dimension_numbers<[1], [0], [0], [1], [0, 0, 1, 1], [], []>} : vector<256x32xf32>, vector<32x32xf32>, vector<256x32xf32> -> vector<256x32xf32>
    %c0_208 = arith.constant 0 : index
    %c0_209 = arith.constant 0 : index
    %142 = vector.load %arg10[%c0_208, %c0_209] : memref<256x32xf32, #tpu.memory_space<vmem>>, vector<256x32xf32>
    %143 = arith.addf %142, %141 : vector<256x32xf32>
    %c0_210 = arith.constant 0 : index
    %c0_211 = arith.constant 0 : index
    %144 = vector.load %arg10[%c0_210, %c0_211] : memref<256x32xf32, #tpu.memory_space<vmem>>, vector<256x32xf32>
    tpu.vector_store %arg10[%c0_210, %c0_211], %143 {strides = array<i32>} : memref<256x32xf32, #tpu.memory_space<vmem>>, vector<256x32xf32>,
    %c2_212 = arith.constant 2 : index
    %c9_213 = arith.constant 9 : index
    %c0_214 = arith.constant 0 : index
    %145 = vector.load %arg9[%c2_212, %c9_213, %c0_214] : memref<18x32x32xf32, #tpu.memory_space<vmem>>, vector<16x16x32xf32>
    %146 = vector.shape_cast %145 : vector<16x16x32xf32> to vector<256x32xf32>
    %c2_215 = arith.constant 2 : index
    %c2_216 = arith.constant 2 : index
    %c0_217 = arith.constant 0 : index
    %c0_218 = arith.constant 0 : index
    %147 = vector.load %arg4[%c2_215, %c2_216, %c0_217, %c0_218] : memref<3x3x32x32xf32, #tpu.memory_space<vmem>>, vector<1x1x32x32xf32>
    %148 = vector.shape_cast %147 : vector<1x1x32x32xf32> to vector<32x32xf32>
    %cst_219 = arith.constant dense<0.000000e+00> : vector<256x32xf32>
    %149 = tpu.matmul %146, %148, %cst_219 {dimension_numbers = #tpu.dot_dimension_numbers<[1], [0], [0], [1], [0, 0, 1, 1], [], []>} : vector<256x32xf32>, vector<32x32xf32>, vector<256x32xf32> -> vector<256x32xf32>
    %c0_220 = arith.constant 0 : index
    %c0_221 = arith.constant 0 : index
    %150 = vector.load %arg10[%c0_220, %c0_221] : memref<256x32xf32, #tpu.memory_space<vmem>>, vector<256x32xf32>
    %151 = arith.addf %150, %149 : vector<256x32xf32>
    %c0_222 = arith.constant 0 : index
    %c0_223 = arith.constant 0 : index
    %152 = vector.load %arg10[%c0_222, %c0_223] : memref<256x32xf32, #tpu.memory_space<vmem>>, vector<256x32xf32>
    tpu.vector_store %arg10[%c0_222, %c0_223], %151 {strides = array<i32>} : memref<256x32xf32, #tpu.memory_space<vmem>>, vector<256x32xf32>,
    %c0_224 = arith.constant 0 : index
    %c0_225 = arith.constant 0 : index
    %153 = vector.load %arg10[%c0_224, %c0_225] : memref<256x32xf32, #tpu.memory_space<vmem>>, vector<256x32xf32>
    %cst_226 = arith.constant dense<0.000000e+00> : vector<32xf32>
    %154 = vector.multi_reduction <add>, %153, %cst_226 [0] : vector<256x32xf32> to vector<32xf32>
    %155 = vector.shape_cast %154 : vector<32xf32> to vector<1x32xf32>
    %cst_227 = arith.constant 3.906250e-03 : f32
    %156 = vector.broadcast %cst_227 : f32 to vector<1x32xf32>
    %157 = arith.mulf %155, %156 : vector<1x32xf32>
    %c0_228 = arith.constant 0 : index
    %c0_229 = arith.constant 0 : index
    %158 = vector.load %arg5[%c0_228, %c0_229] : memref<1x32xf32, #tpu.memory_space<vmem>>, vector<1x32xf32>
    %159 = arith.addf %157, %158 : vector<1x32xf32>
    %c0_230 = arith.constant 0 : index
    %c0_231 = arith.constant 0 : index
    %160 = vector.load %arg6[%c0_230, %c0_231] : memref<32x2xf32, #tpu.memory_space<vmem>>, vector<32x2xf32>
    %cst_232 = arith.constant dense<0.000000e+00> : vector<1x2xf32>
    %161 = tpu.matmul %159, %160, %cst_232 {dimension_numbers = #tpu.dot_dimension_numbers<[1], [0], [0], [1], [0, 0, 1, 1], [], []>} : vector<1x32xf32>, vector<32x2xf32>, vector<1x2xf32> -> vector<1x2xf32>
    %cst_233 = arith.constant 0.000000e+00 : f32
    %162 = vector.broadcast %cst_233 : f32 to vector<1x2xf32>
    %163 = arith.maximumf %161, %162 : vector<1x2xf32>
    %c0_234 = arith.constant 0 : index
    %c0_235 = arith.constant 0 : index
    %164 = vector.load %arg7[%c0_234, %c0_235] : memref<2x32xf32, #tpu.memory_space<vmem>>, vector<2x32xf32>
    %cst_236 = arith.constant dense<0.000000e+00> : vector<1x32xf32>
    %165 = tpu.matmul %163, %164, %cst_236 {dimension_numbers = #tpu.dot_dimension_numbers<[1], [0], [0], [1], [0, 0, 1, 1], [], []>} : vector<1x2xf32>, vector<2x32xf32>, vector<1x32xf32> -> vector<1x32xf32>
    %166 = arith.negf %165 : vector<1x32xf32>
    %167 = math.exp %166 : vector<1x32xf32>
    %cst_237 = arith.constant 1.000000e+00 : f32
    %168 = vector.broadcast %cst_237 : f32 to vector<1x32xf32>
    %169 = arith.addf %168, %167 : vector<1x32xf32>
    %170 = arith.divf %168, %169 : vector<1x32xf32>
    %c0_238 = arith.constant 0 : index
    %c0_239 = arith.constant 0 : index
    %171 = vector.load %arg10[%c0_238, %c0_239] : memref<256x32xf32, #tpu.memory_space<vmem>>, vector<256x32xf32>
    %c0_240 = arith.constant 0 : index
    %c0_241 = arith.constant 0 : index
    %172 = vector.load %arg5[%c0_240, %c0_241] : memref<1x32xf32, #tpu.memory_space<vmem>>, vector<1x32xf32>
    %173 = vector.broadcast %172 : vector<1x32xf32> to vector<256x32xf32>
    %174 = arith.addf %171, %173 : vector<256x32xf32>
    %175 = vector.broadcast %170 : vector<1x32xf32> to vector<256x32xf32>
    %176 = arith.mulf %174, %175 : vector<256x32xf32>
    %c0_242 = arith.constant 0 : index
    %c0_243 = arith.constant 0 : index
    %c0_244 = arith.constant 0 : index
    %c0_245 = arith.constant 0 : index
    %177 = vector.load %arg1[%c0_242, %c0_243, %c0_244, %c0_245] : memref<1x16x16x32xf32, #tpu.memory_space<vmem>>, vector<1x16x16x32xf32>
    %178 = vector.shape_cast %177 : vector<1x16x16x32xf32> to vector<16x16x32xf32>
    %179 = vector.shape_cast %178 : vector<16x16x32xf32> to vector<256x32xf32>
    %180 = arith.addf %176, %179 : vector<256x32xf32>
    %cst_246 = arith.constant 0.000000e+00 : f32
    %181 = vector.broadcast %cst_246 : f32 to vector<256x32xf32>
    %182 = arith.maximumf %180, %181 : vector<256x32xf32>
    %183 = vector.shape_cast %182 : vector<256x32xf32> to vector<16x16x32xf32>
    %c0_247 = arith.constant 0 : index
    %c0_248 = arith.constant 0 : index
    %c0_249 = arith.constant 0 : index
    %c0_250 = arith.constant 0 : index
    %184 = vector.load %arg8[%c0_247, %c0_248, %c0_249, %c0_250] : memref<1x16x16x32xf32, #tpu.memory_space<vmem>>, vector<1x16x16x32xf32>
    %185 = vector.shape_cast %184 : vector<1x16x16x32xf32> to vector<16x16x32xf32>
    %186 = vector.shape_cast %183 : vector<16x16x32xf32> to vector<1x16x16x32xf32>
    tpu.vector_store %arg8[%c0_247, %c0_248, %c0_249, %c0_250], %186 {strides = array<i32>} : memref<1x16x16x32xf32, #tpu.memory_space<vmem>>, vector<1x16x16x32xf32>,
    return
  }
  func.func @transform_0(%arg0: i32) -> (i32, i32, i32, i32) {
    %c0_i32 = arith.constant 0 : i32
    %c0_i32_0 = arith.constant 0 : i32
    %c0_i32_1 = arith.constant 0 : i32
    %c0_i32_2 = arith.constant 0 : i32
    return %arg0, %c0_i32, %c0_i32_0, %c0_i32_1 : i32, i32, i32, i32
  }
  func.func @transform_1(%arg0: i32) -> (i32, i32, i32, i32) {
    %c0_i32 = arith.constant 0 : i32
    %c0_i32_0 = arith.constant 0 : i32
    %c0_i32_1 = arith.constant 0 : i32
    %c0_i32_2 = arith.constant 0 : i32
    %c0_i32_3 = arith.constant 0 : i32
    return %c0_i32, %c0_i32_0, %c0_i32_1, %c0_i32_2 : i32, i32, i32, i32
  }
  func.func @transform_2(%arg0: i32) -> (i32, i32) {
    %c0_i32 = arith.constant 0 : i32
    %c0_i32_0 = arith.constant 0 : i32
    %c0_i32_1 = arith.constant 0 : i32
    return %c0_i32, %c0_i32_0 : i32, i32
  }
  func.func @transform_3(%arg0: i32) -> (i32, i32, i32, i32) {
    %c0_i32 = arith.constant 0 : i32
    %c0_i32_0 = arith.constant 0 : i32
    %c0_i32_1 = arith.constant 0 : i32
    %c0_i32_2 = arith.constant 0 : i32
    %c0_i32_3 = arith.constant 0 : i32
    return %c0_i32, %c0_i32_0, %c0_i32_1, %c0_i32_2 : i32, i32, i32, i32
  }
  func.func @transform_4(%arg0: i32) -> (i32, i32) {
    %c0_i32 = arith.constant 0 : i32
    %c0_i32_0 = arith.constant 0 : i32
    %c0_i32_1 = arith.constant 0 : i32
    return %c0_i32, %c0_i32_0 : i32, i32
  }
  func.func @transform_5(%arg0: i32) -> (i32, i32) {
    %c0_i32 = arith.constant 0 : i32
    %c0_i32_0 = arith.constant 0 : i32
    %c0_i32_1 = arith.constant 0 : i32
    return %c0_i32, %c0_i32_0 : i32, i32
  }
  func.func @transform_6(%arg0: i32) -> (i32, i32) {
    %c0_i32 = arith.constant 0 : i32
    %c0_i32_0 = arith.constant 0 : i32
    %c0_i32_1 = arith.constant 0 : i32
    return %c0_i32, %c0_i32_0 : i32, i32
  }
  func.func @transform_7(%arg0: i32) -> (i32, i32, i32, i32) {
    %c0_i32 = arith.constant 0 : i32
    %c0_i32_0 = arith.constant 0 : i32
    %c0_i32_1 = arith.constant 0 : i32
    %c0_i32_2 = arith.constant 0 : i32
    return %arg0, %c0_i32, %c0_i32_0, %c0_i32_1 : i32, i32, i32, i32
  }
}

</mosaic_0001>

<bundles_post_ra>
// kernel: tpu_custom_call.1
= control target key start
LH: loop header
LB: loop body
LE: loop exit
PB: predicated region body
PF: predicated region fallthrough
CT: control target
= control target key end

     0   :  { %s10836_s0 = inlined_call_operand.hbm [shape: f32[2,16,16,32], index: 0, kind: input, shape index: {}]   ;;  %s10837_s1 = inlined_call_operand.hbm [shape: f32[3,3,32,32], index: 1, kind: input, shape index: {}]   ;;  %s10838_s2 = inlined_call_operand.vmem [shape: f32[1,32], index: 2, kind: input, shape index: {}]   ;;  %s10839_s3 = inlined_call_operand.hbm [shape: f32[3,3,32,32], index: 3, kind: input, shape index: {}]   ;;  %s10840_s4 = inlined_call_operand.vmem [shape: f32[1,32], index: 4, kind: input, shape index: {}]   ;;  %s10841_s5 = inlined_call_operand.vmem [shape: f32[32,2], index: 5, kind: input, shape index: {}]   ;;  %s10842_s6 = inlined_call_operand.vmem [shape: f32[2,32], index: 6, kind: input, shape index: {}]   ;;  %s10843_s7 = inlined_call_operand.hbm [shape: f32[2,16,16,32], index: 7, kind: output, shape index: {}]  }
   0x1   :  { %10846 = sst [smem:[#allocation14_spill]] %s10837_s1 }
   0x2   :  { %12 = vsyncpa [#allocation5], 0 }
   0x3   :  { %14 = vsyncpa [#allocation5 + $0x1], 0 }
   0x4   :  { %15 = vsyncpa [#allocation8], 0 }
   0x5   :  { %16 = vsyncpa [#allocation6], 0 }
   0x6   :  { %18 = vsyncpa [#allocation6 + $0x1], 0  ;;  %s8009_s24 = smov 0   ;;  %s8011_s25 = smov 0  }
   0x7   :  { %s8013_s26 = smov 0   ;;  %s8015_s27 = smov 0  }
   0x8 LB: > { %s8030_s28 = sadd.s32 4294967295, %s7960_s27   ;;  %s7113_s29 = sadd.s32 4294967294, %s7960_s27   ;;  %s7960_s27 = sphi %s8015_s27, %s10859_s27   ;;  %s7956_s26 = sphi %s8013_s26, %s10858_s26   ;;  %s7952_s25 = sphi %s8011_s25, %s10857_s25   ;;  %s7948_s24 = sphi %s8009_s24, %s10856_s24  }
   0x9   : > { %p44_p0 = scmp.ne.s32.totalorder %s7952_s25, %s7948_s24  ;;  %p45_p1 = scmp.eq.s32.totalorder %s8030_s28, 0 }
   0xa   : > { %p194_p2 = scmp.eq.s32.totalorder %s8030_s28, 1  ;;  %p200_p3 = scmp.eq.s32.totalorder %s7113_s29, 1 }
   0xb   : > { %p8039_p4 = por %p45_p1, %p44_p0  ;;  %p7114_p5 = scmp.ge.s32.totalorder %s7960_s27, 1 }
   0xc   : > { %p8044_p6 = por %p200_p3, %p44_p0  ;;  %p207_p7 = scmp.lt.s32.totalorder %s7960_s27, 3 }
   0xd   : > { %s10849_s1 = sld [smem:[#allocation14_spill]]  ;;  %s7962_s13 = smov [#allocation7]  }
   0xe   : > { %p8052_p8 = pnand %p7114_p5, %p207_p7  ;;  %s220_s14 = sshll.u32 %s7962_s13, 4  ;;  %s221_s14 = int_to_ptr.vmem [resolvable:$true] %s220_s14 }
   0xf   : > { %s235_s17 = sshll.u32 %s10839_s3, 4  ;;  %s10844_s18 = smov 128   ;;  %s236_s17 = int_to_ptr.hbm [resolvable:$true] %s235_s17 }
  0x10   : > { %p7733_p9 = pneg %p8052_p8  ;;  %s10845_s19 = smov 8  }
  0x11   : > { %s7965_s20 = smov [#allocation9]   ;;  %s8071_s22 = sadd.s32 1, %s7960_s27  }
  0x12   : > { %p7734_p10 = pnand %p7733_p9, %p45_p1  ;;  %s237_s21 = sshll.u32 %s7965_s20, 4  ;;  %s238_s21 = int_to_ptr.vmem [resolvable:$true] %s237_s21 }
  0x13   : > { %s218_s11 = sshll.u32 %s10849_s1, 4  ;;  %s31_s23 = sadd.s32 1, %s7956_s26  ;;  %s219_s11 = int_to_ptr.hbm [resolvable:$true] %s218_s11 }
  0x14   : > { %7736 = dma.hbm_to_vmem [thread:$0]  (!%p7734_p10), %s219_s11, 4608, %s221_s14, [#allocation8], %s10844_s18, %s10844_s18, %s10845_s19  }
  0x15   : > { %7739 = dma.hbm_to_vmem [thread:$0]  (!%p7734_p10), %s236_s17, 4608, %s238_s21, [#allocation8], %s10844_s18, %s10844_s18, %s10845_s19  }
  0x16   : > { %s28_s29 = ssub.s32 %s7960_s27, %s8071_s22  ;;  %p38_p12 = scmp.ne.s32.totalorder %s7956_s26, %s7952_s25 }
  0x17   : > { %p29_p13 = scmp.eq.s32.totalorder %s28_s29, 0  ;;  %p39_p0 = scmp.eq.s32.totalorder %s7960_s27, 0 }
  0x18   : > { %p8081_p3 = por %p194_p2, %p38_p12  ;;  %p7750_p5 = scmp.lt.s32.totalorder %s7960_s27, 2 }
  0x19   : > { %s8087_s10 = scalar_select %p29_p13, %s7956_s26, %s31_s23  }
  0x1a   : > { %p40_p7 = por %p39_p0, %p38_p12  ;;  %s260_s11 = sand.u32 1, %s7956_s26  }
  0x1b   : > { %s7118_s13 = sshll.u32 %s260_s11, 8  ;;  %s7711_s14 = sshll.u32 %s7960_s27, 8 }
  0x1c   : > { %s269_s17 = scalar_lea.hbm %s10836_s0, %s7711_s14  ;;  %s264_s20 = scalar_lea.vmem [#allocation4], %s7118_s13 }
  0x1d   : > { %s272_s21 = sshll.u32 %s264_s20, 4  ;;  %s270_s29 = sshll.u32 %s269_s17, 4  ;;  %s273_s21 = int_to_ptr.vmem [resolvable:$true] %s272_s21  ;;  %s271_s29 = int_to_ptr.hbm [resolvable:$true] %s270_s29 }
  0x1e   : > { %p8094_p2 = pnand %p7750_p5, %p40_p7  ;;  %s261_s23 = scalar_lea.sflag [#allocation5], %s260_s11 }
  0x1f   : > { %s7860_s19 = sshra.s32 %s271_s29, 4  ;;  %s7867_s15 = scalar_lea.hbm %s10836_s0, 512  ;;  %s7861_s19 = int_to_ptr.hbm [resolvable:$true] %s7860_s19 }
  0x20   : > { %s7862_s1 = scalar_lea.hbm %s7861_s19, 256  ;;  %p7864_p10 = pneg %p8094_p2 }
  0x21   : > { %p7863_p9 = scmp.ne.s32.totalorder %s7861_s19, %s7862_s1  ;;  %p7868_p0 = scmp.lt.s32.totalorder %s7861_s19, %s10836_s0 }
  0x22   : > { %p7869_p5 = scmp.lt.s32.totalorder %s7867_s15, %s7862_s1 }
  0x23   : > { %p7865_p12 = pnand %p7864_p10, %p7863_p9 }
  0x24   : > { %p7870_p7 = por %p7869_p5, %p7868_p0 }
  0x25   : > { %p7866_p13 = pneg %p7865_p12 }
  0x27   : > { %p7871_p11 = pnand %p7870_p7, %p7866_p13 }
  0x29   : > { %7874 = shalt.err (!%p7871_p11)
}
  0x2a   : > { %s10853_s11 = smov 8   ;;  %s10854_s20 = smov 128  }
  0x2b   : > { %7743 = dma.hbm_to_vmem [thread:$0]  (!%p8094_p2), %s271_s29, 4096, %s273_s21, %s261_s23, %s10854_s20, %s10854_s20, %s10853_s11  }
  0x2c   : > { %284 = sbr.rel (%p8052_p8) target bundleno = 1921 (0x781), region = 48  ;;  %s8114_s14 = sand.u32 (!%p8052_p8), 1, %s7952_s25  }
  0x2d   : > { %s7122_s1 = sshll.u32 (!%p8052_p8), %s8114_s14, 8  ;;  %s287_s19 = scalar_lea.sflag (!%p8052_p8), [#allocation5], %s8114_s14 }
  0x2e   : > { %s8120_s13 = scalar_lea.vmem (!%p8052_p8), [#allocation4], %s7122_s1 }
  0x31   : > { %7935 = dma.done.wait (%p8039_p4), %s287_s19, 4096  }
  0x32   : > { %7937 = vsyncadd (%p8039_p4), %s287_s19, 4294963200 }
  0x33   : > { %7939 = dma.done.wait (%p45_p1), [#allocation8], 9216  }
  0x34   : > { %7941 = vsyncadd (%p45_p1), [#allocation8], 4294958080  ;;  %vm332_vm0 = vcmask 261120   ;;  %v7966_v0 = vmov 0.0   ;;  %v505_v1 = vld [vmem:[#allocation7 + $0x18] sm:$0xff]  ;;  %v504_v3 = vld [vmem:[#allocation7 + $0x10] sm:$0xff] }
  0x35   : > { %333 = vst.msk [vmem:[#allocation2] sm:$0xff] %vm332_vm0, %v7966_v0  ;;  %v783_v2 = vld [vmem:[#allocation7 + $0x38] sm:$0xff]  ;;  %614 = vmatpush.msra.mxu0 %v505_v1  ;;  %7713 = vmatpush.msra.mxu2 %v505_v1  ;;  %v782_v4 = vld [vmem:[#allocation7 + $0x30] sm:$0xff]  ;;  %v503_v5 = vld [vmem:[#allocation7 + $0x8] sm:$0xff]  ;;  %vm6766_vm1 = vcmask 1041408   ;;  %vm6762_vm2 = vcmask 15360  }
  0x36   : > { %334 = vst.msk [vmem:[#allocation2 + $0x8] sm:$0xff] %vm332_vm0, %v7966_v0  ;;  %7717 = vmatpush.msra.mxu3 %v783_v2  ;;  %892 = vmatpush.msra.mxu1 %v783_v2  ;;  %v781_v6 = vld [vmem:[#allocation7 + $0x28] sm:$0xff]  ;;  %v502_v7 = vld [vmem:[#allocation7] sm:$0xff]  ;;  %v1125_v10 = vld [vmem:[#allocation7 + $0x58] sm:$0xff]  ;;  %s10663_s15 = scalar_lea.vmem [#allocation10], %s7122_s1  ;;  %s7712_s1 = sshll.u32 %s8030_s28, 8 }
  0x37   : > { %335 = vst.msk [vmem:[#allocation2 + $0x10] sm:$0xff] %vm332_vm0, %v7966_v0  ;;  %615 = vmatpush.msra.mxu0 %v504_v3  ;;  %7714 = vmatpush.msra.mxu2 %v504_v3  ;;  %v780_v9 = vld [vmem:[#allocation7 + $0x20] sm:$0xff]  ;;  %v1467_v12 = vld [vmem:[#allocation7 + $0x78] sm:$0xff]  ;;  %v419_v15 = vld [vmem:[%s8120_s13 + $0x70] sm:$0xff]  ;;  %s7018_s17 = sshll.u32 %s10663_s15, 4  ;;  %s7006_s20 = scalar_lea.sflag [#allocation6], %s8114_s14  ;;  %s7019_s17 = int_to_ptr.vmem [resolvable:$true] %s7018_s17 }
  0x38   : > { %336 = vst.msk [vmem:[#allocation2 + $0x18] sm:$0xff] %vm332_vm0, %v7966_v0  ;;  %7718 = vmatpush.msra.mxu3 %v782_v4  ;;  %893 = vmatpush.msra.mxu1 %v782_v4  ;;  %v1809_v13 = vld [vmem:[#allocation7 + $0x98] sm:$0xff]  ;;  %v421_v17 = vld [vmem:[%s8120_s13 + $0x80] sm:$0xff]  ;;  %v422_v19 = vld [vmem:[%s8120_s13 + $0x88] sm:$0xff]  ;;  %s7910_s21 = scalar_lea.hbm %s10843_s7, 512 }
  0x39   : > { %337 = vst.msk [vmem:[#allocation2 + $0x20] sm:$0xff] %vm332_vm0, %v7966_v0  ;;  %616 = vmatpush.msra.mxu0 %v503_v5  ;;  %7715 = vmatpush.msra.mxu2 %v503_v5  ;;  %v420_v16 = vld [vmem:[%s8120_s13 + $0x78] sm:$0xff]  ;;  %v405_v18 = vld [vmem:[%s8120_s13] sm:$0xff]  ;;  %v1124_v21 = vld [vmem:[#allocation7 + $0x50] sm:$0xff] }
  0x3a   : > { %338 = vst.msk [vmem:[#allocation2 + $0x28] sm:$0xff] %vm332_vm0, %v7966_v0  ;;  %7719 = vmatpush.msra.mxu3 %v781_v6  ;;  %894 = vmatpush.msra.mxu1 %v781_v6  ;;  %v406_v22 = vld [vmem:[%s8120_s13 + $0x8] sm:$0xff]  ;;  %v423_v23 = vld [vmem:[%s8120_s13 + $0x90] sm:$0xff]  ;;  %v424_v25 = vld [vmem:[%s8120_s13 + $0x98] sm:$0xff] }
  0x3b   : > { %339 = vst.msk [vmem:[#allocation2 + $0x30] sm:$0xff] %vm332_vm0, %v7966_v0  ;;  %617 = vmatpush.msra.mxu0 %v502_v7  ;;  %7716 = vmatpush.msra.mxu2 %v502_v7  ;;  %v407_v24 = vld [vmem:[%s8120_s13 + $0x10] sm:$0xff]  ;;  %v408_v26 = vld [vmem:[%s8120_s13 + $0x18] sm:$0xff]  ;;  %v425_v29 = vld [vmem:[%s8120_s13 + $0xa0] sm:$0xff] }
  0x3c   : > { %340 = vst.msk [vmem:[#allocation2 + $0x38] sm:$0xff] %vm332_vm0, %v7966_v0  ;;  %7720 = vmatpush.msra.mxu3 %v780_v9  ;;  %895 = vmatpush.msra.mxu1 %v780_v9  ;;  %v409_v34 = vld [vmem:[%s8120_s13 + $0x20] sm:$0xff]  ;;  %v426_v36 = vld [vmem:[%s8120_s13 + $0xa8] sm:$0xff]  ;;  %v1466_v37 = vld [vmem:[#allocation7 + $0x70] sm:$0xff] }
  0x3d   : > { %341 = vst.msk [vmem:[#allocation2 + $0x40] sm:$0xff] %vm332_vm0, %v7966_v0  ;;  %v470_v8 = vld [vmem:[#allocation2 + $0x7] sm:$0xff]  ;;  %1234 = vmatpush.msrb.mxu2 %v1125_v10  ;;  %1918 = vmatpush.msrb.mxu0 %v1809_v13  ;;  %v1808_v39 = vld [vmem:[#allocation7 + $0x90] sm:$0xff]  ;;  %v428_v50 = vld [vmem:[%s8120_s13 + $0xb8] sm:$0xff] }
  0x3e   : > { %342 = vst.msk [vmem:[#allocation2 + $0x48] sm:$0xff] %vm332_vm0, %v7966_v0  ;;  %7126 = vmatmul.msk.f32.vlgmr.msra.gmra.mxu0 %vm332_vm0, %v470_v8  ;;  %v471_v11 = vld [vmem:[#allocation2 + $0xf] sm:$0xff]  ;;  %1576 = vmatpush.msrb.mxu3 %v1467_v12  ;;  %v412_v55 = vld [vmem:[%s8120_s13 + $0x38] sm:$0xff]  ;;  %v429_v57 = vld [vmem:[%s8120_s13 + $0xc0] sm:$0xff] }
  0x3f   : > { %343 = vst.msk [vmem:[#allocation2 + $0x50] sm:$0xff] %vm332_vm0, %v7966_v0  ;;  %v747_v14 = vld [vmem:[#allocation2 + $0x8] sm:$0xff]  ;;  %v748_v20 = vld [vmem:[#allocation2 + $0x10] sm:$0xff]  ;;  %1235 = vmatpush.msrb.mxu2 %v1124_v21  ;;  %1919 = vmatpush.msrb.mxu0 %v1808_v39  ;;  %v413_v62 = vld [vmem:[%s8120_s13 + $0x40] sm:$0xff] }
  0x40   : > { %344 = vst.msk [vmem:[#allocation2 + $0x58] sm:$0xff] %vm332_vm0, %v7966_v0  ;;  %7158 = vmatmul.msk.f32.vlgmr.msra.gmra.mxu1 %vm332_vm0, %v747_v14  ;;  %1577 = vmatpush.msrb.mxu3 %v1466_v37  ;;  %v410_v42 = vld [vmem:[%s8120_s13 + $0x28] sm:$0xff]  ;;  %v427_v44 = vld [vmem:[%s8120_s13 + $0xb0] sm:$0xff]  ;;  %v432_v13 = vld [vmem:[%s8120_s13 + $0xd8] sm:$0xff] }
  0x41   : > { %345 = vst.msk [vmem:[#allocation2 + $0x60] sm:$0xff] %vm332_vm0, %v7966_v0  ;;  %v411_v48 = vld [vmem:[%s8120_s13 + $0x30] sm:$0xff]  ;;  %v1123_v52 = vld [vmem:[#allocation7 + $0x48] sm:$0xff]  ;;  %v1806_v37 = vld [vmem:[#allocation7 + $0x80] sm:$0xff] }
  0x42   : > { %346 = vst.msk [vmem:[#allocation2 + $0x68] sm:$0xff] %vm332_vm0, %v7966_v0  ;;  %1236 = vmatpush.msrb.mxu2 %v1123_v52  ;;  %v1465_v59 = vld [vmem:[#allocation7 + $0x68] sm:$0xff]  ;;  %v431_v7 = vld [vmem:[%s8120_s13 + $0xd0] sm:$0xff] }
  0x43   : > { %347 = vst.msk [vmem:[#allocation2 + $0x70] sm:$0xff] %vm332_vm0, %v7966_v0  ;;  %1578 = vmatpush.msrb.mxu3 %v1465_v59  ;;  %v1807_v2 = vld [vmem:[#allocation7 + $0x88] sm:$0xff] }
  0x44   : > { %348 = vst.msk [vmem:[#allocation2 + $0x78] sm:$0xff] %vm332_vm0, %v7966_v0  ;;  %1920 = vmatpush.msrb.mxu0 %v1807_v2  ;;  %v414_v5 = vld [vmem:[%s8120_s13 + $0x48] sm:$0xff] }
  0x45   : > { %349 = vst.msk [vmem:[#allocation2 + $0x80] sm:$0xff] %vm332_vm0, %v7966_v0 }
  0x46   : > { %350 = vst.msk [vmem:[#allocation2 + $0x88] sm:$0xff] %vm332_vm0, %v7966_v0  ;;  %7127 = vmatmul.msk.f32.gmra.mxu0 %vm332_vm0, %v471_v11  ;;  %v415_v11 = vld [vmem:[%s8120_s13 + $0x50] sm:$0xff] }
  0x47   : > { %351 = vst.msk [vmem:[#allocation2 + $0x90] sm:$0xff] %vm332_vm0, %v7966_v0  ;;  %1921 = vmatpush.msrb.mxu0 %v1806_v37 }
  0x48   : > { %352 = vst.msk [vmem:[#allocation2 + $0x98] sm:$0xff] %vm332_vm0, %v7966_v0  ;;  %7159 = vmatmul.msk.f32.gmra.mxu1 %vm332_vm0, %v748_v20  ;;  %v433_v20 = vld [vmem:[%s8120_s13 + $0xe0] sm:$0xff] }
  0x49   : > { %353 = vst.msk [vmem:[#allocation2 + $0xa0] sm:$0xff] %vm332_vm0, %v7966_v0 }
  0x4a   : > { %354 = vst.msk [vmem:[#allocation2 + $0xa8] sm:$0xff] %vm332_vm0, %v7966_v0 }
  0x4b   : > { %355 = vst.msk [vmem:[#allocation2 + $0xb0] sm:$0xff] %vm332_vm0, %v7966_v0 }
  0x4c   : > { %356 = vst.msk [vmem:[#allocation2 + $0xb8] sm:$0xff] %vm332_vm0, %v7966_v0 }
  0x4d   : > { %357 = vst.msk [vmem:[#allocation2 + $0xc0] sm:$0xff] %vm332_vm0, %v7966_v0 }
  0x4e   : > { %358 = vst.msk [vmem:[#allocation2 + $0xc8] sm:$0xff] %vm332_vm0, %v7966_v0 }
  0x4f   : > { %359 = vst.msk [vmem:[#allocation2 + $0xd0] sm:$0xff] %vm332_vm0, %v7966_v0 }
  0x50   : > { %360 = vst.msk [vmem:[#allocation2 + $0xd8] sm:$0xff] %vm332_vm0, %v7966_v0 }
  0x51   : > { %361 = vst.msk [vmem:[#allocation2 + $0xe0] sm:$0xff] %vm332_vm0, %v7966_v0 }
  0x52   : > { %362 = vst.msk [vmem:[#allocation2 + $0xe8] sm:$0xff] %vm332_vm0, %v7966_v0 }
  0x53   : > { %363 = vst.msk [vmem:[#allocation2 + $0xf0] sm:$0xff] %vm332_vm0, %v7966_v0 }
  0x54   : > { %364 = vst.msk [vmem:[#allocation2 + $0xf8] sm:$0xff] %vm332_vm0, %v7966_v0 }
  0x55   : > { %365 = vst.msk [vmem:[#allocation2 + $0x100] sm:$0xff] %vm332_vm0, %v7966_v0 }
  0x56   : > { %366 = vst.msk [vmem:[#allocation2 + $0x108] sm:$0xff] %vm332_vm0, %v7966_v0 }
  0x57   : > { %367 = vst.msk [vmem:[#allocation2 + $0x110] sm:$0xff] %vm332_vm0, %v7966_v0 }
  0x58   : > { %368 = vst.msk [vmem:[#allocation2 + $0x118] sm:$0xff] %vm332_vm0, %v7966_v0 }
  0x59   : > { %369 = vst.msk [vmem:[#allocation2 + $0x120] sm:$0xff] %vm332_vm0, %v7966_v0 }
  0x5a   : > { %370 = vst.msk [vmem:[#allocation2 + $0x128] sm:$0xff] %vm332_vm0, %v7966_v0 }
  0x5b   : > { %371 = vst.msk [vmem:[#allocation2 + $0x130] sm:$0xff] %vm332_vm0, %v7966_v0 }
  0x5c   : > { %372 = vst.msk [vmem:[#allocation2 + $0x138] sm:$0xff] %vm332_vm0, %v7966_v0 }
  0x5d   : > { %373 = vst.msk [vmem:[#allocation2 + $0x140] sm:$0xff] %vm332_vm0, %v7966_v0 }
  0x5e   : > { %374 = vst.msk [vmem:[#allocation2 + $0x148] sm:$0xff] %vm332_vm0, %v7966_v0 }
  0x5f   : > { %375 = vst.msk [vmem:[#allocation2 + $0x150] sm:$0xff] %vm332_vm0, %v7966_v0 }
  0x60   : > { %376 = vst.msk [vmem:[#allocation2 + $0x158] sm:$0xff] %vm332_vm0, %v7966_v0 }
  0x61   : > { %377 = vst.msk [vmem:[#allocation2 + $0x160] sm:$0xff] %vm332_vm0, %v7966_v0 }
  0x62   : > { %378 = vst.msk [vmem:[#allocation2 + $0x168] sm:$0xff] %vm332_vm0, %v7966_v0 }
  0x63   : > { %379 = vst.msk [vmem:[#allocation2 + $0x170] sm:$0xff] %vm332_vm0, %v7966_v0 }
  0x64   : > { %380 = vst.msk [vmem:[#allocation2 + $0x178] sm:$0xff] %vm332_vm0, %v7966_v0 }
  0x65   : > { %381 = vst.msk [vmem:[#allocation2 + $0x180] sm:$0xff] %vm332_vm0, %v7966_v0 }
  0x66   : > { %382 = vst.msk [vmem:[#allocation2 + $0x188] sm:$0xff] %vm332_vm0, %v7966_v0 }
  0x67   : > { %383 = vst.msk [vmem:[#allocation2 + $0x190] sm:$0xff] %vm332_vm0, %v7966_v0 }
  0x68   : > { %384 = vst.msk [vmem:[#allocation2 + $0x198] sm:$0xff] %vm332_vm0, %v7966_v0 }
  0x69   : > { %385 = vst.msk [vmem:[#allocation2 + $0x1a0] sm:$0xff] %vm332_vm0, %v7966_v0 }
  0x6a   : > { %386 = vst.msk [vmem:[#allocation2 + $0x1a8] sm:$0xff] %vm332_vm0, %v7966_v0 }
  0x6b   : > { %387 = vst.msk [vmem:[#allocation2 + $0x1b0] sm:$0xff] %vm332_vm0, %v7966_v0 }
  0x6c   : > { %388 = vst.msk [vmem:[#allocation2 + $0x1b8] sm:$0xff] %vm332_vm0, %v7966_v0 }
  0x6d   : > { %389 = vst.msk [vmem:[#allocation2 + $0x1c0] sm:$0xff] %vm332_vm0, %v7966_v0 }
  0x6e   : > { %390 = vst.msk [vmem:[#allocation2 + $0x1c8] sm:$0xff] %vm332_vm0, %v7966_v0 }
  0x6f   : > { %391 = vst.msk [vmem:[#allocation2 + $0x1d0] sm:$0xff] %vm332_vm0, %v7966_v0 }
  0x70   : > { %392 = vst.msk [vmem:[#allocation2 + $0x1d8] sm:$0xff] %vm332_vm0, %v7966_v0 }
  0x71   : > { %393 = vst.msk [vmem:[#allocation2 + $0x1e0] sm:$0xff] %vm332_vm0, %v7966_v0 }
  0x72   : > { %394 = vst.msk [vmem:[#allocation2 + $0x1e8] sm:$0xff] %vm332_vm0, %v7966_v0 }
  0x73   : > { %395 = vst.msk [vmem:[#allocation2 + $0x1f0] sm:$0xff] %vm332_vm0, %v7966_v0 }
  0x74   : > { %396 = vst.msk [vmem:[#allocation2 + $0x1f8] sm:$0xff] %vm332_vm0, %v7966_v0 }
  0x75   : > { %397 = vst.msk [vmem:[#allocation2 + $0x200] sm:$0xff] %vm332_vm0, %v7966_v0 }
  0x76   : > { %398 = vst.msk [vmem:[#allocation2 + $0x208] sm:$0xff] %vm332_vm0, %v7966_v0 }
  0x77   : > { %399 = vst.msk [vmem:[#allocation2 + $0x210] sm:$0xff] %vm332_vm0, %v7966_v0 }
  0x78   : > { %400 = vst.msk [vmem:[#allocation2 + $0x218] sm:$0xff] %vm332_vm0, %v7966_v0 }
  0x79   : > { %401 = vst.msk [vmem:[#allocation2 + $0x220] sm:$0xff] %vm332_vm0, %v7966_v0 }
  0x7a   : > { %402 = vst.msk [vmem:[#allocation2 + $0x228] sm:$0xff] %vm332_vm0, %v7966_v0 }
  0x7b   : > { %403 = vst.msk [vmem:[#allocation2 + $0x230] sm:$0xff] %vm332_vm0, %v7966_v0 }
  0x7c   : > { %404 = vst.msk [vmem:[#allocation2 + $0x238] sm:$0xff] %vm332_vm0, %v7966_v0  ;;  %v430_v0 = vld [vmem:[%s8120_s13 + $0xc8] sm:$0xff] }
  0x7d   : > { %452 = vst.msk [vmem:[#allocation2 + $0x108] sm:$0xff] %vm332_vm0, %v419_v15  ;;  %v1122_v15 = vld [vmem:[#allocation7 + $0x40] sm:$0xff] }
  0x7e   : > { %453 = vst.msk [vmem:[#allocation2 + $0x110] sm:$0xff] %vm332_vm0, %v420_v16  ;;  %1237 = vmatpush.msrb.mxu2 %v1122_v15 }
  0x7f   : > { %454 = vst.msk [vmem:[#allocation2 + $0x128] sm:$0xff] %vm332_vm0, %v421_v17 }
  0x80   : > { %438 = vst.msk [vmem:[#allocation2 + $0x28] sm:$0xff] %vm332_vm0, %v405_v18  ;;  %v416_v18 = vld [vmem:[%s8120_s13 + $0x58] sm:$0xff] }
  0x81   : > { %455 = vst.msk [vmem:[#allocation2 + $0x130] sm:$0xff] %vm332_vm0, %v422_v19 }
  0x82   : > { %439 = vst.msk [vmem:[#allocation2 + $0x30] sm:$0xff] %vm332_vm0, %v406_v22  ;;  %v1464_v22 = vld [vmem:[#allocation7 + $0x60] sm:$0xff] }
  0x83   : > { %456 = vst.msk [vmem:[#allocation2 + $0x148] sm:$0xff] %vm332_vm0, %v423_v23  ;;  %1579 = vmatpush.msrb.mxu3 %v1464_v22 }
  0x84   : > { %440 = vst.msk [vmem:[#allocation2 + $0x48] sm:$0xff] %vm332_vm0, %v407_v24  ;;  %v8483_v2 = vld [vmem:[#allocation2 + $0x107] sm:$0xff] }
  0x85   : > { %v8296_v27 = vld [vmem:[#allocation2 + $0x10f] sm:$0xff]  ;;  %457 = vst.msk [vmem:[#allocation2 + $0x150] sm:$0xff] %vm332_vm0, %v424_v25  ;;  %v417_v25 = vld [vmem:[%s8120_s13 + $0x60] sm:$0xff] }
  0x86   : > { %v764_v28 = vld [vmem:[#allocation2 + $0x110] sm:$0xff]  ;;  %7143 = vmatmul.msk.f32.vlgmr.msra.gmra.mxu2 %vm332_vm0, %v8296_v27  ;;  %441 = vst.msk [vmem:[#allocation2 + $0x50] sm:$0xff] %vm332_vm0, %v408_v26  ;;  %v488_v32 = vld [vmem:[#allocation2 + $0x127] sm:$0xff] }
  0x87   : > { %7175 = vmatmul.msk.f32.vlgmr.msra.gmra.mxu3 %vm332_vm0, %v764_v28  ;;  %v8304_v30 = vld [vmem:[#allocation2 + $0x27] sm:$0xff]  ;;  %458 = vst.msk [vmem:[#allocation2 + $0x168] sm:$0xff] %vm332_vm0, %v425_v29 }
  0x88   : > { %v8306_v31 = vld [vmem:[#allocation2 + $0x28] sm:$0xff]  ;;  %7128 = vmatmul.msk.f32.gmra.mxu0 %vm332_vm0, %v8304_v30  ;;  %442 = vst.msk [vmem:[#allocation2 + $0x68] sm:$0xff] %vm332_vm0, %v409_v34  ;;  %v766_v41 = vld [vmem:[#allocation2 + $0x130] sm:$0xff] }
  0x89   : > { %7160 = vmatmul.msk.f32.gmra.mxu1 %vm332_vm0, %v8306_v31  ;;  %v765_v33 = vld [vmem:[#allocation2 + $0x128] sm:$0xff]  ;;  %459 = vst.msk [vmem:[#allocation2 + $0x170] sm:$0xff] %vm332_vm0, %v426_v36  ;;  %v8321_v38 = vld [vmem:[#allocation2 + $0x30] sm:$0xff] }
  0x8a   : > { %v8314_v35 = vld [vmem:[#allocation2 + $0x2f] sm:$0xff]  ;;  %443 = vst.msk [vmem:[#allocation2 + $0x70] sm:$0xff] %vm332_vm0, %v410_v42  ;;  %v490_v46 = vld [vmem:[#allocation2 + $0x147] sm:$0xff] }
  0x8b   : > { %v489_v40 = vld [vmem:[#allocation2 + $0x12f] sm:$0xff]  ;;  %v8328_v43 = vld [vmem:[#allocation2 + $0x47] sm:$0xff]  ;;  %460 = vst.msk [vmem:[#allocation2 + $0x188] sm:$0xff] %vm332_vm0, %v427_v44  ;;  %v2494_v44 = vld [vmem:[#allocation7 + $0xd8] sm:$0xff] }
  0x8c   : > { %v8334_v45 = vld [vmem:[#allocation2 + $0x48] sm:$0xff]  ;;  %444 = vst.msk [vmem:[#allocation2 + $0x88] sm:$0xff] %vm332_vm0, %v411_v48  ;;  %v768_v54 = vld [vmem:[#allocation2 + $0x150] sm:$0xff]  ;;  %2603 = vmatpush.msra.mxu2 %v2494_v44 }
  0x8d   : > { %v767_v47 = vld [vmem:[#allocation2 + $0x148] sm:$0xff]  ;;  %v8348_v51 = vld [vmem:[#allocation2 + $0x50] sm:$0xff]  ;;  %461 = vst.msk [vmem:[#allocation2 + $0x190] sm:$0xff] %vm332_vm0, %v428_v50 }
  0x8e   : > { %7144 = vmatmul.msk.f32.gmra.mxu2 %vm332_vm0, %v488_v32  ;;  %v8342_v49 = vld [vmem:[#allocation2 + $0x4f] sm:$0xff]  ;;  %445 = vst.msk [vmem:[#allocation2 + $0x90] sm:$0xff] %vm332_vm0, %v412_v55  ;;  %v492_v60 = vld [vmem:[#allocation2 + $0x167] sm:$0xff] }
  0x8f   : > { %7176 = vmatmul.msk.f32.gmra.mxu3 %vm332_vm0, %v765_v33  ;;  %v491_v53 = vld [vmem:[#allocation2 + $0x14f] sm:$0xff]  ;;  %v8356_v56 = vld [vmem:[#allocation2 + $0x67] sm:$0xff]  ;;  %462 = vst.msk [vmem:[#allocation2 + $0x1a8] sm:$0xff] %vm332_vm0, %v429_v57 }
  0x90   : > { %7129 = vmatmul.msk.f32.gmra.mxu0 %vm332_vm0, %v8314_v35  ;;  %v8362_v58 = vld [vmem:[#allocation2 + $0x68] sm:$0xff]  ;;  %446 = vst.msk [vmem:[#allocation2 + $0xa8] sm:$0xff] %vm332_vm0, %v413_v62  ;;  %v770_v4 = vld [vmem:[#allocation2 + $0x170] sm:$0xff] }
  0x91   : > { %7161 = vmatmul.msk.f32.gmra.mxu1 %vm332_vm0, %v8321_v38  ;;  %v769_v61 = vld [vmem:[#allocation2 + $0x168] sm:$0xff]  ;;  %v8376_v1 = vld [vmem:[#allocation2 + $0x70] sm:$0xff]  ;;  %463 = vst.msk [vmem:[#allocation2 + $0x1b0] sm:$0xff] %vm332_vm0, %v430_v0 }
  0x92   : > { %v8370_v63 = vld [vmem:[#allocation2 + $0x6f] sm:$0xff]  ;;  %447 = vst.msk [vmem:[#allocation2 + $0xb0] sm:$0xff] %vm332_vm0, %v414_v5  ;;  %v494_v9 = vld [vmem:[#allocation2 + $0x187] sm:$0xff] }
  0x93   : > { %v493_v3 = vld [vmem:[#allocation2 + $0x16f] sm:$0xff]  ;;  %v8384_v6 = vld [vmem:[#allocation2 + $0x87] sm:$0xff]  ;;  %464 = vst.msk [vmem:[#allocation2 + $0x1c8] sm:$0xff] %vm332_vm0, %v431_v7 }
  0x94   : > { %v8390_v8 = vld [vmem:[#allocation2 + $0x88] sm:$0xff]  ;;  %448 = vst.msk [vmem:[#allocation2 + $0xc8] sm:$0xff] %vm332_vm0, %v415_v11  ;;  %v772_v17 = vld [vmem:[#allocation2 + $0x190] sm:$0xff]  ;;  %v3178_v11 = vld [vmem:[#allocation7 + $0x118] sm:$0xff] }
  0x95   : > { %v771_v10 = vld [vmem:[#allocation2 + $0x188] sm:$0xff]  ;;  %v8404_v14 = vld [vmem:[#allocation2 + $0x90] sm:$0xff]  ;;  %465 = vst.msk [vmem:[#allocation2 + $0x1d0] sm:$0xff] %vm332_vm0, %v432_v13  ;;  %3287 = vmatpush.msra.mxu0 %v3178_v11 }
  0x96   : > { %7145 = vmatmul.msk.f32.gmra.mxu2 %vm332_vm0, %v489_v40  ;;  %v8398_v12 = vld [vmem:[#allocation2 + $0x8f] sm:$0xff]  ;;  %449 = vst.msk [vmem:[#allocation2 + $0xd0] sm:$0xff] %vm332_vm0, %v416_v18  ;;  %v496_v23 = vld [vmem:[#allocation2 + $0x1a7] sm:$0xff] }
  0x97   : > { %7177 = vmatmul.msk.f32.gmra.mxu3 %vm332_vm0, %v766_v41  ;;  %v495_v16 = vld [vmem:[#allocation2 + $0x18f] sm:$0xff]  ;;  %v8412_v19 = vld [vmem:[#allocation2 + $0xa7] sm:$0xff]  ;;  %466 = vst.msk [vmem:[#allocation2 + $0x1e8] sm:$0xff] %vm332_vm0, %v433_v20 }
  0x98   : > { %7130 = vmatmul.msk.f32.gmra.mxu0 %vm332_vm0, %v8328_v43  ;;  %v8418_v21 = vld [vmem:[#allocation2 + $0xa8] sm:$0xff]  ;;  %450 = vst.msk [vmem:[#allocation2 + $0xe8] sm:$0xff] %vm332_vm0, %v417_v25  ;;  %v774_v33 = vld [vmem:[#allocation2 + $0x1b0] sm:$0xff]  ;;  %v2148_v20 = vld [vmem:[#allocation7 + $0xa0] sm:$0xff] }
  0x99   : > { %7162 = vmatmul.msk.f32.gmra.mxu1 %vm332_vm0, %v8334_v45  ;;  %v773_v24 = vld [vmem:[#allocation2 + $0x1a8] sm:$0xff]  ;;  %v8432_v29 = vld [vmem:[#allocation2 + $0xb0] sm:$0xff] }
  0x9a   : > { %v8426_v26 = vld [vmem:[#allocation2 + $0xaf] sm:$0xff]  ;;  %v498_v40 = vld [vmem:[#allocation2 + $0x1c7] sm:$0xff] }
  0x9b   : > { %v434_v28 = vld [vmem:[%s8120_s13 + $0xe8] sm:$0xff]  ;;  %v2150_v13 = vld [vmem:[#allocation7 + $0xb0] sm:$0xff] }
  0x9c   : > { %467 = vst.msk [vmem:[#allocation2 + $0x1f0] sm:$0xff] %vm332_vm0, %v434_v28  ;;  %v497_v32 = vld [vmem:[#allocation2 + $0x1af] sm:$0xff]  ;;  %v8440_v36 = vld [vmem:[#allocation2 + $0xc7] sm:$0xff] }
  0x9d   : > { %v418_v34 = vld [vmem:[%s8120_s13 + $0x68] sm:$0xff]  ;;  %v776_v50 = vld [vmem:[#allocation2 + $0x1d0] sm:$0xff] }
  0x9e   : > { %7146 = vmatmul.msk.f32.gmra.mxu2 %vm332_vm0, %v490_v46  ;;  %451 = vst.msk [vmem:[#allocation2 + $0xf0] sm:$0xff] %vm332_vm0, %v418_v34  ;;  %v8445_v39 = vld [vmem:[#allocation2 + $0xc8] sm:$0xff]  ;;  %v8455_v46 = vld [vmem:[#allocation2 + $0xd0] sm:$0xff] }
  0x9f   : > { %7178 = vmatmul.msk.f32.gmra.mxu3 %vm332_vm0, %v767_v47  ;;  %v775_v41 = vld [vmem:[#allocation2 + $0x1c8] sm:$0xff]  ;;  %v1092_v28 = vld [vmem:[#allocation2 + $0x31] sm:$0xff] }
  0xa0   : > { %7131 = vmatmul.msk.f32.gmra.mxu0 %vm332_vm0, %v8342_v49  ;;  %v8451_v42 = vld [vmem:[#allocation2 + $0xcf] sm:$0xff]  ;;  %v8462_v52 = vld [vmem:[#allocation2 + $0xe7] sm:$0xff] }
  0xa1   : > { %7163 = vmatmul.msk.f32.gmra.mxu1 %vm332_vm0, %v8348_v51  ;;  %v499_v48 = vld [vmem:[#allocation2 + $0x1cf] sm:$0xff]  ;;  %v500_v57 = vld [vmem:[#allocation2 + $0x1e7] sm:$0xff] }
  0xa2   : > { %v777_v59 = vld [vmem:[#allocation2 + $0x1e8] sm:$0xff] }
  0xa3   : > { %v501_v62 = vld [vmem:[#allocation2 + $0x1ef] sm:$0xff] }
  0xa4   : > { %v778_v0 = vld [vmem:[#allocation2 + $0x1f0] sm:$0xff]  ;;  %v8487_v7 = vld [vmem:[#allocation2 + $0x108] sm:$0xff] }
  0xa5   : > { %v2149_v18 = vld [vmem:[#allocation7 + $0xa8] sm:$0xff] }
  0xa6   : > { %7147 = vmatmul.msk.f32.gmra.mxu2 %vm332_vm0, %v491_v53  ;;  %v8466_v53 = vld [vmem:[#allocation2 + $0xe8] sm:$0xff] }
  0xa7   : > { %7179 = vmatmul.msk.f32.gmra.mxu3 %vm332_vm0, %v768_v54  ;;  %v2836_v54 = vld [vmem:[#allocation7 + $0xf8] sm:$0xff]  ;;  %v1091_v22 = vld [vmem:[#allocation2 + $0x29] sm:$0xff] }
  0xa8   : > { %7132 = vmatmul.msk.f32.gmra.mxu0 %vm332_vm0, %v8356_v56  ;;  %2945 = vmatpush.msra.mxu3 %v2836_v54 }
  0xa9   : > { %7164 = vmatmul.msk.f32.gmra.mxu1 %vm332_vm0, %v8362_v58 }
  0xae   : > { %7148 = vmatmul.msk.f32.gmra.mxu2 %vm332_vm0, %v492_v60  ;;  %v8473_v60 = vld [vmem:[#allocation2 + $0xef] sm:$0xff] }
  0xaf   : > { %7180 = vmatmul.msk.f32.gmra.mxu3 %vm332_vm0, %v769_v61  ;;  %v8477_v61 = vld [vmem:[#allocation2 + $0xf0] sm:$0xff] }
  0xb0   : > { %7133 = vmatmul.msk.f32.gmra.mxu0 %vm332_vm0, %v8370_v63 }
  0xb1   : > { %7165 = vmatmul.msk.f32.gmra.mxu1 %vm332_vm0, %v8376_v1 }
  0xb6   : > { %7149 = vmatmul.msk.f32.gmra.mxu2 %vm332_vm0, %v493_v3 }
  0xb7   : > { %7181 = vmatmul.msk.f32.gmra.mxu3 %vm332_vm0, %v770_v4 }
  0xb8   : > { %7134 = vmatmul.msk.f32.gmra.mxu0 %vm332_vm0, %v8384_v6 }
  0xb9   : > { %7166 = vmatmul.msk.f32.gmra.mxu1 %vm332_vm0, %v8390_v8 }
  0xbb   : > { %v619_v47 = vpop.f32.mrf.mxu0 }
  0xbc   : > { %715 = vst.msk [vmem:[#allocation3] sm:$0xff] %vm332_vm0, %v619_v47 }
  0xbd   : > { %v897_v3 = vpop.f32.mrf.mxu1 }
  0xbe   : > { %7150 = vmatmul.msk.f32.gmra.mxu2 %vm332_vm0, %v494_v9  ;;  %v2151_v9 = vld [vmem:[#allocation7 + $0xb8] sm:$0xff] }
  0xbf   : > { %7182 = vmatmul.msk.f32.gmra.mxu3 %vm332_vm0, %v771_v10  ;;  %v1089_v10 = vld [vmem:[#allocation2 + $0x9] sm:$0xff]  ;;  %2260 = vmatpush.msrb.mxu1 %v2151_v9 }
  0xc0   : > { %7135 = vmatmul.msk.f32.gmra.mxu0 %vm332_vm0, %v8398_v12  ;;  %v1095_v9 = vld [vmem:[#allocation2 + $0x69] sm:$0xff] }
  0xc1   : > { %7167 = vmatmul.msk.f32.gmra.mxu1 %vm332_vm0, %v8404_v14 }
  0xc2   : > { %2261 = vmatpush.msrb.mxu1 %v2150_v13 }
  0xc3   : > { %v622_v55 = vpop.f32.mrf.mxu0  ;;  %v993_v4 = vld [vmem:[#allocation3] sm:$0xff] }
  0xc4   : > { %716 = vst.msk [vmem:[#allocation3 + $0x8] sm:$0xff] %vm332_vm0, %v622_v55  ;;  %v1025_v5 = vadd.f32 %v993_v4, %v897_v3  ;;  %2262 = vmatpush.msrb.mxu1 %v2149_v18 }
  0xc5   : > { %v900_v15 = vpop.f32.mrf.mxu1 }
  0xc6   : > { %7151 = vmatmul.msk.f32.gmra.mxu2 %vm332_vm0, %v495_v16  ;;  %1057 = vst.msk [vmem:[#allocation3] sm:$0xff] %vm332_vm0, %v1025_v5  ;;  %2263 = vmatpush.msrb.mxu1 %v2148_v20  ;;  %v1096_v20 = vld [vmem:[#allocation2 + $0x71] sm:$0xff] }
  0xc7   : > { %7183 = vmatmul.msk.f32.gmra.mxu3 %vm332_vm0, %v772_v17 }
  0xc8   : > { %7136 = vmatmul.msk.f32.gmra.mxu0 %vm332_vm0, %v8412_v19 }
  0xc9   : > { %7168 = vmatmul.msk.f32.gmra.mxu1 %vm332_vm0, %v8418_v21 }
  0xcb   : > { %v994_v16 = vld [vmem:[#allocation3 + $0x8] sm:$0xff] }
  0xcc   : > { %v1026_v17 = vadd.f32 %v994_v16, %v900_v15 }
  0xce   : > { %7152 = vmatmul.msk.f32.gmra.mxu2 %vm332_vm0, %v496_v23  ;;  %1058 = vst.msk [vmem:[#allocation3 + $0x8] sm:$0xff] %vm332_vm0, %v1026_v17  ;;  %v1090_v23 = vld [vmem:[#allocation2 + $0x11] sm:$0xff] }
  0xcf   : > { %7184 = vmatmul.msk.f32.gmra.mxu3 %vm332_vm0, %v773_v24 }
  0xd0   : > { %7137 = vmatmul.msk.f32.gmra.mxu0 %vm332_vm0, %v8426_v26 }
  0xd1   : > { %7169 = vmatmul.msk.f32.gmra.mxu1 %vm332_vm0, %v8432_v29 }
  0xd6   : > { %7153 = vmatmul.msk.f32.gmra.mxu2 %vm332_vm0, %v497_v32 }
  0xd7   : > { %7185 = vmatmul.msk.f32.gmra.mxu3 %vm332_vm0, %v774_v33 }
  0xd8   : > { %7138 = vmatmul.msk.f32.gmra.mxu0 %vm332_vm0, %v8440_v36 }
  0xd9   : > { %7170 = vmatmul.msk.f32.gmra.mxu1 %vm332_vm0, %v8445_v39 }
  0xde   : > { %7154 = vmatmul.msk.f32.gmra.mxu2 %vm332_vm0, %v498_v40 }
  0xdf   : > { %7186 = vmatmul.msk.f32.gmra.mxu3 %vm332_vm0, %v775_v41  ;;  %v1093_v41 = vld [vmem:[#allocation2 + $0x49] sm:$0xff] }
  0xe0   : > { %7139 = vmatmul.msk.f32.gmra.mxu0 %vm332_vm0, %v8451_v42 }
  0xe1   : > { %7171 = vmatmul.msk.f32.gmra.mxu1 %vm332_vm0, %v8455_v46 }
  0xe6   : > { %7155 = vmatmul.msk.f32.gmra.mxu2 %vm332_vm0, %v499_v48 }
  0xe7   : > { %7187 = vmatmul.msk.f32.gmra.mxu3 %vm332_vm0, %v776_v50 }
  0xe8   : > { %7140 = vmatmul.msk.f32.gmra.mxu0 %vm332_vm0, %v8462_v52 }
  0xe9   : > { %7172 = vmatmul.msk.f32.gmra.mxu1 %vm332_vm0, %v8466_v53 }
  0xee   : > { %7156 = vmatmul.msk.f32.gmra.mxu2 %vm332_vm0, %v500_v57  ;;  %v1094_v57 = vld [vmem:[#allocation2 + $0x51] sm:$0xff] }
  0xef   : > { %7188 = vmatmul.msk.f32.gmra.mxu3 %vm332_vm0, %v777_v59 }
  0xf0   : > { %7141 = vmatmul.msk.f32.gmra.mxu0 %vm332_vm0, %v8473_v60 }
  0xf1   : > { %7173 = vmatmul.msk.f32.gmra.mxu1 %vm332_vm0, %v8477_v61 }
  0xf6   : > { %7157 = vmatmul.msk.f32.gmra.mxu2 %vm332_vm0, %v501_v62 }
  0xf7   : > { %7189 = vmatmul.msk.f32.gmra.mxu3 %vm332_vm0, %v778_v0 }
  0xf8   : > { %7142 = vmatmul.msk.f32.gmra.mxu0 %vm332_vm0, %v8483_v2 }
  0xf9   : > { %7174 = vmatmul.msk.f32.gmra.mxu1 %vm332_vm0, %v8487_v7 }
  0xfe   : > { %7190 = vmatmul.msk.f32.vlgmr.msrb.gmra.mxu2 %vm332_vm0, %v1089_v10 }
  0xff   : > { %7222 = vmatmul.msk.f32.vlgmr.msrb.gmra.mxu3 %vm332_vm0, %v8304_v30 }
 0x100   : > { %7254 = vmatmul.msk.f32.vlgmr.msrb.gmra.mxu0 %vm332_vm0, %v8306_v31 }
 0x101   : > { %7286 = vmatmul.msk.f32.vlgmr.msrb.gmra.mxu1 %vm332_vm0, %v1091_v22 }
 0x105   : > { %v625_v24 = vpop.f32.mrf.mxu0 }
 0x106   : > { %v903_v25 = vpop.f32.mrf.mxu1  ;;  %7191 = vmatmul.msk.f32.gmra.mxu2 %vm332_vm0, %v1090_v23  ;;  %717 = vst.msk [vmem:[#allocation3 + $0x10] sm:$0xff] %vm332_vm0, %v625_v24 }
 0x107   : > { %7223 = vmatmul.msk.f32.gmra.mxu3 %vm332_vm0, %v8314_v35 }
 0x108   : > { %7255 = vmatmul.msk.f32.gmra.mxu0 %vm332_vm0, %v8321_v38 }
 0x109   : > { %v670_v30 = vpop.f32.mrf.mxu2  ;;  %7287 = vmatmul.msk.f32.gmra.mxu1 %vm332_vm0, %v1092_v28 }
 0x10a   : > { %v948_v31 = vpop.f32.mrf.mxu3  ;;  %732 = vst.msk [vmem:[#allocation3 + $0x88] sm:$0xff] %vm332_vm0, %v670_v30 }
 0x10d   : > { %v628_v32 = vpop.f32.mrf.mxu0  ;;  %v995_v33 = vld [vmem:[#allocation3 + $0x10] sm:$0xff] }
 0x10e   : > { %v906_v34 = vpop.f32.mrf.mxu1  ;;  %7192 = vmatmul.msk.f32.gmra.mxu2 %vm332_vm0, %v1091_v22  ;;  %718 = vst.msk [vmem:[#allocation3 + $0x18] sm:$0xff] %vm332_vm0, %v628_v32  ;;  %v1027_v35 = vadd.f32 %v995_v33, %v903_v25  ;;  %v1097_v32 = vld [vmem:[#allocation2 + $0x89] sm:$0xff] }
 0x10f   : > { %7224 = vmatmul.msk.f32.gmra.mxu3 %vm332_vm0, %v8328_v43 }
 0x110   : > { %7256 = vmatmul.msk.f32.gmra.mxu0 %vm332_vm0, %v8334_v45  ;;  %1059 = vst.msk [vmem:[#allocation3 + $0x10] sm:$0xff] %vm332_vm0, %v1027_v35 }
 0x111   : > { %v1010_v38 = vld [vmem:[#allocation3 + $0x88] sm:$0xff]  ;;  %v673_v37 = vpop.f32.mrf.mxu2  ;;  %7288 = vmatmul.msk.f32.gmra.mxu1 %vm332_vm0, %v1093_v41 }
 0x112   : > { %v951_v40 = vpop.f32.mrf.mxu3  ;;  %v1042_v44 = vadd.f32 %v1010_v38, %v948_v31  ;;  %733 = vst.msk [vmem:[#allocation3 + $0x90] sm:$0xff] %vm332_vm0, %v673_v37 }
 0x114   : > { %1074 = vst.msk [vmem:[#allocation3 + $0x88] sm:$0xff] %vm332_vm0, %v1042_v44 }
 0x115   : > { %v631_v43 = vpop.f32.mrf.mxu0  ;;  %v996_v47 = vld [vmem:[#allocation3 + $0x18] sm:$0xff] }
 0x116   : > { %v909_v48 = vpop.f32.mrf.mxu1  ;;  %7193 = vmatmul.msk.f32.gmra.mxu2 %vm332_vm0, %v1092_v28  ;;  %719 = vst.msk [vmem:[#allocation3 + $0x20] sm:$0xff] %vm332_vm0, %v631_v43  ;;  %v1028_v45 = vadd.f32 %v996_v47, %v906_v34 }
 0x117   : > { %7225 = vmatmul.msk.f32.gmra.mxu3 %vm332_vm0, %v8342_v49 }
 0x118   : > { %7257 = vmatmul.msk.f32.gmra.mxu0 %vm332_vm0, %v8348_v51  ;;  %1060 = vst.msk [vmem:[#allocation3 + $0x18] sm:$0xff] %vm332_vm0, %v1028_v45 }
 0x119   : > { %v1011_v50 = vld [vmem:[#allocation3 + $0x90] sm:$0xff]  ;;  %v676_v54 = vpop.f32.mrf.mxu2  ;;  %7289 = vmatmul.msk.f32.gmra.mxu1 %vm332_vm0, %v1094_v57 }
 0x11a   : > { %v954_v55 = vpop.f32.mrf.mxu3  ;;  %v1043_v59 = vadd.f32 %v1011_v50, %v951_v40  ;;  %734 = vst.msk [vmem:[#allocation3 + $0x98] sm:$0xff] %vm332_vm0, %v676_v54 }
 0x11c   : > { %1075 = vst.msk [vmem:[#allocation3 + $0x90] sm:$0xff] %vm332_vm0, %v1043_v59 }
 0x11d   : > { %v634_v49 = vpop.f32.mrf.mxu0  ;;  %v997_v62 = vld [vmem:[#allocation3 + $0x20] sm:$0xff] }
 0x11e   : > { %v912_v0 = vpop.f32.mrf.mxu1  ;;  %7194 = vmatmul.msk.f32.gmra.mxu2 %vm332_vm0, %v1093_v41  ;;  %720 = vst.msk [vmem:[#allocation3 + $0x28] sm:$0xff] %vm332_vm0, %v634_v49  ;;  %v1029_v51 = vadd.f32 %v997_v62, %v909_v48  ;;  %v1098_v41 = vld [vmem:[#allocation2 + $0x91] sm:$0xff] }
 0x11f   : > { %7226 = vmatmul.msk.f32.gmra.mxu3 %vm332_vm0, %v8356_v56  ;;  %v2493_v56 = vld [vmem:[#allocation7 + $0xd0] sm:$0xff] }
 0x120   : > { %7258 = vmatmul.msk.f32.gmra.mxu0 %vm332_vm0, %v8362_v58  ;;  %1061 = vst.msk [vmem:[#allocation3 + $0x20] sm:$0xff] %vm332_vm0, %v1029_v51  ;;  %2604 = vmatpush.msra.mxu2 %v2493_v56 }
 0x121   : > { %v1012_v3 = vld [vmem:[#allocation3 + $0x98] sm:$0xff]  ;;  %v679_v4 = vpop.f32.mrf.mxu2  ;;  %7290 = vmatmul.msk.f32.gmra.mxu1 %vm332_vm0, %v1095_v9 }
 0x122   : > { %v957_v5 = vpop.f32.mrf.mxu3  ;;  %v1044_v10 = vadd.f32 %v1012_v3, %v954_v55  ;;  %735 = vst.msk [vmem:[#allocation3 + $0xa0] sm:$0xff] %vm332_vm0, %v679_v4  ;;  %v1099_v55 = vld [vmem:[#allocation2 + $0xa9] sm:$0xff]  ;;  %v1100_v3 = vld [vmem:[#allocation2 + $0xb1] sm:$0xff] }
 0x124   : > { %1076 = vst.msk [vmem:[#allocation3 + $0x98] sm:$0xff] %vm332_vm0, %v1044_v10 }
 0x125   : > { %v637_v11 = vpop.f32.mrf.mxu0  ;;  %v998_v13 = vld [vmem:[#allocation3 + $0x28] sm:$0xff] }
 0x126   : > { %v915_v15 = vpop.f32.mrf.mxu1  ;;  %7195 = vmatmul.msk.f32.gmra.mxu2 %vm332_vm0, %v1094_v57  ;;  %721 = vst.msk [vmem:[#allocation3 + $0x30] sm:$0xff] %vm332_vm0, %v637_v11  ;;  %v1030_v58 = vadd.f32 %v998_v13, %v912_v0  ;;  %v1101_v13 = vld [vmem:[#allocation2 + $0xc9] sm:$0xff] }
 0x127   : > { %7227 = vmatmul.msk.f32.gmra.mxu3 %vm332_vm0, %v8370_v63  ;;  %v2835_v63 = vld [vmem:[#allocation7 + $0xf0] sm:$0xff] }
 0x128   : > { %7259 = vmatmul.msk.f32.gmra.mxu0 %vm332_vm0, %v8376_v1  ;;  %1062 = vst.msk [vmem:[#allocation3 + $0x28] sm:$0xff] %vm332_vm0, %v1030_v58  ;;  %2946 = vmatpush.msra.mxu3 %v2835_v63 }
 0x129   : > { %v1013_v16 = vld [vmem:[#allocation3 + $0xa0] sm:$0xff]  ;;  %v682_v17 = vpop.f32.mrf.mxu2  ;;  %7291 = vmatmul.msk.f32.gmra.mxu1 %vm332_vm0, %v1096_v20 }
 0x12a   : > { %v960_v18 = vpop.f32.mrf.mxu3  ;;  %v1045_v22 = vadd.f32 %v1013_v16, %v957_v5  ;;  %736 = vst.msk [vmem:[#allocation3 + $0xa8] sm:$0xff] %vm332_vm0, %v682_v17 }
 0x12c   : > { %1077 = vst.msk [vmem:[#allocation3 + $0xa0] sm:$0xff] %vm332_vm0, %v1045_v22  ;;  %v1102_v22 = vld [vmem:[#allocation2 + $0xd1] sm:$0xff] }
 0x12d   : > { %v640_v23 = vpop.f32.mrf.mxu0  ;;  %v999_v24 = vld [vmem:[#allocation3 + $0x30] sm:$0xff] }
 0x12e   : > { %v918_v25 = vpop.f32.mrf.mxu1  ;;  %7196 = vmatmul.msk.f32.gmra.mxu2 %vm332_vm0, %v1095_v9  ;;  %722 = vst.msk [vmem:[#allocation3 + $0x38] sm:$0xff] %vm332_vm0, %v640_v23  ;;  %v1031_v1 = vadd.f32 %v999_v24, %v915_v15 }
 0x12f   : > { %7228 = vmatmul.msk.f32.gmra.mxu3 %vm332_vm0, %v8384_v6 }
 0x130   : > { %7260 = vmatmul.msk.f32.gmra.mxu0 %vm332_vm0, %v8390_v8  ;;  %1063 = vst.msk [vmem:[#allocation3 + $0x30] sm:$0xff] %vm332_vm0, %v1031_v1 }
 0x131   : > { %v1014_v30 = vld [vmem:[#allocation3 + $0xa8] sm:$0xff]  ;;  %v685_v31 = vpop.f32.mrf.mxu2  ;;  %7292 = vmatmul.msk.f32.gmra.mxu1 %vm332_vm0, %v1097_v32 }
 0x132   : > { %v963_v28 = vpop.f32.mrf.mxu3  ;;  %v1046_v33 = vadd.f32 %v1014_v30, %v960_v18  ;;  %737 = vst.msk [vmem:[#allocation3 + $0xb0] sm:$0xff] %vm332_vm0, %v685_v31  ;;  %v1103_v31 = vld [vmem:[#allocation2 + $0xe9] sm:$0xff] }
 0x134   : > { %1078 = vst.msk [vmem:[#allocation3 + $0xa8] sm:$0xff] %vm332_vm0, %v1046_v33 }
 0x135   : > { %v643_v6 = vpop.f32.mrf.mxu0  ;;  %v1000_v34 = vld [vmem:[#allocation3 + $0x38] sm:$0xff] }
 0x136   : > { %v921_v35 = vpop.f32.mrf.mxu1  ;;  %7197 = vmatmul.msk.f32.gmra.mxu2 %vm332_vm0, %v1096_v20  ;;  %723 = vst.msk [vmem:[#allocation3 + $0x40] sm:$0xff] %vm332_vm0, %v643_v6  ;;  %v1032_v8 = vadd.f32 %v1000_v34, %v918_v25 }
 0x137   : > { %7229 = vmatmul.msk.f32.gmra.mxu3 %vm332_vm0, %v8398_v12  ;;  %v3177_v12 = vld [vmem:[#allocation7 + $0x110] sm:$0xff] }
 0x138   : > { %7261 = vmatmul.msk.f32.gmra.mxu0 %vm332_vm0, %v8404_v14  ;;  %1064 = vst.msk [vmem:[#allocation3 + $0x38] sm:$0xff] %vm332_vm0, %v1032_v8 }
 0x139   : > { %v1015_v38 = vld [vmem:[#allocation3 + $0xb0] sm:$0xff]  ;;  %v688_v37 = vpop.f32.mrf.mxu2  ;;  %7293 = vmatmul.msk.f32.gmra.mxu1 %vm332_vm0, %v1098_v41  ;;  %3288 = vmatpush.msra.mxu0 %v3177_v12 }
 0x13a   : > { %v966_v40 = vpop.f32.mrf.mxu3  ;;  %v1047_v44 = vadd.f32 %v1015_v38, %v963_v28  ;;  %738 = vst.msk [vmem:[#allocation3 + $0xb8] sm:$0xff] %vm332_vm0, %v688_v37  ;;  %v1104_v38 = vld [vmem:[#allocation2 + $0xf1] sm:$0xff] }
 0x13c   : > { %1079 = vst.msk [vmem:[#allocation3 + $0xb0] sm:$0xff] %vm332_vm0, %v1047_v44  ;;  %v2834_v44 = vld [vmem:[#allocation7 + $0xe8] sm:$0xff] }
 0x13d   : > { %v646_v43 = vpop.f32.mrf.mxu0  ;;  %v1001_v47 = vld [vmem:[#allocation3 + $0x40] sm:$0xff]  ;;  %2947 = vmatpush.msra.mxu3 %v2834_v44 }
 0x13e   : > { %v924_v48 = vpop.f32.mrf.mxu1  ;;  %7198 = vmatmul.msk.f32.gmra.mxu2 %vm332_vm0, %v1097_v32  ;;  %724 = vst.msk [vmem:[#allocation3 + $0x48] sm:$0xff] %vm332_vm0, %v646_v43  ;;  %v1033_v14 = vadd.f32 %v1001_v47, %v921_v35 }
 0x13f   : > { %7230 = vmatmul.msk.f32.gmra.mxu3 %vm332_vm0, %v8412_v19 }
 0x140   : > { %7262 = vmatmul.msk.f32.gmra.mxu0 %vm332_vm0, %v8418_v21  ;;  %1065 = vst.msk [vmem:[#allocation3 + $0x40] sm:$0xff] %vm332_vm0, %v1033_v14 }
 0x141   : > { %v1016_v45 = vld [vmem:[#allocation3 + $0xb8] sm:$0xff]  ;;  %v691_v50 = vpop.f32.mrf.mxu2  ;;  %7294 = vmatmul.msk.f32.gmra.mxu1 %vm332_vm0, %v1099_v55 }
 0x142   : > { %v969_v54 = vpop.f32.mrf.mxu3  ;;  %v1048_v57 = vadd.f32 %v1016_v45, %v966_v40  ;;  %739 = vst.msk [vmem:[#allocation3 + $0xc0] sm:$0xff] %vm332_vm0, %v691_v50  ;;  %v1788_v45 = vld [vmem:[#allocation2 + $0x110] sm:$0xff] }
 0x144   : > { %1080 = vst.msk [vmem:[#allocation3 + $0xb8] sm:$0xff] %vm332_vm0, %v1048_v57 }
 0x145   : > { %v649_v19 = vpop.f32.mrf.mxu0  ;;  %v1002_v59 = vld [vmem:[#allocation3 + $0x48] sm:$0xff] }
 0x146   : > { %v927_v49 = vpop.f32.mrf.mxu1  ;;  %7199 = vmatmul.msk.f32.gmra.mxu2 %vm332_vm0, %v1098_v41  ;;  %725 = vst.msk [vmem:[#allocation3 + $0x50] sm:$0xff] %vm332_vm0, %v649_v19  ;;  %v1034_v21 = vadd.f32 %v1002_v59, %v924_v48  ;;  %v1105_v48 = vld [vmem:[#allocation2 + $0x109] sm:$0xff]  ;;  %v1106_v59 = vld [vmem:[#allocation2 + $0x111] sm:$0xff] }
 0x147   : > { %7231 = vmatmul.msk.f32.gmra.mxu3 %vm332_vm0, %v8426_v26 }
 0x148   : > { %7263 = vmatmul.msk.f32.gmra.mxu0 %vm332_vm0, %v8432_v29  ;;  %1066 = vst.msk [vmem:[#allocation3 + $0x48] sm:$0xff] %vm332_vm0, %v1034_v21  ;;  %v1447_v21 = vld [vmem:[#allocation2 + $0x127] sm:$0xff] }
 0x149   : > { %v1017_v62 = vld [vmem:[#allocation3 + $0xc0] sm:$0xff]  ;;  %v694_v0 = vpop.f32.mrf.mxu2  ;;  %7295 = vmatmul.msk.f32.gmra.mxu1 %vm332_vm0, %v1100_v3 }
 0x14a   : > { %v972_v51 = vpop.f32.mrf.mxu3  ;;  %v1049_v4 = vadd.f32 %v1017_v62, %v969_v54  ;;  %740 = vst.msk [vmem:[#allocation3 + $0xc8] sm:$0xff] %vm332_vm0, %v694_v0  ;;  %v1789_v62 = vld [vmem:[#allocation2 + $0x128] sm:$0xff] }
 0x14c   : > { %1081 = vst.msk [vmem:[#allocation3 + $0xc0] sm:$0xff] %vm332_vm0, %v1049_v4 }
 0x14d   : > { %v652_v26 = vpop.f32.mrf.mxu0  ;;  %v1003_v5 = vld [vmem:[#allocation3 + $0x50] sm:$0xff] }
 0x14e   : > { %v930_v9 = vpop.f32.mrf.mxu1  ;;  %7200 = vmatmul.msk.f32.gmra.mxu2 %vm332_vm0, %v1099_v55  ;;  %726 = vst.msk [vmem:[#allocation3 + $0x58] sm:$0xff] %vm332_vm0, %v652_v26  ;;  %v1035_v29 = vadd.f32 %v1003_v5, %v927_v49 }
 0x14f   : > { %7232 = vmatmul.msk.f32.gmra.mxu3 %vm332_vm0, %v8440_v36 }
 0x150   : > { %7264 = vmatmul.msk.f32.gmra.mxu0 %vm332_vm0, %v8445_v39  ;;  %1067 = vst.msk [vmem:[#allocation3 + $0x50] sm:$0xff] %vm332_vm0, %v1035_v29 }
 0x151   : > { %v1018_v10 = vld [vmem:[#allocation3 + $0xc8] sm:$0xff]  ;;  %v697_v56 = vpop.f32.mrf.mxu2  ;;  %7296 = vmatmul.msk.f32.gmra.mxu1 %vm332_vm0, %v1101_v13 }
 0x152   : > { %v975_v11 = vpop.f32.mrf.mxu3  ;;  %v1050_v15 = vadd.f32 %v1018_v10, %v972_v51  ;;  %741 = vst.msk [vmem:[#allocation3 + $0xd0] sm:$0xff] %vm332_vm0, %v697_v56  ;;  %v1107_v10 = vld [vmem:[#allocation2 + $0x129] sm:$0xff] }
 0x154   : > { %1082 = vst.msk [vmem:[#allocation3 + $0xc8] sm:$0xff] %vm332_vm0, %v1050_v15 }
 0x155   : > { %v655_v36 = vpop.f32.mrf.mxu0  ;;  %v1004_v58 = vld [vmem:[#allocation3 + $0x58] sm:$0xff] }
 0x156   : > { %v933_v16 = vpop.f32.mrf.mxu1  ;;  %7201 = vmatmul.msk.f32.gmra.mxu2 %vm332_vm0, %v1100_v3  ;;  %727 = vst.msk [vmem:[#allocation3 + $0x60] sm:$0xff] %vm332_vm0, %v655_v36  ;;  %v1036_v39 = vadd.f32 %v1004_v58, %v930_v9  ;;  %v3176_v3 = vld [vmem:[#allocation7 + $0x108] sm:$0xff]  ;;  %v1335_v9 = vld [vmem:[#allocation3] sm:$0xff]  ;;  %v1790_v36 = vld [vmem:[#allocation2 + $0x130] sm:$0xff] }
 0x157   : > { %7233 = vmatmul.msk.f32.gmra.mxu3 %vm332_vm0, %v8451_v42  ;;  %3289 = vmatpush.msra.mxu0 %v3176_v3  ;;  %v3651_v58 = vld [vmem:[#allocation9 + $0x18] sm:$0xff] }
 0x158   : > { %7265 = vmatmul.msk.f32.gmra.mxu0 %vm332_vm0, %v8455_v46  ;;  %1068 = vst.msk [vmem:[#allocation3 + $0x58] sm:$0xff] %vm332_vm0, %v1036_v39  ;;  %3760 = vmatpush.msra.mxu1 %v3651_v58 }
 0x159   : > { %v1019_v17 = vld [vmem:[#allocation3 + $0xd0] sm:$0xff]  ;;  %v700_v18 = vpop.f32.mrf.mxu2  ;;  %7297 = vmatmul.msk.f32.gmra.mxu1 %vm332_vm0, %v1102_v22 }
 0x15a   : > { %v978_v20 = vpop.f32.mrf.mxu3  ;;  %v1051_v63 = vadd.f32 %v1019_v17, %v975_v11  ;;  %742 = vst.msk [vmem:[#allocation3 + $0xd8] sm:$0xff] %vm332_vm0, %v700_v18  ;;  %v1336_v17 = vld [vmem:[#allocation3 + $0x8] sm:$0xff] }
 0x15c   : > { %1083 = vst.msk [vmem:[#allocation3 + $0xd0] sm:$0xff] %vm332_vm0, %v1051_v63  ;;  %v1449_v63 = vld [vmem:[#allocation2 + $0x147] sm:$0xff] }
 0x15d   : > { %v658_v42 = vpop.f32.mrf.mxu0  ;;  %v1005_v23 = vld [vmem:[#allocation3 + $0x60] sm:$0xff] }
 0x15e   : > { %v936_v24 = vpop.f32.mrf.mxu1  ;;  %7202 = vmatmul.msk.f32.gmra.mxu2 %vm332_vm0, %v1101_v13  ;;  %728 = vst.msk [vmem:[#allocation3 + $0x68] sm:$0xff] %vm332_vm0, %v658_v42  ;;  %v1037_v46 = vadd.f32 %v1005_v23, %v933_v16  ;;  %v1448_v13 = vld [vmem:[#allocation2 + $0x12f] sm:$0xff] }
 0x15f   : > { %7234 = vmatmul.msk.f32.gmra.mxu3 %vm332_vm0, %v8462_v52  ;;  %v2492_v52 = vld [vmem:[#allocation7 + $0xc8] sm:$0xff] }
 0x160   : > { %7266 = vmatmul.msk.f32.gmra.mxu0 %vm332_vm0, %v8466_v53  ;;  %1069 = vst.msk [vmem:[#allocation3 + $0x60] sm:$0xff] %vm332_vm0, %v1037_v46  ;;  %2605 = vmatpush.msra.mxu2 %v2492_v52  ;;  %v1791_v46 = vld [vmem:[#allocation2 + $0x148] sm:$0xff] }
 0x161   : > { %v1020_v25 = vld [vmem:[#allocation3 + $0xd8] sm:$0xff]  ;;  %v703_v1 = vpop.f32.mrf.mxu2  ;;  %7298 = vmatmul.msk.f32.gmra.mxu1 %vm332_vm0, %v1103_v31 }
 0x162   : > { %v981_v30 = vpop.f32.mrf.mxu3  ;;  %v1052_v28 = vadd.f32 %v1020_v25, %v978_v20  ;;  %743 = vst.msk [vmem:[#allocation3 + $0xe0] sm:$0xff] %vm332_vm0, %v703_v1  ;;  %v1108_v20 = vld [vmem:[#allocation2 + $0x131] sm:$0xff] }
 0x164   : > { %1084 = vst.msk [vmem:[#allocation3 + $0xd8] sm:$0xff] %vm332_vm0, %v1052_v28  ;;  %v1109_v28 = vld [vmem:[#allocation2 + $0x149] sm:$0xff] }
 0x165   : > { %v661_v32 = vpop.f32.mrf.mxu0  ;;  %v1006_v33 = vld [vmem:[#allocation3 + $0x68] sm:$0xff] }
 0x166   : > { %7203 = vmatmul.msk.f32.gmra.mxu2 %vm332_vm0, %v1102_v22  ;;  %729 = vst.msk [vmem:[#allocation3 + $0x70] sm:$0xff] %vm332_vm0, %v661_v32  ;;  %v1038_v53 = vadd.f32 %v1006_v33, %v936_v24  ;;  %v939_v6 = vpop.f32.mrf.mxu1  ;;  %v1450_v33 = vld [vmem:[#allocation2 + $0x14f] sm:$0xff] }
 0x167   : > { %7235 = vmatmul.msk.f32.gmra.mxu3 %vm332_vm0, %v8473_v60 }
 0x168   : > { %7267 = vmatmul.msk.f32.gmra.mxu0 %vm332_vm0, %v8477_v61  ;;  %1070 = vst.msk [vmem:[#allocation3 + $0x68] sm:$0xff] %vm332_vm0, %v1038_v53 }
 0x169   : > { %v1021_v34 = vld [vmem:[#allocation3 + $0xe0] sm:$0xff]  ;;  %v706_v35 = vpop.f32.mrf.mxu2  ;;  %7299 = vmatmul.msk.f32.gmra.mxu1 %vm332_vm0, %v1104_v38 }
 0x16a   : > { %v984_v8 = vpop.f32.mrf.mxu3  ;;  %v1053_v37 = vadd.f32 %v1021_v34, %v981_v30  ;;  %744 = vst.msk [vmem:[#allocation3 + $0xe8] sm:$0xff] %vm332_vm0, %v706_v35  ;;  %v1337_v30 = vld [vmem:[#allocation3 + $0x10] sm:$0xff] }
 0x16b   : > { %v1792_v34 = vld [vmem:[#allocation2 + $0x150] sm:$0xff] }
 0x16c   : > { %1085 = vst.msk [vmem:[#allocation3 + $0xe0] sm:$0xff] %vm332_vm0, %v1053_v37 }
 0x16d   : > { %v664_v60 = vpop.f32.mrf.mxu0  ;;  %v1007_v40 = vld [vmem:[#allocation3 + $0x70] sm:$0xff] }
 0x16e   : > { %7204 = vmatmul.msk.f32.gmra.mxu2 %vm332_vm0, %v1103_v31  ;;  %730 = vst.msk [vmem:[#allocation3 + $0x78] sm:$0xff] %vm332_vm0, %v664_v60  ;;  %v1039_v61 = vadd.f32 %v1007_v40, %v939_v6  ;;  %v942_v41 = vpop.f32.mrf.mxu1  ;;  %v1338_v60 = vld [vmem:[#allocation3 + $0x18] sm:$0xff] }
 0x16f   : > { %7236 = vmatmul.msk.f32.gmra.mxu3 %vm332_vm0, %v8483_v2 }
 0x170   : > { %7268 = vmatmul.msk.f32.gmra.mxu0 %vm332_vm0, %v8487_v7  ;;  %1071 = vst.msk [vmem:[#allocation3 + $0x70] sm:$0xff] %vm332_vm0, %v1039_v61  ;;  %v1110_v61 = vld [vmem:[#allocation2 + $0x151] sm:$0xff] }
 0x171   : > { %v1022_v12 = vld [vmem:[#allocation3 + $0xe8] sm:$0xff]  ;;  %v709_v43 = vpop.f32.mrf.mxu2  ;;  %7300 = vmatmul.msk.f32.gmra.mxu1 %vm332_vm0, %v1105_v48 }
 0x172   : > { %v987_v47 = vpop.f32.mrf.mxu3  ;;  %v1054_v14 = vadd.f32 %v1022_v12, %v984_v8  ;;  %745 = vst.msk [vmem:[#allocation3 + $0xf0] sm:$0xff] %vm332_vm0, %v709_v43  ;;  %v1451_v12 = vld [vmem:[#allocation2 + $0x167] sm:$0xff] }
 0x174   : > { %1086 = vst.msk [vmem:[#allocation3 + $0xe8] sm:$0xff] %vm332_vm0, %v1054_v14  ;;  %v1793_v14 = vld [vmem:[#allocation2 + $0x168] sm:$0xff] }
 0x175   : > { %v667_v2 = vpop.f32.mrf.mxu0  ;;  %v1008_v50 = vld [vmem:[#allocation3 + $0x78] sm:$0xff] }
 0x176   : > { %7205 = vmatmul.msk.f32.gmra.mxu2 %vm332_vm0, %v1104_v38  ;;  %731 = vst.msk [vmem:[#allocation3 + $0x80] sm:$0xff] %vm332_vm0, %v667_v2  ;;  %v1040_v7 = vadd.f32 %v1008_v50, %v942_v41  ;;  %v945_v54 = vpop.f32.mrf.mxu1 }
 0x177   : > { %7237 = vmatmul.msk.f32.gmra.mxu3 %vm332_vm0, %v8296_v27 }
 0x178   : > { %7269 = vmatmul.msk.f32.gmra.mxu0 %vm332_vm0, %v1788_v45  ;;  %1072 = vst.msk [vmem:[#allocation3 + $0x78] sm:$0xff] %vm332_vm0, %v1040_v7 }
 0x179   : > { %v1023_v55 = vld [vmem:[#allocation3 + $0xf0] sm:$0xff]  ;;  %v712_v57 = vpop.f32.mrf.mxu2  ;;  %7301 = vmatmul.msk.f32.gmra.mxu1 %vm332_vm0, %v1106_v59 }
 0x17a   : > { %v990_v19 = vpop.f32.mrf.mxu3  ;;  %v1055_v49 = vadd.f32 %v1023_v55, %v987_v47  ;;  %746 = vst.msk [vmem:[#allocation3 + $0xf8] sm:$0xff] %vm332_vm0, %v712_v57  ;;  %v1339_v55 = vld [vmem:[#allocation3 + $0x20] sm:$0xff] }
 0x17c   : > { %1087 = vst.msk [vmem:[#allocation3 + $0xf0] sm:$0xff] %vm332_vm0, %v1055_v49 }
 0x17d   : > { %v8648_v27 = vpop.f32.mrf.mxu0  ;;  %v1009_v0 = vld [vmem:[#allocation3 + $0x80] sm:$0xff] }
 0x17e   : > { %7206 = vmatmul.msk.f32.gmra.mxu2 %vm332_vm0, %v1105_v48  ;;  %v1041_v51 = vadd.f32 %v1009_v0, %v945_v54  ;;  %v8654_v4 = vpop.f32.mrf.mxu1 }
 0x17f   : > { %7238 = vmatmul.msk.f32.gmra.mxu3 %vm332_vm0, %v1447_v21  ;;  %v1452_v21 = vld [vmem:[#allocation2 + $0x16f] sm:$0xff] }
 0x180   : > { %7270 = vmatmul.msk.f32.gmra.mxu0 %vm332_vm0, %v1789_v62  ;;  %1073 = vst.msk [vmem:[#allocation3 + $0x80] sm:$0xff] %vm332_vm0, %v1041_v51  ;;  %v1794_v51 = vld [vmem:[#allocation2 + $0x170] sm:$0xff] }
 0x181   : > { %v1024_v26 = vld [vmem:[#allocation3 + $0xf8] sm:$0xff]  ;;  %v1239_v5 = vpop.f32.mrf.mxu2  ;;  %7302 = vmatmul.msk.f32.gmra.mxu1 %vm332_vm0, %v1107_v10 }
 0x182   : > { %v1581_v29 = vpop.f32.mrf.mxu3  ;;  %v1056_v56 = vadd.f32 %v1024_v26, %v990_v19  ;;  %v1367_v11 = vadd.f32 %v1335_v9, %v1239_v5  ;;  %v1111_v19 = vld [vmem:[#allocation2 + $0x169] sm:$0xff]  ;;  %v2491_v5 = vld [vmem:[#allocation7 + $0xc0] sm:$0xff] }
 0x183   : > { %2606 = vmatpush.msra.mxu2 %v2491_v5  ;;  %v3650_v5 = vld [vmem:[#allocation9 + $0x10] sm:$0xff] }
 0x184   : > { %1088 = vst.msk [vmem:[#allocation3 + $0xf8] sm:$0xff] %vm332_vm0, %v1056_v56  ;;  %3761 = vmatpush.msra.mxu1 %v3650_v5  ;;  %v1348_v5 = vld [vmem:[#allocation3 + $0x68] sm:$0xff] }
 0x185   : > { %1399 = vst.msk [vmem:[#allocation3] sm:$0xff] %vm332_vm0, %v1367_v11  ;;  %v1926_v15 = vpop.f32.mrf.mxu0  ;;  %v1112_v11 = vld [vmem:[#allocation2 + $0x171] sm:$0xff] }
 0x186   : > { %7207 = vmatmul.msk.f32.gmra.mxu2 %vm332_vm0, %v1106_v59  ;;  %v8662_v16 = vpop.f32.mrf.mxu1 }
 0x187   : > { %7239 = vmatmul.msk.f32.gmra.mxu3 %vm332_vm0, %v1448_v13 }
 0x188   : > { %7271 = vmatmul.msk.f32.gmra.mxu0 %vm332_vm0, %v1790_v36  ;;  %v1453_v36 = vld [vmem:[#allocation2 + $0x187] sm:$0xff] }
 0x189   : > { %v1242_v39 = vpop.f32.mrf.mxu2  ;;  %7303 = vmatmul.msk.f32.gmra.mxu1 %vm332_vm0, %v1108_v20 }
 0x18a   : > { %v1584_v18 = vpop.f32.mrf.mxu3  ;;  %v1368_v22 = vadd.f32 %v1336_v17, %v1242_v39  ;;  %v1795_v17 = vld [vmem:[#allocation2 + $0x188] sm:$0xff] }
 0x18c   : > { %v1677_v42 = vld [vmem:[#allocation3] sm:$0xff]  ;;  %1400 = vst.msk [vmem:[#allocation3 + $0x8] sm:$0xff] %vm332_vm0, %v1368_v22 }
 0x18d   : > { %v1709_v23 = vadd.f32 %v1677_v42, %v1581_v29  ;;  %v8666_v24 = vpop.f32.mrf.mxu0 }
 0x18e   : > { %7208 = vmatmul.msk.f32.gmra.mxu2 %vm332_vm0, %v1107_v10  ;;  %v8672_v25 = vpop.f32.mrf.mxu1  ;;  %v1340_v10 = vld [vmem:[#allocation3 + $0x28] sm:$0xff] }
 0x18f   : > { %7240 = vmatmul.msk.f32.gmra.mxu3 %vm332_vm0, %v1449_v63  ;;  %1741 = vst.msk [vmem:[#allocation3] sm:$0xff] %vm332_vm0, %v1709_v23  ;;  %v2833_v63 = vld [vmem:[#allocation7 + $0xe0] sm:$0xff] }
 0x190   : > { %7272 = vmatmul.msk.f32.gmra.mxu0 %vm332_vm0, %v1791_v46  ;;  %2948 = vmatpush.msra.mxu3 %v2833_v63 }
 0x191   : > { %v1245_v1 = vpop.f32.mrf.mxu2  ;;  %7304 = vmatmul.msk.f32.gmra.mxu1 %vm332_vm0, %v1109_v28 }
 0x192   : > { %v1587_v31 = vpop.f32.mrf.mxu3  ;;  %v1369_v52 = vadd.f32 %v1337_v30, %v1245_v1  ;;  %v1113_v1 = vld [vmem:[#allocation2 + $0x189] sm:$0xff] }
 0x193   : > { %v1678_v32 = vld [vmem:[#allocation3 + $0x8] sm:$0xff] }
 0x194   : > { %v1710_v53 = vadd.f32 %v1678_v32, %v1584_v18  ;;  %1401 = vst.msk [vmem:[#allocation3 + $0x10] sm:$0xff] %vm332_vm0, %v1369_v52 }
 0x195   : > { %v8676_v6 = vpop.f32.mrf.mxu0 }
 0x196   : > { %1742 = vst.msk [vmem:[#allocation3 + $0x8] sm:$0xff] %vm332_vm0, %v1710_v53  ;;  %v2019_v35 = vld [vmem:[#allocation3] sm:$0xff]  ;;  %7209 = vmatmul.msk.f32.gmra.mxu2 %vm332_vm0, %v1108_v20  ;;  %v8683_v38 = vpop.f32.mrf.mxu1 }
 0x197   : > { %7241 = vmatmul.msk.f32.gmra.mxu3 %vm332_vm0, %v1450_v33  ;;  %v2051_v8 = vadd.f32 %v2019_v35, %v8648_v27  ;;  %v1796_v33 = vld [vmem:[#allocation2 + $0x190] sm:$0xff] }
 0x198   : > { %7273 = vmatmul.msk.f32.gmra.mxu0 %vm332_vm0, %v1792_v34 }
 0x199   : > { %2083 = vst.msk [vmem:[#allocation3] sm:$0xff] %vm332_vm0, %v2051_v8  ;;  %v1248_v37 = vpop.f32.mrf.mxu2  ;;  %7305 = vmatmul.msk.f32.gmra.mxu1 %vm332_vm0, %v1110_v61 }
 0x19a   : > { %v1590_v40 = vpop.f32.mrf.mxu3  ;;  %v1370_v41 = vadd.f32 %v1338_v60, %v1248_v37  ;;  %v1342_v37 = vld [vmem:[#allocation3 + $0x38] sm:$0xff] }
 0x19b   : > { %v1679_v44 = vld [vmem:[#allocation3 + $0x10] sm:$0xff] }
 0x19c   : > { %v1711_v43 = vadd.f32 %v1679_v44, %v1587_v31  ;;  %1402 = vst.msk [vmem:[#allocation3 + $0x18] sm:$0xff] %vm332_vm0, %v1370_v41  ;;  %v1455_v44 = vld [vmem:[#allocation2 + $0x1a7] sm:$0xff] }
 0x19d   : > { %v2020_v47 = vld [vmem:[#allocation3 + $0x8] sm:$0xff]  ;;  %v8688_v48 = vpop.f32.mrf.mxu0 }
 0x19e   : > { %1743 = vst.msk [vmem:[#allocation3 + $0x10] sm:$0xff] %vm332_vm0, %v1711_v43  ;;  %v2052_v2 = vadd.f32 %v2020_v47, %v1926_v15  ;;  %7210 = vmatmul.msk.f32.gmra.mxu2 %vm332_vm0, %v1109_v28  ;;  %v8695_v50 = vpop.f32.mrf.mxu1  ;;  %v1454_v28 = vld [vmem:[#allocation2 + $0x18f] sm:$0xff] }
 0x19f   : > { %7242 = vmatmul.msk.f32.gmra.mxu3 %vm332_vm0, %v1451_v12  ;;  %v1797_v47 = vld [vmem:[#allocation2 + $0x1a8] sm:$0xff] }
 0x1a0   : > { %2084 = vst.msk [vmem:[#allocation3 + $0x8] sm:$0xff] %vm332_vm0, %v2052_v2  ;;  %v2361_v45 = vld [vmem:[#allocation3] sm:$0xff]  ;;  %7274 = vmatmul.msk.f32.gmra.mxu0 %vm332_vm0, %v1793_v14 }
 0x1a1   : > { %v2393_v7 = vadd.f32 %v2361_v45, %v8654_v4  ;;  %v1251_v54 = vpop.f32.mrf.mxu2  ;;  %7306 = vmatmul.msk.f32.gmra.mxu1 %vm332_vm0, %v1111_v19  ;;  %v3175_v45 = vld [vmem:[#allocation7 + $0x100] sm:$0xff] }
 0x1a2   : > { %v1593_v57 = vpop.f32.mrf.mxu3  ;;  %v1371_v59 = vadd.f32 %v1339_v55, %v1251_v54  ;;  %v1343_v55 = vld [vmem:[#allocation3 + $0x40] sm:$0xff]  ;;  %3290 = vmatpush.msra.mxu0 %v3175_v45 }
 0x1a3   : > { %v1680_v49 = vld [vmem:[#allocation3 + $0x18] sm:$0xff]  ;;  %2425 = vst.msk [vmem:[#allocation3] sm:$0xff] %vm332_vm0, %v2393_v7 }
 0x1a4   : > { %v1712_v27 = vadd.f32 %v1680_v49, %v1590_v40  ;;  %1403 = vst.msk [vmem:[#allocation3 + $0x20] sm:$0xff] %vm332_vm0, %v1371_v59  ;;  %v1114_v40 = vld [vmem:[#allocation2 + $0x191] sm:$0xff] }
 0x1a5   : > { %v2021_v62 = vld [vmem:[#allocation3 + $0x10] sm:$0xff]  ;;  %v8701_v0 = vpop.f32.mrf.mxu0 }
 0x1a6   : > { %1744 = vst.msk [vmem:[#allocation3 + $0x18] sm:$0xff] %vm332_vm0, %v1712_v27  ;;  %v2053_v3 = vadd.f32 %v2021_v62, %v8666_v24  ;;  %7211 = vmatmul.msk.f32.gmra.mxu2 %vm332_vm0, %v1110_v61  ;;  %v8710_v9 = vpop.f32.mrf.mxu1  ;;  %v1341_v24 = vld [vmem:[#allocation3 + $0x30] sm:$0xff] }
 0x1a7   : > { %7243 = vmatmul.msk.f32.gmra.mxu3 %vm332_vm0, %v1452_v21  ;;  %v2362_v4 = vld [vmem:[#allocation3 + $0x8] sm:$0xff] }
 0x1a8   : > { %2085 = vst.msk [vmem:[#allocation3 + $0x10] sm:$0xff] %vm332_vm0, %v2053_v3  ;;  %v2394_v26 = vadd.f32 %v2362_v4, %v8662_v16  ;;  %7275 = vmatmul.msk.f32.gmra.mxu0 %vm332_vm0, %v1794_v51  ;;  %v1456_v21 = vld [vmem:[#allocation2 + $0x1af] sm:$0xff] }
 0x1a9   : > { %v1254_v29 = vpop.f32.mrf.mxu2  ;;  %7307 = vmatmul.msk.f32.gmra.mxu1 %vm332_vm0, %v1112_v11  ;;  %v435_v3 = vld [vmem:[%s8120_s13 + $0xf0] sm:$0xff] }
 0x1aa   : > { %v1596_v56 = vpop.f32.mrf.mxu3  ;;  %2426 = vst.msk [vmem:[#allocation3 + $0x8] sm:$0xff] %vm332_vm0, %v2394_v26  ;;  %v1372_v13 = vadd.f32 %v1340_v10, %v1254_v29 }
 0x1ab   : > { %v1681_v15 = vld [vmem:[#allocation3 + $0x20] sm:$0xff]  ;;  %468 = vst.msk [vmem:[#allocation2 + $0x208] sm:$0xff] %vm332_vm0, %v435_v3 }
 0x1ac   : > { %v1713_v58 = vadd.f32 %v1681_v15, %v1593_v57  ;;  %1404 = vst.msk [vmem:[#allocation3 + $0x28] sm:$0xff] %vm332_vm0, %v1372_v13  ;;  %v1116_v13 = vld [vmem:[#allocation2 + $0x1b1] sm:$0xff] }
 0x1ad   : > { %v2022_v16 = vld [vmem:[#allocation3 + $0x18] sm:$0xff]  ;;  %v8715_v39 = vpop.f32.mrf.mxu0 }
 0x1ae   : > { %1745 = vst.msk [vmem:[#allocation3 + $0x20] sm:$0xff] %vm332_vm0, %v1713_v58  ;;  %v2054_v18 = vadd.f32 %v2022_v16, %v8676_v6  ;;  %7212 = vmatmul.msk.f32.gmra.mxu2 %vm332_vm0, %v1111_v19  ;;  %v8724_v42 = vpop.f32.mrf.mxu1  ;;  %v1115_v19 = vld [vmem:[#allocation2 + $0x1a9] sm:$0xff] }
 0x1af   : > { %7244 = vmatmul.msk.f32.gmra.mxu3 %vm332_vm0, %v1453_v36  ;;  %v2363_v20 = vld [vmem:[#allocation3 + $0x10] sm:$0xff]  ;;  %v1457_v58 = vld [vmem:[#allocation2 + $0x1c7] sm:$0xff] }
 0x1b0   : > { %2086 = vst.msk [vmem:[#allocation3 + $0x18] sm:$0xff] %vm332_vm0, %v2054_v18  ;;  %v2395_v22 = vadd.f32 %v2363_v20, %v8672_v25  ;;  %7276 = vmatmul.msk.f32.gmra.mxu0 %vm332_vm0, %v1795_v17  ;;  %v1799_v17 = vld [vmem:[#allocation2 + $0x1c8] sm:$0xff]  ;;  %v436_v20 = vld [vmem:[%s8120_s13 + $0xf8] sm:$0xff] }
 0x1b1   : > { %v1257_v23 = vpop.f32.mrf.mxu2  ;;  %7308 = vmatmul.msk.f32.gmra.mxu1 %vm332_vm0, %v1113_v1  ;;  %469 = vst.msk [vmem:[#allocation2 + $0x210] sm:$0xff] %vm332_vm0, %v436_v20 }
 0x1b2   : > { %v1599_v46 = vpop.f32.mrf.mxu3  ;;  %2427 = vst.msk [vmem:[#allocation3 + $0x10] sm:$0xff] %vm332_vm0, %v2395_v22  ;;  %v1373_v30 = vadd.f32 %v1341_v24, %v1257_v23 }
 0x1b3   : > { %v1682_v31 = vld [vmem:[#allocation3 + $0x28] sm:$0xff] }
 0x1b4   : > { %v1714_v52 = vadd.f32 %v1682_v31, %v1596_v56  ;;  %1405 = vst.msk [vmem:[#allocation3 + $0x30] sm:$0xff] %vm332_vm0, %v1373_v30  ;;  %v1344_v56 = vld [vmem:[#allocation3 + $0x48] sm:$0xff] }
 0x1b5   : > { %v2023_v25 = vld [vmem:[#allocation3 + $0x20] sm:$0xff]  ;;  %v8729_v32 = vpop.f32.mrf.mxu0  ;;  %v1117_v30 = vld [vmem:[#allocation2 + $0x1c9] sm:$0xff] }
 0x1b6   : > { %1746 = vst.msk [vmem:[#allocation3 + $0x28] sm:$0xff] %vm332_vm0, %v1714_v52  ;;  %v2055_v53 = vadd.f32 %v2023_v25, %v8688_v48  ;;  %7213 = vmatmul.msk.f32.gmra.mxu2 %vm332_vm0, %v1112_v11  ;;  %v8738_v35 = vpop.f32.mrf.mxu1  ;;  %v1458_v52 = vld [vmem:[#allocation2 + $0x1cf] sm:$0xff] }
 0x1b7   : > { %7245 = vmatmul.msk.f32.gmra.mxu3 %vm332_vm0, %v1454_v28  ;;  %v2364_v6 = vld [vmem:[#allocation3 + $0x18] sm:$0xff] }
 0x1b8   : > { %2087 = vst.msk [vmem:[#allocation3 + $0x20] sm:$0xff] %vm332_vm0, %v2055_v53  ;;  %v2396_v34 = vadd.f32 %v2364_v6, %v8683_v38  ;;  %7277 = vmatmul.msk.f32.gmra.mxu0 %vm332_vm0, %v1796_v33  ;;  %v1800_v33 = vld [vmem:[#allocation2 + $0x1d0] sm:$0xff] }
 0x1b9   : > { %v1260_v8 = vpop.f32.mrf.mxu2  ;;  %7309 = vmatmul.msk.f32.gmra.mxu1 %vm332_vm0, %v1114_v40 }
 0x1ba   : > { %v1602_v60 = vpop.f32.mrf.mxu3  ;;  %2428 = vst.msk [vmem:[#allocation3 + $0x18] sm:$0xff] %vm332_vm0, %v2396_v34  ;;  %v1374_v61 = vadd.f32 %v1342_v37, %v1260_v8 }
 0x1bb   : > { %v1683_v41 = vld [vmem:[#allocation3 + $0x30] sm:$0xff] }
 0x1bc   : > { %v1715_v12 = vadd.f32 %v1683_v41, %v1599_v46  ;;  %1406 = vst.msk [vmem:[#allocation3 + $0x38] sm:$0xff] %vm332_vm0, %v1374_v61  ;;  %v1345_v46 = vld [vmem:[#allocation3 + $0x50] sm:$0xff] }
 0x1bd   : > { %v2024_v43 = vld [vmem:[#allocation3 + $0x28] sm:$0xff]  ;;  %v8743_v38 = vpop.f32.mrf.mxu0  ;;  %v1118_v61 = vld [vmem:[#allocation2 + $0x1d1] sm:$0xff] }
 0x1be   : > { %1747 = vst.msk [vmem:[#allocation3 + $0x30] sm:$0xff] %vm332_vm0, %v1715_v12  ;;  %v2056_v48 = vadd.f32 %v2024_v43, %v8701_v0  ;;  %7214 = vmatmul.msk.f32.gmra.mxu2 %vm332_vm0, %v1113_v1  ;;  %v8752_v7 = vpop.f32.mrf.mxu1  ;;  %v1798_v0 = vld [vmem:[#allocation2 + $0x1b0] sm:$0xff]  ;;  %v1459_v12 = vld [vmem:[#allocation2 + $0x1e7] sm:$0xff] }
 0x1bf   : > { %7246 = vmatmul.msk.f32.gmra.mxu3 %vm332_vm0, %v1455_v44  ;;  %v2365_v14 = vld [vmem:[#allocation3 + $0x20] sm:$0xff] }
 0x1c0   : > { %2088 = vst.msk [vmem:[#allocation3 + $0x28] sm:$0xff] %vm332_vm0, %v2056_v48  ;;  %v2397_v2 = vadd.f32 %v2365_v14, %v8695_v50  ;;  %7278 = vmatmul.msk.f32.gmra.mxu0 %vm332_vm0, %v1797_v47  ;;  %v1801_v47 = vld [vmem:[#allocation2 + $0x1e8] sm:$0xff] }
 0x1c1   : > { %v1263_v54 = vpop.f32.mrf.mxu2  ;;  %7310 = vmatmul.msk.f32.gmra.mxu1 %vm332_vm0, %v1115_v19 }
 0x1c2   : > { %v1605_v57 = vpop.f32.mrf.mxu3  ;;  %2429 = vst.msk [vmem:[#allocation3 + $0x20] sm:$0xff] %vm332_vm0, %v2397_v2  ;;  %v1375_v59 = vadd.f32 %v1343_v55, %v1263_v54  ;;  %v1347_v55 = vld [vmem:[#allocation3 + $0x60] sm:$0xff] }
 0x1c3   : > { %v1684_v49 = vld [vmem:[#allocation3 + $0x38] sm:$0xff] }
 0x1c4   : > { %v1716_v27 = vadd.f32 %v1684_v49, %v1602_v60  ;;  %1407 = vst.msk [vmem:[#allocation3 + $0x40] sm:$0xff] %vm332_vm0, %v1375_v59  ;;  %v1346_v60 = vld [vmem:[#allocation3 + $0x58] sm:$0xff] }
 0x1c5   : > { %v2025_v50 = vld [vmem:[#allocation3 + $0x30] sm:$0xff]  ;;  %v8757_v62 = vpop.f32.mrf.mxu0 }
 0x1c6   : > { %1748 = vst.msk [vmem:[#allocation3 + $0x38] sm:$0xff] %vm332_vm0, %v1716_v27  ;;  %v2057_v51 = vadd.f32 %v2025_v50, %v8715_v39  ;;  %7215 = vmatmul.msk.f32.gmra.mxu2 %vm332_vm0, %v1114_v40  ;;  %v8768_v29 = vpop.f32.mrf.mxu1 }
 0x1c7   : > { %7247 = vmatmul.msk.f32.gmra.mxu3 %vm332_vm0, %v1456_v21  ;;  %v2366_v4 = vld [vmem:[#allocation3 + $0x28] sm:$0xff] }
 0x1c8   : > { %2089 = vst.msk [vmem:[#allocation3 + $0x30] sm:$0xff] %vm332_vm0, %v2057_v51  ;;  %v2398_v26 = vadd.f32 %v2366_v4, %v8710_v9  ;;  %7279 = vmatmul.msk.f32.gmra.mxu0 %vm332_vm0, %v1798_v0  ;;  %v1460_v21 = vld [vmem:[#allocation2 + $0x1ef] sm:$0xff] }
 0x1c9   : > { %v1266_v10 = vpop.f32.mrf.mxu2  ;;  %7311 = vmatmul.msk.f32.gmra.mxu1 %vm332_vm0, %v1116_v13 }
 0x1ca   : > { %v1608_v11 = vpop.f32.mrf.mxu3  ;;  %2430 = vst.msk [vmem:[#allocation3 + $0x28] sm:$0xff] %vm332_vm0, %v2398_v26  ;;  %v1376_v15 = vadd.f32 %v1344_v56, %v1266_v10  ;;  %v1120_v56 = vld [vmem:[#allocation2 + $0x1f1] sm:$0xff] }
 0x1cb   : > { %v1685_v36 = vld [vmem:[#allocation3 + $0x40] sm:$0xff] }
 0x1cc   : > { %v1717_v16 = vadd.f32 %v1685_v36, %v1605_v57  ;;  %1408 = vst.msk [vmem:[#allocation3 + $0x48] sm:$0xff] %vm332_vm0, %v1376_v15  ;;  %v1461_v15 = vld [vmem:[#allocation2 + $0x207] sm:$0xff] }
 0x1cd   : > { %v2026_v9 = vld [vmem:[#allocation3 + $0x38] sm:$0xff]  ;;  %v8773_v39 = vpop.f32.mrf.mxu0 }
 0x1ce   : > { %1749 = vst.msk [vmem:[#allocation3 + $0x40] sm:$0xff] %vm332_vm0, %v1717_v16  ;;  %v2058_v18 = vadd.f32 %v2026_v9, %v8729_v32  ;;  %7216 = vmatmul.msk.f32.gmra.mxu2 %vm332_vm0, %v1115_v19  ;;  %v8784_v23 = vpop.f32.mrf.mxu1  ;;  %v1119_v19 = vld [vmem:[#allocation2 + $0x1e9] sm:$0xff] }
 0x1cf   : > { %7248 = vmatmul.msk.f32.gmra.mxu3 %vm332_vm0, %v1457_v58  ;;  %v2367_v22 = vld [vmem:[#allocation3 + $0x30] sm:$0xff]  ;;  %v1803_v16 = vld [vmem:[#allocation2 + $0x208] sm:$0xff] }
 0x1d0   : > { %2090 = vst.msk [vmem:[#allocation3 + $0x38] sm:$0xff] %vm332_vm0, %v2058_v18  ;;  %v2399_v63 = vadd.f32 %v2367_v22, %v8724_v42  ;;  %7280 = vmatmul.msk.f32.gmra.mxu0 %vm332_vm0, %v1799_v17  ;;  %v1349_v22 = vld [vmem:[#allocation3 + $0x70] sm:$0xff] }
 0x1d1   : > { %v1269_v24 = vpop.f32.mrf.mxu2  ;;  %7312 = vmatmul.msk.f32.gmra.mxu1 %vm332_vm0, %v1117_v30 }
 0x1d2   : > { %v1611_v1 = vpop.f32.mrf.mxu3  ;;  %2431 = vst.msk [vmem:[#allocation3 + $0x30] sm:$0xff] %vm332_vm0, %v2399_v63  ;;  %v1377_v31 = vadd.f32 %v1345_v46, %v1269_v24  ;;  %v2145_v46 = vld [vmem:[#allocation2 + $0x209] sm:$0xff] }
 0x1d3   : > { %v1686_v28 = vld [vmem:[#allocation3 + $0x48] sm:$0xff] }
 0x1d4   : > { %v1718_v25 = vadd.f32 %v1686_v28, %v1608_v11  ;;  %1409 = vst.msk [vmem:[#allocation3 + $0x50] sm:$0xff] %vm332_vm0, %v1377_v31 }
 0x1d5   : > { %v2027_v32 = vld [vmem:[#allocation3 + $0x40] sm:$0xff]  ;;  %v8789_v42 = vpop.f32.mrf.mxu0 }
 0x1d6   : > { %1750 = vst.msk [vmem:[#allocation3 + $0x48] sm:$0xff] %vm332_vm0, %v1718_v25  ;;  %v2059_v53 = vadd.f32 %v2027_v32, %v8743_v38  ;;  %7217 = vmatmul.msk.f32.gmra.mxu2 %vm332_vm0, %v1116_v13  ;;  %v8798_v8 = vpop.f32.mrf.mxu1 }
 0x1d7   : > { %7249 = vmatmul.msk.f32.gmra.mxu3 %vm332_vm0, %v1458_v52  ;;  %v2368_v6 = vld [vmem:[#allocation3 + $0x38] sm:$0xff]  ;;  %v1804_v52 = vld [vmem:[#allocation2 + $0x210] sm:$0xff] }
 0x1d8   : > { %2091 = vst.msk [vmem:[#allocation3 + $0x40] sm:$0xff] %vm332_vm0, %v2059_v53  ;;  %v2400_v34 = vadd.f32 %v2368_v6, %v8738_v35  ;;  %7281 = vmatmul.msk.f32.gmra.mxu0 %vm332_vm0, %v1800_v33  ;;  %v1350_v6 = vld [vmem:[#allocation3 + $0x78] sm:$0xff] }
 0x1d9   : > { %v1272_v37 = vpop.f32.mrf.mxu2  ;;  %7313 = vmatmul.msk.f32.gmra.mxu1 %vm332_vm0, %v1118_v61 }
 0x1da   : > { %v1614_v40 = vpop.f32.mrf.mxu3  ;;  %2432 = vst.msk [vmem:[#allocation3 + $0x38] sm:$0xff] %vm332_vm0, %v2400_v34  ;;  %v1378_v41 = vadd.f32 %v1346_v60, %v1272_v37  ;;  %v2146_v60 = vld [vmem:[#allocation2 + $0x211] sm:$0xff] }
 0x1db   : > { %v1687_v44 = vld [vmem:[#allocation3 + $0x50] sm:$0xff] }
 0x1dc   : > { %v1719_v43 = vadd.f32 %v1687_v44, %v1611_v1  ;;  %1410 = vst.msk [vmem:[#allocation3 + $0x58] sm:$0xff] %vm332_vm0, %v1378_v41  ;;  %v2800_v41 = vld [vmem:[#allocation2 + $0x48] sm:$0xff] }
 0x1dd   : > { %v2028_v38 = vld [vmem:[#allocation3 + $0x48] sm:$0xff]  ;;  %v8803_v35 = vpop.f32.mrf.mxu0 }
 0x1de   : > { %1751 = vst.msk [vmem:[#allocation3 + $0x50] sm:$0xff] %vm332_vm0, %v1719_v43  ;;  %v2060_v48 = vadd.f32 %v2028_v38, %v8757_v62  ;;  %7218 = vmatmul.msk.f32.gmra.mxu2 %vm332_vm0, %v1117_v30  ;;  %v8812_v45 = vpop.f32.mrf.mxu1  ;;  %v1802_v62 = vld [vmem:[#allocation2 + $0x1f0] sm:$0xff] }
 0x1df   : > { %7250 = vmatmul.msk.f32.gmra.mxu3 %vm332_vm0, %v1459_v12  ;;  %v2369_v14 = vld [vmem:[#allocation3 + $0x40] sm:$0xff]  ;;  %v1462_v30 = vld [vmem:[#allocation2 + $0x20f] sm:$0xff] }
 0x1e0   : > { %2092 = vst.msk [vmem:[#allocation3 + $0x48] sm:$0xff] %vm332_vm0, %v2060_v48  ;;  %v2401_v2 = vadd.f32 %v2369_v14, %v8752_v7  ;;  %7282 = vmatmul.msk.f32.gmra.mxu0 %vm332_vm0, %v1801_v47  ;;  %v3142_v43 = vld [vmem:[#allocation2 + $0x49] sm:$0xff] }
 0x1e1   : > { %v1275_v54 = vpop.f32.mrf.mxu2  ;;  %7314 = vmatmul.msk.f32.gmra.mxu1 %vm332_vm0, %v1119_v19 }
 0x1e2   : > { %v1617_v57 = vpop.f32.mrf.mxu3  ;;  %2433 = vst.msk [vmem:[#allocation3 + $0x40] sm:$0xff] %vm332_vm0, %v2401_v2  ;;  %v1379_v59 = vadd.f32 %v1347_v55, %v1275_v54  ;;  %v1351_v2 = vld [vmem:[#allocation3 + $0x80] sm:$0xff] }
 0x1e3   : > { %v1688_v49 = vld [vmem:[#allocation3 + $0x58] sm:$0xff] }
 0x1e4   : > { %v1720_v27 = vadd.f32 %v1688_v49, %v1614_v40  ;;  %1411 = vst.msk [vmem:[#allocation3 + $0x60] sm:$0xff] %vm332_vm0, %v1379_v59  ;;  %v2801_v59 = vld [vmem:[#allocation2 + $0x50] sm:$0xff] }
 0x1e5   : > { %v2029_v50 = vld [vmem:[#allocation3 + $0x50] sm:$0xff]  ;;  %v8817_v7 = vpop.f32.mrf.mxu0 }
 0x1e6   : > { %1752 = vst.msk [vmem:[#allocation3 + $0x58] sm:$0xff] %vm332_vm0, %v1720_v27  ;;  %v2061_v0 = vadd.f32 %v2029_v50, %v8773_v39  ;;  %7219 = vmatmul.msk.f32.gmra.mxu2 %vm332_vm0, %v1118_v61  ;;  %v8826_v4 = vpop.f32.mrf.mxu1  ;;  %v2458_v61 = vld [vmem:[#allocation2 + $0x47] sm:$0xff] }
 0x1e7   : > { %7251 = vmatmul.msk.f32.gmra.mxu3 %vm332_vm0, %v1460_v21  ;;  %v2370_v51 = vld [vmem:[#allocation3 + $0x48] sm:$0xff] }
 0x1e8   : > { %2093 = vst.msk [vmem:[#allocation3 + $0x50] sm:$0xff] %vm332_vm0, %v2061_v0  ;;  %v2402_v3 = vadd.f32 %v2370_v51, %v8768_v29  ;;  %7283 = vmatmul.msk.f32.gmra.mxu0 %vm332_vm0, %v1802_v62  ;;  %v3649_v0 = vld [vmem:[#allocation9 + $0x8] sm:$0xff] }
 0x1e9   : > { %v1278_v26 = vpop.f32.mrf.mxu2  ;;  %7315 = vmatmul.msk.f32.gmra.mxu1 %vm332_vm0, %v1120_v56 }
 0x1ea   : > { %v1620_v10 = vpop.f32.mrf.mxu3  ;;  %2434 = vst.msk [vmem:[#allocation3 + $0x48] sm:$0xff] %vm332_vm0, %v2402_v3  ;;  %v1380_v11 = vadd.f32 %v1348_v5, %v1278_v26  ;;  %v1352_v26 = vld [vmem:[#allocation3 + $0x88] sm:$0xff]  ;;  %3762 = vmatpush.msra.mxu1 %v3649_v0 }
 0x1eb   : > { %v1689_v13 = vld [vmem:[#allocation3 + $0x60] sm:$0xff] }
 0x1ec   : > { %v1721_v36 = vadd.f32 %v1689_v13, %v1617_v57  ;;  %1412 = vst.msk [vmem:[#allocation3 + $0x68] sm:$0xff] %vm332_vm0, %v1380_v11  ;;  %v2460_v11 = vld [vmem:[#allocation2 + $0x67] sm:$0xff] }
 0x1ed   : > { %v2030_v58 = vld [vmem:[#allocation3 + $0x58] sm:$0xff]  ;;  %v8831_v29 = vpop.f32.mrf.mxu0  ;;  %v2802_v13 = vld [vmem:[#allocation2 + $0x68] sm:$0xff] }
 0x1ee   : > { %1753 = vst.msk [vmem:[#allocation3 + $0x60] sm:$0xff] %vm332_vm0, %v1721_v36  ;;  %v2062_v9 = vadd.f32 %v2030_v58, %v8789_v42  ;;  %7220 = vmatmul.msk.f32.gmra.mxu2 %vm332_vm0, %v1119_v19  ;;  %v8840_v18 = vpop.f32.mrf.mxu1  ;;  %v2459_v19 = vld [vmem:[#allocation2 + $0x4f] sm:$0xff] }
 0x1ef   : > { %7252 = vmatmul.msk.f32.gmra.mxu3 %vm332_vm0, %v1461_v15  ;;  %v2371_v39 = vld [vmem:[#allocation3 + $0x50] sm:$0xff] }
 0x1f0   : > { %2094 = vst.msk [vmem:[#allocation3 + $0x58] sm:$0xff] %vm332_vm0, %v2062_v9  ;;  %v2403_v17 = vadd.f32 %v2371_v39, %v8784_v23  ;;  %7284 = vmatmul.msk.f32.gmra.mxu0 %vm332_vm0, %v1803_v16  ;;  %v3144_v58 = vld [vmem:[#allocation2 + $0x69] sm:$0xff] }
 0x1f1   : > { %v1281_v20 = vpop.f32.mrf.mxu2  ;;  %7316 = vmatmul.msk.f32.gmra.mxu1 %vm332_vm0, %v2145_v46  ;;  %v2461_v46 = vld [vmem:[#allocation2 + $0x6f] sm:$0xff] }
 0x1f2   : > { %v1623_v63 = vpop.f32.mrf.mxu3  ;;  %2435 = vst.msk [vmem:[#allocation3 + $0x50] sm:$0xff] %vm332_vm0, %v2403_v17  ;;  %v1381_v24 = vadd.f32 %v1349_v22, %v1281_v20  ;;  %v1353_v17 = vld [vmem:[#allocation3 + $0x90] sm:$0xff] }
 0x1f3   : > { %v1690_v1 = vld [vmem:[#allocation3 + $0x68] sm:$0xff] }
 0x1f4   : > { %v1722_v31 = vadd.f32 %v1690_v1, %v1620_v10  ;;  %1413 = vst.msk [vmem:[#allocation3 + $0x70] sm:$0xff] %vm332_vm0, %v1381_v24  ;;  %v2803_v1 = vld [vmem:[#allocation2 + $0x70] sm:$0xff] }
 0x1f5   : > { %v2031_v28 = vld [vmem:[#allocation3 + $0x60] sm:$0xff]  ;;  %v8845_v23 = vpop.f32.mrf.mxu0 }
 0x1f6   : > { %1754 = vst.msk [vmem:[#allocation3 + $0x68] sm:$0xff] %vm332_vm0, %v1722_v31  ;;  %v2063_v25 = vadd.f32 %v2031_v28, %v8803_v35  ;;  %7221 = vmatmul.msk.f32.gmra.mxu2 %vm332_vm0, %v1120_v56  ;;  %v8854_v33 = vpop.f32.mrf.mxu1 }
 0x1f7   : > { %7253 = vmatmul.msk.f32.gmra.mxu3 %vm332_vm0, %v1462_v30  ;;  %v2372_v32 = vld [vmem:[#allocation3 + $0x58] sm:$0xff] }
 0x1f8   : > { %2095 = vst.msk [vmem:[#allocation3 + $0x60] sm:$0xff] %vm332_vm0, %v2063_v25  ;;  %v2404_v42 = vadd.f32 %v2372_v32, %v8798_v8  ;;  %7285 = vmatmul.msk.f32.gmra.mxu0 %vm332_vm0, %v1804_v52 }
 0x1f9   : > { %v1284_v53 = vpop.f32.mrf.mxu2  ;;  %7317 = vmatmul.msk.f32.gmra.mxu1 %vm332_vm0, %v2146_v60  ;;  %v2804_v60 = vld [vmem:[#allocation2 + $0x88] sm:$0xff] }
 0x1fa   : > { %v1626_v34 = vpop.f32.mrf.mxu3  ;;  %2436 = vst.msk [vmem:[#allocation3 + $0x58] sm:$0xff] %vm332_vm0, %v2404_v42  ;;  %v1382_v37 = vadd.f32 %v1350_v6, %v1284_v53  ;;  %v1354_v42 = vld [vmem:[#allocation3 + $0x98] sm:$0xff] }
 0x1fb   : > { %v1691_v40 = vld [vmem:[#allocation3 + $0x70] sm:$0xff] }
 0x1fc   : > { %v1723_v44 = vadd.f32 %v1691_v40, %v1623_v63  ;;  %1414 = vst.msk [vmem:[#allocation3 + $0x78] sm:$0xff] %vm332_vm0, %v1382_v37  ;;  %v2462_v37 = vld [vmem:[#allocation2 + $0x87] sm:$0xff] }
 0x1fd   : > { %v2032_v8 = vld [vmem:[#allocation3 + $0x68] sm:$0xff]  ;;  %v8859_v12 = vpop.f32.mrf.mxu0 }
 0x1fe   : > { %1755 = vst.msk [vmem:[#allocation3 + $0x70] sm:$0xff] %vm332_vm0, %v1723_v44  ;;  %v2064_v38 = vadd.f32 %v2032_v8, %v8817_v7  ;;  %7318 = vmatmul.msk.f32.vlgmr.msra.gmra.mxu2 %vm332_vm0, %v2458_v61  ;;  %v8868_v48 = vpop.f32.mrf.mxu1 }
 0x1ff   : > { %7350 = vmatmul.msk.f32.vlgmr.msra.gmra.mxu3 %vm332_vm0, %v2800_v41  ;;  %v2373_v35 = vld [vmem:[#allocation3 + $0x60] sm:$0xff] }
 0x200   : > { %2096 = vst.msk [vmem:[#allocation3 + $0x68] sm:$0xff] %vm332_vm0, %v2064_v38  ;;  %v2405_v47 = vadd.f32 %v2373_v35, %v8812_v45  ;;  %7382 = vmatmul.msk.f32.vlgmr.msra.gmra.mxu0 %vm332_vm0, %v3142_v43  ;;  %v3143_v45 = vld [vmem:[#allocation2 + $0x51] sm:$0xff]  ;;  %v1355_v35 = vld [vmem:[#allocation3 + $0xa0] sm:$0xff] }
 0x201   : > { %v1287_v14 = vpop.f32.mrf.mxu2 }
 0x202   : > { %v1629_v54 = vpop.f32.mrf.mxu3  ;;  %2437 = vst.msk [vmem:[#allocation3 + $0x60] sm:$0xff] %vm332_vm0, %v2405_v47  ;;  %v1383_v55 = vadd.f32 %v1351_v2, %v1287_v14 }
 0x203   : > { %v1692_v57 = vld [vmem:[#allocation3 + $0x78] sm:$0xff] }
 0x204   : > { %v1724_v49 = vadd.f32 %v1692_v57, %v1626_v34  ;;  %1415 = vst.msk [vmem:[#allocation3 + $0x80] sm:$0xff] %vm332_vm0, %v1383_v55  ;;  %v2805_v55 = vld [vmem:[#allocation2 + $0x90] sm:$0xff] }
 0x205   : > { %v2033_v21 = vld [vmem:[#allocation3 + $0x70] sm:$0xff]  ;;  %v8872_v27 = vpop.f32.mrf.mxu0 }
 0x206   : > { %1756 = vst.msk [vmem:[#allocation3 + $0x78] sm:$0xff] %vm332_vm0, %v1724_v49  ;;  %v2065_v50 = vadd.f32 %v2033_v21, %v8831_v29  ;;  %7319 = vmatmul.msk.f32.gmra.mxu2 %vm332_vm0, %v2459_v19  ;;  %v8881_v51 = vpop.f32.mrf.mxu1  ;;  %v3147_v49 = vld [vmem:[#allocation2 + $0x91] sm:$0xff] }
 0x207   : > { %7351 = vmatmul.msk.f32.gmra.mxu3 %vm332_vm0, %v2801_v59  ;;  %v2374_v7 = vld [vmem:[#allocation3 + $0x68] sm:$0xff] }
 0x208   : > { %2097 = vst.msk [vmem:[#allocation3 + $0x70] sm:$0xff] %vm332_vm0, %v2065_v50  ;;  %v2406_v62 = vadd.f32 %v2374_v7, %v8826_v4  ;;  %7383 = vmatmul.msk.f32.gmra.mxu0 %vm332_vm0, %v3143_v45  ;;  %v1356_v7 = vld [vmem:[#allocation3 + $0xa8] sm:$0xff] }
 0x209   : > { %v1290_v3 = vpop.f32.mrf.mxu2 }
 0x20a   : > { %v1632_v5 = vpop.f32.mrf.mxu3  ;;  %2438 = vst.msk [vmem:[#allocation3 + $0x68] sm:$0xff] %vm332_vm0, %v2406_v62  ;;  %v1384_v10 = vadd.f32 %v1352_v26, %v1290_v3  ;;  %v2464_v26 = vld [vmem:[#allocation2 + $0xa7] sm:$0xff] }
 0x20b   : > { %v1693_v56 = vld [vmem:[#allocation3 + $0x80] sm:$0xff] }
 0x20c   : > { %v1725_v15 = vadd.f32 %v1693_v56, %v1629_v54  ;;  %1416 = vst.msk [vmem:[#allocation3 + $0x88] sm:$0xff] %vm332_vm0, %v1384_v10  ;;  %v2463_v54 = vld [vmem:[#allocation2 + $0x8f] sm:$0xff] }
 0x20d   : > { %v2034_v36 = vld [vmem:[#allocation3 + $0x78] sm:$0xff]  ;;  %v8885_v4 = vpop.f32.mrf.mxu0 }
 0x20e   : > { %1757 = vst.msk [vmem:[#allocation3 + $0x80] sm:$0xff] %vm332_vm0, %v1725_v15  ;;  %v2066_v29 = vadd.f32 %v2034_v36, %v8845_v23  ;;  %7320 = vmatmul.msk.f32.gmra.mxu2 %vm332_vm0, %v2460_v11  ;;  %v8895_v63 = vpop.f32.mrf.mxu1 }
 0x20f   : > { %7352 = vmatmul.msk.f32.gmra.mxu3 %vm332_vm0, %v2802_v13  ;;  %v2375_v16 = vld [vmem:[#allocation3 + $0x70] sm:$0xff] }
 0x210   : > { %2098 = vst.msk [vmem:[#allocation3 + $0x78] sm:$0xff] %vm332_vm0, %v2066_v29  ;;  %v2407_v9 = vadd.f32 %v2375_v16, %v8840_v18  ;;  %7384 = vmatmul.msk.f32.gmra.mxu0 %vm332_vm0, %v3144_v58  ;;  %v3145_v18 = vld [vmem:[#allocation2 + $0x71] sm:$0xff]  ;;  %v3148_v13 = vld [vmem:[#allocation2 + $0xa9] sm:$0xff] }
 0x211   : > { %v1293_v39 = vpop.f32.mrf.mxu2  ;;  %v1357_v29 = vld [vmem:[#allocation3 + $0xb0] sm:$0xff] }
 0x212   : > { %v1635_v20 = vpop.f32.mrf.mxu3  ;;  %2439 = vst.msk [vmem:[#allocation3 + $0x70] sm:$0xff] %vm332_vm0, %v2407_v9  ;;  %v1385_v22 = vadd.f32 %v1353_v17, %v1293_v39  ;;  %v2465_v17 = vld [vmem:[#allocation2 + $0xaf] sm:$0xff] }
 0x213   : > { %v1694_v24 = vld [vmem:[#allocation3 + $0x88] sm:$0xff] }
 0x214   : > { %v1726_v30 = vadd.f32 %v1694_v24, %v1632_v5  ;;  %1417 = vst.msk [vmem:[#allocation3 + $0x90] sm:$0xff] %vm332_vm0, %v1385_v22  ;;  %v2806_v5 = vld [vmem:[#allocation2 + $0xa8] sm:$0xff] }
 0x215   : > { %v2035_v31 = vld [vmem:[#allocation3 + $0x80] sm:$0xff]  ;;  %v8898_v28 = vpop.f32.mrf.mxu0 }
 0x216   : > { %1758 = vst.msk [vmem:[#allocation3 + $0x88] sm:$0xff] %vm332_vm0, %v1726_v30  ;;  %v2067_v23 = vadd.f32 %v2035_v31, %v8859_v12  ;;  %7321 = vmatmul.msk.f32.gmra.mxu2 %vm332_vm0, %v2461_v46  ;;  %v8909_v61 = vpop.f32.mrf.mxu1 }
 0x217   : > { %7353 = vmatmul.msk.f32.gmra.mxu3 %vm332_vm0, %v2803_v1  ;;  %v2376_v52 = vld [vmem:[#allocation3 + $0x78] sm:$0xff] }
 0x218   : > { %2099 = vst.msk [vmem:[#allocation3 + $0x80] sm:$0xff] %vm332_vm0, %v2067_v23  ;;  %v2408_v25 = vadd.f32 %v2376_v52, %v8854_v33  ;;  %7385 = vmatmul.msk.f32.gmra.mxu0 %vm332_vm0, %v3145_v18  ;;  %v3146_v33 = vld [vmem:[#allocation2 + $0x89] sm:$0xff]  ;;  %v1358_v18 = vld [vmem:[#allocation3 + $0xb8] sm:$0xff] }
 0x219   : > { %v1296_v32 = vpop.f32.mrf.mxu2 }
 0x21a   : > { %v1638_v53 = vpop.f32.mrf.mxu3  ;;  %2440 = vst.msk [vmem:[#allocation3 + $0x78] sm:$0xff] %vm332_vm0, %v2408_v25  ;;  %v1386_v6 = vadd.f32 %v1354_v42, %v1296_v32  ;;  %v2466_v42 = vld [vmem:[#allocation2 + $0xc7] sm:$0xff] }
 0x21b   : > { %v1695_v34 = vld [vmem:[#allocation3 + $0x90] sm:$0xff] }
 0x21c   : > { %v1727_v40 = vadd.f32 %v1695_v34, %v1635_v20  ;;  %1418 = vst.msk [vmem:[#allocation3 + $0x98] sm:$0xff] %vm332_vm0, %v1386_v6  ;;  %v2807_v20 = vld [vmem:[#allocation2 + $0xb0] sm:$0xff] }
 0x21d   : > { %v2036_v41 = vld [vmem:[#allocation3 + $0x88] sm:$0xff]  ;;  %v8911_v44 = vpop.f32.mrf.mxu0 }
 0x21e   : > { %1759 = vst.msk [vmem:[#allocation3 + $0x90] sm:$0xff] %vm332_vm0, %v1727_v40  ;;  %v2068_v8 = vadd.f32 %v2036_v41, %v8872_v27  ;;  %7322 = vmatmul.msk.f32.gmra.mxu2 %vm332_vm0, %v2462_v37  ;;  %v8928_v21 = vpop.f32.mrf.mxu1 }
 0x21f   : > { %7354 = vmatmul.msk.f32.gmra.mxu3 %vm332_vm0, %v2804_v60  ;;  %v2377_v12 = vld [vmem:[#allocation3 + $0x80] sm:$0xff]  ;;  %v3150_v60 = vld [vmem:[#allocation2 + $0xc9] sm:$0xff] }
 0x220   : > { %2100 = vst.msk [vmem:[#allocation3 + $0x88] sm:$0xff] %vm332_vm0, %v2068_v8  ;;  %v2409_v43 = vadd.f32 %v2377_v12, %v8868_v48  ;;  %7386 = vmatmul.msk.f32.gmra.mxu0 %vm332_vm0, %v3146_v33  ;;  %v1359_v33 = vld [vmem:[#allocation3 + $0xc0] sm:$0xff] }
 0x221   : > { %v1299_v38 = vpop.f32.mrf.mxu2 }
 0x222   : > { %v1641_v47 = vpop.f32.mrf.mxu3  ;;  %2441 = vst.msk [vmem:[#allocation3 + $0x80] sm:$0xff] %vm332_vm0, %v2409_v43  ;;  %v1387_v14 = vadd.f32 %v1355_v35, %v1299_v38  ;;  %v2467_v38 = vld [vmem:[#allocation2 + $0xcf] sm:$0xff] }
 0x223   : > { %v1696_v2 = vld [vmem:[#allocation3 + $0x98] sm:$0xff]  ;;  %v2809_v35 = vld [vmem:[#allocation2 + $0xd0] sm:$0xff] }
 0x224   : > { %v1728_v57 = vadd.f32 %v1696_v2, %v1638_v53  ;;  %1419 = vst.msk [vmem:[#allocation3 + $0xa0] sm:$0xff] %vm332_vm0, %v1387_v14  ;;  %v2808_v53 = vld [vmem:[#allocation2 + $0xc8] sm:$0xff] }
 0x225   : > { %v2037_v19 = vld [vmem:[#allocation3 + $0x90] sm:$0xff]  ;;  %v8922_v59 = vpop.f32.mrf.mxu0 }
 0x226   : > { %1760 = vst.msk [vmem:[#allocation3 + $0x98] sm:$0xff] %vm332_vm0, %v1728_v57  ;;  %v2069_v48 = vadd.f32 %v2037_v19, %v8885_v4  ;;  %7323 = vmatmul.msk.f32.gmra.mxu2 %vm332_vm0, %v2463_v54  ;;  %v8944_v4 = vpop.f32.mrf.mxu1 }
 0x227   : > { %7355 = vmatmul.msk.f32.gmra.mxu3 %vm332_vm0, %v2805_v55  ;;  %v2378_v27 = vld [vmem:[#allocation3 + $0x88] sm:$0xff]  ;;  %v3151_v55 = vld [vmem:[#allocation2 + $0xd1] sm:$0xff] }
 0x228   : > { %2101 = vst.msk [vmem:[#allocation3 + $0x90] sm:$0xff] %vm332_vm0, %v2069_v48  ;;  %v2410_v45 = vadd.f32 %v2378_v27, %v8881_v51  ;;  %7387 = vmatmul.msk.f32.gmra.mxu0 %vm332_vm0, %v3147_v49  ;;  %v3648_v49 = vld [vmem:[#allocation9] sm:$0xff] }
 0x229   : > { %v1302_v50 = vpop.f32.mrf.mxu2  ;;  %3763 = vmatpush.msra.mxu1 %v3648_v49 }
 0x22a   : > { %v1644_v62 = vpop.f32.mrf.mxu3  ;;  %2442 = vst.msk [vmem:[#allocation3 + $0x88] sm:$0xff] %vm332_vm0, %v2410_v45  ;;  %v1388_v0 = vadd.f32 %v1356_v7, %v1302_v50  ;;  %v2468_v7 = vld [vmem:[#allocation2 + $0xe7] sm:$0xff] }
 0x22b   : > { %v1697_v3 = vld [vmem:[#allocation3 + $0xa0] sm:$0xff] }
 0x22c   : > { %v1729_v10 = vadd.f32 %v1697_v3, %v1641_v47  ;;  %1420 = vst.msk [vmem:[#allocation3 + $0xa8] sm:$0xff] %vm332_vm0, %v1388_v0 }
 0x22d   : > { %v2038_v56 = vld [vmem:[#allocation3 + $0x98] sm:$0xff]  ;;  %v8935_v11 = vpop.f32.mrf.mxu0 }
 0x22e   : > { %1761 = vst.msk [vmem:[#allocation3 + $0xa0] sm:$0xff] %vm332_vm0, %v1729_v10  ;;  %v2070_v51 = vadd.f32 %v2038_v56, %v8898_v28  ;;  %7324 = vmatmul.msk.f32.gmra.mxu2 %vm332_vm0, %v2464_v26  ;;  %v2331_v25 = vpop.f32.mrf.mxu1 }
 0x22f   : > { %7356 = vmatmul.msk.f32.gmra.mxu3 %vm332_vm0, %v2806_v5  ;;  %v2379_v15 = vld [vmem:[#allocation3 + $0x90] sm:$0xff] }
 0x230   : > { %2102 = vst.msk [vmem:[#allocation3 + $0x98] sm:$0xff] %vm332_vm0, %v2070_v51  ;;  %v2411_v36 = vadd.f32 %v2379_v15, %v8895_v63  ;;  %7388 = vmatmul.msk.f32.gmra.mxu0 %vm332_vm0, %v3148_v13  ;;  %v3149_v63 = vld [vmem:[#allocation2 + $0xb1] sm:$0xff]  ;;  %v3152_v5 = vld [vmem:[#allocation2 + $0xe9] sm:$0xff] }
 0x231   : > { %v1305_v58 = vpop.f32.mrf.mxu2  ;;  %v1361_v15 = vld [vmem:[#allocation3 + $0xd0] sm:$0xff] }
 0x232   : > { %v1647_v16 = vpop.f32.mrf.mxu3  ;;  %2443 = vst.msk [vmem:[#allocation3 + $0x90] sm:$0xff] %vm332_vm0, %v2411_v36  ;;  %v1389_v9 = vadd.f32 %v1357_v29, %v1305_v58  ;;  %v2469_v29 = vld [vmem:[#allocation2 + $0xef] sm:$0xff] }
 0x233   : > { %v1698_v39 = vld [vmem:[#allocation3 + $0xa8] sm:$0xff] }
 0x234   : > { %v1730_v22 = vadd.f32 %v1698_v39, %v1644_v62  ;;  %1421 = vst.msk [vmem:[#allocation3 + $0xb0] sm:$0xff] %vm332_vm0, %v1389_v9  ;;  %v2810_v62 = vld [vmem:[#allocation2 + $0xe8] sm:$0xff] }
 0x235   : > { %v2039_v24 = vld [vmem:[#allocation3 + $0xa0] sm:$0xff]  ;;  %v8948_v46 = vpop.f32.mrf.mxu0 }
 0x236   : > { %1762 = vst.msk [vmem:[#allocation3 + $0xa8] sm:$0xff] %vm332_vm0, %v1730_v22  ;;  %v2071_v1 = vadd.f32 %v2039_v24, %v8911_v44  ;;  %7325 = vmatmul.msk.f32.gmra.mxu2 %vm332_vm0, %v2465_v17  ;;  %v2334_v14 = vpop.f32.mrf.mxu1 }
 0x237   : > { %7357 = vmatmul.msk.f32.gmra.mxu3 %vm332_vm0, %v2807_v20  ;;  %v2380_v30 = vld [vmem:[#allocation3 + $0x98] sm:$0xff] }
 0x238   : > { %2103 = vst.msk [vmem:[#allocation3 + $0xa0] sm:$0xff] %vm332_vm0, %v2071_v1  ;;  %v2412_v31 = vadd.f32 %v2380_v30, %v8909_v61  ;;  %7389 = vmatmul.msk.f32.gmra.mxu0 %vm332_vm0, %v3149_v63  ;;  %v3153_v20 = vld [vmem:[#allocation2 + $0xf1] sm:$0xff] }
 0x239   : > { %v1308_v28 = vpop.f32.mrf.mxu2  ;;  %v1362_v30 = vld [vmem:[#allocation3 + $0xd8] sm:$0xff] }
 0x23a   : > { %v1650_v23 = vpop.f32.mrf.mxu3  ;;  %2444 = vst.msk [vmem:[#allocation3 + $0x98] sm:$0xff] %vm332_vm0, %v2412_v31  ;;  %v1390_v52 = vadd.f32 %v1358_v18, %v1308_v28 }
 0x23b   : > { %v1699_v32 = vld [vmem:[#allocation3 + $0xb0] sm:$0xff] }
 0x23c   : > { %v1731_v6 = vadd.f32 %v1699_v32, %v1647_v16  ;;  %1422 = vst.msk [vmem:[#allocation3 + $0xb8] sm:$0xff] %vm332_vm0, %v1390_v52  ;;  %v2811_v16 = vld [vmem:[#allocation2 + $0xf0] sm:$0xff]  ;;  %v2812_v52 = vld [vmem:[#allocation2 + $0x108] sm:$0xff] }
 0x23d   : > { %v2040_v34 = vld [vmem:[#allocation3 + $0xa8] sm:$0xff]  ;;  %v8959_v37 = vpop.f32.mrf.mxu0 }
 0x23e   : > { %1763 = vst.msk [vmem:[#allocation3 + $0xb0] sm:$0xff] %vm332_vm0, %v1731_v6  ;;  %v2072_v40 = vadd.f32 %v2040_v34, %v8922_v59  ;;  %7326 = vmatmul.msk.f32.gmra.mxu2 %vm332_vm0, %v2466_v42  ;;  %v2337_v56 = vpop.f32.mrf.mxu1 }
 0x23f   : > { %7358 = vmatmul.msk.f32.gmra.mxu3 %vm332_vm0, %v2808_v53  ;;  %v2381_v61 = vld [vmem:[#allocation3 + $0xa0] sm:$0xff]  ;;  %v3154_v53 = vld [vmem:[#allocation2 + $0x109] sm:$0xff] }
 0x240   : > { %2104 = vst.msk [vmem:[#allocation3 + $0xa8] sm:$0xff] %vm332_vm0, %v2072_v40  ;;  %v2413_v41 = vadd.f32 %v2381_v61, %v8928_v21  ;;  %7390 = vmatmul.msk.f32.gmra.mxu0 %vm332_vm0, %v3150_v60  ;;  %v1360_v21 = vld [vmem:[#allocation3 + $0xc8] sm:$0xff]  ;;  %v3929_v60 = vld [vmem:[#allocation9 + $0x38] sm:$0xff]  ;;  %v1363_v61 = vld [vmem:[#allocation3 + $0xe0] sm:$0xff] }
 0x241   : > { %v1311_v44 = vpop.f32.mrf.mxu2  ;;  %4038 = vmatpush.msrb.mxu2 %v3929_v60  ;;  %v2704_v60 = vld [vmem:[#allocation3] sm:$0xff] }
 0x242   : > { %v1653_v8 = vpop.f32.mrf.mxu3  ;;  %2445 = vst.msk [vmem:[#allocation3 + $0xa0] sm:$0xff] %vm332_vm0, %v2413_v41  ;;  %v1391_v12 = vadd.f32 %v1359_v33, %v1311_v44 }
 0x243   : > { %v1700_v43 = vld [vmem:[#allocation3 + $0xb8] sm:$0xff] }
 0x244   : > { %v1732_v47 = vadd.f32 %v1700_v43, %v1650_v23  ;;  %1423 = vst.msk [vmem:[#allocation3 + $0xc0] sm:$0xff] %vm332_vm0, %v1391_v12  ;;  %v2470_v23 = vld [vmem:[#allocation2 + $0x107] sm:$0xff]  ;;  %v2471_v12 = vld [vmem:[#allocation2 + $0x10f] sm:$0xff] }
 0x245   : > { %v2041_v2 = vld [vmem:[#allocation3 + $0xb0] sm:$0xff]  ;;  %v8970_v54 = vpop.f32.mrf.mxu0 }
 0x246   : > { %1764 = vst.msk [vmem:[#allocation3 + $0xb8] sm:$0xff] %vm332_vm0, %v1732_v47  ;;  %v2073_v57 = vadd.f32 %v2041_v2, %v8935_v11  ;;  %7327 = vmatmul.msk.f32.gmra.mxu2 %vm332_vm0, %v2467_v38  ;;  %v2340_v63 = vpop.f32.mrf.mxu1  ;;  %v2813_v43 = vld [vmem:[#allocation2 + $0x110] sm:$0xff] }
 0x247   : > { %7359 = vmatmul.msk.f32.gmra.mxu3 %vm332_vm0, %v2809_v35  ;;  %v2382_v19 = vld [vmem:[#allocation3 + $0xa8] sm:$0xff] }
 0x248   : > { %2105 = vst.msk [vmem:[#allocation3 + $0xb0] sm:$0xff] %vm332_vm0, %v2073_v57  ;;  %v2414_v59 = vadd.f32 %v2382_v19, %v8944_v4  ;;  %7391 = vmatmul.msk.f32.gmra.mxu0 %vm332_vm0, %v3151_v55  ;;  %v1364_v19 = vld [vmem:[#allocation3 + $0xe8] sm:$0xff] }
 0x249   : > { %v1314_v48 = vpop.f32.mrf.mxu2 }
 0x24a   : > { %v1656_v27 = vpop.f32.mrf.mxu3  ;;  %2446 = vst.msk [vmem:[#allocation3 + $0xa8] sm:$0xff] %vm332_vm0, %v2414_v59  ;;  %v1392_v45 = vadd.f32 %v1360_v21, %v1314_v48  ;;  %v2472_v21 = vld [vmem:[#allocation2 + $0x127] sm:$0xff] }
 0x24b   : > { %v1701_v50 = vld [vmem:[#allocation3 + $0xc0] sm:$0xff] }
 0x24c   : > { %v1733_v0 = vadd.f32 %v1701_v50, %v1653_v8  ;;  %1424 = vst.msk [vmem:[#allocation3 + $0xc8] sm:$0xff] %vm332_vm0, %v1392_v45 }
 0x24d   : > { %v2042_v3 = vld [vmem:[#allocation3 + $0xb8] sm:$0xff]  ;;  %v8981_v26 = vpop.f32.mrf.mxu0 }
 0x24e   : > { %1765 = vst.msk [vmem:[#allocation3 + $0xc0] sm:$0xff] %vm332_vm0, %v1733_v0  ;;  %v2074_v10 = vadd.f32 %v2042_v3, %v8948_v46  ;;  %7328 = vmatmul.msk.f32.gmra.mxu2 %vm332_vm0, %v2468_v7  ;;  %v2343_v33 = vpop.f32.mrf.mxu1  ;;  %v3156_v0 = vld [vmem:[#allocation2 + $0x129] sm:$0xff] }
 0x24f   : > { %7360 = vmatmul.msk.f32.gmra.mxu3 %vm332_vm0, %v2810_v62  ;;  %v2383_v11 = vld [vmem:[#allocation3 + $0xb0] sm:$0xff] }
 0x250   : > { %2106 = vst.msk [vmem:[#allocation3 + $0xb8] sm:$0xff] %vm332_vm0, %v2074_v10  ;;  %v2415_v13 = vadd.f32 %v2383_v11, %v2331_v25  ;;  %7392 = vmatmul.msk.f32.gmra.mxu0 %vm332_vm0, %v3152_v5  ;;  %v4271_v10 = vld [vmem:[#allocation9 + $0x58] sm:$0xff]  ;;  %v1365_v11 = vld [vmem:[#allocation3 + $0xf0] sm:$0xff] }
 0x251   : > { %v1317_v51 = vpop.f32.mrf.mxu2  ;;  %4380 = vmatpush.msrb.mxu3 %v4271_v10  ;;  %v2706_v10 = vld [vmem:[#allocation3 + $0x10] sm:$0xff] }
 0x252   : > { %v1659_v36 = vpop.f32.mrf.mxu3  ;;  %2447 = vst.msk [vmem:[#allocation3 + $0xb0] sm:$0xff] %vm332_vm0, %v2415_v13  ;;  %v1393_v4 = vadd.f32 %v1361_v15, %v1317_v51 }
 0x253   : > { %v1702_v58 = vld [vmem:[#allocation3 + $0xc8] sm:$0xff] }
 0x254   : > { %v1734_v9 = vadd.f32 %v1702_v58, %v1656_v27  ;;  %1425 = vst.msk [vmem:[#allocation3 + $0xd0] sm:$0xff] %vm332_vm0, %v1393_v4  ;;  %v2814_v27 = vld [vmem:[#allocation2 + $0x128] sm:$0xff]  ;;  %v2815_v4 = vld [vmem:[#allocation2 + $0x130] sm:$0xff] }
 0x255   : > { %v2043_v39 = vld [vmem:[#allocation3 + $0xc0] sm:$0xff]  ;;  %v8991_v17 = vpop.f32.mrf.mxu0 }
 0x256   : > { %1766 = vst.msk [vmem:[#allocation3 + $0xc8] sm:$0xff] %vm332_vm0, %v1734_v9  ;;  %v2075_v22 = vadd.f32 %v2043_v39, %v8959_v37  ;;  %7329 = vmatmul.msk.f32.gmra.mxu2 %vm332_vm0, %v2469_v29  ;;  %v2346_v50 = vpop.f32.mrf.mxu1  ;;  %v3157_v9 = vld [vmem:[#allocation2 + $0x131] sm:$0xff] }
 0x257   : > { %7361 = vmatmul.msk.f32.gmra.mxu3 %vm332_vm0, %v2811_v16  ;;  %v2384_v24 = vld [vmem:[#allocation3 + $0xb8] sm:$0xff] }
 0x258   : > { %2107 = vst.msk [vmem:[#allocation3 + $0xc0] sm:$0xff] %vm332_vm0, %v2075_v22  ;;  %v2416_v46 = vadd.f32 %v2384_v24, %v2334_v14  ;;  %7393 = vmatmul.msk.f32.gmra.mxu0 %vm332_vm0, %v3153_v20  ;;  %v3155_v14 = vld [vmem:[#allocation2 + $0x111] sm:$0xff] }
 0x259   : > { %v1320_v1 = vpop.f32.mrf.mxu2 }
 0x25a   : > { %v1662_v31 = vpop.f32.mrf.mxu3  ;;  %2448 = vst.msk [vmem:[#allocation3 + $0xb8] sm:$0xff] %vm332_vm0, %v2416_v46  ;;  %v1394_v28 = vadd.f32 %v1362_v30, %v1320_v1  ;;  %v1366_v46 = vld [vmem:[#allocation3 + $0xf8] sm:$0xff] }
 0x25b   : > { %v1703_v18 = vld [vmem:[#allocation3 + $0xd0] sm:$0xff] }
 0x25c   : > { %v1735_v25 = vadd.f32 %v1703_v18, %v1659_v36  ;;  %1426 = vst.msk [vmem:[#allocation3 + $0xd8] sm:$0xff] %vm332_vm0, %v1394_v28  ;;  %v2473_v36 = vld [vmem:[#allocation2 + $0x12f] sm:$0xff] }
 0x25d   : > { %v2044_v32 = vld [vmem:[#allocation3 + $0xc8] sm:$0xff]  ;;  %v9001_v42 = vpop.f32.mrf.mxu0 }
 0x25e   : > { %1767 = vst.msk [vmem:[#allocation3 + $0xd0] sm:$0xff] %vm332_vm0, %v1735_v25  ;;  %v2076_v6 = vadd.f32 %v2044_v32, %v8970_v54  ;;  %7330 = vmatmul.msk.f32.gmra.mxu2 %vm332_vm0, %v2470_v23  ;;  %v2816_v28 = vld [vmem:[#allocation2 + $0x148] sm:$0xff] }
 0x25f   : > { %7362 = vmatmul.msk.f32.gmra.mxu3 %vm332_vm0, %v2812_v52  ;;  %v2385_v34 = vld [vmem:[#allocation3 + $0xc0] sm:$0xff]  ;;  %v3158_v32 = vld [vmem:[#allocation2 + $0x149] sm:$0xff] }
 0x260   : > { %2108 = vst.msk [vmem:[#allocation3 + $0xc8] sm:$0xff] %vm332_vm0, %v2076_v6  ;;  %v2417_v37 = vadd.f32 %v2385_v34, %v2337_v56  ;;  %7394 = vmatmul.msk.f32.gmra.mxu0 %vm332_vm0, %v3154_v53  ;;  %v3616_v23 = vld [vmem:[#allocation2 + $0x7] sm:$0xff] }
 0x261   : > { %v1323_v40 = vpop.f32.mrf.mxu2  ;;  %7414 = vmatmul.msk.f32.vlgmr.msra.gmra.mxu1 %vm332_vm0, %v3616_v23 }
 0x262   : > { %v1665_v41 = vpop.f32.mrf.mxu3  ;;  %2449 = vst.msk [vmem:[#allocation3 + $0xc0] sm:$0xff] %vm332_vm0, %v2417_v37  ;;  %v1395_v44 = vadd.f32 %v1363_v61, %v1323_v40 }
 0x263   : > { %v1704_v8 = vld [vmem:[#allocation3 + $0xd8] sm:$0xff] }
 0x264   : > { %v1736_v38 = vadd.f32 %v1704_v8, %v1662_v31  ;;  %1427 = vst.msk [vmem:[#allocation3 + $0xe0] sm:$0xff] %vm332_vm0, %v1395_v44  ;;  %v2474_v31 = vld [vmem:[#allocation2 + $0x147] sm:$0xff]  ;;  %v2475_v44 = vld [vmem:[#allocation2 + $0x14f] sm:$0xff] }
 0x265   : > { %v2045_v35 = vld [vmem:[#allocation3 + $0xd0] sm:$0xff]  ;;  %v9011_v47 = vpop.f32.mrf.mxu0 }
 0x266   : > { %1768 = vst.msk [vmem:[#allocation3 + $0xd8] sm:$0xff] %vm332_vm0, %v1736_v38  ;;  %v2077_v2 = vadd.f32 %v2045_v35, %v8981_v26  ;;  %7331 = vmatmul.msk.f32.gmra.mxu2 %vm332_vm0, %v2471_v12  ;;  %v3617_v12 = vld [vmem:[#allocation2 + $0xf] sm:$0xff] }
 0x267   : > { %7363 = vmatmul.msk.f32.gmra.mxu3 %vm332_vm0, %v2813_v43  ;;  %v2386_v54 = vld [vmem:[#allocation3 + $0xc8] sm:$0xff]  ;;  %v3159_v35 = vld [vmem:[#allocation2 + $0x151] sm:$0xff] }
 0x268   : > { %2109 = vst.msk [vmem:[#allocation3 + $0xd0] sm:$0xff] %vm332_vm0, %v2077_v2  ;;  %v2418_v55 = vadd.f32 %v2386_v54, %v2340_v63  ;;  %7395 = vmatmul.msk.f32.gmra.mxu0 %vm332_vm0, %v3155_v14 }
 0x269   : > { %v1326_v57 = vpop.f32.mrf.mxu2  ;;  %7415 = vmatmul.msk.f32.gmra.mxu1 %vm332_vm0, %v3617_v12 }
 0x26a   : > { %v1668_v59 = vpop.f32.mrf.mxu3  ;;  %2450 = vst.msk [vmem:[#allocation3 + $0xc8] sm:$0xff] %vm332_vm0, %v2418_v55  ;;  %v1396_v49 = vadd.f32 %v1364_v19, %v1326_v57  ;;  %v2705_v55 = vld [vmem:[#allocation3 + $0x8] sm:$0xff] }
 0x26b   : > { %v1705_v48 = vld [vmem:[#allocation3 + $0xe0] sm:$0xff] }
 0x26c   : > { %v1737_v45 = vadd.f32 %v1705_v48, %v1665_v41  ;;  %1428 = vst.msk [vmem:[#allocation3 + $0xe8] sm:$0xff] %vm332_vm0, %v1396_v49  ;;  %v2476_v49 = vld [vmem:[#allocation2 + $0x167] sm:$0xff] }
 0x26d   : > { %v2046_v7 = vld [vmem:[#allocation3 + $0xd8] sm:$0xff]  ;;  %v9021_v62 = vpop.f32.mrf.mxu0  ;;  %v2818_v48 = vld [vmem:[#allocation2 + $0x168] sm:$0xff] }
 0x26e   : > { %1769 = vst.msk [vmem:[#allocation3 + $0xe0] sm:$0xff] %vm332_vm0, %v1737_v45  ;;  %v2078_v3 = vadd.f32 %v2046_v7, %v8991_v17  ;;  %7332 = vmatmul.msk.f32.gmra.mxu2 %vm332_vm0, %v2472_v21  ;;  %v2349_v17 = vpop.f32.mrf.mxu1  ;;  %v4613_v45 = vld [vmem:[#allocation9 + $0x78] sm:$0xff] }
 0x26f   : > { %7364 = vmatmul.msk.f32.gmra.mxu3 %vm332_vm0, %v2814_v27  ;;  %v2387_v26 = vld [vmem:[#allocation3 + $0xd0] sm:$0xff]  ;;  %4722 = vmatpush.msrb.mxu0 %v4613_v45 }
 0x270   : > { %2110 = vst.msk [vmem:[#allocation3 + $0xd8] sm:$0xff] %vm332_vm0, %v2078_v3  ;;  %v2419_v5 = vadd.f32 %v2387_v26, %v2343_v33  ;;  %7396 = vmatmul.msk.f32.gmra.mxu0 %vm332_vm0, %v3156_v0  ;;  %v2817_v33 = vld [vmem:[#allocation2 + $0x150] sm:$0xff] }
 0x271   : > { %v1329_v56 = vpop.f32.mrf.mxu2  ;;  %v3928_v45 = vld [vmem:[#allocation9 + $0x30] sm:$0xff] }
 0x272   : > { %v1671_v13 = vpop.f32.mrf.mxu3  ;;  %2451 = vst.msk [vmem:[#allocation3 + $0xd0] sm:$0xff] %vm332_vm0, %v2419_v5  ;;  %v1397_v51 = vadd.f32 %v1365_v11, %v1329_v56  ;;  %4039 = vmatpush.msrb.mxu2 %v3928_v45  ;;  %v2826_v45 = vld [vmem:[#allocation2 + $0x1e8] sm:$0xff] }
 0x273   : > { %v1706_v15 = vld [vmem:[#allocation3 + $0xe8] sm:$0xff] }
 0x274   : > { %v1738_v58 = vadd.f32 %v1706_v15, %v1668_v59  ;;  %1429 = vst.msk [vmem:[#allocation3 + $0xf0] sm:$0xff] %vm332_vm0, %v1397_v51  ;;  %v2477_v51 = vld [vmem:[#allocation2 + $0x16f] sm:$0xff] }
 0x275   : > { %v2047_v29 = vld [vmem:[#allocation3 + $0xe0] sm:$0xff]  ;;  %v9031_v16 = vpop.f32.mrf.mxu0  ;;  %v2819_v15 = vld [vmem:[#allocation2 + $0x170] sm:$0xff] }
 0x276   : > { %1770 = vst.msk [vmem:[#allocation3 + $0xe8] sm:$0xff] %vm332_vm0, %v1738_v58  ;;  %v2079_v39 = vadd.f32 %v2047_v29, %v9001_v42  ;;  %7333 = vmatmul.msk.f32.gmra.mxu2 %vm332_vm0, %v2473_v36  ;;  %v2352_v34 = vpop.f32.mrf.mxu1 }
 0x277   : > { %7365 = vmatmul.msk.f32.gmra.mxu3 %vm332_vm0, %v2815_v4  ;;  %v2388_v20 = vld [vmem:[#allocation3 + $0xd8] sm:$0xff] }
 0x278   : > { %2111 = vst.msk [vmem:[#allocation3 + $0xe0] sm:$0xff] %vm332_vm0, %v2079_v39  ;;  %v2420_v22 = vadd.f32 %v2388_v20, %v2346_v50  ;;  %7397 = vmatmul.msk.f32.gmra.mxu0 %vm332_vm0, %v3157_v9  ;;  %v4955_v4 = vld [vmem:[#allocation9 + $0x98] sm:$0xff] }
 0x279   : > { %v1332_v24 = vpop.f32.mrf.mxu2  ;;  %5064 = vmatpush.msrb.mxu1 %v4955_v4  ;;  %v3161_v9 = vld [vmem:[#allocation2 + $0x171] sm:$0xff] }
 0x27a   : > { %v1674_v63 = vpop.f32.mrf.mxu3  ;;  %2452 = vst.msk [vmem:[#allocation3 + $0xd8] sm:$0xff] %vm332_vm0, %v2420_v22  ;;  %v1398_v1 = vadd.f32 %v1366_v46, %v1332_v24  ;;  %v2707_v24 = vld [vmem:[#allocation3 + $0x18] sm:$0xff] }
 0x27b   : > { %v1707_v30 = vld [vmem:[#allocation3 + $0xf0] sm:$0xff] }
 0x27c   : > { %v1739_v18 = vadd.f32 %v1707_v30, %v1671_v13  ;;  %1430 = vst.msk [vmem:[#allocation3 + $0xf8] sm:$0xff] %vm332_vm0, %v1398_v1  ;;  %v2478_v30 = vld [vmem:[#allocation2 + $0x187] sm:$0xff] }
 0x27d   : > { %v2048_v52 = vld [vmem:[#allocation3 + $0xe8] sm:$0xff]  ;;  %v9041_v25 = vpop.f32.mrf.mxu0 }
 0x27e   : > { %1771 = vst.msk [vmem:[#allocation3 + $0xf0] sm:$0xff] %vm332_vm0, %v1739_v18  ;;  %v2080_v42 = vadd.f32 %v2048_v52, %v9011_v47  ;;  %7334 = vmatmul.msk.f32.gmra.mxu2 %vm332_vm0, %v2474_v31  ;;  %v2355_v21 = vpop.f32.mrf.mxu1  ;;  %v2820_v31 = vld [vmem:[#allocation2 + $0x188] sm:$0xff] }
 0x27f   : > { %7366 = vmatmul.msk.f32.gmra.mxu3 %vm332_vm0, %v2816_v28  ;;  %v2389_v53 = vld [vmem:[#allocation3 + $0xe0] sm:$0xff] }
 0x280   : > { %2112 = vst.msk [vmem:[#allocation3 + $0xe8] sm:$0xff] %vm332_vm0, %v2080_v42  ;;  %v2421_v6 = vadd.f32 %v2389_v53, %v2349_v17  ;;  %7398 = vmatmul.msk.f32.gmra.mxu0 %vm332_vm0, %v3158_v32  ;;  %v9085_v28 = vld [vmem:[%s10838_s2] ss:$0 sm:$0xff] }
 0x281   : > { %v2608_v37 = vpop.f32.mrf.mxu2 }
 0x282   : > { %v2950_v40 = vpop.f32.mrf.mxu3  ;;  %2453 = vst.msk [vmem:[#allocation3 + $0xe0] sm:$0xff] %vm332_vm0, %v2421_v6  ;;  %v2736_v61 = vadd.f32 %v2704_v60, %v2608_v37 }
 0x283   : > { %v1708_v41 = vld [vmem:[#allocation3 + $0xf8] sm:$0xff] }
 0x284   : > { %v1740_v8 = vadd.f32 %v1708_v41, %v1674_v63  ;;  %2768 = vst.msk [vmem:[#allocation3] sm:$0xff] %vm332_vm0, %v2736_v61  ;;  %v2479_v41 = vld [vmem:[#allocation2 + $0x18f] sm:$0xff] }
 0x285   : > { %v2049_v43 = vld [vmem:[#allocation3 + $0xf0] sm:$0xff]  ;;  %v9052_v38 = vpop.f32.mrf.mxu0 }
 0x286   : > { %1772 = vst.msk [vmem:[#allocation3 + $0xf8] sm:$0xff] %vm332_vm0, %v1740_v8  ;;  %v2081_v47 = vadd.f32 %v2049_v43, %v9021_v62  ;;  %7335 = vmatmul.msk.f32.gmra.mxu2 %vm332_vm0, %v2475_v44  ;;  %v3160_v62 = vld [vmem:[#allocation2 + $0x169] sm:$0xff]  ;;  %v2358_v29 = vpop.f32.mrf.mxu1  ;;  %v3163_v43 = vld [vmem:[#allocation2 + $0x191] sm:$0xff] }
 0x287   : > { %7367 = vmatmul.msk.f32.gmra.mxu3 %vm332_vm0, %v2817_v33  ;;  %v2390_v14 = vld [vmem:[#allocation3 + $0xe8] sm:$0xff]  ;;  %v2821_v44 = vld [vmem:[#allocation2 + $0x190] sm:$0xff] }
 0x288   : > { %2113 = vst.msk [vmem:[#allocation3 + $0xf0] sm:$0xff] %vm332_vm0, %v2081_v47  ;;  %v2422_v2 = vadd.f32 %v2390_v14, %v2352_v34  ;;  %7399 = vmatmul.msk.f32.gmra.mxu0 %vm332_vm0, %v3159_v35  ;;  %v2708_v34 = vld [vmem:[#allocation3 + $0x20] sm:$0xff] }
 0x289   : > { %v2611_v54 = vpop.f32.mrf.mxu2 }
 0x28a   : > { %v2953_v57 = vpop.f32.mrf.mxu3  ;;  %2454 = vst.msk [vmem:[#allocation3 + $0xe8] sm:$0xff] %vm332_vm0, %v2422_v2  ;;  %v2737_v19 = vadd.f32 %v2705_v55, %v2611_v54  ;;  %v2709_v2 = vld [vmem:[#allocation3 + $0x28] sm:$0xff] }
 0x28b   : > { %v3046_v59 = vld [vmem:[#allocation3] sm:$0xff] }
 0x28c   : > { %v3078_v27 = vadd.f32 %v3046_v59, %v2950_v40  ;;  %2769 = vst.msk [vmem:[#allocation3 + $0x8] sm:$0xff] %vm332_vm0, %v2737_v19  ;;  %v2480_v59 = vld [vmem:[#allocation2 + $0x1a7] sm:$0xff] }
 0x28d   : > { %v2050_v50 = vld [vmem:[#allocation3 + $0xf8] sm:$0xff]  ;;  %v9063_v7 = vpop.f32.mrf.mxu0 }
 0x28e   : > { %3110 = vst.msk [vmem:[#allocation3] sm:$0xff] %vm332_vm0, %v3078_v27  ;;  %v2082_v0 = vadd.f32 %v2050_v50, %v9031_v16  ;;  %7336 = vmatmul.msk.f32.gmra.mxu2 %vm332_vm0, %v2476_v49  ;;  %v2822_v49 = vld [vmem:[#allocation2 + $0x1a8] sm:$0xff] }
 0x28f   : > { %7368 = vmatmul.msk.f32.gmra.mxu3 %vm332_vm0, %v2818_v48  ;;  %v2391_v3 = vld [vmem:[#allocation3 + $0xf0] sm:$0xff] }
 0x290   : > { %2114 = vst.msk [vmem:[#allocation3 + $0xf8] sm:$0xff] %vm332_vm0, %v2082_v0  ;;  %v2423_v26 = vadd.f32 %v2391_v3, %v2355_v21  ;;  %7400 = vmatmul.msk.f32.gmra.mxu0 %vm332_vm0, %v3160_v62 }
 0x291   : > { %v2614_v5 = vpop.f32.mrf.mxu2 }
 0x292   : > { %v2956_v56 = vpop.f32.mrf.mxu3  ;;  %2455 = vst.msk [vmem:[#allocation3 + $0xf0] sm:$0xff] %vm332_vm0, %v2423_v26  ;;  %v2738_v11 = vadd.f32 %v2706_v10, %v2614_v5  ;;  %v2710_v5 = vld [vmem:[#allocation3 + $0x30] sm:$0xff] }
 0x293   : > { %v3047_v13 = vld [vmem:[#allocation3 + $0x8] sm:$0xff] }
 0x294   : > { %v3079_v36 = vadd.f32 %v3047_v13, %v2953_v57  ;;  %2770 = vst.msk [vmem:[#allocation3 + $0x10] sm:$0xff] %vm332_vm0, %v2738_v11 }
 0x295   : > { %v3388_v58 = vld [vmem:[#allocation3] sm:$0xff]  ;;  %v9073_v16 = vpop.f32.mrf.mxu0 }
 0x296   : > { %3111 = vst.msk [vmem:[#allocation3 + $0x8] sm:$0xff] %vm332_vm0, %v3079_v36  ;;  %v3420_v39 = vadd.f32 %v3388_v58, %v9041_v25  ;;  %7337 = vmatmul.msk.f32.gmra.mxu2 %vm332_vm0, %v2477_v51  ;;  %v3162_v25 = vld [vmem:[#allocation2 + $0x189] sm:$0xff] }
 0x297   : > { %7369 = vmatmul.msk.f32.gmra.mxu3 %vm332_vm0, %v2819_v15  ;;  %v2392_v17 = vld [vmem:[#allocation3 + $0xf8] sm:$0xff]  ;;  %v2481_v51 = vld [vmem:[#allocation2 + $0x1af] sm:$0xff] }
 0x298   : > { %3452 = vst.msk [vmem:[#allocation3] sm:$0xff] %vm332_vm0, %v3420_v39  ;;  %v2424_v20 = vadd.f32 %v2392_v17, %v2358_v29  ;;  %7401 = vmatmul.msk.f32.gmra.mxu0 %vm332_vm0, %v3161_v9  ;;  %v2823_v15 = vld [vmem:[#allocation2 + $0x1b0] sm:$0xff] }
 0x299   : > { %v2617_v22 = vpop.f32.mrf.mxu2  ;;  %v3165_v29 = vld [vmem:[#allocation2 + $0x1b1] sm:$0xff] }
 0x29a   : > { %v2959_v46 = vpop.f32.mrf.mxu3  ;;  %2456 = vst.msk [vmem:[#allocation3 + $0xf8] sm:$0xff] %vm332_vm0, %v2424_v20  ;;  %v2739_v63 = vadd.f32 %v2707_v24, %v2617_v22  ;;  %v2711_v22 = vld [vmem:[#allocation3 + $0x38] sm:$0xff] }
 0x29b   : > { %v3048_v1 = vld [vmem:[#allocation3 + $0x10] sm:$0xff] }
 0x29c   : > { %v3080_v18 = vadd.f32 %v3048_v1, %v2956_v56  ;;  %2771 = vst.msk [vmem:[#allocation3 + $0x18] sm:$0xff] %vm332_vm0, %v2739_v63 }
 0x29d   : > { %v3389_v23 = vld [vmem:[#allocation3 + $0x8] sm:$0xff]  ;;  %v9088_v52 = vpop.f32.mrf.mxu0 }
 0x29e   : > { %3112 = vst.msk [vmem:[#allocation3 + $0x10] sm:$0xff] %vm332_vm0, %v3080_v18  ;;  %v3421_v32 = vadd.f32 %v3389_v23, %v9052_v38  ;;  %7338 = vmatmul.msk.f32.gmra.mxu2 %vm332_vm0, %v2478_v30  ;;  %v2482_v30 = vld [vmem:[#allocation2 + $0x1c7] sm:$0xff] }
 0x29f   : > { %7370 = vmatmul.msk.f32.gmra.mxu3 %vm332_vm0, %v2820_v31  ;;  %v3484_v42 = vld [vmem:[#allocation3] sm:$0xff]  ;;  %v2824_v31 = vld [vmem:[#allocation2 + $0x1c8] sm:$0xff] }
 0x2a0   : > { %v3520_v53 = vadd.f32 %v9085_v28, %v3484_v42  ;;  %3453 = vst.msk [vmem:[#allocation3 + $0x8] sm:$0xff] %vm332_vm0, %v3421_v32  ;;  %7402 = vmatmul.msk.f32.gmra.mxu0 %vm332_vm0, %v3162_v25  ;;  %v3166_v32 = vld [vmem:[#allocation2 + $0x1c9] sm:$0xff] }
 0x2a1   : > { %v2620_v6 = vpop.f32.mrf.mxu2 }
 0x2a2   : > { %v2962_v37 = vpop.f32.mrf.mxu3  ;;  %v3552_v60 = vmax.f32 %v3520_v53, 0.0  ;;  %v2740_v40 = vadd.f32 %v2708_v34, %v2620_v6 }
 0x2a3   : > { %v3049_v61 = vld [vmem:[#allocation3 + $0x18] sm:$0xff] }
 0x2a4   : > { %3584 = vst.msk [vmem:[#allocation2 + $0x28] sm:$0xff] %vm332_vm0, %v3552_v60  ;;  %v3081_v33 = vadd.f32 %v3049_v61, %v2959_v46  ;;  %v2712_v60 = vld [vmem:[#allocation3 + $0x40] sm:$0xff] }
 0x2a5   : > { %v3390_v8 = vld [vmem:[#allocation3 + $0x10] sm:$0xff]  ;;  %2772 = vst.msk [vmem:[#allocation3 + $0x20] sm:$0xff] %vm332_vm0, %v2740_v40  ;;  %v9099_v12 = vpop.f32.mrf.mxu0 }
 0x2a6   : > { %3113 = vst.msk [vmem:[#allocation3 + $0x18] sm:$0xff] %vm332_vm0, %v3081_v33  ;;  %v3422_v38 = vadd.f32 %v3390_v8, %v9063_v7  ;;  %7339 = vmatmul.msk.f32.gmra.mxu2 %vm332_vm0, %v2479_v41  ;;  %v3164_v7 = vld [vmem:[#allocation2 + $0x1a9] sm:$0xff] }
 0x2a7   : > { %7371 = vmatmul.msk.f32.gmra.mxu3 %vm332_vm0, %v2821_v44  ;;  %v3485_v35 = vld [vmem:[#allocation3 + $0x8] sm:$0xff]  ;;  %v2825_v8 = vld [vmem:[#allocation2 + $0x1d0] sm:$0xff] }
 0x2a8   : > { %v3521_v47 = vadd.f32 %v9085_v28, %v3485_v35  ;;  %3454 = vst.msk [vmem:[#allocation3 + $0x10] sm:$0xff] %vm332_vm0, %v3422_v38  ;;  %7403 = vmatmul.msk.f32.gmra.mxu0 %vm332_vm0, %v3163_v43  ;;  %v2483_v33 = vld [vmem:[#allocation2 + $0x1cf] sm:$0xff] }
 0x2a9   : > { %v2623_v14 = vpop.f32.mrf.mxu2  ;;  %v3167_v35 = vld [vmem:[#allocation2 + $0x1d1] sm:$0xff] }
 0x2aa   : > { %v2965_v54 = vpop.f32.mrf.mxu3  ;;  %v3553_v55 = vmax.f32 %v3521_v47, 0.0  ;;  %v2741_v57 = vadd.f32 %v2709_v2, %v2623_v14 }
 0x2ab   : > { %v9108_v19 = vld [vmem:[#allocation2 + $0x27] sm:$0xff] }
 0x2ac   : > { %3585 = vst.msk [vmem:[#allocation2 + $0x30] sm:$0xff] %vm332_vm0, %v3553_v55  ;;  %v3050_v48 = vld [vmem:[#allocation3 + $0x20] sm:$0xff]  ;;  %7416 = vmatmul.msk.f32.gmra.mxu1 %vm332_vm0, %v9108_v19 }
 0x2ad   : > { %v3082_v21 = vadd.f32 %v3050_v48, %v2962_v37  ;;  %v3391_v27 = vld [vmem:[#allocation3 + $0x18] sm:$0xff]  ;;  %2773 = vst.msk [vmem:[#allocation3 + $0x28] sm:$0xff] %vm332_vm0, %v2741_v57  ;;  %v9114_v50 = vpop.f32.mrf.mxu0  ;;  %v2713_v57 = vld [vmem:[#allocation3 + $0x48] sm:$0xff] }
 0x2ae   : > { %v3423_v62 = vadd.f32 %v3391_v27, %v9073_v16  ;;  %7340 = vmatmul.msk.f32.gmra.mxu2 %vm332_vm0, %v2480_v59  ;;  %v2484_v27 = vld [vmem:[#allocation2 + $0x1e7] sm:$0xff] }
 0x2af   : > { %7372 = vmatmul.msk.f32.gmra.mxu3 %vm332_vm0, %v2822_v49  ;;  %v3486_v0 = vld [vmem:[#allocation3 + $0x10] sm:$0xff]  ;;  %3114 = vst.msk [vmem:[#allocation3 + $0x20] sm:$0xff] %vm332_vm0, %v3082_v21 }
 0x2b0   : > { %v3522_v3 = vadd.f32 %v9085_v28, %v3486_v0  ;;  %3455 = vst.msk [vmem:[#allocation3 + $0x18] sm:$0xff] %vm332_vm0, %v3423_v62  ;;  %7404 = vmatmul.msk.f32.gmra.mxu0 %vm332_vm0, %v3164_v7 }
 0x2b1   : > { %v2626_v26 = vpop.f32.mrf.mxu2 }
 0x2b2   : > { %v2968_v10 = vpop.f32.mrf.mxu3  ;;  %v3554_v56 = vmax.f32 %v3522_v3, 0.0  ;;  %v2742_v11 = vadd.f32 %v2710_v5, %v2626_v26  ;;  %v3168_v3 = vld [vmem:[#allocation2 + $0x1e9] sm:$0xff] }
 0x2b3   : > { %v9123_v13 = vld [vmem:[#allocation2 + $0x2f] sm:$0xff] }
 0x2b4   : > { %3586 = vst.msk [vmem:[#allocation2 + $0x48] sm:$0xff] %vm332_vm0, %v3554_v56  ;;  %v3051_v36 = vld [vmem:[#allocation3 + $0x28] sm:$0xff]  ;;  %7417 = vmatmul.msk.f32.gmra.mxu1 %vm332_vm0, %v9123_v13 }
 0x2b5   : > { %v3083_v4 = vadd.f32 %v3051_v36, %v2965_v54  ;;  %2774 = vst.msk [vmem:[#allocation3 + $0x30] sm:$0xff] %vm332_vm0, %v2742_v11  ;;  %v9129_v58 = vpop.f32.mrf.mxu0 }
 0x2b6   : > { %v3392_v16 = vld [vmem:[#allocation3 + $0x20] sm:$0xff]  ;;  %7341 = vmatmul.msk.f32.gmra.mxu2 %vm332_vm0, %v2481_v51  ;;  %v2714_v51 = vld [vmem:[#allocation3 + $0x50] sm:$0xff] }
 0x2b7   : > { %7373 = vmatmul.msk.f32.gmra.mxu3 %vm332_vm0, %v2823_v15  ;;  %v3487_v9 = vld [vmem:[#allocation3 + $0x18] sm:$0xff]  ;;  %3115 = vst.msk [vmem:[#allocation3 + $0x28] sm:$0xff] %vm332_vm0, %v3083_v4  ;;  %v3424_v39 = vadd.f32 %v3392_v16, %v9088_v52  ;;  %v4270_v52 = vld [vmem:[#allocation9 + $0x50] sm:$0xff] }
 0x2b8   : > { %v3523_v17 = vadd.f32 %v9085_v28, %v3487_v9  ;;  %7405 = vmatmul.msk.f32.gmra.mxu0 %vm332_vm0, %v3165_v29  ;;  %4381 = vmatpush.msrb.mxu3 %v4270_v52  ;;  %v2485_v16 = vld [vmem:[#allocation2 + $0x1ef] sm:$0xff] }
 0x2b9   : > { %3456 = vst.msk [vmem:[#allocation3 + $0x20] sm:$0xff] %vm332_vm0, %v3424_v39  ;;  %v2629_v20 = vpop.f32.mrf.mxu2  ;;  %v2827_v9 = vld [vmem:[#allocation2 + $0x1f0] sm:$0xff] }
 0x2ba   : > { %v2971_v24 = vpop.f32.mrf.mxu3  ;;  %v3555_v46 = vmax.f32 %v3523_v17, 0.0  ;;  %v2743_v63 = vadd.f32 %v2711_v22, %v2629_v20 }
 0x2bb   : > { %v9138_v1 = vld [vmem:[#allocation2 + $0x47] sm:$0xff] }
 0x2bc   : > { %3587 = vst.msk [vmem:[#allocation2 + $0x50] sm:$0xff] %vm332_vm0, %v3555_v46  ;;  %v3052_v18 = vld [vmem:[#allocation3 + $0x30] sm:$0xff]  ;;  %7418 = vmatmul.msk.f32.gmra.mxu1 %vm332_vm0, %v9138_v1 }
 0x2bd   : > { %v3084_v23 = vadd.f32 %v3052_v18, %v2968_v10  ;;  %2775 = vst.msk [vmem:[#allocation3 + $0x38] sm:$0xff] %vm332_vm0, %v2743_v63  ;;  %v9144_v25 = vpop.f32.mrf.mxu0  ;;  %v2715_v18 = vld [vmem:[#allocation3 + $0x58] sm:$0xff] }
 0x2be   : > { %v3393_v42 = vld [vmem:[#allocation3 + $0x28] sm:$0xff]  ;;  %7342 = vmatmul.msk.f32.gmra.mxu2 %vm332_vm0, %v2482_v30 }
 0x2bf   : > { %7374 = vmatmul.msk.f32.gmra.mxu3 %vm332_vm0, %v2824_v31  ;;  %3116 = vst.msk [vmem:[#allocation3 + $0x30] sm:$0xff] %vm332_vm0, %v3084_v23  ;;  %v3425_v53 = vadd.f32 %v3393_v42, %v9099_v12  ;;  %v2828_v42 = vld [vmem:[#allocation2 + $0x208] sm:$0xff] }
 0x2c0   : > { %v3488_v6 = vld [vmem:[#allocation3 + $0x20] sm:$0xff]  ;;  %7406 = vmatmul.msk.f32.gmra.mxu0 %vm332_vm0, %v3166_v32 }
 0x2c1   : > { %v3524_v34 = vadd.f32 %v9085_v28, %v3488_v6  ;;  %3457 = vst.msk [vmem:[#allocation3 + $0x28] sm:$0xff] %vm332_vm0, %v3425_v53  ;;  %v2632_v37 = vpop.f32.mrf.mxu2  ;;  %v2486_v32 = vld [vmem:[#allocation2 + $0x207] sm:$0xff] }
 0x2c2   : > { %v2974_v40 = vpop.f32.mrf.mxu3  ;;  %v2744_v61 = vadd.f32 %v2712_v60, %v2632_v37  ;;  %v3927_v6 = vld [vmem:[#allocation9 + $0x28] sm:$0xff] }
 0x2c3   : > { %v3556_v41 = vmax.f32 %v3524_v34, 0.0  ;;  %v9153_v44 = vld [vmem:[#allocation2 + $0x4f] sm:$0xff]  ;;  %4040 = vmatpush.msrb.mxu2 %v3927_v6 }
 0x2c4   : > { %v3053_v43 = vld [vmem:[#allocation3 + $0x38] sm:$0xff]  ;;  %2776 = vst.msk [vmem:[#allocation3 + $0x40] sm:$0xff] %vm332_vm0, %v2744_v61  ;;  %7419 = vmatmul.msk.f32.gmra.mxu1 %vm332_vm0, %v9153_v44  ;;  %v4269_v34 = vld [vmem:[#allocation9 + $0x48] sm:$0xff] }
 0x2c5   : > { %3588 = vst.msk [vmem:[#allocation2 + $0x68] sm:$0xff] %vm332_vm0, %v3556_v41  ;;  %v3085_v12 = vadd.f32 %v3053_v43, %v2971_v24  ;;  %v9159_v38 = vpop.f32.mrf.mxu0  ;;  %v3169_v24 = vld [vmem:[#allocation2 + $0x1f1] sm:$0xff]  ;;  %4382 = vmatpush.msrb.mxu3 %v4269_v34  ;;  %v3170_v41 = vld [vmem:[#allocation2 + $0x209] sm:$0xff]  ;;  %v4268_v43 = vld [vmem:[#allocation9 + $0x40] sm:$0xff] }
 0x2c6   : > { %v3394_v47 = vld [vmem:[#allocation3 + $0x30] sm:$0xff]  ;;  %7343 = vmatmul.msk.f32.gmra.mxu2 %vm332_vm0, %v2483_v33  ;;  %v3926_v33 = vld [vmem:[#allocation9 + $0x20] sm:$0xff] }
 0x2c7   : > { %7375 = vmatmul.msk.f32.gmra.mxu3 %vm332_vm0, %v2825_v8  ;;  %3117 = vst.msk [vmem:[#allocation3 + $0x38] sm:$0xff] %vm332_vm0, %v3085_v12  ;;  %v3426_v14 = vadd.f32 %v3394_v47, %v9114_v50  ;;  %v4612_v50 = vld [vmem:[#allocation9 + $0x70] sm:$0xff]  ;;  %4041 = vmatpush.msrb.mxu2 %v3926_v33 }
 0x2c8   : > { %v3489_v2 = vld [vmem:[#allocation3 + $0x28] sm:$0xff]  ;;  %7407 = vmatmul.msk.f32.gmra.mxu0 %vm332_vm0, %v3167_v35  ;;  %4383 = vmatpush.msrb.mxu3 %v4268_v43  ;;  %v3173_v6 = vld [vmem:[#allocation2 + $0x231] sm:$0xff] }
 0x2c9   : > { %v3525_v54 = vadd.f32 %v9085_v28, %v3489_v2  ;;  %3458 = vst.msk [vmem:[#allocation3 + $0x30] sm:$0xff] %vm332_vm0, %v3426_v14  ;;  %v2635_v55 = vpop.f32.mrf.mxu2  ;;  %4723 = vmatpush.msrb.mxu0 %v4612_v50  ;;  %v2716_v14 = vld [vmem:[#allocation3 + $0x60] sm:$0xff] }
 0x2ca   : > { %v2977_v59 = vpop.f32.mrf.mxu3  ;;  %v2745_v49 = vadd.f32 %v2713_v57, %v2635_v55  ;;  %v2487_v57 = vld [vmem:[#allocation2 + $0x20f] sm:$0xff] }
 0x2cb   : > { %v3557_v48 = vmax.f32 %v3525_v54, 0.0  ;;  %v3054_v21 = vld [vmem:[#allocation3 + $0x40] sm:$0xff] }
 0x2cc   : > { %v3086_v7 = vadd.f32 %v3054_v21, %v2974_v40  ;;  %2777 = vst.msk [vmem:[#allocation3 + $0x48] sm:$0xff] %vm332_vm0, %v2745_v49  ;;  %v9169_v62 = vld [vmem:[#allocation2 + $0x67] sm:$0xff] }
 0x2cd   : > { %3589 = vst.msk [vmem:[#allocation2 + $0x70] sm:$0xff] %vm332_vm0, %v3557_v48  ;;  %7420 = vmatmul.msk.f32.gmra.mxu1 %vm332_vm0, %v9169_v62  ;;  %v9174_v0 = vpop.f32.mrf.mxu0 }
 0x2ce   : > { %3118 = vst.msk [vmem:[#allocation3 + $0x40] sm:$0xff] %vm332_vm0, %v3086_v7  ;;  %v3395_v26 = vld [vmem:[#allocation3 + $0x38] sm:$0xff]  ;;  %7344 = vmatmul.msk.f32.gmra.mxu2 %vm332_vm0, %v2484_v27 }
 0x2cf   : > { %7376 = vmatmul.msk.f32.gmra.mxu3 %vm332_vm0, %v2826_v45  ;;  %v3427_v5 = vadd.f32 %v3395_v26, %v9129_v58  ;;  %v4954_v58 = vld [vmem:[#allocation9 + $0x90] sm:$0xff] }
 0x2d0   : > { %v3490_v10 = vld [vmem:[#allocation3 + $0x30] sm:$0xff]  ;;  %7408 = vmatmul.msk.f32.gmra.mxu0 %vm332_vm0, %v3168_v3  ;;  %5065 = vmatpush.msrb.mxu1 %v4954_v58 }
 0x2d1   : > { %v3526_v56 = vadd.f32 %v9085_v28, %v3490_v10  ;;  %3459 = vst.msk [vmem:[#allocation3 + $0x38] sm:$0xff] %vm332_vm0, %v3427_v5  ;;  %v2638_v11 = vpop.f32.mrf.mxu2  ;;  %v3171_v45 = vld [vmem:[#allocation2 + $0x211] sm:$0xff]  ;;  %v2717_v5 = vld [vmem:[#allocation3 + $0x68] sm:$0xff] }
 0x2d2   : > { %v2980_v15 = vpop.f32.mrf.mxu3  ;;  %v2746_v36 = vadd.f32 %v2714_v51, %v2638_v11  ;;  %v4611_v51 = vld [vmem:[#allocation9 + $0x68] sm:$0xff] }
 0x2d3   : > { %v3558_v4 = vmax.f32 %v3526_v56, 0.0  ;;  %v3055_v29 = vld [vmem:[#allocation3 + $0x48] sm:$0xff]  ;;  %4724 = vmatpush.msrb.mxu0 %v4611_v51 }
 0x2d4   : > { %v3087_v39 = vadd.f32 %v3055_v29, %v2977_v59  ;;  %2778 = vst.msk [vmem:[#allocation3 + $0x50] sm:$0xff] %vm332_vm0, %v2746_v36  ;;  %v9184_v17 = vld [vmem:[#allocation2 + $0x6f] sm:$0xff]  ;;  %v4610_v29 = vld [vmem:[#allocation9 + $0x60] sm:$0xff] }
 0x2d5   : > { %3590 = vst.msk [vmem:[#allocation2 + $0x88] sm:$0xff] %vm332_vm0, %v3558_v4  ;;  %v3396_v20 = vld [vmem:[#allocation3 + $0x40] sm:$0xff]  ;;  %7421 = vmatmul.msk.f32.gmra.mxu1 %vm332_vm0, %v9184_v17  ;;  %v9189_v22 = vpop.f32.mrf.mxu0  ;;  %v2829_v59 = vld [vmem:[#allocation2 + $0x210] sm:$0xff]  ;;  %v2830_v36 = vld [vmem:[#allocation2 + $0x228] sm:$0xff]  ;;  %4725 = vmatpush.msrb.mxu0 %v4610_v29 }
 0x2d6   : > { %3119 = vst.msk [vmem:[#allocation3 + $0x48] sm:$0xff] %vm332_vm0, %v3087_v39  ;;  %v3428_v46 = vadd.f32 %v3396_v20, %v9144_v25  ;;  %7345 = vmatmul.msk.f32.gmra.mxu2 %vm332_vm0, %v2485_v16  ;;  %v3172_v58 = vld [vmem:[#allocation2 + $0x229] sm:$0xff] }
 0x2d7   : > { %7377 = vmatmul.msk.f32.gmra.mxu3 %vm332_vm0, %v2827_v9 }
 0x2d8   : > { %v3491_v63 = vld [vmem:[#allocation3 + $0x38] sm:$0xff]  ;;  %3460 = vst.msk [vmem:[#allocation3 + $0x40] sm:$0xff] %vm332_vm0, %v3428_v46  ;;  %7409 = vmatmul.msk.f32.gmra.mxu0 %vm332_vm0, %v3169_v24 }
 0x2d9   : > { %v3527_v30 = vadd.f32 %v9085_v28, %v3491_v63  ;;  %v2641_v31 = vpop.f32.mrf.mxu2 }
 0x2da   : > { %v2983_v23 = vpop.f32.mrf.mxu3  ;;  %v2747_v52 = vadd.f32 %v2715_v18, %v2641_v31 }
 0x2db   : > { %v3559_v53 = vmax.f32 %v3527_v30, 0.0  ;;  %v3056_v25 = vld [vmem:[#allocation3 + $0x50] sm:$0xff] }
 0x2dc   : > { %v3088_v37 = vadd.f32 %v3056_v25, %v2980_v15  ;;  %2779 = vst.msk [vmem:[#allocation3 + $0x58] sm:$0xff] %vm332_vm0, %v2747_v52  ;;  %v9199_v60 = vld [vmem:[#allocation2 + $0x87] sm:$0xff]  ;;  %v2718_v30 = vld [vmem:[#allocation3 + $0x70] sm:$0xff] }
 0x2dd   : > { %3591 = vst.msk [vmem:[#allocation2 + $0x90] sm:$0xff] %vm332_vm0, %v3559_v53  ;;  %v3397_v40 = vld [vmem:[#allocation3 + $0x48] sm:$0xff]  ;;  %7422 = vmatmul.msk.f32.gmra.mxu1 %vm332_vm0, %v9199_v60  ;;  %v9204_v61 = vpop.f32.mrf.mxu0 }
 0x2de   : > { %3120 = vst.msk [vmem:[#allocation3 + $0x50] sm:$0xff] %vm332_vm0, %v3088_v37  ;;  %v3429_v8 = vadd.f32 %v3397_v40, %v9159_v38  ;;  %7346 = vmatmul.msk.f32.gmra.mxu2 %vm332_vm0, %v2486_v32  ;;  %v2831_v32 = vld [vmem:[#allocation2 + $0x230] sm:$0xff] }
 0x2df   : > { %7378 = vmatmul.msk.f32.gmra.mxu3 %vm332_vm0, %v2828_v42  ;;  %v3492_v12 = vld [vmem:[#allocation3 + $0x40] sm:$0xff] }
 0x2e0   : > { %v3528_v35 = vadd.f32 %v9085_v28, %v3492_v12  ;;  %3461 = vst.msk [vmem:[#allocation3 + $0x48] sm:$0xff] %vm332_vm0, %v3429_v8  ;;  %7410 = vmatmul.msk.f32.gmra.mxu0 %vm332_vm0, %v3170_v41  ;;  %v2719_v8 = vld [vmem:[#allocation3 + $0x78] sm:$0xff] }
 0x2e1   : > { %v2644_v47 = vpop.f32.mrf.mxu2 }
 0x2e2   : > { %v2986_v2 = vpop.f32.mrf.mxu3  ;;  %v3560_v54 = vmax.f32 %v3528_v35, 0.0  ;;  %v2748_v55 = vadd.f32 %v2716_v14, %v2644_v47  ;;  %v3765_v47 = vpop.f32.mrf.mxu1 }
 0x2e3   : > { %v3057_v38 = vld [vmem:[#allocation3 + $0x58] sm:$0xff]  ;;  %3861 = vst.msk [vmem:[#allocation3] sm:$0xff] %vm332_vm0, %v3765_v47 }
 0x2e4   : > { %3592 = vst.msk [vmem:[#allocation2 + $0xa8] sm:$0xff] %vm332_vm0, %v3560_v54  ;;  %v3089_v49 = vadd.f32 %v3057_v38, %v2983_v23  ;;  %v9214_v48 = vld [vmem:[#allocation2 + $0x8f] sm:$0xff] }
 0x2e5   : > { %v3398_v21 = vld [vmem:[#allocation3 + $0x50] sm:$0xff]  ;;  %2780 = vst.msk [vmem:[#allocation3 + $0x60] sm:$0xff] %vm332_vm0, %v2748_v55  ;;  %7423 = vmatmul.msk.f32.gmra.mxu1 %vm332_vm0, %v9214_v48  ;;  %v9219_v27 = vpop.f32.mrf.mxu0 }
 0x2e6   : > { %3121 = vst.msk [vmem:[#allocation3 + $0x58] sm:$0xff] %vm332_vm0, %v3089_v49  ;;  %v3430_v7 = vadd.f32 %v3398_v21, %v9174_v0  ;;  %7347 = vmatmul.msk.f32.gmra.mxu2 %vm332_vm0, %v2487_v57  ;;  %v2488_v0 = vld [vmem:[#allocation2 + $0x227] sm:$0xff] }
 0x2e7   : > { %7379 = vmatmul.msk.f32.gmra.mxu3 %vm332_vm0, %v2829_v59  ;;  %v3493_v50 = vld [vmem:[#allocation3 + $0x48] sm:$0xff] }
 0x2e8   : > { %v3529_v3 = vadd.f32 %v9085_v28, %v3493_v50  ;;  %3462 = vst.msk [vmem:[#allocation3 + $0x50] sm:$0xff] %vm332_vm0, %v3430_v7  ;;  %7411 = vmatmul.msk.f32.gmra.mxu0 %vm332_vm0, %v3171_v45  ;;  %v4235_v54 = vld [vmem:[#allocation2 + $0x9] sm:$0xff]  ;;  %v2720_v7 = vld [vmem:[#allocation3 + $0x80] sm:$0xff] }
 0x2e9   : > { %v2647_v26 = vpop.f32.mrf.mxu2 }
 0x2ea   : > { %v2989_v10 = vpop.f32.mrf.mxu3  ;;  %v3561_v56 = vmax.f32 %v3529_v3, 0.0  ;;  %v2749_v11 = vadd.f32 %v2717_v5, %v2647_v26  ;;  %v3768_v26 = vpop.f32.mrf.mxu1 }
 0x2eb   : > { %v9228_v15 = vld [vmem:[#allocation2 + $0xa7] sm:$0xff]  ;;  %3862 = vst.msk [vmem:[#allocation3 + $0x8] sm:$0xff] %vm332_vm0, %v3768_v26 }
 0x2ec   : > { %3593 = vst.msk [vmem:[#allocation2 + $0xb0] sm:$0xff] %vm332_vm0, %v3561_v56  ;;  %v3058_v4 = vld [vmem:[#allocation3 + $0x60] sm:$0xff]  ;;  %v3894_v56 = vld [vmem:[#allocation2 + $0x10] sm:$0xff] }
 0x2ed   : > { %v3090_v16 = vadd.f32 %v3058_v4, %v2986_v2  ;;  %v3399_v9 = vld [vmem:[#allocation3 + $0x58] sm:$0xff]  ;;  %2781 = vst.msk [vmem:[#allocation3 + $0x68] sm:$0xff] %vm332_vm0, %v2749_v11  ;;  %7424 = vmatmul.msk.f32.gmra.mxu1 %vm332_vm0, %v9228_v15  ;;  %v9234_v39 = vpop.f32.mrf.mxu0  ;;  %v3893_v2 = vld [vmem:[#allocation2 + $0x8] sm:$0xff] }
 0x2ee   : > { %v3431_v20 = vadd.f32 %v3399_v9, %v9189_v22  ;;  %7348 = vmatmul.msk.f32.gmra.mxu2 %vm332_vm0, %v2488_v0  ;;  %v2489_v22 = vld [vmem:[#allocation2 + $0x22f] sm:$0xff] }
 0x2ef   : > { %7380 = vmatmul.msk.f32.gmra.mxu3 %vm332_vm0, %v2830_v36  ;;  %v3494_v24 = vld [vmem:[#allocation3 + $0x50] sm:$0xff]  ;;  %3122 = vst.msk [vmem:[#allocation3 + $0x60] sm:$0xff] %vm332_vm0, %v3090_v16  ;;  %v2721_v9 = vld [vmem:[#allocation3 + $0x88] sm:$0xff] }
 0x2f0   : > { %v3530_v46 = vadd.f32 %v9085_v28, %v3494_v24  ;;  %3463 = vst.msk [vmem:[#allocation3 + $0x58] sm:$0xff] %vm332_vm0, %v3431_v20  ;;  %7412 = vmatmul.msk.f32.gmra.mxu0 %vm332_vm0, %v3172_v58  ;;  %v4236_v11 = vld [vmem:[#allocation2 + $0x11] sm:$0xff] }
 0x2f1   : > { %v2650_v63 = vpop.f32.mrf.mxu2 }
 0x2f2   : > { %v2992_v31 = vpop.f32.mrf.mxu3  ;;  %v3562_v18 = vmax.f32 %v3530_v46, 0.0  ;;  %v2750_v23 = vadd.f32 %v2718_v30, %v2650_v63 }
 0x2f3   : > { %v9243_v52 = vld [vmem:[#allocation2 + $0xaf] sm:$0xff] }
 0x2f4   : > { %3594 = vst.msk [vmem:[#allocation2 + $0xc8] sm:$0xff] %vm332_vm0, %v3562_v18  ;;  %v3059_v42 = vld [vmem:[#allocation3 + $0x68] sm:$0xff] }
 0x2f5   : > { %v3091_v53 = vadd.f32 %v3059_v42, %v2989_v10  ;;  %2782 = vst.msk [vmem:[#allocation3 + $0x70] sm:$0xff] %vm332_vm0, %v2750_v23  ;;  %7425 = vmatmul.msk.f32.gmra.mxu1 %vm332_vm0, %v9243_v52  ;;  %v9249_v25 = vpop.f32.mrf.mxu0 }
 0x2f6   : > { %v3400_v34 = vld [vmem:[#allocation3 + $0x60] sm:$0xff]  ;;  %7349 = vmatmul.msk.f32.gmra.mxu2 %vm332_vm0, %v2489_v22 }
 0x2f7   : > { %7381 = vmatmul.msk.f32.gmra.mxu3 %vm332_vm0, %v2831_v32  ;;  %v3495_v37 = vld [vmem:[#allocation3 + $0x58] sm:$0xff]  ;;  %3123 = vst.msk [vmem:[#allocation3 + $0x68] sm:$0xff] %vm332_vm0, %v3091_v53  ;;  %v3432_v40 = vadd.f32 %v3400_v34, %v9204_v61  ;;  %v2722_v53 = vld [vmem:[#allocation3 + $0x90] sm:$0xff] }
 0x2f8   : > { %v3531_v41 = vadd.f32 %v9085_v28, %v3495_v37  ;;  %7413 = vmatmul.msk.f32.gmra.mxu0 %vm332_vm0, %v3173_v6 }
 0x2f9   : > { %3464 = vst.msk [vmem:[#allocation3 + $0x60] sm:$0xff] %vm332_vm0, %v3432_v40  ;;  %v2653_v33 = vpop.f32.mrf.mxu2 }
 0x2fa   : > { %v2995_v43 = vpop.f32.mrf.mxu3  ;;  %v3563_v12 = vmax.f32 %v3531_v41, 0.0  ;;  %v2751_v35 = vadd.f32 %v2719_v8, %v2653_v33 }
 0x2fb   : > { %v9258_v14 = vld [vmem:[#allocation2 + $0xc7] sm:$0xff] }
 0x2fc   : > { %3595 = vst.msk [vmem:[#allocation2 + $0xd0] sm:$0xff] %vm332_vm0, %v3563_v12  ;;  %v3060_v61 = vld [vmem:[#allocation3 + $0x70] sm:$0xff] }
 0x2fd   : > { %v3092_v55 = vadd.f32 %v3060_v61, %v2992_v31  ;;  %2783 = vst.msk [vmem:[#allocation3 + $0x78] sm:$0xff] %vm332_vm0, %v2751_v35  ;;  %7426 = vmatmul.msk.f32.gmra.mxu1 %vm332_vm0, %v9258_v14  ;;  %v9265_v38 = vpop.f32.mrf.mxu0  ;;  %v2723_v61 = vld [vmem:[#allocation3 + $0x98] sm:$0xff] }
 0x2fe   : > { %v3401_v57 = vld [vmem:[#allocation3 + $0x68] sm:$0xff]  ;;  %7446 = vmatmul.msk.f32.vlgmr.msrb.gmra.mxu2 %vm332_vm0, %v3893_v2 }
 0x2ff   : > { %7478 = vmatmul.msk.f32.vlgmr.msrb.gmra.mxu3 %vm332_vm0, %v4235_v54  ;;  %3124 = vst.msk [vmem:[#allocation3 + $0x70] sm:$0xff] %vm332_vm0, %v3092_v55  ;;  %v3433_v59 = vadd.f32 %v3401_v57, %v9219_v27 }
 0x300   : > { %v3496_v49 = vld [vmem:[#allocation3 + $0x60] sm:$0xff]  ;;  %7510 = vmatmul.msk.f32.vlgmr.msrb.gmra.mxu0 %vm332_vm0, %v9108_v19 }
 0x301   : > { %v3532_v21 = vadd.f32 %v9085_v28, %v3496_v49  ;;  %3465 = vst.msk [vmem:[#allocation3 + $0x68] sm:$0xff] %vm332_vm0, %v3433_v59  ;;  %v2656_v45 = vpop.f32.mrf.mxu2 }
 0x302   : > { %v2998_v50 = vpop.f32.mrf.mxu3  ;;  %v2752_v3 = vadd.f32 %v2720_v7, %v2656_v45  ;;  %v4239_v7 = vld [vmem:[#allocation2 + $0x49] sm:$0xff] }
 0x303   : > { %v3564_v5 = vmax.f32 %v3532_v21, 0.0  ;;  %v9275_v10 = vld [vmem:[#allocation2 + $0xcf] sm:$0xff] }
 0x304   : > { %v3061_v27 = vld [vmem:[#allocation3 + $0x78] sm:$0xff]  ;;  %2784 = vst.msk [vmem:[#allocation3 + $0x80] sm:$0xff] %vm332_vm0, %v2752_v3 }
 0x305   : > { %3596 = vst.msk [vmem:[#allocation2 + $0xe8] sm:$0xff] %vm332_vm0, %v3564_v5  ;;  %v3093_v19 = vadd.f32 %v3061_v27, %v2995_v43  ;;  %7427 = vmatmul.msk.f32.gmra.mxu1 %vm332_vm0, %v9275_v10  ;;  %v9282_v51 = vpop.f32.mrf.mxu0  ;;  %v4238_v43 = vld [vmem:[#allocation2 + $0x31] sm:$0xff] }
 0x306   : > { %v3402_v0 = vld [vmem:[#allocation3 + $0x70] sm:$0xff]  ;;  %7447 = vmatmul.msk.f32.gmra.mxu2 %vm332_vm0, %v3894_v56 }
 0x307   : > { %7479 = vmatmul.msk.f32.gmra.mxu3 %vm332_vm0, %v4236_v11  ;;  %3125 = vst.msk [vmem:[#allocation3 + $0x78] sm:$0xff] %vm332_vm0, %v3093_v19  ;;  %v3434_v36 = vadd.f32 %v3402_v0, %v9234_v39  ;;  %v4237_v39 = vld [vmem:[#allocation2 + $0x29] sm:$0xff]  ;;  %v2724_v11 = vld [vmem:[#allocation3 + $0xa0] sm:$0xff] }
 0x308   : > { %v3497_v4 = vld [vmem:[#allocation3 + $0x68] sm:$0xff]  ;;  %7511 = vmatmul.msk.f32.gmra.mxu0 %vm332_vm0, %v9123_v13 }
 0x309   : > { %v3533_v29 = vadd.f32 %v9085_v28, %v3497_v4  ;;  %3466 = vst.msk [vmem:[#allocation3 + $0x70] sm:$0xff] %vm332_vm0, %v3434_v36  ;;  %v2659_v16 = vpop.f32.mrf.mxu2  ;;  %v9298_v13 = vld [vmem:[#allocation2 + $0x28] sm:$0xff] }
 0x30a   : > { %v3001_v58 = vpop.f32.mrf.mxu3  ;;  %v2753_v20 = vadd.f32 %v2721_v9, %v2659_v16  ;;  %v9355_v16 = vld [vmem:[#allocation2 + $0x50] sm:$0xff] }
 0x30b   : > { %v3565_v24 = vmax.f32 %v3533_v29, 0.0  ;;  %v3062_v46 = vld [vmem:[#allocation3 + $0x80] sm:$0xff] }
 0x30c   : > { %v3094_v63 = vadd.f32 %v3062_v46, %v2998_v50  ;;  %2785 = vst.msk [vmem:[#allocation3 + $0x88] sm:$0xff] %vm332_vm0, %v2753_v20  ;;  %v9293_v30 = vld [vmem:[#allocation2 + $0xe7] sm:$0xff] }
 0x30d   : > { %3597 = vst.msk [vmem:[#allocation2 + $0xf0] sm:$0xff] %vm332_vm0, %v3565_v24  ;;  %7428 = vmatmul.msk.f32.gmra.mxu1 %vm332_vm0, %v9293_v30  ;;  %v9300_v31 = vpop.f32.mrf.mxu0 }
 0x30e   : > { %3126 = vst.msk [vmem:[#allocation3 + $0x80] sm:$0xff] %vm332_vm0, %v3094_v63  ;;  %v3403_v18 = vld [vmem:[#allocation3 + $0x78] sm:$0xff]  ;;  %7448 = vmatmul.msk.f32.gmra.mxu2 %vm332_vm0, %v9298_v13  ;;  %v2725_v63 = vld [vmem:[#allocation3 + $0xa8] sm:$0xff] }
 0x30f   : > { %7480 = vmatmul.msk.f32.gmra.mxu3 %vm332_vm0, %v4237_v39  ;;  %v3435_v23 = vadd.f32 %v3403_v18, %v9249_v25  ;;  %v4953_v25 = vld [vmem:[#allocation9 + $0x88] sm:$0xff] }
 0x310   : > { %v3498_v22 = vld [vmem:[#allocation3 + $0x70] sm:$0xff]  ;;  %7512 = vmatmul.msk.f32.gmra.mxu0 %vm332_vm0, %v9138_v1  ;;  %5066 = vmatpush.msrb.mxu1 %v4953_v25 }
 0x311   : > { %v3534_v32 = vadd.f32 %v9085_v28, %v3498_v22  ;;  %3467 = vst.msk [vmem:[#allocation3 + $0x78] sm:$0xff] %vm332_vm0, %v3435_v23  ;;  %v2662_v42 = vpop.f32.mrf.mxu2  ;;  %v9317_v1 = vld [vmem:[#allocation2 + $0x30] sm:$0xff] }
 0x312   : > { %v3004_v6 = vpop.f32.mrf.mxu3  ;;  %v2754_v34 = vadd.f32 %v2722_v53, %v2662_v42 }
 0x313   : > { %v3566_v37 = vmax.f32 %v3534_v32, 0.0  ;;  %v3063_v40 = vld [vmem:[#allocation3 + $0x88] sm:$0xff] }
 0x314   : > { %v3095_v41 = vadd.f32 %v3063_v40, %v3001_v58  ;;  %2786 = vst.msk [vmem:[#allocation3 + $0x90] sm:$0xff] %vm332_vm0, %v2754_v34  ;;  %v9312_v33 = vld [vmem:[#allocation2 + $0xef] sm:$0xff] }
 0x315   : > { %3598 = vst.msk [vmem:[#allocation2 + $0x108] sm:$0xff] %vm332_vm0, %v3566_v37  ;;  %v3404_v8 = vld [vmem:[#allocation3 + $0x80] sm:$0xff]  ;;  %7429 = vmatmul.msk.f32.gmra.mxu1 %vm332_vm0, %v9312_v33  ;;  %v9319_v12 = vpop.f32.mrf.mxu0 }
 0x316   : > { %3127 = vst.msk [vmem:[#allocation3 + $0x88] sm:$0xff] %vm332_vm0, %v3095_v41  ;;  %v3436_v35 = vadd.f32 %v3404_v8, %v9265_v38  ;;  %7449 = vmatmul.msk.f32.gmra.mxu2 %vm332_vm0, %v9317_v1  ;;  %v2726_v8 = vld [vmem:[#allocation3 + $0xb0] sm:$0xff] }
 0x317   : > { %7481 = vmatmul.msk.f32.gmra.mxu3 %vm332_vm0, %v4238_v43 }
 0x318   : > { %v3499_v47 = vld [vmem:[#allocation3 + $0x78] sm:$0xff]  ;;  %3468 = vst.msk [vmem:[#allocation3 + $0x80] sm:$0xff] %vm332_vm0, %v3436_v35  ;;  %7513 = vmatmul.msk.f32.gmra.mxu0 %vm332_vm0, %v9153_v44  ;;  %v9336_v44 = vld [vmem:[#allocation2 + $0x48] sm:$0xff] }
 0x319   : > { %v3535_v2 = vadd.f32 %v9085_v28, %v3499_v47  ;;  %v2665_v54 = vpop.f32.mrf.mxu2 }
 0x31a   : > { %v3007_v55 = vpop.f32.mrf.mxu3  ;;  %v2755_v57 = vadd.f32 %v2723_v61, %v2665_v54 }
 0x31b   : > { %v3567_v59 = vmax.f32 %v3535_v2, 0.0  ;;  %v3064_v38 = vld [vmem:[#allocation3 + $0x90] sm:$0xff] }
 0x31c   : > { %v3096_v49 = vadd.f32 %v3064_v38, %v3004_v6  ;;  %2787 = vst.msk [vmem:[#allocation3 + $0x98] sm:$0xff] %vm332_vm0, %v2755_v57  ;;  %v9331_v21 = vld [vmem:[#allocation2 + $0x107] sm:$0xff] }
 0x31d   : > { %3599 = vst.msk [vmem:[#allocation2 + $0x110] sm:$0xff] %vm332_vm0, %v3567_v59  ;;  %v3405_v45 = vld [vmem:[#allocation3 + $0x88] sm:$0xff]  ;;  %7430 = vmatmul.msk.f32.gmra.mxu1 %vm332_vm0, %v9331_v21  ;;  %v9338_v50 = vpop.f32.mrf.mxu0 }
 0x31e   : > { %3128 = vst.msk [vmem:[#allocation3 + $0x90] sm:$0xff] %vm332_vm0, %v3096_v49  ;;  %v3437_v3 = vadd.f32 %v3405_v45, %v9282_v51  ;;  %7450 = vmatmul.msk.f32.gmra.mxu2 %vm332_vm0, %v9336_v44  ;;  %v4241_v6 = vld [vmem:[#allocation2 + $0x69] sm:$0xff] }
 0x31f   : > { %7482 = vmatmul.msk.f32.gmra.mxu3 %vm332_vm0, %v4239_v7  ;;  %v3500_v26 = vld [vmem:[#allocation3 + $0x80] sm:$0xff] }
 0x320   : > { %v3536_v5 = vadd.f32 %v9085_v28, %v3500_v26  ;;  %3469 = vst.msk [vmem:[#allocation3 + $0x88] sm:$0xff] %vm332_vm0, %v3437_v3  ;;  %7514 = vmatmul.msk.f32.gmra.mxu0 %vm332_vm0, %v9169_v62  ;;  %v4240_v62 = vld [vmem:[#allocation2 + $0x51] sm:$0xff] }
 0x321   : > { %v2668_v56 = vpop.f32.mrf.mxu2  ;;  %v2727_v3 = vld [vmem:[#allocation3 + $0xb8] sm:$0xff] }
 0x322   : > { %v3010_v27 = vpop.f32.mrf.mxu3  ;;  %v3568_v19 = vmax.f32 %v3536_v5, 0.0  ;;  %v2756_v0 = vadd.f32 %v2724_v11, %v2668_v56 }
 0x323   : > { %v3065_v36 = vld [vmem:[#allocation3 + $0x98] sm:$0xff] }
 0x324   : > { %3600 = vst.msk [vmem:[#allocation2 + $0x128] sm:$0xff] %vm332_vm0, %v3568_v19  ;;  %v3097_v51 = vadd.f32 %v3065_v36, %v3007_v55  ;;  %v9350_v4 = vld [vmem:[#allocation2 + $0x10f] sm:$0xff] }
 0x325   : > { %v3406_v29 = vld [vmem:[#allocation3 + $0x90] sm:$0xff]  ;;  %2788 = vst.msk [vmem:[#allocation3 + $0xa0] sm:$0xff] %vm332_vm0, %v2756_v0  ;;  %7431 = vmatmul.msk.f32.gmra.mxu1 %vm332_vm0, %v9350_v4  ;;  %v9357_v9 = vpop.f32.mrf.mxu0 }
 0x326   : > { %3129 = vst.msk [vmem:[#allocation3 + $0x98] sm:$0xff] %vm332_vm0, %v3097_v51  ;;  %v3438_v58 = vadd.f32 %v3406_v29, %v9300_v31  ;;  %7451 = vmatmul.msk.f32.gmra.mxu2 %vm332_vm0, %v9355_v16  ;;  %v4242_v55 = vld [vmem:[#allocation2 + $0x71] sm:$0xff] }
 0x327   : > { %7483 = vmatmul.msk.f32.gmra.mxu3 %vm332_vm0, %v4240_v62  ;;  %v3501_v20 = vld [vmem:[#allocation3 + $0x88] sm:$0xff]  ;;  %v9429_v62 = vld [vmem:[%s10838_s2] ss:$0 sm:$0xff] }
 0x328   : > { %v3537_v24 = vadd.f32 %v9085_v28, %v3501_v20  ;;  %3470 = vst.msk [vmem:[#allocation3 + $0x90] sm:$0xff] %vm332_vm0, %v3438_v58  ;;  %7515 = vmatmul.msk.f32.gmra.mxu0 %vm332_vm0, %v9184_v17  ;;  %v9375_v17 = vld [vmem:[#allocation2 + $0x68] sm:$0xff] }
 0x329   : > { %v2671_v46 = vpop.f32.mrf.mxu2  ;;  %v3771_v22 = vpop.f32.mrf.mxu1 }
 0x32a   : > { %v3013_v39 = vpop.f32.mrf.mxu3  ;;  %v3569_v18 = vmax.f32 %v3537_v24, 0.0  ;;  %v2757_v23 = vadd.f32 %v2725_v63, %v2671_v46  ;;  %3863 = vst.msk [vmem:[#allocation3 + $0x10] sm:$0xff] %vm332_vm0, %v3771_v22  ;;  %v2728_v24 = vld [vmem:[#allocation3 + $0xc0] sm:$0xff]  ;;  %v9440_v22 = vld [vmem:[#allocation2 + $0x90] sm:$0xff] }
 0x32b   : > { %v9369_v31 = vld [vmem:[#allocation2 + $0x127] sm:$0xff] }
 0x32c   : > { %3601 = vst.msk [vmem:[#allocation2 + $0x130] sm:$0xff] %vm332_vm0, %v3569_v18  ;;  %v3066_v32 = vld [vmem:[#allocation3 + $0xa0] sm:$0xff] }
 0x32d   : > { %v3098_v42 = vadd.f32 %v3066_v32, %v3010_v27  ;;  %v3407_v53 = vld [vmem:[#allocation3 + $0x98] sm:$0xff]  ;;  %2789 = vst.msk [vmem:[#allocation3 + $0xa8] sm:$0xff] %vm332_vm0, %v2757_v23  ;;  %7432 = vmatmul.msk.f32.gmra.mxu1 %vm332_vm0, %v9369_v31  ;;  %v9377_v34 = vpop.f32.mrf.mxu0 }
 0x32e   : > { %v3439_v37 = vadd.f32 %v3407_v53, %v9319_v12  ;;  %7452 = vmatmul.msk.f32.gmra.mxu2 %vm332_vm0, %v9375_v17  ;;  %v4244_v32 = vld [vmem:[#allocation2 + $0x91] sm:$0xff] }
 0x32f   : > { %7484 = vmatmul.msk.f32.gmra.mxu3 %vm332_vm0, %v4241_v6  ;;  %v3502_v40 = vld [vmem:[#allocation3 + $0x90] sm:$0xff]  ;;  %3130 = vst.msk [vmem:[#allocation3 + $0xa0] sm:$0xff] %vm332_vm0, %v3098_v42 }
 0x330   : > { %v3538_v41 = vadd.f32 %v9085_v28, %v3502_v40  ;;  %3471 = vst.msk [vmem:[#allocation3 + $0x98] sm:$0xff] %vm332_vm0, %v3439_v37  ;;  %7516 = vmatmul.msk.f32.gmra.mxu0 %vm332_vm0, %v9199_v60  ;;  %v9395_v60 = vld [vmem:[#allocation2 + $0x70] sm:$0xff] }
 0x331   : > { %v2674_v25 = vpop.f32.mrf.mxu2  ;;  %v3774_v47 = vpop.f32.mrf.mxu1 }
 0x332   : > { %v3016_v43 = vpop.f32.mrf.mxu3  ;;  %v3570_v35 = vmax.f32 %v3538_v41, 0.0  ;;  %v2758_v12 = vadd.f32 %v2726_v8, %v2674_v25  ;;  %3864 = vst.msk [vmem:[#allocation3 + $0x18] sm:$0xff] %vm332_vm0, %v3774_v47  ;;  %v2729_v25 = vld [vmem:[#allocation3 + $0xc8] sm:$0xff] }
 0x333   : > { %v9389_v2 = vld [vmem:[#allocation2 + $0x12f] sm:$0xff] }
 0x334   : > { %3602 = vst.msk [vmem:[#allocation2 + $0x148] sm:$0xff] %vm332_vm0, %v3570_v35  ;;  %v3067_v54 = vld [vmem:[#allocation3 + $0xa8] sm:$0xff] }
 0x335   : > { %v3099_v61 = vadd.f32 %v3067_v54, %v3013_v39  ;;  %2790 = vst.msk [vmem:[#allocation3 + $0xb0] sm:$0xff] %vm332_vm0, %v2758_v12  ;;  %7433 = vmatmul.msk.f32.gmra.mxu1 %vm332_vm0, %v9389_v2  ;;  %v9397_v57 = vpop.f32.mrf.mxu0 }
 0x336   : > { %v3408_v59 = vld [vmem:[#allocation3 + $0xa0] sm:$0xff]  ;;  %7453 = vmatmul.msk.f32.gmra.mxu2 %vm332_vm0, %v9395_v60 }
 0x337   : > { %7485 = vmatmul.msk.f32.gmra.mxu3 %vm332_vm0, %v4242_v55  ;;  %v3503_v38 = vld [vmem:[#allocation3 + $0x98] sm:$0xff]  ;;  %3131 = vst.msk [vmem:[#allocation3 + $0xa8] sm:$0xff] %vm332_vm0, %v3099_v61  ;;  %v3440_v49 = vadd.f32 %v3408_v59, %v9338_v50  ;;  %v4245_v61 = vld [vmem:[#allocation2 + $0xa9] sm:$0xff] }
 0x338   : > { %v3539_v45 = vadd.f32 %v9085_v28, %v3503_v38  ;;  %7517 = vmatmul.msk.f32.gmra.mxu0 %vm332_vm0, %v9214_v48  ;;  %v9415_v28 = vld [vmem:[#allocation2 + $0x88] sm:$0xff] }
 0x339   : > { %3472 = vst.msk [vmem:[#allocation3 + $0xa0] sm:$0xff] %vm332_vm0, %v3440_v49  ;;  %v2677_v7 = vpop.f32.mrf.mxu2  ;;  %v3777_v11 = vpop.f32.mrf.mxu1  ;;  %v4243_v48 = vld [vmem:[#allocation2 + $0x89] sm:$0xff] }
 0x33a   : > { %v3019_v26 = vpop.f32.mrf.mxu3  ;;  %v3571_v5 = vmax.f32 %v3539_v45, 0.0  ;;  %v2759_v56 = vadd.f32 %v2727_v3, %v2677_v7  ;;  %3865 = vst.msk [vmem:[#allocation3 + $0x20] sm:$0xff] %vm332_vm0, %v3777_v11  ;;  %v2730_v3 = vld [vmem:[#allocation3 + $0xd0] sm:$0xff] }
 0x33b   : > { %v9409_v27 = vld [vmem:[#allocation2 + $0x147] sm:$0xff] }
 0x33c   : > { %3603 = vst.msk [vmem:[#allocation2 + $0x150] sm:$0xff] %vm332_vm0, %v3571_v5  ;;  %v3068_v50 = vld [vmem:[#allocation3 + $0xb0] sm:$0xff] }
 0x33d   : > { %v3100_v19 = vadd.f32 %v3068_v50, %v3016_v43  ;;  %2791 = vst.msk [vmem:[#allocation3 + $0xb8] sm:$0xff] %vm332_vm0, %v2759_v56  ;;  %7434 = vmatmul.msk.f32.gmra.mxu1 %vm332_vm0, %v9409_v27  ;;  %v9417_v0 = vpop.f32.mrf.mxu0 }
 0x33e   : > { %v3409_v36 = vld [vmem:[#allocation3 + $0xa8] sm:$0xff]  ;;  %7454 = vmatmul.msk.f32.gmra.mxu2 %vm332_vm0, %v9415_v28 }
 0x33f   : > { %7486 = vmatmul.msk.f32.gmra.mxu3 %vm332_vm0, %v4243_v48  ;;  %3132 = vst.msk [vmem:[#allocation3 + $0xb0] sm:$0xff] %vm332_vm0, %v3100_v19  ;;  %v3441_v51 = vadd.f32 %v3409_v36, %v9357_v9  ;;  %v4952_v48 = vld [vmem:[#allocation9 + $0x80] sm:$0xff]  ;;  %v9480_v36 = vld [vmem:[#allocation2 + $0xb0] sm:$0xff] }
 0x340   : > { %v3504_v29 = vld [vmem:[#allocation3 + $0xa0] sm:$0xff]  ;;  %7518 = vmatmul.msk.f32.gmra.mxu0 %vm332_vm0, %v9228_v15  ;;  %5067 = vmatpush.msrb.mxu1 %v4952_v48 }
 0x341   : > { %v3540_v58 = vadd.f32 %v9429_v62, %v3504_v29  ;;  %3473 = vst.msk [vmem:[#allocation3 + $0xa8] sm:$0xff] %vm332_vm0, %v3441_v51  ;;  %v2680_v20 = vpop.f32.mrf.mxu2  ;;  %v3780_v39 = vpop.f32.mrf.mxu1  ;;  %v4246_v51 = vld [vmem:[#allocation2 + $0xb1] sm:$0xff] }
 0x342   : > { %v3022_v46 = vpop.f32.mrf.mxu3  ;;  %v2760_v63 = vadd.f32 %v2728_v24, %v2680_v20  ;;  %3866 = vst.msk [vmem:[#allocation3 + $0x28] sm:$0xff] %vm332_vm0, %v3780_v39 }
 0x343   : > { %v3572_v18 = vmax.f32 %v3540_v58, 0.0  ;;  %v9434_v9 = vld [vmem:[#allocation2 + $0x14f] sm:$0xff] }
 0x344   : > { %v3069_v15 = vld [vmem:[#allocation3 + $0xb8] sm:$0xff]  ;;  %2792 = vst.msk [vmem:[#allocation3 + $0xc0] sm:$0xff] %vm332_vm0, %v2760_v63 }
 0x345   : > { %3604 = vst.msk [vmem:[#allocation2 + $0x168] sm:$0xff] %vm332_vm0, %v3572_v18  ;;  %v3101_v23 = vadd.f32 %v3069_v15, %v3019_v26  ;;  %7435 = vmatmul.msk.f32.gmra.mxu1 %vm332_vm0, %v9434_v9  ;;  %v9442_v42 = vpop.f32.mrf.mxu0  ;;  %v2731_v63 = vld [vmem:[#allocation3 + $0xd8] sm:$0xff] }
 0x346   : > { %v3410_v53 = vld [vmem:[#allocation3 + $0xb0] sm:$0xff]  ;;  %7455 = vmatmul.msk.f32.gmra.mxu2 %vm332_vm0, %v9440_v22 }
 0x347   : > { %7487 = vmatmul.msk.f32.gmra.mxu3 %vm332_vm0, %v4244_v32  ;;  %3133 = vst.msk [vmem:[#allocation3 + $0xb8] sm:$0xff] %vm332_vm0, %v3101_v23  ;;  %v3442_v6 = vadd.f32 %v3410_v53, %v9377_v34 }
 0x348   : > { %v3505_v37 = vld [vmem:[#allocation3 + $0xa8] sm:$0xff]  ;;  %7519 = vmatmul.msk.f32.gmra.mxu0 %vm332_vm0, %v9243_v52 }
 0x349   : > { %v3541_v40 = vadd.f32 %v9429_v62, %v3505_v37  ;;  %3474 = vst.msk [vmem:[#allocation3 + $0xb0] sm:$0xff] %vm332_vm0, %v3442_v6  ;;  %v2683_v41 = vpop.f32.mrf.mxu2  ;;  %v9460_v52 = vld [vmem:[#allocation2 + $0xa8] sm:$0xff] }
 0x34a   : > { %v3025_v8 = vpop.f32.mrf.mxu3  ;;  %v2761_v43 = vadd.f32 %v2729_v25, %v2683_v41  ;;  %v3783_v35 = vpop.f32.mrf.mxu1  ;;  %v4247_v37 = vld [vmem:[#allocation2 + $0xc9] sm:$0xff] }
 0x34b   : > { %v3573_v12 = vmax.f32 %v3541_v40, 0.0  ;;  %v3070_v47 = vld [vmem:[#allocation3 + $0xc0] sm:$0xff]  ;;  %3867 = vst.msk [vmem:[#allocation3 + $0x30] sm:$0xff] %vm332_vm0, %v3783_v35 }
 0x34c   : > { %v3102_v54 = vadd.f32 %v3070_v47, %v3022_v46  ;;  %2793 = vst.msk [vmem:[#allocation3 + $0xc8] sm:$0xff] %vm332_vm0, %v2761_v43  ;;  %v9455_v34 = vld [vmem:[#allocation2 + $0x167] sm:$0xff] }
 0x34d   : > { %3605 = vst.msk [vmem:[#allocation2 + $0x170] sm:$0xff] %vm332_vm0, %v3573_v12  ;;  %7436 = vmatmul.msk.f32.gmra.mxu1 %vm332_vm0, %v9455_v34  ;;  %v9462_v55 = vpop.f32.mrf.mxu0  ;;  %v2732_v35 = vld [vmem:[#allocation3 + $0xe0] sm:$0xff] }
 0x34e   : > { %3134 = vst.msk [vmem:[#allocation3 + $0xc0] sm:$0xff] %vm332_vm0, %v3102_v54  ;;  %v3411_v59 = vld [vmem:[#allocation3 + $0xb8] sm:$0xff]  ;;  %7456 = vmatmul.msk.f32.gmra.mxu2 %vm332_vm0, %v9460_v52 }
 0x34f   : > { %7488 = vmatmul.msk.f32.gmra.mxu3 %vm332_vm0, %v4245_v61  ;;  %v3443_v38 = vadd.f32 %v3411_v59, %v9397_v57 }
 0x350   : > { %v3506_v49 = vld [vmem:[#allocation3 + $0xb0] sm:$0xff]  ;;  %7520 = vmatmul.msk.f32.gmra.mxu0 %vm332_vm0, %v9258_v14 }
 0x351   : > { %v3542_v45 = vadd.f32 %v9429_v62, %v3506_v49  ;;  %3475 = vst.msk [vmem:[#allocation3 + $0xb8] sm:$0xff] %vm332_vm0, %v3443_v38  ;;  %v2686_v7 = vpop.f32.mrf.mxu2 }
 0x352   : > { %v3028_v26 = vpop.f32.mrf.mxu3  ;;  %v2762_v5 = vadd.f32 %v2730_v3, %v2686_v7  ;;  %v3786_v56 = vpop.f32.mrf.mxu1 }
 0x353   : > { %v3574_v11 = vmax.f32 %v3542_v45, 0.0  ;;  %v3071_v50 = vld [vmem:[#allocation3 + $0xc8] sm:$0xff]  ;;  %3868 = vst.msk [vmem:[#allocation3 + $0x38] sm:$0xff] %vm332_vm0, %v3786_v56  ;;  %v4248_v45 = vld [vmem:[#allocation2 + $0xd1] sm:$0xff] }
 0x354   : > { %v3103_v19 = vadd.f32 %v3071_v50, %v3025_v8  ;;  %2794 = vst.msk [vmem:[#allocation3 + $0xd0] sm:$0xff] %vm332_vm0, %v2762_v5  ;;  %v9475_v57 = vld [vmem:[#allocation2 + $0x16f] sm:$0xff] }
 0x355   : > { %3606 = vst.msk [vmem:[#allocation2 + $0x188] sm:$0xff] %vm332_vm0, %v3574_v11  ;;  %v3412_v14 = vld [vmem:[#allocation3 + $0xc0] sm:$0xff]  ;;  %7437 = vmatmul.msk.f32.gmra.mxu1 %vm332_vm0, %v9475_v57  ;;  %v9482_v29 = vpop.f32.mrf.mxu0  ;;  %v2733_v11 = vld [vmem:[#allocation3 + $0xe8] sm:$0xff] }
 0x356   : > { %3135 = vst.msk [vmem:[#allocation3 + $0xc8] sm:$0xff] %vm332_vm0, %v3103_v19  ;;  %v3444_v58 = vadd.f32 %v3412_v14, %v9417_v0  ;;  %7457 = vmatmul.msk.f32.gmra.mxu2 %vm332_vm0, %v9480_v36 }
 0x357   : > { %7489 = vmatmul.msk.f32.gmra.mxu3 %vm332_vm0, %v4246_v51 }
 0x358   : > { %v3507_v20 = vld [vmem:[#allocation3 + $0xb8] sm:$0xff]  ;;  %3476 = vst.msk [vmem:[#allocation3 + $0xc0] sm:$0xff] %vm332_vm0, %v3444_v58  ;;  %7521 = vmatmul.msk.f32.gmra.mxu0 %vm332_vm0, %v9275_v10  ;;  %v9500_v10 = vld [vmem:[#allocation2 + $0xc8] sm:$0xff] }
 0x359   : > { %v3543_v24 = vadd.f32 %v9429_v62, %v3507_v20  ;;  %v2689_v46 = vpop.f32.mrf.mxu2  ;;  %v9537_v58 = vld [vmem:[#allocation2 + $0xe8] sm:$0xff] }
 0x35a   : > { %v3031_v39 = vpop.f32.mrf.mxu3  ;;  %v2763_v18 = vadd.f32 %v2731_v63, %v2689_v46  ;;  %v3789_v15 = vpop.f32.mrf.mxu1  ;;  %v5297_v46 = vld [vmem:[#allocation9 + $0xb8] sm:$0xff] }
 0x35b   : > { %v3575_v0 = vmax.f32 %v3543_v24, 0.0  ;;  %v3072_v23 = vld [vmem:[#allocation3 + $0xd0] sm:$0xff]  ;;  %3869 = vst.msk [vmem:[#allocation3 + $0x40] sm:$0xff] %vm332_vm0, %v3789_v15  ;;  %5406 = vmatpush.msra.mxu2 %v5297_v46  ;;  %v4139_v46 = vld [vmem:[#allocation3] sm:$0xff] }
 0x35c   : > { %v3104_v32 = vadd.f32 %v3072_v23, %v3028_v26  ;;  %2795 = vst.msk [vmem:[#allocation3 + $0xd8] sm:$0xff] %vm332_vm0, %v2763_v18  ;;  %v9495_v53 = vld [vmem:[#allocation2 + $0x187] sm:$0xff]  ;;  %v2734_v23 = vld [vmem:[#allocation3 + $0xf0] sm:$0xff] }
 0x35d   : > { %3607 = vst.msk [vmem:[#allocation2 + $0x190] sm:$0xff] %vm332_vm0, %v3575_v0  ;;  %v3413_v6 = vld [vmem:[#allocation3 + $0xc8] sm:$0xff]  ;;  %7438 = vmatmul.msk.f32.gmra.mxu1 %vm332_vm0, %v9495_v53  ;;  %v9502_v40 = vpop.f32.mrf.mxu0 }
 0x35e   : > { %3136 = vst.msk [vmem:[#allocation3 + $0xd0] sm:$0xff] %vm332_vm0, %v3104_v32  ;;  %v3445_v41 = vadd.f32 %v3413_v6, %v9442_v42  ;;  %7458 = vmatmul.msk.f32.gmra.mxu2 %vm332_vm0, %v9500_v10 }
 0x35f   : > { %7490 = vmatmul.msk.f32.gmra.mxu3 %vm332_vm0, %v4247_v37  ;;  %v3508_v25 = vld [vmem:[#allocation3 + $0xc0] sm:$0xff] }
 0x360   : > { %v3544_v8 = vadd.f32 %v9429_v62, %v3508_v25  ;;  %3477 = vst.msk [vmem:[#allocation3 + $0xc8] sm:$0xff] %vm332_vm0, %v3445_v41  ;;  %7522 = vmatmul.msk.f32.gmra.mxu0 %vm332_vm0, %v9293_v30  ;;  %v9520_v30 = vld [vmem:[#allocation2 + $0xd0] sm:$0xff] }
 0x361   : > { %v2692_v43 = vpop.f32.mrf.mxu2 }
 0x362   : > { %v3034_v12 = vpop.f32.mrf.mxu3  ;;  %v3576_v47 = vmax.f32 %v3544_v8, 0.0  ;;  %v2764_v54 = vadd.f32 %v2732_v35, %v2692_v43  ;;  %v3792_v61 = vpop.f32.mrf.mxu1  ;;  %v4250_v43 = vld [vmem:[#allocation2 + $0xf1] sm:$0xff] }
 0x363   : > { %v3073_v42 = vld [vmem:[#allocation3 + $0xd8] sm:$0xff]  ;;  %3870 = vst.msk [vmem:[#allocation3 + $0x48] sm:$0xff] %vm332_vm0, %v3792_v61 }
 0x364   : > { %3608 = vst.msk [vmem:[#allocation2 + $0x1a8] sm:$0xff] %vm332_vm0, %v3576_v47  ;;  %v3105_v59 = vadd.f32 %v3073_v42, %v3031_v39  ;;  %v9515_v38 = vld [vmem:[#allocation2 + $0x18f] sm:$0xff] }
 0x365   : > { %v3414_v49 = vld [vmem:[#allocation3 + $0xd0] sm:$0xff]  ;;  %2796 = vst.msk [vmem:[#allocation3 + $0xe0] sm:$0xff] %vm332_vm0, %v2764_v54  ;;  %7439 = vmatmul.msk.f32.gmra.mxu1 %vm332_vm0, %v9515_v38  ;;  %v9522_v7 = vpop.f32.mrf.mxu0 }
 0x366   : > { %3137 = vst.msk [vmem:[#allocation3 + $0xd8] sm:$0xff] %vm332_vm0, %v3105_v59  ;;  %v3446_v3 = vadd.f32 %v3414_v49, %v9462_v55  ;;  %7459 = vmatmul.msk.f32.gmra.mxu2 %vm332_vm0, %v9520_v30  ;;  %v2735_v59 = vld [vmem:[#allocation3 + $0xf8] sm:$0xff] }
 0x367   : > { %7491 = vmatmul.msk.f32.gmra.mxu3 %vm332_vm0, %v4248_v45  ;;  %v3509_v26 = vld [vmem:[#allocation3 + $0xc8] sm:$0xff] }
 0x368   : > { %v3545_v5 = vadd.f32 %v9429_v62, %v3509_v26  ;;  %3478 = vst.msk [vmem:[#allocation3 + $0xd0] sm:$0xff] %vm332_vm0, %v3446_v3  ;;  %7523 = vmatmul.msk.f32.gmra.mxu0 %vm332_vm0, %v9312_v33  ;;  %v4249_v33 = vld [vmem:[#allocation2 + $0xe9] sm:$0xff] }
 0x369   : > { %v2695_v56 = vpop.f32.mrf.mxu2 }
 0x36a   : > { %v3037_v50 = vpop.f32.mrf.mxu3  ;;  %v3577_v19 = vmax.f32 %v3545_v5, 0.0  ;;  %v2765_v48 = vadd.f32 %v2733_v11, %v2695_v56  ;;  %v3795_v14 = vpop.f32.mrf.mxu1  ;;  %v4251_v11 = vld [vmem:[#allocation2 + $0x109] sm:$0xff] }
 0x36b   : > { %3871 = vst.msk [vmem:[#allocation3 + $0x50] sm:$0xff] %vm332_vm0, %v3795_v14  ;;  %v9534_v55 = vld [vmem:[#allocation2 + $0x1a7] sm:$0xff] }
 0x36c   : > { %3609 = vst.msk [vmem:[#allocation2 + $0x1b0] sm:$0xff] %vm332_vm0, %v3577_v19  ;;  %v3074_v51 = vld [vmem:[#allocation3 + $0xe0] sm:$0xff] }
 0x36d   : > { %v3106_v20 = vadd.f32 %v3074_v51, %v3034_v12  ;;  %v3415_v24 = vld [vmem:[#allocation3 + $0xd8] sm:$0xff]  ;;  %2797 = vst.msk [vmem:[#allocation3 + $0xe8] sm:$0xff] %vm332_vm0, %v2765_v48  ;;  %7440 = vmatmul.msk.f32.gmra.mxu1 %vm332_vm0, %v9534_v55  ;;  %v9542_v63 = vpop.f32.mrf.mxu0 }
 0x36e   : > { %v3447_v39 = vadd.f32 %v3415_v24, %v9482_v29  ;;  %7460 = vmatmul.msk.f32.gmra.mxu2 %vm332_vm0, %v9537_v58 }
 0x36f   : > { %7492 = vmatmul.msk.f32.gmra.mxu3 %vm332_vm0, %v4249_v33  ;;  %v3510_v18 = vld [vmem:[#allocation3 + $0xd0] sm:$0xff]  ;;  %3138 = vst.msk [vmem:[#allocation3 + $0xe0] sm:$0xff] %vm332_vm0, %v3106_v20  ;;  %v5981_v20 = vld [vmem:[#allocation9 + $0xf8] sm:$0xff] }
 0x370   : > { %v3546_v15 = vadd.f32 %v9429_v62, %v3510_v18  ;;  %3479 = vst.msk [vmem:[#allocation3 + $0xd8] sm:$0xff] %vm332_vm0, %v3447_v39  ;;  %7524 = vmatmul.msk.f32.gmra.mxu0 %vm332_vm0, %v9331_v21  ;;  %v9560_v21 = vld [vmem:[#allocation2 + $0xf0] sm:$0xff] }
 0x371   : > { %v2698_v0 = vpop.f32.mrf.mxu2  ;;  %6090 = vmatpush.msra.mxu0 %v5981_v20 }
 0x372   : > { %v3040_v32 = vpop.f32.mrf.mxu3  ;;  %v3578_v29 = vmax.f32 %v3546_v15, 0.0  ;;  %v2766_v6 = vadd.f32 %v2734_v23, %v2698_v0  ;;  %v3798_v37 = vpop.f32.mrf.mxu1 }
 0x373   : > { %3872 = vst.msk [vmem:[#allocation3 + $0x58] sm:$0xff] %vm332_vm0, %v3798_v37  ;;  %v9554_v41 = vld [vmem:[#allocation2 + $0x1af] sm:$0xff] }
 0x374   : > { %3610 = vst.msk [vmem:[#allocation2 + $0x1c8] sm:$0xff] %vm332_vm0, %v3578_v29  ;;  %v3075_v25 = vld [vmem:[#allocation3 + $0xe8] sm:$0xff]  ;;  %v4252_v29 = vld [vmem:[#allocation2 + $0x111] sm:$0xff] }
 0x375   : > { %v3107_v8 = vadd.f32 %v3075_v25, %v3037_v50  ;;  %2798 = vst.msk [vmem:[#allocation3 + $0xf0] sm:$0xff] %vm332_vm0, %v2766_v6  ;;  %7441 = vmatmul.msk.f32.gmra.mxu1 %vm332_vm0, %v9554_v41  ;;  %v9562_v35 = vpop.f32.mrf.mxu0  ;;  %v5639_v50 = vld [vmem:[#allocation9 + $0xd8] sm:$0xff] }
 0x376   : > { %v3416_v12 = vld [vmem:[#allocation3 + $0xe0] sm:$0xff]  ;;  %7461 = vmatmul.msk.f32.gmra.mxu2 %vm332_vm0, %v9560_v21  ;;  %5748 = vmatpush.msra.mxu3 %v5639_v50 }
 0x377   : > { %7493 = vmatmul.msk.f32.gmra.mxu3 %vm332_vm0, %v4250_v43  ;;  %v3511_v47 = vld [vmem:[#allocation3 + $0xd8] sm:$0xff]  ;;  %3139 = vst.msk [vmem:[#allocation3 + $0xe8] sm:$0xff] %vm332_vm0, %v3107_v8  ;;  %v3448_v54 = vadd.f32 %v3416_v12, %v9502_v40 }
 0x378   : > { %v3547_v61 = vadd.f32 %v9429_v62, %v3511_v47  ;;  %7525 = vmatmul.msk.f32.gmra.mxu0 %vm332_vm0, %v9350_v4  ;;  %v9580_v4 = vld [vmem:[#allocation2 + $0x108] sm:$0xff]  ;;  %v6323_v43 = vld [vmem:[#allocation9 + $0x118] sm:$0xff] }
 0x379   : > { %3480 = vst.msk [vmem:[#allocation3 + $0xe0] sm:$0xff] %vm332_vm0, %v3448_v54  ;;  %v2701_v42 = vpop.f32.mrf.mxu2  ;;  %v4140_v54 = vld [vmem:[#allocation3 + $0x8] sm:$0xff]  ;;  %6432 = vmatpush.msra.mxu1 %v6323_v43 }
 0x37a   : > { %v3043_v49 = vpop.f32.mrf.mxu3  ;;  %v3579_v45 = vmax.f32 %v3547_v61, 0.0  ;;  %v2767_v3 = vadd.f32 %v2735_v59, %v2701_v42  ;;  %v3801_v26 = vpop.f32.mrf.mxu1 }
 0x37b   : > { %3873 = vst.msk [vmem:[#allocation3 + $0x60] sm:$0xff] %vm332_vm0, %v3801_v26  ;;  %v9574_v5 = vld [vmem:[#allocation2 + $0x1c7] sm:$0xff] }
 0x37c   : > { %3611 = vst.msk [vmem:[#allocation2 + $0x1d0] sm:$0xff] %vm332_vm0, %v3579_v45  ;;  %v3076_v40 = vld [vmem:[#allocation3 + $0xf0] sm:$0xff] }
 0x37d   : > { %v3108_v56 = vadd.f32 %v3076_v40, %v3040_v32  ;;  %2799 = vst.msk [vmem:[#allocation3 + $0xf8] sm:$0xff] %vm332_vm0, %v2767_v3  ;;  %7442 = vmatmul.msk.f32.gmra.mxu1 %vm332_vm0, %v9574_v5  ;;  %v9582_v19 = vpop.f32.mrf.mxu0  ;;  %v9600_v32 = vld [vmem:[#allocation2 + $0x110] sm:$0xff] }
 0x37e   : > { %v3417_v48 = vld [vmem:[#allocation3 + $0xe8] sm:$0xff]  ;;  %7462 = vmatmul.msk.f32.gmra.mxu2 %vm332_vm0, %v9580_v4 }
 0x37f   : > { %7494 = vmatmul.msk.f32.gmra.mxu3 %vm332_vm0, %v4251_v11  ;;  %3140 = vst.msk [vmem:[#allocation3 + $0xf0] sm:$0xff] %vm332_vm0, %v3108_v56  ;;  %v3449_v14 = vadd.f32 %v3417_v48, %v9522_v7  ;;  %v4253_v26 = vld [vmem:[#allocation2 + $0x129] sm:$0xff] }
 0x380   : > { %v3512_v51 = vld [vmem:[#allocation3 + $0xe0] sm:$0xff]  ;;  %7526 = vmatmul.msk.f32.gmra.mxu0 %vm332_vm0, %v9369_v31 }
 0x381   : > { %v3548_v24 = vadd.f32 %v9429_v62, %v3512_v51  ;;  %3481 = vst.msk [vmem:[#allocation3 + $0xe8] sm:$0xff] %vm332_vm0, %v3449_v14  ;;  %v4043_v33 = vpop.f32.mrf.mxu2  ;;  %v4141_v51 = vld [vmem:[#allocation3 + $0x10] sm:$0xff] }
 0x382   : > { %v4385_v39 = vpop.f32.mrf.mxu3  ;;  %v3804_v18 = vpop.f32.mrf.mxu1  ;;  %v4171_v15 = vadd.f32 %v4139_v46, %v4043_v33 }
 0x383   : > { %v3580_v0 = vmax.f32 %v3548_v24, 0.0  ;;  %3874 = vst.msk [vmem:[#allocation3 + $0x68] sm:$0xff] %vm332_vm0, %v3804_v18  ;;  %v9594_v7 = vld [vmem:[#allocation2 + $0x1cf] sm:$0xff] }
 0x384   : > { %v3077_v23 = vld [vmem:[#allocation3 + $0xf8] sm:$0xff]  ;;  %4203 = vst.msk [vmem:[#allocation3] sm:$0xff] %vm332_vm0, %v4171_v15  ;;  %v9640_v15 = vld [vmem:[#allocation2 + $0x130] sm:$0xff] }
 0x385   : > { %3612 = vst.msk [vmem:[#allocation2 + $0x1e8] sm:$0xff] %vm332_vm0, %v3580_v0  ;;  %v3109_v31 = vadd.f32 %v3077_v23, %v3043_v49  ;;  %7443 = vmatmul.msk.f32.gmra.mxu1 %vm332_vm0, %v9594_v7  ;;  %v9602_v6 = vpop.f32.mrf.mxu0  ;;  %v4254_v0 = vld [vmem:[#allocation2 + $0x131] sm:$0xff] }
 0x386   : > { %v3418_v37 = vld [vmem:[#allocation3 + $0xf0] sm:$0xff]  ;;  %7463 = vmatmul.msk.f32.gmra.mxu2 %vm332_vm0, %v9600_v32 }
 0x387   : > { %7495 = vmatmul.msk.f32.gmra.mxu3 %vm332_vm0, %v4252_v29  ;;  %3141 = vst.msk [vmem:[#allocation3 + $0xf8] sm:$0xff] %vm332_vm0, %v3109_v31  ;;  %v3450_v25 = vadd.f32 %v3418_v37, %v9542_v63 }
 0x388   : > { %v3513_v8 = vld [vmem:[#allocation3 + $0xe8] sm:$0xff]  ;;  %7527 = vmatmul.msk.f32.gmra.mxu0 %vm332_vm0, %v9389_v2 }
 0x389   : > { %v3549_v12 = vadd.f32 %v9429_v62, %v3513_v8  ;;  %3482 = vst.msk [vmem:[#allocation3 + $0xf0] sm:$0xff] %vm332_vm0, %v3450_v25  ;;  %v4046_v47 = vpop.f32.mrf.mxu2  ;;  %v9620_v2 = vld [vmem:[#allocation2 + $0x128] sm:$0xff]  ;;  %v4142_v8 = vld [vmem:[#allocation3 + $0x18] sm:$0xff] }
 0x38a   : > { %v4388_v61 = vpop.f32.mrf.mxu3  ;;  %v3807_v42 = vpop.f32.mrf.mxu1  ;;  %v4172_v59 = vadd.f32 %v4140_v54, %v4046_v47 }
 0x38b   : > { %v3581_v49 = vmax.f32 %v3549_v12, 0.0  ;;  %v4481_v45 = vld [vmem:[#allocation3] sm:$0xff]  ;;  %3875 = vst.msk [vmem:[#allocation3 + $0x70] sm:$0xff] %vm332_vm0, %v3807_v42 }
 0x38c   : > { %v4513_v63 = vadd.f32 %v4481_v45, %v4385_v39  ;;  %4204 = vst.msk [vmem:[#allocation3 + $0x8] sm:$0xff] %vm332_vm0, %v4172_v59  ;;  %v9615_v3 = vld [vmem:[#allocation2 + $0x1e7] sm:$0xff] }
 0x38d   : > { %3613 = vst.msk [vmem:[#allocation2 + $0x1f0] sm:$0xff] %vm332_vm0, %v3581_v49  ;;  %7444 = vmatmul.msk.f32.gmra.mxu1 %vm332_vm0, %v9615_v3  ;;  %v9622_v40 = vpop.f32.mrf.mxu0 }
 0x38e   : > { %4545 = vst.msk [vmem:[#allocation3] sm:$0xff] %vm332_vm0, %v4513_v63  ;;  %v3419_v56 = vld [vmem:[#allocation3 + $0xf8] sm:$0xff]  ;;  %7464 = vmatmul.msk.f32.gmra.mxu2 %vm332_vm0, %v9620_v2  ;;  %v4143_v63 = vld [vmem:[#allocation3 + $0x20] sm:$0xff] }
 0x38f   : > { %7496 = vmatmul.msk.f32.gmra.mxu3 %vm332_vm0, %v4253_v26  ;;  %v3451_v11 = vadd.f32 %v3419_v56, %v9562_v35 }
 0x390   : > { %v3514_v50 = vld [vmem:[#allocation3 + $0xf0] sm:$0xff]  ;;  %7528 = vmatmul.msk.f32.gmra.mxu0 %vm332_vm0, %v9409_v27 }
 0x391   : > { %v3550_v48 = vadd.f32 %v9429_v62, %v3514_v50  ;;  %3483 = vst.msk [vmem:[#allocation3 + $0xf8] sm:$0xff] %vm332_vm0, %v3451_v11  ;;  %v4049_v14 = vpop.f32.mrf.mxu2 }
 0x392   : > { %v4391_v20 = vpop.f32.mrf.mxu3  ;;  %v3810_v24 = vpop.f32.mrf.mxu1  ;;  %v4173_v33 = vadd.f32 %v4141_v51, %v4049_v14  ;;  %v9674_v14 = vld [vmem:[#allocation2 + $0x150] sm:$0xff] }
 0x393   : > { %v3582_v46 = vmax.f32 %v3550_v48, 0.0  ;;  %v4482_v39 = vld [vmem:[#allocation3 + $0x8] sm:$0xff]  ;;  %3876 = vst.msk [vmem:[#allocation3 + $0x78] sm:$0xff] %vm332_vm0, %v3810_v24 }
 0x394   : > { %v4514_v18 = vadd.f32 %v4482_v39, %v4388_v61  ;;  %4205 = vst.msk [vmem:[#allocation3 + $0x10] sm:$0xff] %vm332_vm0, %v4173_v33  ;;  %v9635_v35 = vld [vmem:[#allocation2 + $0x1ef] sm:$0xff] }
 0x395   : > { %3614 = vst.msk [vmem:[#allocation2 + $0x208] sm:$0xff] %vm332_vm0, %v3582_v46  ;;  %v4823_v27 = vld [vmem:[#allocation3] sm:$0xff]  ;;  %7445 = vmatmul.msk.f32.gmra.mxu1 %vm332_vm0, %v9635_v35  ;;  %v9642_v23 = vpop.f32.mrf.mxu0  ;;  %v4144_v24 = vld [vmem:[#allocation3 + $0x28] sm:$0xff] }
 0x396   : > { %4546 = vst.msk [vmem:[#allocation3 + $0x8] sm:$0xff] %vm332_vm0, %v4514_v18  ;;  %v4855_v31 = vadd.f32 %v4823_v27, %v9582_v19  ;;  %7465 = vmatmul.msk.f32.gmra.mxu2 %vm332_vm0, %v9640_v15 }
 0x397   : > { %7497 = vmatmul.msk.f32.gmra.mxu3 %vm332_vm0, %v4254_v0  ;;  %v9690_v0 = vld [vmem:[#allocation2 + $0x168] sm:$0xff] }
 0x398   : > { %v3515_v29 = vld [vmem:[#allocation3 + $0xf8] sm:$0xff]  ;;  %4887 = vst.msk [vmem:[#allocation3] sm:$0xff] %vm332_vm0, %v4855_v31  ;;  %7529 = vmatmul.msk.f32.gmra.mxu0 %vm332_vm0, %v9434_v9  ;;  %v9658_v9 = vld [vmem:[#allocation2 + $0x148] sm:$0xff] }
 0x399   : > { %v3551_v37 = vadd.f32 %v9429_v62, %v3515_v29  ;;  %v4052_v25 = vpop.f32.mrf.mxu2  ;;  %v4255_v62 = vld [vmem:[#allocation2 + $0x149] sm:$0xff] }
 0x39a   : > { %v4394_v43 = vpop.f32.mrf.mxu3  ;;  %v3813_v12 = vpop.f32.mrf.mxu1  ;;  %v4174_v47 = vadd.f32 %v4142_v8, %v4052_v25  ;;  %v4257_v31 = vld [vmem:[#allocation2 + $0x169] sm:$0xff] }
 0x39b   : > { %v3583_v54 = vmax.f32 %v3551_v37, 0.0  ;;  %v4483_v19 = vld [vmem:[#allocation3 + $0x10] sm:$0xff]  ;;  %3877 = vst.msk [vmem:[#allocation3 + $0x80] sm:$0xff] %vm332_vm0, %v3813_v12 }
 0x39c   : > { %v4515_v61 = vadd.f32 %v4483_v19, %v4391_v20  ;;  %4206 = vst.msk [vmem:[#allocation3 + $0x18] sm:$0xff] %vm332_vm0, %v4174_v47  ;;  %v4145_v25 = vld [vmem:[#allocation3 + $0x30] sm:$0xff] }
 0x39d   : > { %3615 = vst.msk [vmem:[#allocation2 + $0x210] sm:$0xff] %vm332_vm0, %v3583_v54  ;;  %v4824_v42 = vld [vmem:[#allocation3 + $0x8] sm:$0xff]  ;;  %7542 = vmatmul.msk.f32.vlgmr.msrb.gmra.mxu1 %vm332_vm0, %v9298_v13  ;;  %v9660_v59 = vpop.f32.mrf.mxu0  ;;  %v5296_v13 = vld [vmem:[#allocation9 + $0xb0] sm:$0xff] }
 0x39e   : > { %4547 = vst.msk [vmem:[#allocation3 + $0x10] sm:$0xff] %vm332_vm0, %v4515_v61  ;;  %v4856_v49 = vadd.f32 %v4824_v42, %v9602_v6  ;;  %7466 = vmatmul.msk.f32.gmra.mxu2 %vm332_vm0, %v9658_v9  ;;  %v9706_v19 = vld [vmem:[#allocation2 + $0x170] sm:$0xff] }
 0x39f   : > { %7498 = vmatmul.msk.f32.gmra.mxu3 %vm332_vm0, %v4255_v62  ;;  %5407 = vmatpush.msra.mxu2 %v5296_v13  ;;  %v4146_v62 = vld [vmem:[#allocation3 + $0x38] sm:$0xff] }
 0x3a0   : > { %4888 = vst.msk [vmem:[#allocation3 + $0x8] sm:$0xff] %vm332_vm0, %v4856_v49  ;;  %7530 = vmatmul.msk.f32.gmra.mxu0 %vm332_vm0, %v9455_v34  ;;  %v4256_v34 = vld [vmem:[#allocation2 + $0x151] sm:$0xff] }
 0x3a1   : > { %v4055_v45 = vpop.f32.mrf.mxu2 }
 0x3a2   : > { %v4397_v26 = vpop.f32.mrf.mxu3  ;;  %v3816_v56 = vpop.f32.mrf.mxu1  ;;  %v4175_v11 = vadd.f32 %v4143_v63, %v4055_v45 }
 0x3a3   : > { %v4484_v50 = vld [vmem:[#allocation3 + $0x18] sm:$0xff]  ;;  %3878 = vst.msk [vmem:[#allocation3 + $0x88] sm:$0xff] %vm332_vm0, %v3816_v56  ;;  %v9722_v56 = vld [vmem:[#allocation2 + $0x188] sm:$0xff] }
 0x3a4   : > { %v4516_v6 = vadd.f32 %v4484_v50, %v4394_v43  ;;  %4207 = vst.msk [vmem:[#allocation3 + $0x20] sm:$0xff] %vm332_vm0, %v4175_v11  ;;  %v4259_v11 = vld [vmem:[#allocation2 + $0x189] sm:$0xff] }
 0x3a5   : > { %v4825_v48 = vld [vmem:[#allocation3 + $0x10] sm:$0xff]  ;;  %7543 = vmatmul.msk.f32.gmra.mxu1 %vm332_vm0, %v9317_v1  ;;  %v9676_v51 = vpop.f32.mrf.mxu0 }
 0x3a6   : > { %4548 = vst.msk [vmem:[#allocation3 + $0x18] sm:$0xff] %vm332_vm0, %v4516_v6  ;;  %v4857_v20 = vadd.f32 %v4825_v48, %v9622_v40  ;;  %7467 = vmatmul.msk.f32.gmra.mxu2 %vm332_vm0, %v9674_v14  ;;  %v4147_v48 = vld [vmem:[#allocation3 + $0x40] sm:$0xff] }
 0x3a7   : > { %7499 = vmatmul.msk.f32.gmra.mxu3 %vm332_vm0, %v4256_v34 }
 0x3a8   : > { %4889 = vst.msk [vmem:[#allocation3 + $0x10] sm:$0xff] %vm332_vm0, %v4857_v20  ;;  %7531 = vmatmul.msk.f32.gmra.mxu0 %vm332_vm0, %v9475_v57 }
 0x3a9   : > { %v4058_v1 = vpop.f32.mrf.mxu2 }
 0x3aa   : > { %v4400_v33 = vpop.f32.mrf.mxu3  ;;  %v3819_v46 = vpop.f32.mrf.mxu1  ;;  %v4176_v39 = vadd.f32 %v4144_v24, %v4058_v1 }
 0x3ab   : > { %v4485_v18 = vld [vmem:[#allocation3 + $0x20] sm:$0xff]  ;;  %3879 = vst.msk [vmem:[#allocation3 + $0x90] sm:$0xff] %vm332_vm0, %v3819_v46  ;;  %v9738_v46 = vld [vmem:[#allocation2 + $0x190] sm:$0xff] }
 0x3ac   : > { %v4517_v27 = vadd.f32 %v4485_v18, %v4397_v26  ;;  %4208 = vst.msk [vmem:[#allocation3 + $0x28] sm:$0xff] %vm332_vm0, %v4176_v39 }
 0x3ad   : > { %v4826_v40 = vld [vmem:[#allocation3 + $0x18] sm:$0xff]  ;;  %7544 = vmatmul.msk.f32.gmra.mxu1 %vm332_vm0, %v9336_v44  ;;  %v9692_v29 = vpop.f32.mrf.mxu0  ;;  %v5638_v44 = vld [vmem:[#allocation9 + $0xd0] sm:$0xff] }
 0x3ae   : > { %4549 = vst.msk [vmem:[#allocation3 + $0x20] sm:$0xff] %vm332_vm0, %v4517_v27  ;;  %v4858_v57 = vadd.f32 %v4826_v40, %v9642_v23  ;;  %7468 = vmatmul.msk.f32.gmra.mxu2 %vm332_vm0, %v9690_v0  ;;  %5749 = vmatpush.msra.mxu3 %v5638_v44  ;;  %v4148_v40 = vld [vmem:[#allocation3 + $0x48] sm:$0xff] }
 0x3af   : > { %7500 = vmatmul.msk.f32.gmra.mxu3 %vm332_vm0, %v4257_v31 }
 0x3b0   : > { %4890 = vst.msk [vmem:[#allocation3 + $0x18] sm:$0xff] %vm332_vm0, %v4858_v57  ;;  %7532 = vmatmul.msk.f32.gmra.mxu0 %vm332_vm0, %v9495_v53  ;;  %v4258_v53 = vld [vmem:[#allocation2 + $0x171] sm:$0xff] }
 0x3b1   : > { %v4061_v37 = vpop.f32.mrf.mxu2 }
 0x3b2   : > { %v4403_v8 = vpop.f32.mrf.mxu3  ;;  %v3822_v43 = vpop.f32.mrf.mxu1  ;;  %v4177_v12 = vadd.f32 %v4145_v25, %v4061_v37 }
 0x3b3   : > { %v4486_v47 = vld [vmem:[#allocation3 + $0x28] sm:$0xff]  ;;  %3880 = vst.msk [vmem:[#allocation3 + $0x98] sm:$0xff] %vm332_vm0, %v3822_v43 }
 0x3b4   : > { %v4518_v23 = vadd.f32 %v4486_v47, %v4400_v33  ;;  %4209 = vst.msk [vmem:[#allocation3 + $0x30] sm:$0xff] %vm332_vm0, %v4177_v12  ;;  %v4149_v47 = vld [vmem:[#allocation3 + $0x50] sm:$0xff] }
 0x3b5   : > { %v4827_v54 = vld [vmem:[#allocation3 + $0x20] sm:$0xff]  ;;  %7545 = vmatmul.msk.f32.gmra.mxu1 %vm332_vm0, %v9355_v16  ;;  %v9708_v61 = vpop.f32.mrf.mxu0 }
 0x3b6   : > { %4550 = vst.msk [vmem:[#allocation3 + $0x28] sm:$0xff] %vm332_vm0, %v4518_v23  ;;  %v4859_v42 = vadd.f32 %v4827_v54, %v9660_v59  ;;  %7469 = vmatmul.msk.f32.gmra.mxu2 %vm332_vm0, %v9706_v19 }
 0x3b7   : > { %7501 = vmatmul.msk.f32.gmra.mxu3 %vm332_vm0, %v4258_v53 }
 0x3b8   : > { %4891 = vst.msk [vmem:[#allocation3 + $0x20] sm:$0xff] %vm332_vm0, %v4859_v42  ;;  %7533 = vmatmul.msk.f32.gmra.mxu0 %vm332_vm0, %v9515_v38 }
 0x3b9   : > { %v4064_v16 = vpop.f32.mrf.mxu2 }
 0x3ba   : > { %v4406_v49 = vpop.f32.mrf.mxu3  ;;  %v3825_v13 = vpop.f32.mrf.mxu1  ;;  %v4178_v45 = vadd.f32 %v4146_v62, %v4064_v16  ;;  %v9770_v62 = vld [vmem:[#allocation2 + $0x1b0] sm:$0xff] }
 0x3bb   : > { %v4487_v63 = vld [vmem:[#allocation3 + $0x30] sm:$0xff]  ;;  %3881 = vst.msk [vmem:[#allocation3 + $0xa0] sm:$0xff] %vm332_vm0, %v3825_v13 }
 0x3bc   : > { %v4519_v26 = vadd.f32 %v4487_v63, %v4403_v8  ;;  %4210 = vst.msk [vmem:[#allocation3 + $0x38] sm:$0xff] %vm332_vm0, %v4178_v45  ;;  %v9754_v8 = vld [vmem:[#allocation2 + $0x1a8] sm:$0xff]  ;;  %v4150_v45 = vld [vmem:[#allocation3 + $0x58] sm:$0xff] }
 0x3bd   : > { %v4828_v59 = vld [vmem:[#allocation3 + $0x28] sm:$0xff]  ;;  %7546 = vmatmul.msk.f32.gmra.mxu1 %vm332_vm0, %v9375_v17  ;;  %v9724_v50 = vpop.f32.mrf.mxu0  ;;  %v5980_v17 = vld [vmem:[#allocation9 + $0xf0] sm:$0xff] }
 0x3be   : > { %4551 = vst.msk [vmem:[#allocation3 + $0x30] sm:$0xff] %vm332_vm0, %v4519_v26  ;;  %v4860_v38 = vadd.f32 %v4828_v59, %v9676_v51  ;;  %7470 = vmatmul.msk.f32.gmra.mxu2 %vm332_vm0, %v9722_v56  ;;  %6091 = vmatpush.msra.mxu0 %v5980_v17  ;;  %v4263_v17 = vld [vmem:[#allocation2 + $0x1c9] sm:$0xff] }
 0x3bf   : > { %7502 = vmatmul.msk.f32.gmra.mxu3 %vm332_vm0, %v4259_v11 }
 0x3c0   : > { %4892 = vst.msk [vmem:[#allocation3 + $0x28] sm:$0xff] %vm332_vm0, %v4860_v38  ;;  %7534 = vmatmul.msk.f32.gmra.mxu0 %vm332_vm0, %v9534_v55  ;;  %v4260_v55 = vld [vmem:[#allocation2 + $0x191] sm:$0xff] }
 0x3c1   : > { %v4067_v6 = vpop.f32.mrf.mxu2 }
 0x3c2   : > { %v4409_v34 = vpop.f32.mrf.mxu3  ;;  %v3828_v20 = vpop.f32.mrf.mxu1  ;;  %v4179_v1 = vadd.f32 %v4147_v48, %v4067_v6 }
 0x3c3   : > { %v4488_v24 = vld [vmem:[#allocation3 + $0x38] sm:$0xff]  ;;  %3882 = vst.msk [vmem:[#allocation3 + $0xa8] sm:$0xff] %vm332_vm0, %v3828_v20 }
 0x3c4   : > { %v4520_v51 = vadd.f32 %v4488_v24, %v4406_v49  ;;  %4211 = vst.msk [vmem:[#allocation3 + $0x40] sm:$0xff] %vm332_vm0, %v4179_v1  ;;  %v4262_v49 = vld [vmem:[#allocation2 + $0x1b1] sm:$0xff]  ;;  %v5294_v1 = vld [vmem:[#allocation9 + $0xa0] sm:$0xff] }
 0x3c5   : > { %v4829_v33 = vld [vmem:[#allocation3 + $0x30] sm:$0xff]  ;;  %7547 = vmatmul.msk.f32.gmra.mxu1 %vm332_vm0, %v9395_v60  ;;  %v9740_v39 = vpop.f32.mrf.mxu0  ;;  %v5636_v24 = vld [vmem:[#allocation9 + $0xc0] sm:$0xff] }
 0x3c6   : > { %4552 = vst.msk [vmem:[#allocation3 + $0x38] sm:$0xff] %vm332_vm0, %v4520_v51  ;;  %v4861_v18 = vadd.f32 %v4829_v33, %v9692_v29  ;;  %7471 = vmatmul.msk.f32.gmra.mxu2 %vm332_vm0, %v9738_v46  ;;  %v6322_v60 = vld [vmem:[#allocation9 + $0x110] sm:$0xff]  ;;  %v4151_v51 = vld [vmem:[#allocation3 + $0x60] sm:$0xff] }
 0x3c7   : > { %7503 = vmatmul.msk.f32.gmra.mxu3 %vm332_vm0, %v4260_v55  ;;  %6433 = vmatpush.msra.mxu1 %v6322_v60 }
 0x3c8   : > { %4893 = vst.msk [vmem:[#allocation3 + $0x30] sm:$0xff] %vm332_vm0, %v4861_v18  ;;  %7535 = vmatmul.msk.f32.gmra.mxu0 %vm332_vm0, %v9554_v41  ;;  %v4261_v41 = vld [vmem:[#allocation2 + $0x1a9] sm:$0xff] }
 0x3c9   : > { %v4070_v27 = vpop.f32.mrf.mxu2 }
 0x3ca   : > { %v4412_v31 = vpop.f32.mrf.mxu3  ;;  %v3831_v57 = vpop.f32.mrf.mxu1  ;;  %v4180_v44 = vadd.f32 %v4148_v40, %v4070_v27  ;;  %v9802_v40 = vld [vmem:[#allocation2 + $0x1d0] sm:$0xff] }
 0x3cb   : > { %v4489_v37 = vld [vmem:[#allocation3 + $0x40] sm:$0xff]  ;;  %3883 = vst.msk [vmem:[#allocation3 + $0xb0] sm:$0xff] %vm332_vm0, %v3831_v57 }
 0x3cc   : > { %v4521_v29 = vadd.f32 %v4489_v37, %v4409_v34  ;;  %4212 = vst.msk [vmem:[#allocation3 + $0x48] sm:$0xff] %vm332_vm0, %v4180_v44  ;;  %v5637_v34 = vld [vmem:[#allocation9 + $0xc8] sm:$0xff] }
 0x3cd   : > { %v4830_v25 = vld [vmem:[#allocation3 + $0x38] sm:$0xff]  ;;  %7548 = vmatmul.msk.f32.gmra.mxu1 %vm332_vm0, %v9415_v28  ;;  %v9756_v43 = vpop.f32.mrf.mxu0  ;;  %5750 = vmatpush.msra.mxu3 %v5637_v34  ;;  %v4152_v44 = vld [vmem:[#allocation3 + $0x68] sm:$0xff] }
 0x3ce   : > { %4553 = vst.msk [vmem:[#allocation3 + $0x40] sm:$0xff] %vm332_vm0, %v4521_v29  ;;  %v4862_v12 = vadd.f32 %v4830_v25, %v9708_v61  ;;  %7472 = vmatmul.msk.f32.gmra.mxu2 %vm332_vm0, %v9754_v8 }
 0x3cf   : > { %7504 = vmatmul.msk.f32.gmra.mxu3 %vm332_vm0, %v4261_v41 }
 0x3d0   : > { %4894 = vst.msk [vmem:[#allocation3 + $0x38] sm:$0xff] %vm332_vm0, %v4862_v12  ;;  %7536 = vmatmul.msk.f32.gmra.mxu0 %vm332_vm0, %v9574_v5  ;;  %5751 = vmatpush.msra.mxu3 %v5636_v24  ;;  %v5261_v24 = vld [vmem:[#allocation2 + $0x29] sm:$0xff] }
 0x3d1   : > { %v4073_v28 = vpop.f32.mrf.mxu2 }
 0x3d2   : > { %v4415_v23 = vpop.f32.mrf.mxu3  ;;  %v3834_v54 = vpop.f32.mrf.mxu1  ;;  %v4181_v53 = vadd.f32 %v4149_v47, %v4073_v28  ;;  %v9818_v47 = vld [vmem:[#allocation2 + $0x1e8] sm:$0xff] }
 0x3d3   : > { %v4490_v42 = vld [vmem:[#allocation3 + $0x48] sm:$0xff]  ;;  %3884 = vst.msk [vmem:[#allocation3 + $0xb8] sm:$0xff] %vm332_vm0, %v3834_v54 }
 0x3d4   : > { %v4522_v16 = vadd.f32 %v4490_v42, %v4412_v31  ;;  %4213 = vst.msk [vmem:[#allocation3 + $0x50] sm:$0xff] %vm332_vm0, %v4181_v53  ;;  %v5978_v53 = vld [vmem:[#allocation9 + $0xe0] sm:$0xff] }
 0x3d5   : > { %v4831_v61 = vld [vmem:[#allocation3 + $0x40] sm:$0xff]  ;;  %7549 = vmatmul.msk.f32.gmra.mxu1 %vm332_vm0, %v9440_v22  ;;  %v9772_v13 = vpop.f32.mrf.mxu0 }
 0x3d6   : > { %4554 = vst.msk [vmem:[#allocation3 + $0x48] sm:$0xff] %vm332_vm0, %v4522_v16  ;;  %v4863_v5 = vadd.f32 %v4831_v61, %v9724_v50  ;;  %7473 = vmatmul.msk.f32.gmra.mxu2 %vm332_vm0, %v9770_v62  ;;  %v9784_v50 = vld [vmem:[#allocation2 + $0x1c8] sm:$0xff]  ;;  %v4153_v16 = vld [vmem:[#allocation3 + $0x70] sm:$0xff] }
 0x3d7   : > { %7505 = vmatmul.msk.f32.gmra.mxu3 %vm332_vm0, %v4262_v49  ;;  %v4607_v42 = vld [vmem:[#allocation2 + $0x207] sm:$0xff] }
 0x3d8   : > { %4895 = vst.msk [vmem:[#allocation3 + $0x40] sm:$0xff] %vm332_vm0, %v4863_v5  ;;  %7537 = vmatmul.msk.f32.gmra.mxu0 %vm332_vm0, %v9594_v7  ;;  %v5295_v7 = vld [vmem:[#allocation9 + $0xa8] sm:$0xff] }
 0x3d9   : > { %v4076_v22 = vpop.f32.mrf.mxu2  ;;  %5408 = vmatpush.msra.mxu2 %v5295_v7 }
 0x3da   : > { %v4418_v63 = vpop.f32.mrf.mxu3  ;;  %v3837_v26 = vpop.f32.mrf.mxu1  ;;  %v4182_v59 = vadd.f32 %v4150_v45, %v4076_v22 }
 0x3db   : > { %v4491_v11 = vld [vmem:[#allocation3 + $0x50] sm:$0xff]  ;;  %3885 = vst.msk [vmem:[#allocation3 + $0xc0] sm:$0xff] %vm332_vm0, %v3837_v26  ;;  %5409 = vmatpush.msra.mxu2 %v5294_v1 }
 0x3dc   : > { %v4523_v38 = vadd.f32 %v4491_v11, %v4415_v23  ;;  %4214 = vst.msk [vmem:[#allocation3 + $0x58] sm:$0xff] %vm332_vm0, %v4182_v59  ;;  %v4265_v23 = vld [vmem:[#allocation2 + $0x1e9] sm:$0xff]  ;;  %v4266_v26 = vld [vmem:[#allocation2 + $0x1f1] sm:$0xff] }
 0x3dd   : > { %v4832_v6 = vld [vmem:[#allocation3 + $0x48] sm:$0xff]  ;;  %7550 = vmatmul.msk.f32.gmra.mxu1 %vm332_vm0, %v9460_v52  ;;  %v9788_v48 = vpop.f32.mrf.mxu0 }
 0x3de   : > { %4555 = vst.msk [vmem:[#allocation3 + $0x50] sm:$0xff] %vm332_vm0, %v4523_v38  ;;  %v4864_v20 = vadd.f32 %v4832_v6, %v9740_v39  ;;  %7474 = vmatmul.msk.f32.gmra.mxu2 %vm332_vm0, %v9784_v50  ;;  %v4608_v38 = vld [vmem:[#allocation2 + $0x20f] sm:$0xff] }
 0x3df   : > { %7506 = vmatmul.msk.f32.gmra.mxu3 %vm332_vm0, %v4263_v17  ;;  %v4154_v17 = vld [vmem:[#allocation3 + $0x78] sm:$0xff] }
 0x3e0   : > { %4896 = vst.msk [vmem:[#allocation3 + $0x48] sm:$0xff] %vm332_vm0, %v4864_v20  ;;  %7538 = vmatmul.msk.f32.gmra.mxu0 %vm332_vm0, %v9615_v3  ;;  %v4264_v3 = vld [vmem:[#allocation2 + $0x1d1] sm:$0xff] }
 0x3e1   : > { %v4079_v52 = vpop.f32.mrf.mxu2 }
 0x3e2   : > { %v4421_v33 = vpop.f32.mrf.mxu3  ;;  %v3840_v55 = vpop.f32.mrf.mxu1  ;;  %v4183_v39 = vadd.f32 %v4151_v51, %v4079_v52  ;;  %v5603_v52 = vld [vmem:[#allocation2 + $0x47] sm:$0xff] }
 0x3e3   : > { %v4492_v18 = vld [vmem:[#allocation3 + $0x58] sm:$0xff]  ;;  %3886 = vst.msk [vmem:[#allocation3 + $0xc8] sm:$0xff] %vm332_vm0, %v3840_v55  ;;  %v5945_v55 = vld [vmem:[#allocation2 + $0x48] sm:$0xff] }
 0x3e4   : > { %v4524_v60 = vadd.f32 %v4492_v18, %v4418_v63  ;;  %4215 = vst.msk [vmem:[#allocation3 + $0x60] sm:$0xff] %vm332_vm0, %v4183_v39  ;;  %v9833_v63 = vld [vmem:[#allocation2 + $0x1f0] sm:$0xff]  ;;  %v4155_v18 = vld [vmem:[#allocation3 + $0x80] sm:$0xff] }
 0x3e5   : > { %v4833_v27 = vld [vmem:[#allocation3 + $0x50] sm:$0xff]  ;;  %7551 = vmatmul.msk.f32.gmra.mxu1 %vm332_vm0, %v9480_v36  ;;  %v9804_v31 = vpop.f32.mrf.mxu0 }
 0x3e6   : > { %4556 = vst.msk [vmem:[#allocation3 + $0x58] sm:$0xff] %vm332_vm0, %v4524_v60  ;;  %v4865_v57 = vadd.f32 %v4833_v27, %v9756_v43  ;;  %7475 = vmatmul.msk.f32.gmra.mxu2 %vm332_vm0, %v9802_v40  ;;  %v5979_v43 = vld [vmem:[#allocation9 + $0xe8] sm:$0xff] }
 0x3e7   : > { %7507 = vmatmul.msk.f32.gmra.mxu3 %vm332_vm0, %v4264_v3  ;;  %6092 = vmatpush.msra.mxu0 %v5979_v43 }
 0x3e8   : > { %4897 = vst.msk [vmem:[#allocation3 + $0x50] sm:$0xff] %vm332_vm0, %v4865_v57  ;;  %7539 = vmatmul.msk.f32.gmra.mxu0 %vm332_vm0, %v9635_v35 }
 0x3e9   : > { %v4082_v36 = vpop.f32.mrf.mxu2  ;;  %6093 = vmatpush.msra.mxu0 %v5978_v53 }
 0x3ea   : > { %v4424_v37 = vpop.f32.mrf.mxu3  ;;  %v3843_v29 = vpop.f32.mrf.mxu1  ;;  %v4184_v25 = vadd.f32 %v4152_v44, %v4082_v36  ;;  %v5262_v36 = vld [vmem:[#allocation2 + $0x31] sm:$0xff] }
 0x3eb   : > { %v4493_v41 = vld [vmem:[#allocation3 + $0x60] sm:$0xff]  ;;  %3887 = vst.msk [vmem:[#allocation3 + $0xd0] sm:$0xff] %vm332_vm0, %v3843_v29  ;;  %v5604_v44 = vld [vmem:[#allocation2 + $0x4f] sm:$0xff] }
 0x3ec   : > { %v4525_v12 = vadd.f32 %v4493_v41, %v4421_v33  ;;  %4216 = vst.msk [vmem:[#allocation3 + $0x68] sm:$0xff] %vm332_vm0, %v4184_v25  ;;  %v5946_v25 = vld [vmem:[#allocation2 + $0x50] sm:$0xff]  ;;  %v6321_v41 = vld [vmem:[#allocation9 + $0x108] sm:$0xff] }
 0x3ed   : > { %v4834_v28 = vld [vmem:[#allocation3 + $0x58] sm:$0xff]  ;;  %7552 = vmatmul.msk.f32.gmra.mxu1 %vm332_vm0, %v9500_v10  ;;  %v9820_v35 = vpop.f32.mrf.mxu0 }
 0x3ee   : > { %4557 = vst.msk [vmem:[#allocation3 + $0x60] sm:$0xff] %vm332_vm0, %v4525_v12  ;;  %v4866_v54 = vadd.f32 %v4834_v28, %v9772_v13  ;;  %7476 = vmatmul.msk.f32.gmra.mxu2 %vm332_vm0, %v9818_v47  ;;  %6434 = vmatpush.msra.mxu1 %v6321_v41 }
 0x3ef   : > { %7508 = vmatmul.msk.f32.gmra.mxu3 %vm332_vm0, %v4265_v23 }
 0x3f0   : > { %4898 = vst.msk [vmem:[#allocation3 + $0x58] sm:$0xff] %vm332_vm0, %v4866_v54  ;;  %7540 = vmatmul.msk.f32.gmra.mxu0 %vm332_vm0, %v4607_v42  ;;  %v9872_v42 = vld [vmem:[#allocation2 + $0x49] sm:$0xff] }
 0x3f1   : > { %v4085_v10 = vpop.f32.mrf.mxu2 }
 0x3f2   : > { %v4427_v61 = vpop.f32.mrf.mxu3  ;;  %v3846_v49 = vpop.f32.mrf.mxu1  ;;  %v4185_v5 = vadd.f32 %v4153_v16, %v4085_v10  ;;  %v5605_v10 = vld [vmem:[#allocation2 + $0x67] sm:$0xff] }
 0x3f3   : > { %v4494_v22 = vld [vmem:[#allocation3 + $0x68] sm:$0xff]  ;;  %3888 = vst.msk [vmem:[#allocation3 + $0xd8] sm:$0xff] %vm332_vm0, %v3846_v49 }
 0x3f4   : > { %v4526_v13 = vadd.f32 %v4494_v22, %v4424_v37  ;;  %4217 = vst.msk [vmem:[#allocation3 + $0x70] sm:$0xff] %vm332_vm0, %v4185_v5  ;;  %v5947_v49 = vld [vmem:[#allocation2 + $0x68] sm:$0xff]  ;;  %v4157_v5 = vld [vmem:[#allocation3 + $0x90] sm:$0xff] }
 0x3f5   : > { %v4835_v45 = vld [vmem:[#allocation3 + $0x60] sm:$0xff]  ;;  %7553 = vmatmul.msk.f32.gmra.mxu1 %vm332_vm0, %v9520_v30  ;;  %v9835_v59 = vpop.f32.mrf.mxu0 }
 0x3f6   : > { %4558 = vst.msk [vmem:[#allocation3 + $0x68] sm:$0xff] %vm332_vm0, %v4526_v13  ;;  %v4867_v11 = vadd.f32 %v4835_v45, %v9788_v48  ;;  %7477 = vmatmul.msk.f32.gmra.mxu2 %vm332_vm0, %v9833_v63 }
 0x3f7   : > { %7509 = vmatmul.msk.f32.gmra.mxu3 %vm332_vm0, %v4266_v26 }
 0x3f8   : > { %4899 = vst.msk [vmem:[#allocation3 + $0x60] sm:$0xff] %vm332_vm0, %v4867_v11  ;;  %7541 = vmatmul.msk.f32.gmra.mxu0 %vm332_vm0, %v4608_v38  ;;  %v9887_v38 = vld [vmem:[#allocation2 + $0x51] sm:$0xff] }
 0x3f9   : > { %v4088_v30 = vpop.f32.mrf.mxu2 }
 0x3fa   : > { %v4430_v6 = vpop.f32.mrf.mxu3  ;;  %v3849_v7 = vpop.f32.mrf.mxu1  ;;  %v4186_v34 = vadd.f32 %v4154_v17, %v4088_v30  ;;  %v5606_v30 = vld [vmem:[#allocation2 + $0x6f] sm:$0xff] }
 0x3fb   : > { %v4495_v20 = vld [vmem:[#allocation3 + $0x70] sm:$0xff]  ;;  %3889 = vst.msk [vmem:[#allocation3 + $0xe0] sm:$0xff] %vm332_vm0, %v3849_v7 }
 0x3fc   : > { %v4527_v1 = vadd.f32 %v4495_v20, %v4427_v61  ;;  %4218 = vst.msk [vmem:[#allocation3 + $0x78] sm:$0xff] %vm332_vm0, %v4186_v34  ;;  %v5948_v7 = vld [vmem:[#allocation2 + $0x70] sm:$0xff]  ;;  %v4158_v34 = vld [vmem:[#allocation3 + $0x98] sm:$0xff] }
 0x3fd   : > { %v4836_v48 = vld [vmem:[#allocation3 + $0x68] sm:$0xff]  ;;  %7554 = vmatmul.msk.f32.gmra.mxu1 %vm332_vm0, %v9537_v58  ;;  %v9848_v51 = vpop.f32.mrf.mxu0 }
 0x3fe   : > { %4559 = vst.msk [vmem:[#allocation3 + $0x70] sm:$0xff] %vm332_vm0, %v4527_v1  ;;  %v4868_v33 = vadd.f32 %v4836_v48, %v9804_v31  ;;  %7574 = vmatmul.msk.f32.vlgmr.msra.gmra.mxu2 %vm332_vm0, %v5261_v24  ;;  %v5165_v24 = vld [vmem:[#allocation3] sm:$0xff] }
 0x3ff   : > { %7606 = vmatmul.msk.f32.vlgmr.msra.gmra.mxu3 %vm332_vm0, %v5603_v52 }
 0x400   : > { %4900 = vst.msk [vmem:[#allocation3 + $0x68] sm:$0xff] %vm332_vm0, %v4868_v33  ;;  %7638 = vmatmul.msk.f32.vlgmr.msra.gmra.mxu0 %vm332_vm0, %v5945_v55 }
 0x401   : > { %v4091_v39 = vpop.f32.mrf.mxu2 }
 0x402   : > { %v4433_v58 = vpop.f32.mrf.mxu3  ;;  %v3852_v60 = vpop.f32.mrf.mxu1  ;;  %v4187_v27 = vadd.f32 %v4155_v18, %v4091_v39  ;;  %v9902_v39 = vld [vmem:[#allocation2 + $0x69] sm:$0xff] }
 0x403   : > { %v4496_v3 = vld [vmem:[#allocation3 + $0x78] sm:$0xff]  ;;  %3890 = vst.msk [vmem:[#allocation3 + $0xe8] sm:$0xff] %vm332_vm0, %v3852_v60  ;;  %v5607_v18 = vld [vmem:[#allocation2 + $0x87] sm:$0xff] }
 0x404   : > { %v4528_v57 = vadd.f32 %v4496_v3, %v4430_v6  ;;  %4219 = vst.msk [vmem:[#allocation3 + $0x80] sm:$0xff] %vm332_vm0, %v4187_v27  ;;  %v5949_v27 = vld [vmem:[#allocation2 + $0x88] sm:$0xff]  ;;  %v4159_v3 = vld [vmem:[#allocation3 + $0xa0] sm:$0xff] }
 0x405   : > { %v4837_v31 = vld [vmem:[#allocation3 + $0x70] sm:$0xff]  ;;  %7555 = vmatmul.msk.f32.gmra.mxu1 %vm332_vm0, %v9560_v21  ;;  %v9860_v37 = vpop.f32.mrf.mxu0  ;;  %v4156_v21 = vld [vmem:[#allocation3 + $0x88] sm:$0xff] }
 0x406   : > { %4560 = vst.msk [vmem:[#allocation3 + $0x78] sm:$0xff] %vm332_vm0, %v4528_v57  ;;  %v4869_v29 = vadd.f32 %v4837_v31, %v9820_v35  ;;  %7575 = vmatmul.msk.f32.gmra.mxu2 %vm332_vm0, %v5262_v36 }
 0x407   : > { %7607 = vmatmul.msk.f32.gmra.mxu3 %vm332_vm0, %v5604_v44  ;;  %v5166_v44 = vld [vmem:[#allocation3 + $0x8] sm:$0xff] }
 0x408   : > { %4901 = vst.msk [vmem:[#allocation3 + $0x70] sm:$0xff] %vm332_vm0, %v4869_v29  ;;  %7639 = vmatmul.msk.f32.gmra.mxu0 %vm332_vm0, %v5946_v25 }
 0x409   : > { %v4094_v12 = vpop.f32.mrf.mxu2 }
 0x40a   : > { %v4436_v43 = vpop.f32.mrf.mxu3  ;;  %v3855_v28 = vpop.f32.mrf.mxu1  ;;  %v4188_v23 = vadd.f32 %v4156_v21, %v4094_v12  ;;  %v9917_v12 = vld [vmem:[#allocation2 + $0x71] sm:$0xff] }
 0x40b   : > { %v4497_v54 = vld [vmem:[#allocation3 + $0x80] sm:$0xff]  ;;  %3891 = vst.msk [vmem:[#allocation3 + $0xf0] sm:$0xff] %vm332_vm0, %v3855_v28  ;;  %v5608_v21 = vld [vmem:[#allocation2 + $0x8f] sm:$0xff] }
 0x40c   : > { %v4529_v35 = vadd.f32 %v4497_v54, %v4433_v58  ;;  %4220 = vst.msk [vmem:[#allocation3 + $0x88] sm:$0xff] %vm332_vm0, %v4188_v23  ;;  %v5950_v23 = vld [vmem:[#allocation2 + $0x90] sm:$0xff]  ;;  %v4160_v54 = vld [vmem:[#allocation3 + $0xa8] sm:$0xff] }
 0x40d   : > { %v4838_v53 = vld [vmem:[#allocation3 + $0x78] sm:$0xff]  ;;  %7556 = vmatmul.msk.f32.gmra.mxu1 %vm332_vm0, %v9580_v4  ;;  %v9874_v16 = vpop.f32.mrf.mxu0 }
 0x40e   : > { %4561 = vst.msk [vmem:[#allocation3 + $0x80] sm:$0xff] %vm332_vm0, %v4529_v35  ;;  %v4870_v61 = vadd.f32 %v4838_v53, %v9835_v59  ;;  %7576 = vmatmul.msk.f32.gmra.mxu2 %vm332_vm0, %v9872_v42 }
 0x40f   : > { %7608 = vmatmul.msk.f32.gmra.mxu3 %vm332_vm0, %v5605_v10 }
 0x410   : > { %4902 = vst.msk [vmem:[#allocation3 + $0x78] sm:$0xff] %vm332_vm0, %v4870_v61  ;;  %7640 = vmatmul.msk.f32.gmra.mxu0 %vm332_vm0, %v5947_v49  ;;  %v5167_v61 = vld [vmem:[#allocation3 + $0x10] sm:$0xff] }
 0x411   : > { %v4097_v4 = vpop.f32.mrf.mxu2 }
 0x412   : > { %v4439_v22 = vpop.f32.mrf.mxu3  ;;  %v3858_v13 = vpop.f32.mrf.mxu1  ;;  %v4189_v45 = vadd.f32 %v4157_v5, %v4097_v4 }
 0x413   : > { %v4498_v26 = vld [vmem:[#allocation3 + $0x88] sm:$0xff]  ;;  %3892 = vst.msk [vmem:[#allocation3 + $0xf8] sm:$0xff] %vm332_vm0, %v3858_v13 }
 0x414   : > { %v4530_v11 = vadd.f32 %v4498_v26, %v4436_v43  ;;  %4221 = vst.msk [vmem:[#allocation3 + $0x90] sm:$0xff] %vm332_vm0, %v4189_v45  ;;  %v5609_v13 = vld [vmem:[#allocation2 + $0xa7] sm:$0xff] }
 0x415   : > { %v4839_v59 = vld [vmem:[#allocation3 + $0x80] sm:$0xff]  ;;  %7557 = vmatmul.msk.f32.gmra.mxu1 %vm332_vm0, %v9600_v32  ;;  %v9889_v17 = vpop.f32.mrf.mxu0 }
 0x416   : > { %4562 = vst.msk [vmem:[#allocation3 + $0x88] sm:$0xff] %vm332_vm0, %v4530_v11  ;;  %v4871_v6 = vadd.f32 %v4839_v59, %v9848_v51  ;;  %7577 = vmatmul.msk.f32.gmra.mxu2 %vm332_vm0, %v9887_v38  ;;  %v5951_v11 = vld [vmem:[#allocation2 + $0xa8] sm:$0xff]  ;;  %v4161_v59 = vld [vmem:[#allocation3 + $0xb0] sm:$0xff] }
 0x417   : > { %7609 = vmatmul.msk.f32.gmra.mxu3 %vm332_vm0, %v5606_v30 }
 0x418   : > { %4903 = vst.msk [vmem:[#allocation3 + $0x80] sm:$0xff] %vm332_vm0, %v4871_v6  ;;  %7641 = vmatmul.msk.f32.gmra.mxu0 %vm332_vm0, %v5948_v7 }
 0x419   : > { %v4100_v32 = vpop.f32.mrf.mxu2 }
 0x41a   : > { %v4442_v20 = vpop.f32.mrf.mxu3  ;;  %v4190_v1 = vadd.f32 %v4158_v34, %v4100_v32  ;;  %v5069_v48 = vpop.f32.mrf.mxu1  ;;  %v5168_v32 = vld [vmem:[#allocation3 + $0x18] sm:$0xff] }
 0x41b   : > { %v4499_v52 = vld [vmem:[#allocation3 + $0x90] sm:$0xff]  ;;  %v5197_v33 = vadd.f32 %v5165_v24, %v5069_v48 }
 0x41c   : > { %v4531_v55 = vadd.f32 %v4499_v52, %v4439_v22  ;;  %4222 = vst.msk [vmem:[#allocation3 + $0x98] sm:$0xff] %vm332_vm0, %v4190_v1  ;;  %v9932_v22 = vld [vmem:[#allocation2 + $0x89] sm:$0xff]  ;;  %v9947_v48 = vld [vmem:[#allocation2 + $0x91] sm:$0xff] }
 0x41d   : > { %v4840_v51 = vld [vmem:[#allocation3 + $0x88] sm:$0xff]  ;;  %5229 = vst.msk [vmem:[#allocation3] sm:$0xff] %vm332_vm0, %v5197_v33  ;;  %7558 = vmatmul.msk.f32.gmra.mxu1 %vm332_vm0, %v9620_v2  ;;  %v9904_v58 = vpop.f32.mrf.mxu0 }
 0x41e   : > { %4563 = vst.msk [vmem:[#allocation3 + $0x90] sm:$0xff] %vm332_vm0, %v4531_v55  ;;  %v4872_v60 = vadd.f32 %v4840_v51, %v9860_v37  ;;  %7578 = vmatmul.msk.f32.gmra.mxu2 %vm332_vm0, %v9902_v39  ;;  %v5610_v24 = vld [vmem:[#allocation2 + $0xaf] sm:$0xff]  ;;  %v4162_v51 = vld [vmem:[#allocation3 + $0xb8] sm:$0xff] }
 0x41f   : > { %7610 = vmatmul.msk.f32.gmra.mxu3 %vm332_vm0, %v5607_v18  ;;  %v5952_v55 = vld [vmem:[#allocation2 + $0xb0] sm:$0xff] }
 0x420   : > { %4904 = vst.msk [vmem:[#allocation3 + $0x88] sm:$0xff] %vm332_vm0, %v4872_v60  ;;  %7642 = vmatmul.msk.f32.gmra.mxu0 %vm332_vm0, %v5949_v27 }
 0x421   : > { %v4103_v2 = vpop.f32.mrf.mxu2 }
 0x422   : > { %v4445_v57 = vpop.f32.mrf.mxu3  ;;  %v4191_v31 = vadd.f32 %v4159_v3, %v4103_v2  ;;  %v5072_v36 = vpop.f32.mrf.mxu1  ;;  %v5169_v2 = vld [vmem:[#allocation3 + $0x20] sm:$0xff] }
 0x423   : > { %v4500_v29 = vld [vmem:[#allocation3 + $0x98] sm:$0xff]  ;;  %v5198_v25 = vadd.f32 %v5166_v44, %v5072_v36  ;;  %v9962_v36 = vld [vmem:[#allocation2 + $0xa9] sm:$0xff] }
 0x424   : > { %v4532_v41 = vadd.f32 %v4500_v29, %v4442_v20  ;;  %4223 = vst.msk [vmem:[#allocation3 + $0xa0] sm:$0xff] %vm332_vm0, %v4191_v31  ;;  %v5611_v44 = vld [vmem:[#allocation2 + $0xc7] sm:$0xff] }
 0x425   : > { %v4841_v37 = vld [vmem:[#allocation3 + $0x90] sm:$0xff]  ;;  %5230 = vst.msk [vmem:[#allocation3 + $0x8] sm:$0xff] %vm332_vm0, %v5198_v25  ;;  %7559 = vmatmul.msk.f32.gmra.mxu1 %vm332_vm0, %v9640_v15  ;;  %v9919_v43 = vpop.f32.mrf.mxu0 }
 0x426   : > { %4564 = vst.msk [vmem:[#allocation3 + $0x98] sm:$0xff] %vm332_vm0, %v4532_v41  ;;  %v4873_v28 = vadd.f32 %v4841_v37, %v9874_v16  ;;  %7579 = vmatmul.msk.f32.gmra.mxu2 %vm332_vm0, %v9917_v12  ;;  %v5953_v41 = vld [vmem:[#allocation2 + $0xc8] sm:$0xff]  ;;  %v4163_v37 = vld [vmem:[#allocation3 + $0xc0] sm:$0xff] }
 0x427   : > { %7611 = vmatmul.msk.f32.gmra.mxu3 %vm332_vm0, %v5608_v21 }
 0x428   : > { %4905 = vst.msk [vmem:[#allocation3 + $0x90] sm:$0xff] %vm332_vm0, %v4873_v28  ;;  %7643 = vmatmul.msk.f32.gmra.mxu0 %vm332_vm0, %v5950_v23 }
 0x429   : > { %v4106_v15 = vpop.f32.mrf.mxu2 }
 0x42a   : > { %v4448_v35 = vpop.f32.mrf.mxu3  ;;  %v4192_v53 = vadd.f32 %v4160_v54, %v4106_v15  ;;  %v5075_v10 = vpop.f32.mrf.mxu1  ;;  %v5170_v15 = vld [vmem:[#allocation3 + $0x28] sm:$0xff] }
 0x42b   : > { %v4501_v49 = vld [vmem:[#allocation3 + $0xa0] sm:$0xff]  ;;  %v5199_v4 = vadd.f32 %v5167_v61, %v5075_v10  ;;  %v9977_v10 = vld [vmem:[#allocation2 + $0xb1] sm:$0xff] }
 0x42c   : > { %v4533_v5 = vadd.f32 %v4501_v49, %v4445_v57  ;;  %4224 = vst.msk [vmem:[#allocation3 + $0xa8] sm:$0xff] %vm332_vm0, %v4192_v53  ;;  %v5612_v61 = vld [vmem:[#allocation2 + $0xcf] sm:$0xff] }
 0x42d   : > { %v4842_v16 = vld [vmem:[#allocation3 + $0x98] sm:$0xff]  ;;  %5231 = vst.msk [vmem:[#allocation3 + $0x10] sm:$0xff] %vm332_vm0, %v5199_v4  ;;  %7560 = vmatmul.msk.f32.gmra.mxu1 %vm332_vm0, %v9658_v9  ;;  %v9934_v45 = vpop.f32.mrf.mxu0 }
 0x42e   : > { %4565 = vst.msk [vmem:[#allocation3 + $0xa0] sm:$0xff] %vm332_vm0, %v4533_v5  ;;  %v4874_v26 = vadd.f32 %v4842_v16, %v9889_v17  ;;  %7580 = vmatmul.msk.f32.gmra.mxu2 %vm332_vm0, %v9932_v22  ;;  %v5954_v5 = vld [vmem:[#allocation2 + $0xd0] sm:$0xff] }
 0x42f   : > { %7612 = vmatmul.msk.f32.gmra.mxu3 %vm332_vm0, %v5609_v13  ;;  %v4164_v13 = vld [vmem:[#allocation3 + $0xc8] sm:$0xff] }
 0x430   : > { %4906 = vst.msk [vmem:[#allocation3 + $0x98] sm:$0xff] %vm332_vm0, %v4874_v26  ;;  %7644 = vmatmul.msk.f32.gmra.mxu0 %vm332_vm0, %v5951_v11 }
 0x431   : > { %v4109_v9 = vpop.f32.mrf.mxu2 }
 0x432   : > { %v4451_v30 = vpop.f32.mrf.mxu3  ;;  %v4193_v6 = vadd.f32 %v4161_v59, %v4109_v9  ;;  %v5078_v7 = vpop.f32.mrf.mxu1  ;;  %v5171_v59 = vld [vmem:[#allocation3 + $0x30] sm:$0xff] }
 0x433   : > { %v4502_v34 = vld [vmem:[#allocation3 + $0xa8] sm:$0xff]  ;;  %v5200_v20 = vadd.f32 %v5168_v32, %v5078_v7 }
 0x434   : > { %v4534_v1 = vadd.f32 %v4502_v34, %v4448_v35  ;;  %4225 = vst.msk [vmem:[#allocation3 + $0xb0] sm:$0xff] %vm332_vm0, %v4193_v6  ;;  %v9992_v32 = vld [vmem:[#allocation2 + $0xc9] sm:$0xff] }
 0x435   : > { %v4843_v17 = vld [vmem:[#allocation3 + $0xa0] sm:$0xff]  ;;  %5232 = vst.msk [vmem:[#allocation3 + $0x18] sm:$0xff] %vm332_vm0, %v5200_v20  ;;  %7561 = vmatmul.msk.f32.gmra.mxu1 %vm332_vm0, %v9674_v14  ;;  %v9949_v52 = vpop.f32.mrf.mxu0 }
 0x436   : > { %4566 = vst.msk [vmem:[#allocation3 + $0xa8] sm:$0xff] %vm332_vm0, %v4534_v1  ;;  %v4875_v33 = vadd.f32 %v4843_v17, %v9904_v58  ;;  %7581 = vmatmul.msk.f32.gmra.mxu2 %vm332_vm0, %v9947_v48  ;;  %v5613_v34 = vld [vmem:[#allocation2 + $0xe7] sm:$0xff] }
 0x437   : > { %7613 = vmatmul.msk.f32.gmra.mxu3 %vm332_vm0, %v5610_v24  ;;  %v5955_v17 = vld [vmem:[#allocation2 + $0xe8] sm:$0xff]  ;;  %v4165_v24 = vld [vmem:[#allocation3 + $0xd0] sm:$0xff] }
 0x438   : > { %4907 = vst.msk [vmem:[#allocation3 + $0xa0] sm:$0xff] %vm332_vm0, %v4875_v33  ;;  %7645 = vmatmul.msk.f32.gmra.mxu0 %vm332_vm0, %v5952_v55 }
 0x439   : > { %v4112_v14 = vpop.f32.mrf.mxu2 }
 0x43a   : > { %v4454_v18 = vpop.f32.mrf.mxu3  ;;  %v4194_v60 = vadd.f32 %v4162_v51, %v4112_v14  ;;  %v5081_v27 = vpop.f32.mrf.mxu1  ;;  %v5172_v51 = vld [vmem:[#allocation3 + $0x38] sm:$0xff] }
 0x43b   : > { %v4503_v3 = vld [vmem:[#allocation3 + $0xb0] sm:$0xff]  ;;  %v5201_v57 = vadd.f32 %v5169_v2, %v5081_v27 }
 0x43c   : > { %v4535_v31 = vadd.f32 %v4503_v3, %v4451_v30  ;;  %4226 = vst.msk [vmem:[#allocation3 + $0xb8] sm:$0xff] %vm332_vm0, %v4194_v60  ;;  %v10007_v2 = vld [vmem:[#allocation2 + $0xd1] sm:$0xff] }
 0x43d   : > { %v4844_v58 = vld [vmem:[#allocation3 + $0xa8] sm:$0xff]  ;;  %5233 = vst.msk [vmem:[#allocation3 + $0x20] sm:$0xff] %vm332_vm0, %v5201_v57  ;;  %7562 = vmatmul.msk.f32.gmra.mxu1 %vm332_vm0, %v9690_v0  ;;  %v9964_v29 = vpop.f32.mrf.mxu0 }
 0x43e   : > { %4567 = vst.msk [vmem:[#allocation3 + $0xb0] sm:$0xff] %vm332_vm0, %v4535_v31  ;;  %v4876_v25 = vadd.f32 %v4844_v58, %v9919_v43  ;;  %7582 = vmatmul.msk.f32.gmra.mxu2 %vm332_vm0, %v9962_v36  ;;  %v5614_v3 = vld [vmem:[#allocation2 + $0xef] sm:$0xff] }
 0x43f   : > { %7614 = vmatmul.msk.f32.gmra.mxu3 %vm332_vm0, %v5611_v44  ;;  %v5956_v58 = vld [vmem:[#allocation2 + $0xf0] sm:$0xff]  ;;  %v4166_v44 = vld [vmem:[#allocation3 + $0xd8] sm:$0xff] }
 0x440   : > { %4908 = vst.msk [vmem:[#allocation3 + $0xa8] sm:$0xff] %vm332_vm0, %v4876_v25  ;;  %7646 = vmatmul.msk.f32.gmra.mxu0 %vm332_vm0, %v5953_v41 }
 0x441   : > { %v4115_v0 = vpop.f32.mrf.mxu2 }
 0x442   : > { %v4457_v21 = vpop.f32.mrf.mxu3  ;;  %v4195_v28 = vadd.f32 %v4163_v37, %v4115_v0  ;;  %v5084_v23 = vpop.f32.mrf.mxu1  ;;  %v5173_v37 = vld [vmem:[#allocation3 + $0x40] sm:$0xff] }
 0x443   : > { %v4504_v54 = vld [vmem:[#allocation3 + $0xb8] sm:$0xff]  ;;  %v5202_v35 = vadd.f32 %v5170_v15, %v5084_v23  ;;  %v10022_v15 = vld [vmem:[#allocation2 + $0xe9] sm:$0xff] }
 0x444   : > { %v4536_v53 = vadd.f32 %v4504_v54, %v4454_v18  ;;  %4227 = vst.msk [vmem:[#allocation3 + $0xc0] sm:$0xff] %vm332_vm0, %v4195_v28  ;;  %v5615_v54 = vld [vmem:[#allocation2 + $0x107] sm:$0xff] }
 0x445   : > { %v4845_v43 = vld [vmem:[#allocation3 + $0xb0] sm:$0xff]  ;;  %5234 = vst.msk [vmem:[#allocation3 + $0x28] sm:$0xff] %vm332_vm0, %v5202_v35  ;;  %7563 = vmatmul.msk.f32.gmra.mxu1 %vm332_vm0, %v9706_v19  ;;  %v9979_v49 = vpop.f32.mrf.mxu0  ;;  %v6320_v19 = vld [vmem:[#allocation9 + $0x100] sm:$0xff] }
 0x446   : > { %4568 = vst.msk [vmem:[#allocation3 + $0xb8] sm:$0xff] %vm332_vm0, %v4536_v53  ;;  %v4877_v4 = vadd.f32 %v4845_v43, %v9934_v45  ;;  %7583 = vmatmul.msk.f32.gmra.mxu2 %vm332_vm0, %v9977_v10  ;;  %6435 = vmatpush.msra.mxu1 %v6320_v19  ;;  %v5957_v43 = vld [vmem:[#allocation2 + $0x108] sm:$0xff] }
 0x447   : > { %7615 = vmatmul.msk.f32.gmra.mxu3 %vm332_vm0, %v5612_v61  ;;  %v4167_v61 = vld [vmem:[#allocation3 + $0xe0] sm:$0xff] }
 0x448   : > { %4909 = vst.msk [vmem:[#allocation3 + $0xb0] sm:$0xff] %vm332_vm0, %v4877_v4  ;;  %7647 = vmatmul.msk.f32.gmra.mxu0 %vm332_vm0, %v5954_v5 }
 0x449   : > { %v4118_v16 = vpop.f32.mrf.mxu2 }
 0x44a   : > { %v4460_v26 = vpop.f32.mrf.mxu3  ;;  %v4196_v11 = vadd.f32 %v4164_v13, %v4118_v16  ;;  %v5087_v9 = vpop.f32.mrf.mxu1  ;;  %v5174_v16 = vld [vmem:[#allocation3 + $0x48] sm:$0xff] }
 0x44b   : > { %v4505_v30 = vld [vmem:[#allocation3 + $0xc0] sm:$0xff]  ;;  %v5203_v45 = vadd.f32 %v5171_v59, %v5087_v9  ;;  %v10037_v9 = vld [vmem:[#allocation2 + $0xf1] sm:$0xff] }
 0x44c   : > { %v4537_v6 = vadd.f32 %v4505_v30, %v4457_v21  ;;  %4228 = vst.msk [vmem:[#allocation3 + $0xc8] sm:$0xff] %vm332_vm0, %v4196_v11  ;;  %v5616_v59 = vld [vmem:[#allocation2 + $0x10f] sm:$0xff] }
 0x44d   : > { %v4846_v7 = vld [vmem:[#allocation3 + $0xb8] sm:$0xff]  ;;  %5235 = vst.msk [vmem:[#allocation3 + $0x30] sm:$0xff] %vm332_vm0, %v5203_v45  ;;  %7564 = vmatmul.msk.f32.gmra.mxu1 %vm332_vm0, %v9722_v56  ;;  %v9994_v20 = vpop.f32.mrf.mxu0 }
 0x44e   : > { %4569 = vst.msk [vmem:[#allocation3 + $0xc0] sm:$0xff] %vm332_vm0, %v4537_v6  ;;  %v4878_v1 = vadd.f32 %v4846_v7, %v9949_v52  ;;  %7584 = vmatmul.msk.f32.gmra.mxu2 %vm332_vm0, %v9992_v32  ;;  %v5958_v6 = vld [vmem:[#allocation2 + $0x110] sm:$0xff]  ;;  %v4168_v7 = vld [vmem:[#allocation3 + $0xe8] sm:$0xff] }
 0x44f   : > { %7616 = vmatmul.msk.f32.gmra.mxu3 %vm332_vm0, %v5613_v34 }
 0x450   : > { %4910 = vst.msk [vmem:[#allocation3 + $0xb8] sm:$0xff] %vm332_vm0, %v4878_v1  ;;  %7648 = vmatmul.msk.f32.gmra.mxu0 %vm332_vm0, %v5955_v17 }
 0x451   : > { %v4121_v56 = vpop.f32.mrf.mxu2 }
 0x452   : > { %v4463_v33 = vpop.f32.mrf.mxu3  ;;  %v4197_v55 = vadd.f32 %v4165_v24, %v4121_v56  ;;  %v5090_v14 = vpop.f32.mrf.mxu1  ;;  %v5175_v56 = vld [vmem:[#allocation3 + $0x50] sm:$0xff] }
 0x453   : > { %v4506_v18 = vld [vmem:[#allocation3 + $0xc8] sm:$0xff]  ;;  %v5204_v60 = vadd.f32 %v5172_v51, %v5090_v14 }
 0x454   : > { %v4538_v27 = vadd.f32 %v4506_v18, %v4460_v26  ;;  %4229 = vst.msk [vmem:[#allocation3 + $0xd0] sm:$0xff] %vm332_vm0, %v4197_v55  ;;  %v10052_v14 = vld [vmem:[#allocation2 + $0x109] sm:$0xff] }
 0x455   : > { %v4847_v52 = vld [vmem:[#allocation3 + $0xc0] sm:$0xff]  ;;  %5236 = vst.msk [vmem:[#allocation3 + $0x38] sm:$0xff] %vm332_vm0, %v5204_v60  ;;  %7565 = vmatmul.msk.f32.gmra.mxu1 %vm332_vm0, %v9738_v46  ;;  %v10009_v57 = vpop.f32.mrf.mxu0 }
 0x456   : > { %4570 = vst.msk [vmem:[#allocation3 + $0xc8] sm:$0xff] %vm332_vm0, %v4538_v27  ;;  %v4879_v31 = vadd.f32 %v4847_v52, %v9964_v29  ;;  %7585 = vmatmul.msk.f32.gmra.mxu2 %vm332_vm0, %v10007_v2  ;;  %v5617_v51 = vld [vmem:[#allocation2 + $0x127] sm:$0xff]  ;;  %v4169_v52 = vld [vmem:[#allocation3 + $0xf0] sm:$0xff] }
 0x457   : > { %7617 = vmatmul.msk.f32.gmra.mxu3 %vm332_vm0, %v5614_v3  ;;  %v5959_v27 = vld [vmem:[#allocation2 + $0x128] sm:$0xff] }
 0x458   : > { %4911 = vst.msk [vmem:[#allocation3 + $0xc0] sm:$0xff] %vm332_vm0, %v4879_v31  ;;  %7649 = vmatmul.msk.f32.gmra.mxu0 %vm332_vm0, %v5956_v58 }
 0x459   : > { %v4124_v46 = vpop.f32.mrf.mxu2 }
 0x45a   : > { %v4466_v25 = vpop.f32.mrf.mxu3  ;;  %v4198_v41 = vadd.f32 %v4166_v44, %v4124_v46  ;;  %v5093_v0 = vpop.f32.mrf.mxu1  ;;  %v5176_v46 = vld [vmem:[#allocation3 + $0x58] sm:$0xff] }
 0x45b   : > { %v4507_v21 = vld [vmem:[#allocation3 + $0xd0] sm:$0xff]  ;;  %v5205_v28 = vadd.f32 %v5173_v37, %v5093_v0 }
 0x45c   : > { %v4539_v23 = vadd.f32 %v4507_v21, %v4463_v33  ;;  %4230 = vst.msk [vmem:[#allocation3 + $0xd8] sm:$0xff] %vm332_vm0, %v4198_v41  ;;  %v10067_v0 = vld [vmem:[#allocation2 + $0x111] sm:$0xff] }
 0x45d   : > { %v4848_v29 = vld [vmem:[#allocation3 + $0xc8] sm:$0xff]  ;;  %5237 = vst.msk [vmem:[#allocation3 + $0x40] sm:$0xff] %vm332_vm0, %v5205_v28  ;;  %7566 = vmatmul.msk.f32.gmra.mxu1 %vm332_vm0, %v9754_v8  ;;  %v10024_v35 = vpop.f32.mrf.mxu0 }
 0x45e   : > { %4571 = vst.msk [vmem:[#allocation3 + $0xd0] sm:$0xff] %vm332_vm0, %v4539_v23  ;;  %v4880_v53 = vadd.f32 %v4848_v29, %v9979_v49  ;;  %7586 = vmatmul.msk.f32.gmra.mxu2 %vm332_vm0, %v10022_v15  ;;  %v5618_v37 = vld [vmem:[#allocation2 + $0x12f] sm:$0xff]  ;;  %v4170_v29 = vld [vmem:[#allocation3 + $0xf8] sm:$0xff] }
 0x45f   : > { %7618 = vmatmul.msk.f32.gmra.mxu3 %vm332_vm0, %v5615_v54  ;;  %v5960_v23 = vld [vmem:[#allocation2 + $0x130] sm:$0xff] }
 0x460   : > { %4912 = vst.msk [vmem:[#allocation3 + $0xc8] sm:$0xff] %vm332_vm0, %v4880_v53  ;;  %7650 = vmatmul.msk.f32.gmra.mxu0 %vm332_vm0, %v5957_v43 }
 0x461   : > { %v4127_v8 = vpop.f32.mrf.mxu2 }
 0x462   : > { %v4469_v4 = vpop.f32.mrf.mxu3  ;;  %v4199_v5 = vadd.f32 %v4167_v61, %v4127_v8  ;;  %v5096_v19 = vpop.f32.mrf.mxu1  ;;  %v5177_v8 = vld [vmem:[#allocation3 + $0x60] sm:$0xff] }
 0x463   : > { %v4508_v13 = vld [vmem:[#allocation3 + $0xd8] sm:$0xff]  ;;  %v5206_v26 = vadd.f32 %v5174_v16, %v5096_v19  ;;  %v10082_v19 = vld [vmem:[#allocation2 + $0x129] sm:$0xff] }
 0x464   : > { %v4540_v11 = vadd.f32 %v4508_v13, %v4466_v25  ;;  %4231 = vst.msk [vmem:[#allocation3 + $0xe0] sm:$0xff] %vm332_vm0, %v4199_v5  ;;  %v5619_v16 = vld [vmem:[#allocation2 + $0x147] sm:$0xff] }
 0x465   : > { %v4849_v49 = vld [vmem:[#allocation3 + $0xd0] sm:$0xff]  ;;  %5238 = vst.msk [vmem:[#allocation3 + $0x48] sm:$0xff] %vm332_vm0, %v5206_v26  ;;  %7567 = vmatmul.msk.f32.gmra.mxu1 %vm332_vm0, %v9770_v62  ;;  %v10039_v30 = vpop.f32.mrf.mxu0 }
 0x466   : > { %4572 = vst.msk [vmem:[#allocation3 + $0xd8] sm:$0xff] %vm332_vm0, %v4540_v11  ;;  %v4881_v45 = vadd.f32 %v4849_v49, %v9994_v20  ;;  %7587 = vmatmul.msk.f32.gmra.mxu2 %vm332_vm0, %v10037_v9  ;;  %v5961_v11 = vld [vmem:[#allocation2 + $0x148] sm:$0xff]  ;;  %v5507_v49 = vld [vmem:[#allocation3] sm:$0xff] }
 0x467   : > { %7619 = vmatmul.msk.f32.gmra.mxu3 %vm332_vm0, %v5616_v59 }
 0x468   : > { %4913 = vst.msk [vmem:[#allocation3 + $0xd0] sm:$0xff] %vm332_vm0, %v4881_v45  ;;  %7651 = vmatmul.msk.f32.gmra.mxu0 %vm332_vm0, %v5958_v6  ;;  %v5178_v6 = vld [vmem:[#allocation3 + $0x68] sm:$0xff] }
 0x469   : > { %v4130_v62 = vpop.f32.mrf.mxu2 }
 0x46a   : > { %v4472_v34 = vpop.f32.mrf.mxu3  ;;  %v4200_v1 = vadd.f32 %v4168_v7, %v4130_v62  ;;  %v5099_v17 = vpop.f32.mrf.mxu1 }
 0x46b   : > { %v4509_v24 = vld [vmem:[#allocation3 + $0xe0] sm:$0xff]  ;;  %v5207_v33 = vadd.f32 %v5175_v56, %v5099_v17  ;;  %v10097_v17 = vld [vmem:[#allocation2 + $0x131] sm:$0xff] }
 0x46c   : > { %v4541_v55 = vadd.f32 %v4509_v24, %v4469_v4  ;;  %4232 = vst.msk [vmem:[#allocation3 + $0xe8] sm:$0xff] %vm332_vm0, %v4200_v1  ;;  %v5620_v56 = vld [vmem:[#allocation2 + $0x14f] sm:$0xff] }
 0x46d   : > { %v4850_v20 = vld [vmem:[#allocation3 + $0xd8] sm:$0xff]  ;;  %5239 = vst.msk [vmem:[#allocation3 + $0x50] sm:$0xff] %vm332_vm0, %v5207_v33  ;;  %7568 = vmatmul.msk.f32.gmra.mxu1 %vm332_vm0, %v9784_v50  ;;  %v10054_v18 = vpop.f32.mrf.mxu0 }
 0x46e   : > { %4573 = vst.msk [vmem:[#allocation3 + $0xe0] sm:$0xff] %vm332_vm0, %v4541_v55  ;;  %v4882_v60 = vadd.f32 %v4850_v20, %v10009_v57  ;;  %7588 = vmatmul.msk.f32.gmra.mxu2 %vm332_vm0, %v10052_v14  ;;  %v5962_v55 = vld [vmem:[#allocation2 + $0x150] sm:$0xff]  ;;  %v5508_v20 = vld [vmem:[#allocation3 + $0x8] sm:$0xff] }
 0x46f   : > { %7620 = vmatmul.msk.f32.gmra.mxu3 %vm332_vm0, %v5617_v51 }
 0x470   : > { %4914 = vst.msk [vmem:[#allocation3 + $0xd8] sm:$0xff] %vm332_vm0, %v4882_v60  ;;  %7652 = vmatmul.msk.f32.gmra.mxu0 %vm332_vm0, %v5959_v27  ;;  %v5179_v27 = vld [vmem:[#allocation3 + $0x70] sm:$0xff] }
 0x471   : > { %v4133_v50 = vpop.f32.mrf.mxu2 }
 0x472   : > { %v4475_v3 = vpop.f32.mrf.mxu3  ;;  %v4201_v31 = vadd.f32 %v4169_v52, %v4133_v50  ;;  %v5102_v58 = vpop.f32.mrf.mxu1 }
 0x473   : > { %v4510_v44 = vld [vmem:[#allocation3 + $0xe8] sm:$0xff]  ;;  %v5208_v25 = vadd.f32 %v5176_v46, %v5102_v58 }
 0x474   : > { %v4542_v41 = vadd.f32 %v4510_v44, %v4472_v34  ;;  %4233 = vst.msk [vmem:[#allocation3 + $0xf0] sm:$0xff] %vm332_vm0, %v4201_v31  ;;  %v10114_v46 = vld [vmem:[#allocation2 + $0x149] sm:$0xff] }
 0x475   : > { %v4851_v57 = vld [vmem:[#allocation3 + $0xe0] sm:$0xff]  ;;  %5240 = vst.msk [vmem:[#allocation3 + $0x58] sm:$0xff] %vm332_vm0, %v5208_v25  ;;  %7569 = vmatmul.msk.f32.gmra.mxu1 %vm332_vm0, %v9802_v40  ;;  %v10069_v21 = vpop.f32.mrf.mxu0 }
 0x476   : > { %4574 = vst.msk [vmem:[#allocation3 + $0xe8] sm:$0xff] %vm332_vm0, %v4542_v41  ;;  %v4883_v28 = vadd.f32 %v4851_v57, %v10024_v35  ;;  %7589 = vmatmul.msk.f32.gmra.mxu2 %vm332_vm0, %v10067_v0  ;;  %v5621_v44 = vld [vmem:[#allocation2 + $0x167] sm:$0xff] }
 0x477   : > { %7621 = vmatmul.msk.f32.gmra.mxu3 %vm332_vm0, %v5618_v37  ;;  %v5963_v57 = vld [vmem:[#allocation2 + $0x168] sm:$0xff] }
 0x478   : > { %4915 = vst.msk [vmem:[#allocation3 + $0xe0] sm:$0xff] %vm332_vm0, %v4883_v28  ;;  %7653 = vmatmul.msk.f32.gmra.mxu0 %vm332_vm0, %v5960_v23  ;;  %v5509_v28 = vld [vmem:[#allocation3 + $0x10] sm:$0xff] }
 0x479   : > { %v4136_v40 = vpop.f32.mrf.mxu2 }
 0x47a   : > { %v4478_v54 = vpop.f32.mrf.mxu3  ;;  %v4202_v53 = vadd.f32 %v4170_v29, %v4136_v40  ;;  %v5105_v43 = vpop.f32.mrf.mxu1  ;;  %v5180_v29 = vld [vmem:[#allocation3 + $0x78] sm:$0xff] }
 0x47b   : > { %v4511_v61 = vld [vmem:[#allocation3 + $0xf0] sm:$0xff]  ;;  %v5209_v4 = vadd.f32 %v5177_v8, %v5105_v43 }
 0x47c   : > { %v4543_v5 = vadd.f32 %v4511_v61, %v4475_v3  ;;  %4234 = vst.msk [vmem:[#allocation3 + $0xf8] sm:$0xff] %vm332_vm0, %v4202_v53 }
 0x47d   : > { %v4852_v35 = vld [vmem:[#allocation3 + $0xe8] sm:$0xff]  ;;  %5241 = vst.msk [vmem:[#allocation3 + $0x60] sm:$0xff] %vm332_vm0, %v5209_v4  ;;  %7570 = vmatmul.msk.f32.gmra.mxu1 %vm332_vm0, %v9818_v47  ;;  %v10084_v13 = vpop.f32.mrf.mxu0  ;;  %v10131_v4 = vld [vmem:[#allocation2 + $0x151] sm:$0xff] }
 0x47e   : > { %4575 = vst.msk [vmem:[#allocation3 + $0xf0] sm:$0xff] %vm332_vm0, %v4543_v5  ;;  %v4884_v26 = vadd.f32 %v4852_v35, %v10039_v30  ;;  %7590 = vmatmul.msk.f32.gmra.mxu2 %vm332_vm0, %v10082_v19  ;;  %v5622_v5 = vld [vmem:[#allocation2 + $0x16f] sm:$0xff] }
 0x47f   : > { %7622 = vmatmul.msk.f32.gmra.mxu3 %vm332_vm0, %v5619_v16 }
 0x480   : > { %4916 = vst.msk [vmem:[#allocation3 + $0xe8] sm:$0xff] %vm332_vm0, %v4884_v26  ;;  %7654 = vmatmul.msk.f32.gmra.mxu0 %vm332_vm0, %v5961_v11  ;;  %v5964_v26 = vld [vmem:[#allocation2 + $0x170] sm:$0xff] }
 0x481   : > { %v5411_v47 = vpop.f32.mrf.mxu2 }
 0x482   : > { %v5753_v59 = vpop.f32.mrf.mxu3  ;;  %v5108_v45 = vpop.f32.mrf.mxu1  ;;  %v5539_v62 = vadd.f32 %v5507_v49, %v5411_v47  ;;  %v5510_v47 = vld [vmem:[#allocation3 + $0x18] sm:$0xff] }
 0x483   : > { %v4512_v7 = vld [vmem:[#allocation3 + $0xf8] sm:$0xff]  ;;  %v5210_v34 = vadd.f32 %v5178_v6, %v5108_v45  ;;  %v5181_v45 = vld [vmem:[#allocation3 + $0x80] sm:$0xff] }
 0x484   : > { %v4544_v1 = vadd.f32 %v4512_v7, %v4478_v54  ;;  %5571 = vst.msk [vmem:[#allocation3] sm:$0xff] %vm332_vm0, %v5539_v62 }
 0x485   : > { %v4853_v30 = vld [vmem:[#allocation3 + $0xf0] sm:$0xff]  ;;  %5242 = vst.msk [vmem:[#allocation3 + $0x68] sm:$0xff] %vm332_vm0, %v5210_v34  ;;  %7571 = vmatmul.msk.f32.gmra.mxu1 %vm332_vm0, %v9833_v63  ;;  %v10099_v24 = vpop.f32.mrf.mxu0 }
 0x486   : > { %4576 = vst.msk [vmem:[#allocation3 + $0xf8] sm:$0xff] %vm332_vm0, %v4544_v1  ;;  %v4885_v33 = vadd.f32 %v4853_v30, %v10054_v18  ;;  %7591 = vmatmul.msk.f32.gmra.mxu2 %vm332_vm0, %v10097_v17  ;;  %v10109_v18 = vld [vmem:[#allocation2 + $0x208] sm:$0xff] }
 0x487   : > { %7623 = vmatmul.msk.f32.gmra.mxu3 %vm332_vm0, %v5620_v56  ;;  %v10146_v1 = vld [vmem:[#allocation2 + $0x169] sm:$0xff] }
 0x488   : > { %4917 = vst.msk [vmem:[#allocation3 + $0xf0] sm:$0xff] %vm332_vm0, %v4885_v33  ;;  %7655 = vmatmul.msk.f32.gmra.mxu0 %vm332_vm0, %v5962_v55  ;;  %v5623_v30 = vld [vmem:[#allocation2 + $0x187] sm:$0xff] }
 0x489   : > { %v5414_v63 = vpop.f32.mrf.mxu2  ;;  %v5965_v55 = vld [vmem:[#allocation2 + $0x188] sm:$0xff] }
 0x48a   : > { %v5756_v51 = vpop.f32.mrf.mxu3  ;;  %v5111_v60 = vpop.f32.mrf.mxu1  ;;  %v5540_v50 = vadd.f32 %v5508_v20, %v5414_v63  ;;  %v5511_v63 = vld [vmem:[#allocation3 + $0x20] sm:$0xff] }
 0x48b   : > { %v5849_v52 = vld [vmem:[#allocation3] sm:$0xff]  ;;  %v5211_v3 = vadd.f32 %v5179_v27, %v5111_v60  ;;  %v5182_v60 = vld [vmem:[#allocation3 + $0x88] sm:$0xff] }
 0x48c   : > { %v5881_v31 = vadd.f32 %v5849_v52, %v5753_v59  ;;  %5572 = vst.msk [vmem:[#allocation3 + $0x8] sm:$0xff] %vm332_vm0, %v5540_v50 }
 0x48d   : > { %v4854_v58 = vld [vmem:[#allocation3 + $0xf8] sm:$0xff]  ;;  %5243 = vst.msk [vmem:[#allocation3 + $0x70] sm:$0xff] %vm332_vm0, %v5211_v3  ;;  %7572 = vmatmul.msk.f32.gmra.mxu1 %vm332_vm0, %v10109_v18  ;;  %v10116_v25 = vpop.f32.mrf.mxu0 }
 0x48e   : > { %5913 = vst.msk [vmem:[#allocation3] sm:$0xff] %vm332_vm0, %v5881_v31  ;;  %v4886_v41 = vadd.f32 %v4854_v58, %v10069_v21  ;;  %7592 = vmatmul.msk.f32.gmra.mxu2 %vm332_vm0, %v10114_v46  ;;  %v10126_v21 = vld [vmem:[#allocation2 + $0x210] sm:$0xff] }
 0x48f   : > { %7624 = vmatmul.msk.f32.gmra.mxu3 %vm332_vm0, %v5621_v44  ;;  %v10161_v31 = vld [vmem:[#allocation2 + $0x171] sm:$0xff] }
 0x490   : > { %4918 = vst.msk [vmem:[#allocation3 + $0xf8] sm:$0xff] %vm332_vm0, %v4886_v41  ;;  %7656 = vmatmul.msk.f32.gmra.mxu0 %vm332_vm0, %v5963_v57  ;;  %v5624_v58 = vld [vmem:[#allocation2 + $0x18f] sm:$0xff] }
 0x491   : > { %v5417_v37 = vpop.f32.mrf.mxu2  ;;  %v5966_v57 = vld [vmem:[#allocation2 + $0x190] sm:$0xff] }
 0x492   : > { %v5759_v23 = vpop.f32.mrf.mxu3  ;;  %v5114_v40 = vpop.f32.mrf.mxu1  ;;  %v5541_v54 = vadd.f32 %v5509_v28, %v5417_v37  ;;  %v5512_v37 = vld [vmem:[#allocation3 + $0x28] sm:$0xff] }
 0x493   : > { %v5850_v53 = vld [vmem:[#allocation3 + $0x8] sm:$0xff]  ;;  %v5212_v43 = vadd.f32 %v5180_v29, %v5114_v40  ;;  %v5183_v40 = vld [vmem:[#allocation3 + $0x90] sm:$0xff] }
 0x494   : > { %v5882_v8 = vadd.f32 %v5850_v53, %v5756_v51  ;;  %5573 = vst.msk [vmem:[#allocation3 + $0x10] sm:$0xff] %vm332_vm0, %v5541_v54 }
 0x495   : > { %v6191_v61 = vld [vmem:[#allocation3] sm:$0xff]  ;;  %5244 = vst.msk [vmem:[#allocation3 + $0x78] sm:$0xff] %vm332_vm0, %v5212_v43  ;;  %7573 = vmatmul.msk.f32.gmra.mxu1 %vm332_vm0, %v10126_v21  ;;  %v10133_v35 = vpop.f32.mrf.mxu0 }
 0x496   : > { %5914 = vst.msk [vmem:[#allocation3 + $0x8] sm:$0xff] %vm332_vm0, %v5882_v8  ;;  %v6223_v16 = vadd.f32 %v6191_v61, %v10084_v13  ;;  %7593 = vmatmul.msk.f32.gmra.mxu2 %vm332_vm0, %v10131_v4  ;;  %v10176_v8 = vld [vmem:[#allocation2 + $0x189] sm:$0xff] }
 0x497   : > { %7625 = vmatmul.msk.f32.gmra.mxu3 %vm332_vm0, %v5622_v5  ;;  %v5625_v61 = vld [vmem:[#allocation2 + $0x1a7] sm:$0xff] }
 0x498   : > { %6255 = vst.msk [vmem:[#allocation3] sm:$0xff] %vm332_vm0, %v6223_v16  ;;  %7657 = vmatmul.msk.f32.gmra.mxu0 %vm332_vm0, %v5964_v26  ;;  %v5967_v26 = vld [vmem:[#allocation2 + $0x1a8] sm:$0xff] }
 0x499   : > { %v5420_v11 = vpop.f32.mrf.mxu2 }
 0x49a   : > { %v5762_v49 = vpop.f32.mrf.mxu3  ;;  %v5117_v59 = vpop.f32.mrf.mxu1  ;;  %v5542_v6 = vadd.f32 %v5510_v47, %v5420_v11  ;;  %v5513_v11 = vld [vmem:[#allocation3 + $0x30] sm:$0xff] }
 0x49b   : > { %v5851_v62 = vld [vmem:[#allocation3 + $0x10] sm:$0xff]  ;;  %v5213_v7 = vadd.f32 %v5181_v45, %v5117_v59  ;;  %v5184_v59 = vld [vmem:[#allocation3 + $0x98] sm:$0xff] }
 0x49c   : > { %v5883_v34 = vadd.f32 %v5851_v62, %v5759_v23  ;;  %5574 = vst.msk [vmem:[#allocation3 + $0x18] sm:$0xff] %vm332_vm0, %v5542_v6 }
 0x49d   : > { %v6192_v13 = vld [vmem:[#allocation3 + $0x8] sm:$0xff]  ;;  %5245 = vst.msk [vmem:[#allocation3 + $0x80] sm:$0xff] %vm332_vm0, %v5213_v7  ;;  %7670 = vmatmul.msk.f32.vlgmr.msra.gmra.mxu1 %vm332_vm0, %v9872_v42  ;;  %v10148_v56 = vpop.f32.mrf.mxu0 }
 0x49e   : > { %5915 = vst.msk [vmem:[#allocation3 + $0x10] sm:$0xff] %vm332_vm0, %v5883_v34  ;;  %v6224_v33 = vadd.f32 %v6192_v13, %v10099_v24  ;;  %7594 = vmatmul.msk.f32.gmra.mxu2 %vm332_vm0, %v10146_v1  ;;  %v10191_v34 = vld [vmem:[#allocation2 + $0x191] sm:$0xff] }
 0x49f   : > { %7626 = vmatmul.msk.f32.gmra.mxu3 %vm332_vm0, %v5623_v30  ;;  %v5626_v13 = vld [vmem:[#allocation2 + $0x1af] sm:$0xff] }
 0x4a0   : > { %6256 = vst.msk [vmem:[#allocation3 + $0x8] sm:$0xff] %vm332_vm0, %v6224_v33  ;;  %7658 = vmatmul.msk.f32.gmra.mxu0 %vm332_vm0, %v5965_v55  ;;  %v5968_v55 = vld [vmem:[#allocation2 + $0x1b0] sm:$0xff] }
 0x4a1   : > { %v5423_v42 = vpop.f32.mrf.mxu2 }
 0x4a2   : > { %v5765_v20 = vpop.f32.mrf.mxu3  ;;  %v5120_v51 = vpop.f32.mrf.mxu1  ;;  %v5543_v27 = vadd.f32 %v5511_v63, %v5423_v42  ;;  %v5514_v42 = vld [vmem:[#allocation3 + $0x38] sm:$0xff] }
 0x4a3   : > { %v5852_v50 = vld [vmem:[#allocation3 + $0x18] sm:$0xff]  ;;  %v5214_v52 = vadd.f32 %v5182_v60, %v5120_v51  ;;  %v5185_v51 = vld [vmem:[#allocation3 + $0xa0] sm:$0xff] }
 0x4a4   : > { %v5884_v3 = vadd.f32 %v5852_v50, %v5762_v49  ;;  %5575 = vst.msk [vmem:[#allocation3 + $0x20] sm:$0xff] %vm332_vm0, %v5543_v27 }
 0x4a5   : > { %v6193_v24 = vld [vmem:[#allocation3 + $0x10] sm:$0xff]  ;;  %5246 = vst.msk [vmem:[#allocation3 + $0x88] sm:$0xff] %vm332_vm0, %v5214_v52  ;;  %7671 = vmatmul.msk.f32.gmra.mxu1 %vm332_vm0, %v9887_v38  ;;  %v10163_v44 = vpop.f32.mrf.mxu0 }
 0x4a6   : > { %5916 = vst.msk [vmem:[#allocation3 + $0x18] sm:$0xff] %vm332_vm0, %v5884_v3  ;;  %v6225_v41 = vadd.f32 %v6193_v24, %v10116_v25  ;;  %7595 = vmatmul.msk.f32.gmra.mxu2 %vm332_vm0, %v10161_v31  ;;  %v10206_v3 = vld [vmem:[#allocation2 + $0x1a9] sm:$0xff] }
 0x4a7   : > { %7627 = vmatmul.msk.f32.gmra.mxu3 %vm332_vm0, %v5624_v58  ;;  %v5627_v24 = vld [vmem:[#allocation2 + $0x1c7] sm:$0xff] }
 0x4a8   : > { %6257 = vst.msk [vmem:[#allocation3 + $0x10] sm:$0xff] %vm332_vm0, %v6225_v41  ;;  %7659 = vmatmul.msk.f32.gmra.mxu0 %vm332_vm0, %v5966_v57  ;;  %v5969_v57 = vld [vmem:[#allocation2 + $0x1c8] sm:$0xff] }
 0x4a9   : > { %v5426_v38 = vpop.f32.mrf.mxu2 }
 0x4aa   : > { %v5768_v28 = vpop.f32.mrf.mxu3  ;;  %v5123_v23 = vpop.f32.mrf.mxu1  ;;  %v5544_v29 = vadd.f32 %v5512_v37, %v5426_v38  ;;  %v5515_v38 = vld [vmem:[#allocation3 + $0x40] sm:$0xff] }
 0x4ab   : > { %v5853_v54 = vld [vmem:[#allocation3 + $0x20] sm:$0xff]  ;;  %v5215_v53 = vadd.f32 %v5183_v40, %v5123_v23  ;;  %v5186_v23 = vld [vmem:[#allocation3 + $0xa8] sm:$0xff] }
 0x4ac   : > { %v5885_v43 = vadd.f32 %v5853_v54, %v5765_v20  ;;  %5576 = vst.msk [vmem:[#allocation3 + $0x28] sm:$0xff] %vm332_vm0, %v5544_v29 }
 0x4ad   : > { %v6194_v25 = vld [vmem:[#allocation3 + $0x18] sm:$0xff]  ;;  %5247 = vst.msk [vmem:[#allocation3 + $0x90] sm:$0xff] %vm332_vm0, %v5215_v53  ;;  %7672 = vmatmul.msk.f32.gmra.mxu1 %vm332_vm0, %v9902_v39  ;;  %v10178_v5 = vpop.f32.mrf.mxu0 }
 0x4ae   : > { %5917 = vst.msk [vmem:[#allocation3 + $0x20] sm:$0xff] %vm332_vm0, %v5885_v43  ;;  %v6226_v16 = vadd.f32 %v6194_v25, %v10133_v35  ;;  %7596 = vmatmul.msk.f32.gmra.mxu2 %vm332_vm0, %v10176_v8  ;;  %v10221_v43 = vld [vmem:[#allocation2 + $0x1b1] sm:$0xff] }
 0x4af   : > { %7628 = vmatmul.msk.f32.gmra.mxu3 %vm332_vm0, %v5625_v61  ;;  %v5628_v25 = vld [vmem:[#allocation2 + $0x1cf] sm:$0xff] }
 0x4b0   : > { %6258 = vst.msk [vmem:[#allocation3 + $0x18] sm:$0xff] %vm332_vm0, %v6226_v16  ;;  %7660 = vmatmul.msk.f32.gmra.mxu0 %vm332_vm0, %v5967_v26  ;;  %v5970_v26 = vld [vmem:[#allocation2 + $0x1d0] sm:$0xff] }
 0x4b1   : > { %v5429_v39 = vpop.f32.mrf.mxu2 }
 0x4b2   : > { %v5771_v47 = vpop.f32.mrf.mxu3  ;;  %v5126_v49 = vpop.f32.mrf.mxu1  ;;  %v5545_v45 = vadd.f32 %v5513_v11, %v5429_v39  ;;  %v5516_v39 = vld [vmem:[#allocation3 + $0x48] sm:$0xff] }
 0x4b3   : > { %v5854_v6 = vld [vmem:[#allocation3 + $0x28] sm:$0xff]  ;;  %v5216_v62 = vadd.f32 %v5184_v59, %v5126_v49  ;;  %v5187_v49 = vld [vmem:[#allocation3 + $0xb0] sm:$0xff] }
 0x4b4   : > { %v5886_v7 = vadd.f32 %v5854_v6, %v5768_v28  ;;  %5577 = vst.msk [vmem:[#allocation3 + $0x30] sm:$0xff] %vm332_vm0, %v5545_v45 }
 0x4b5   : > { %v6195_v35 = vld [vmem:[#allocation3 + $0x20] sm:$0xff]  ;;  %5248 = vst.msk [vmem:[#allocation3 + $0x98] sm:$0xff] %vm332_vm0, %v5216_v62  ;;  %7673 = vmatmul.msk.f32.gmra.mxu1 %vm332_vm0, %v9917_v12  ;;  %v10193_v30 = vpop.f32.mrf.mxu0 }
 0x4b6   : > { %5918 = vst.msk [vmem:[#allocation3 + $0x28] sm:$0xff] %vm332_vm0, %v5886_v7  ;;  %v6227_v33 = vadd.f32 %v6195_v35, %v10148_v56  ;;  %7597 = vmatmul.msk.f32.gmra.mxu2 %vm332_vm0, %v10191_v34  ;;  %v10236_v7 = vld [vmem:[#allocation2 + $0x1c9] sm:$0xff] }
 0x4b7   : > { %7629 = vmatmul.msk.f32.gmra.mxu3 %vm332_vm0, %v5626_v13  ;;  %v5629_v35 = vld [vmem:[#allocation2 + $0x1e7] sm:$0xff] }
 0x4b8   : > { %6259 = vst.msk [vmem:[#allocation3 + $0x20] sm:$0xff] %vm332_vm0, %v6227_v33  ;;  %7661 = vmatmul.msk.f32.gmra.mxu0 %vm332_vm0, %v5968_v55  ;;  %v5971_v55 = vld [vmem:[#allocation2 + $0x1e8] sm:$0xff] }
 0x4b9   : > { %v5432_v12 = vpop.f32.mrf.mxu2 }
 0x4ba   : > { %v5774_v63 = vpop.f32.mrf.mxu3  ;;  %v5129_v20 = vpop.f32.mrf.mxu1  ;;  %v5546_v60 = vadd.f32 %v5514_v42, %v5432_v12  ;;  %v5517_v12 = vld [vmem:[#allocation3 + $0x50] sm:$0xff] }
 0x4bb   : > { %v5855_v27 = vld [vmem:[#allocation3 + $0x30] sm:$0xff]  ;;  %v5217_v50 = vadd.f32 %v5185_v51, %v5129_v20  ;;  %v5188_v20 = vld [vmem:[#allocation3 + $0xb8] sm:$0xff] }
 0x4bc   : > { %v5887_v52 = vadd.f32 %v5855_v27, %v5771_v47  ;;  %5578 = vst.msk [vmem:[#allocation3 + $0x38] sm:$0xff] %vm332_vm0, %v5546_v60 }
 0x4bd   : > { %v6196_v56 = vld [vmem:[#allocation3 + $0x28] sm:$0xff]  ;;  %5249 = vst.msk [vmem:[#allocation3 + $0xa0] sm:$0xff] %vm332_vm0, %v5217_v50  ;;  %7674 = vmatmul.msk.f32.gmra.mxu1 %vm332_vm0, %v9932_v22  ;;  %v10208_v58 = vpop.f32.mrf.mxu0 }
 0x4be   : > { %5919 = vst.msk [vmem:[#allocation3 + $0x30] sm:$0xff] %vm332_vm0, %v5887_v52  ;;  %v6228_v41 = vadd.f32 %v6196_v56, %v10163_v44  ;;  %7598 = vmatmul.msk.f32.gmra.mxu2 %vm332_vm0, %v10206_v3  ;;  %v10251_v52 = vld [vmem:[#allocation2 + $0x1d1] sm:$0xff] }
 0x4bf   : > { %7630 = vmatmul.msk.f32.gmra.mxu3 %vm332_vm0, %v5627_v24  ;;  %v5630_v56 = vld [vmem:[#allocation2 + $0x1ef] sm:$0xff] }
 0x4c0   : > { %6260 = vst.msk [vmem:[#allocation3 + $0x28] sm:$0xff] %vm332_vm0, %v6228_v41  ;;  %7662 = vmatmul.msk.f32.gmra.mxu0 %vm332_vm0, %v5969_v57  ;;  %v5972_v57 = vld [vmem:[#allocation2 + $0x1f0] sm:$0xff] }
 0x4c1   : > { %v5435_v22 = vpop.f32.mrf.mxu2 }
 0x4c2   : > { %v5777_v37 = vpop.f32.mrf.mxu3  ;;  %v5132_v28 = vpop.f32.mrf.mxu1  ;;  %v5547_v40 = vadd.f32 %v5515_v38, %v5435_v22  ;;  %v5518_v22 = vld [vmem:[#allocation3 + $0x58] sm:$0xff] }
 0x4c3   : > { %v5856_v29 = vld [vmem:[#allocation3 + $0x38] sm:$0xff]  ;;  %v5218_v54 = vadd.f32 %v5186_v23, %v5132_v28  ;;  %v5189_v28 = vld [vmem:[#allocation3 + $0xc0] sm:$0xff] }
 0x4c4   : > { %v5888_v53 = vadd.f32 %v5856_v29, %v5774_v63  ;;  %5579 = vst.msk [vmem:[#allocation3 + $0x40] sm:$0xff] %vm332_vm0, %v5547_v40 }
 0x4c5   : > { %v6197_v44 = vld [vmem:[#allocation3 + $0x30] sm:$0xff]  ;;  %5250 = vst.msk [vmem:[#allocation3 + $0xa8] sm:$0xff] %vm332_vm0, %v5218_v54  ;;  %7675 = vmatmul.msk.f32.gmra.mxu1 %vm332_vm0, %v9947_v48  ;;  %v10223_v61 = vpop.f32.mrf.mxu0 }
 0x4c6   : > { %5920 = vst.msk [vmem:[#allocation3 + $0x38] sm:$0xff] %vm332_vm0, %v5888_v53  ;;  %v6229_v16 = vadd.f32 %v6197_v44, %v10178_v5  ;;  %7599 = vmatmul.msk.f32.gmra.mxu2 %vm332_vm0, %v10221_v43  ;;  %v10266_v53 = vld [vmem:[#allocation2 + $0x1e9] sm:$0xff] }
 0x4c7   : > { %7631 = vmatmul.msk.f32.gmra.mxu3 %vm332_vm0, %v5628_v25  ;;  %v5631_v44 = vld [vmem:[#allocation2 + $0x207] sm:$0xff] }
 0x4c8   : > { %6261 = vst.msk [vmem:[#allocation3 + $0x30] sm:$0xff] %vm332_vm0, %v6229_v16  ;;  %7663 = vmatmul.msk.f32.gmra.mxu0 %vm332_vm0, %v5970_v26  ;;  %v5519_v26 = vld [vmem:[#allocation3 + $0x60] sm:$0xff] }
 0x4c9   : > { %v5438_v48 = vpop.f32.mrf.mxu2 }
 0x4ca   : > { %v5780_v11 = vpop.f32.mrf.mxu3  ;;  %v5135_v47 = vpop.f32.mrf.mxu1  ;;  %v5548_v59 = vadd.f32 %v5516_v39, %v5438_v48 }
 0x4cb   : > { %v5857_v45 = vld [vmem:[#allocation3 + $0x40] sm:$0xff]  ;;  %v5219_v6 = vadd.f32 %v5187_v49, %v5135_v47 }
 0x4cc   : > { %v5889_v62 = vadd.f32 %v5857_v45, %v5777_v37  ;;  %5580 = vst.msk [vmem:[#allocation3 + $0x48] sm:$0xff] %vm332_vm0, %v5548_v59 }
 0x4cd   : > { %v6198_v5 = vld [vmem:[#allocation3 + $0x38] sm:$0xff]  ;;  %5251 = vst.msk [vmem:[#allocation3 + $0xb0] sm:$0xff] %vm332_vm0, %v5219_v6  ;;  %7676 = vmatmul.msk.f32.gmra.mxu1 %vm332_vm0, %v9962_v36  ;;  %v10238_v13 = vpop.f32.mrf.mxu0 }
 0x4ce   : > { %5921 = vst.msk [vmem:[#allocation3 + $0x40] sm:$0xff] %vm332_vm0, %v5889_v62  ;;  %v6230_v33 = vadd.f32 %v6198_v5, %v10193_v30  ;;  %7600 = vmatmul.msk.f32.gmra.mxu2 %vm332_vm0, %v10236_v7  ;;  %v10282_v6 = vld [vmem:[#allocation2 + $0x1f1] sm:$0xff] }
 0x4cf   : > { %7632 = vmatmul.msk.f32.gmra.mxu3 %vm332_vm0, %v5629_v35  ;;  %v5520_v35 = vld [vmem:[#allocation3 + $0x68] sm:$0xff] }
 0x4d0   : > { %6262 = vst.msk [vmem:[#allocation3 + $0x38] sm:$0xff] %vm332_vm0, %v6230_v33  ;;  %7664 = vmatmul.msk.f32.gmra.mxu0 %vm332_vm0, %v5971_v55 }
 0x4d1   : > { %v5441_v36 = vpop.f32.mrf.mxu2 }
 0x4d2   : > { %v5783_v42 = vpop.f32.mrf.mxu3  ;;  %v5138_v63 = vpop.f32.mrf.mxu1  ;;  %v5549_v51 = vadd.f32 %v5517_v12, %v5441_v36  ;;  %v5191_v36 = vld [vmem:[#allocation3 + $0xd0] sm:$0xff] }
 0x4d3   : > { %v5858_v60 = vld [vmem:[#allocation3 + $0x48] sm:$0xff]  ;;  %v5220_v27 = vadd.f32 %v5188_v20, %v5138_v63 }
 0x4d4   : > { %v5890_v50 = vadd.f32 %v5858_v60, %v5780_v11  ;;  %5581 = vst.msk [vmem:[#allocation3 + $0x50] sm:$0xff] %vm332_vm0, %v5549_v51  ;;  %v5190_v11 = vld [vmem:[#allocation3 + $0xc8] sm:$0xff] }
 0x4d5   : > { %v6199_v30 = vld [vmem:[#allocation3 + $0x40] sm:$0xff]  ;;  %5252 = vst.msk [vmem:[#allocation3 + $0xb8] sm:$0xff] %vm332_vm0, %v5220_v27  ;;  %7677 = vmatmul.msk.f32.gmra.mxu1 %vm332_vm0, %v9977_v10  ;;  %v10253_v24 = vpop.f32.mrf.mxu0  ;;  %v10298_v60 = vld [vmem:[#allocation2 + $0x209] sm:$0xff] }
 0x4d6   : > { %5922 = vst.msk [vmem:[#allocation3 + $0x48] sm:$0xff] %vm332_vm0, %v5890_v50  ;;  %v6231_v41 = vadd.f32 %v6199_v30, %v10208_v58  ;;  %7601 = vmatmul.msk.f32.gmra.mxu2 %vm332_vm0, %v10251_v52  ;;  %v5633_v20 = vld [vmem:[#allocation2 + $0x227] sm:$0xff] }
 0x4d7   : > { %7633 = vmatmul.msk.f32.gmra.mxu3 %vm332_vm0, %v5630_v56  ;;  %v5975_v27 = vld [vmem:[#allocation2 + $0x228] sm:$0xff] }
 0x4d8   : > { %6263 = vst.msk [vmem:[#allocation3 + $0x40] sm:$0xff] %vm332_vm0, %v6231_v41  ;;  %7665 = vmatmul.msk.f32.gmra.mxu0 %vm332_vm0, %v5972_v57  ;;  %v5192_v57 = vld [vmem:[#allocation3 + $0xd8] sm:$0xff] }
 0x4d9   : > { %v5444_v10 = vpop.f32.mrf.mxu2 }
 0x4da   : > { %v5786_v38 = vpop.f32.mrf.mxu3  ;;  %v5141_v37 = vpop.f32.mrf.mxu1  ;;  %v5550_v23 = vadd.f32 %v5518_v22, %v5444_v10 }
 0x4db   : > { %v5859_v40 = vld [vmem:[#allocation3 + $0x50] sm:$0xff]  ;;  %v5221_v29 = vadd.f32 %v5189_v28, %v5141_v37 }
 0x4dc   : > { %v5891_v54 = vadd.f32 %v5859_v40, %v5783_v42  ;;  %5582 = vst.msk [vmem:[#allocation3 + $0x58] sm:$0xff] %vm332_vm0, %v5550_v23  ;;  %v5634_v37 = vld [vmem:[#allocation2 + $0x22f] sm:$0xff] }
 0x4dd   : > { %v6200_v58 = vld [vmem:[#allocation3 + $0x48] sm:$0xff]  ;;  %5253 = vst.msk [vmem:[#allocation3 + $0xc0] sm:$0xff] %vm332_vm0, %v5221_v29  ;;  %7678 = vmatmul.msk.f32.gmra.mxu1 %vm332_vm0, %v9992_v32  ;;  %v10268_v25 = vpop.f32.mrf.mxu0  ;;  %v10313_v23 = vld [vmem:[#allocation2 + $0x211] sm:$0xff] }
 0x4de   : > { %5923 = vst.msk [vmem:[#allocation3 + $0x50] sm:$0xff] %vm332_vm0, %v5891_v54  ;;  %v6232_v16 = vadd.f32 %v6200_v58, %v10223_v61  ;;  %7602 = vmatmul.msk.f32.gmra.mxu2 %vm332_vm0, %v10266_v53  ;;  %v5976_v29 = vld [vmem:[#allocation2 + $0x230] sm:$0xff] }
 0x4df   : > { %7634 = vmatmul.msk.f32.gmra.mxu3 %vm332_vm0, %v5631_v44  ;;  %v5522_v44 = vld [vmem:[#allocation3 + $0x78] sm:$0xff] }
 0x4e0   : > { %6264 = vst.msk [vmem:[#allocation3 + $0x48] sm:$0xff] %vm332_vm0, %v6232_v16  ;;  %7666 = vmatmul.msk.f32.gmra.mxu0 %vm332_vm0, %v10109_v18  ;;  %v5632_v18 = vld [vmem:[#allocation2 + $0x20f] sm:$0xff] }
 0x4e1   : > { %v5447_v32 = vpop.f32.mrf.mxu2 }
 0x4e2   : > { %v5789_v48 = vpop.f32.mrf.mxu3  ;;  %v5144_v39 = vpop.f32.mrf.mxu1  ;;  %v5551_v47 = vadd.f32 %v5519_v26, %v5447_v32  ;;  %v5193_v32 = vld [vmem:[#allocation3 + $0xe0] sm:$0xff] }
 0x4e3   : > { %v5860_v49 = vld [vmem:[#allocation3 + $0x58] sm:$0xff]  ;;  %v5222_v59 = vadd.f32 %v5190_v11, %v5144_v39 }
 0x4e4   : > { %v5892_v45 = vadd.f32 %v5860_v49, %v5786_v38  ;;  %5583 = vst.msk [vmem:[#allocation3 + $0x60] sm:$0xff] %vm332_vm0, %v5551_v47 }
 0x4e5   : > { %v6201_v61 = vld [vmem:[#allocation3 + $0x50] sm:$0xff]  ;;  %5254 = vst.msk [vmem:[#allocation3 + $0xc8] sm:$0xff] %vm332_vm0, %v5222_v59  ;;  %7679 = vmatmul.msk.f32.gmra.mxu1 %vm332_vm0, %v10007_v2  ;;  %v10284_v62 = vpop.f32.mrf.mxu0 }
 0x4e6   : > { %5924 = vst.msk [vmem:[#allocation3 + $0x58] sm:$0xff] %vm332_vm0, %v5892_v45  ;;  %v6233_v5 = vadd.f32 %v6201_v61, %v10238_v13  ;;  %7603 = vmatmul.msk.f32.gmra.mxu2 %vm332_vm0, %v10282_v6  ;;  %v5523_v45 = vld [vmem:[#allocation3 + $0x80] sm:$0xff] }
 0x4e7   : > { %7635 = vmatmul.msk.f32.gmra.mxu3 %vm332_vm0, %v5632_v18 }
 0x4e8   : > { %6265 = vst.msk [vmem:[#allocation3 + $0x50] sm:$0xff] %vm332_vm0, %v6233_v5  ;;  %7667 = vmatmul.msk.f32.gmra.mxu0 %vm332_vm0, %v10126_v21  ;;  %v5194_v5 = vld [vmem:[#allocation3 + $0xe8] sm:$0xff] }
 0x4e9   : > { %v5450_v2 = vpop.f32.mrf.mxu2 }
 0x4ea   : > { %v5792_v33 = vpop.f32.mrf.mxu3  ;;  %v5147_v55 = vpop.f32.mrf.mxu1  ;;  %v5552_v12 = vadd.f32 %v5520_v35, %v5450_v2 }
 0x4eb   : > { %v5861_v42 = vld [vmem:[#allocation3 + $0x60] sm:$0xff]  ;;  %v5223_v63 = vadd.f32 %v5191_v36, %v5147_v55 }
 0x4ec   : > { %v5893_v13 = vadd.f32 %v5861_v42, %v5789_v48  ;;  %5584 = vst.msk [vmem:[#allocation3 + $0x68] sm:$0xff] %vm332_vm0, %v5552_v12  ;;  %v5524_v42 = vld [vmem:[#allocation3 + $0x88] sm:$0xff] }
 0x4ed   : > { %v6202_v51 = vld [vmem:[#allocation3 + $0x58] sm:$0xff]  ;;  %5255 = vst.msk [vmem:[#allocation3 + $0xd0] sm:$0xff] %vm332_vm0, %v5223_v63  ;;  %7680 = vmatmul.msk.f32.gmra.mxu1 %vm332_vm0, %v10022_v15  ;;  %v10300_v21 = vpop.f32.mrf.mxu0  ;;  %v5521_v15 = vld [vmem:[#allocation3 + $0x70] sm:$0xff] }
 0x4ee   : > { %5925 = vst.msk [vmem:[#allocation3 + $0x60] sm:$0xff] %vm332_vm0, %v5893_v13  ;;  %v6234_v50 = vadd.f32 %v6202_v51, %v10253_v24  ;;  %7604 = vmatmul.msk.f32.gmra.mxu2 %vm332_vm0, %v10298_v60  ;;  %v5195_v13 = vld [vmem:[#allocation3 + $0xf0] sm:$0xff] }
 0x4ef   : > { %7636 = vmatmul.msk.f32.gmra.mxu3 %vm332_vm0, %v5633_v20 }
 0x4f0   : > { %6266 = vst.msk [vmem:[#allocation3 + $0x58] sm:$0xff] %vm332_vm0, %v6234_v50  ;;  %7668 = vmatmul.msk.f32.gmra.mxu0 %vm332_vm0, %v5975_v27 }
 0x4f1   : > { %v5453_v30 = vpop.f32.mrf.mxu2 }
 0x4f2   : > { %v5795_v56 = vpop.f32.mrf.mxu3  ;;  %v5150_v41 = vpop.f32.mrf.mxu1  ;;  %v5553_v10 = vadd.f32 %v5521_v15, %v5453_v30 }
 0x4f3   : > { %v5862_v22 = vld [vmem:[#allocation3 + $0x68] sm:$0xff]  ;;  %v5224_v38 = vadd.f32 %v5192_v57, %v5150_v41  ;;  %v5525_v41 = vld [vmem:[#allocation3 + $0x90] sm:$0xff] }
 0x4f4   : > { %v5894_v28 = vadd.f32 %v5862_v22, %v5792_v33  ;;  %5585 = vst.msk [vmem:[#allocation3 + $0x70] sm:$0xff] %vm332_vm0, %v5553_v10  ;;  %v5196_v22 = vld [vmem:[#allocation3 + $0xf8] sm:$0xff] }
 0x4f5   : > { %v6203_v24 = vld [vmem:[#allocation3 + $0x60] sm:$0xff]  ;;  %5256 = vst.msk [vmem:[#allocation3 + $0xd8] sm:$0xff] %vm332_vm0, %v5224_v38  ;;  %7681 = vmatmul.msk.f32.gmra.mxu1 %vm332_vm0, %v10037_v9  ;;  %v6140_v40 = vpop.f32.mrf.mxu0 }
 0x4f6   : > { %5926 = vst.msk [vmem:[#allocation3 + $0x68] sm:$0xff] %vm332_vm0, %v5894_v28  ;;  %v6235_v54 = vadd.f32 %v6203_v24, %v10268_v25  ;;  %7605 = vmatmul.msk.f32.gmra.mxu2 %vm332_vm0, %v10313_v23 }
 0x4f7   : > { %7637 = vmatmul.msk.f32.gmra.mxu3 %vm332_vm0, %v5634_v37 }
 0x4f8   : > { %6267 = vst.msk [vmem:[#allocation3 + $0x60] sm:$0xff] %vm332_vm0, %v6235_v54  ;;  %7669 = vmatmul.msk.f32.gmra.mxu0 %vm332_vm0, %v5976_v29  ;;  %v6736_v54 = vld [vmem:[%s10841_s5 + $0x18] sm:$0xff] }
 0x4f9   : > { %v5456_v58 = vpop.f32.mrf.mxu2  ;;  %6752 = vmatpush.msrb.mxu2 %v6736_v54  ;;  %v6537_v54 = vld [vmem:[#allocation3 + $0x20] sm:$0xff] }
 0x4fa   : > { %v5798_v9 = vpop.f32.mrf.mxu3  ;;  %v5153_v16 = vpop.f32.mrf.mxu1  ;;  %v5554_v26 = vadd.f32 %v5522_v44, %v5456_v58  ;;  %v5526_v44 = vld [vmem:[#allocation3 + $0x98] sm:$0xff] }
 0x4fb   : > { %v5863_v48 = vld [vmem:[#allocation3 + $0x70] sm:$0xff]  ;;  %v5225_v39 = vadd.f32 %v5193_v32, %v5153_v16 }
 0x4fc   : > { %v5895_v11 = vadd.f32 %v5863_v48, %v5795_v56  ;;  %5586 = vst.msk [vmem:[#allocation3 + $0x78] sm:$0xff] %vm332_vm0, %v5554_v26  ;;  %v6533_v26 = vld [vmem:[#allocation3] sm:$0xff] }
 0x4fd   : > { %v6204_v25 = vld [vmem:[#allocation3 + $0x68] sm:$0xff]  ;;  %5257 = vst.msk [vmem:[#allocation3 + $0xe0] sm:$0xff] %vm332_vm0, %v5225_v39  ;;  %7682 = vmatmul.msk.f32.gmra.mxu1 %vm332_vm0, %v10052_v14  ;;  %v6143_v47 = vpop.f32.mrf.mxu0 }
 0x4fe   : > { %5927 = vst.msk [vmem:[#allocation3 + $0x70] sm:$0xff] %vm332_vm0, %v5895_v11  ;;  %v6236_v49 = vadd.f32 %v6204_v25, %v10284_v62 }
 0x500   : > { %6268 = vst.msk [vmem:[#allocation3 + $0x68] sm:$0xff] %vm332_vm0, %v6236_v49 }
 0x501   : > { %v5459_v59 = vpop.f32.mrf.mxu2 }
 0x502   : > { %v5801_v61 = vpop.f32.mrf.mxu3  ;;  %v5156_v18 = vpop.f32.mrf.mxu1  ;;  %v5555_v2 = vadd.f32 %v5523_v45, %v5459_v59  ;;  %v5527_v59 = vld [vmem:[#allocation3 + $0xa0] sm:$0xff] }
 0x503   : > { %v5864_v35 = vld [vmem:[#allocation3 + $0x78] sm:$0xff]  ;;  %v5226_v33 = vadd.f32 %v5194_v5, %v5156_v18  ;;  %v6534_v5 = vld [vmem:[#allocation3 + $0x8] sm:$0xff] }
 0x504   : > { %v5896_v55 = vadd.f32 %v5864_v35, %v5798_v9  ;;  %5587 = vst.msk [vmem:[#allocation3 + $0x80] sm:$0xff] %vm332_vm0, %v5555_v2 }
 0x505   : > { %v6205_v36 = vld [vmem:[#allocation3 + $0x70] sm:$0xff]  ;;  %5258 = vst.msk [vmem:[#allocation3 + $0xe8] sm:$0xff] %vm332_vm0, %v5226_v33  ;;  %7683 = vmatmul.msk.f32.gmra.mxu1 %vm332_vm0, %v10067_v0  ;;  %v6146_v14 = vpop.f32.mrf.mxu0 }
 0x506   : > { %5928 = vst.msk [vmem:[#allocation3 + $0x78] sm:$0xff] %vm332_vm0, %v5896_v55  ;;  %v6237_v62 = vadd.f32 %v6205_v36, %v10300_v21 }
 0x508   : > { %6269 = vst.msk [vmem:[#allocation3 + $0x70] sm:$0xff] %vm332_vm0, %v6237_v62  ;;  %v5528_v62 = vld [vmem:[#allocation3 + $0xa8] sm:$0xff] }
 0x509   : > { %v5462_v12 = vpop.f32.mrf.mxu2 }
 0x50a   : > { %v5804_v63 = vpop.f32.mrf.mxu3  ;;  %v5159_v20 = vpop.f32.mrf.mxu1  ;;  %v5556_v51 = vadd.f32 %v5524_v42, %v5462_v12 }
 0x50b   : > { %v5865_v27 = vld [vmem:[#allocation3 + $0x80] sm:$0xff]  ;;  %v5227_v50 = vadd.f32 %v5195_v13, %v5159_v20  ;;  %v6535_v20 = vld [vmem:[#allocation3 + $0x10] sm:$0xff] }
 0x50c   : > { %v5897_v30 = vadd.f32 %v5865_v27, %v5801_v61  ;;  %5588 = vst.msk [vmem:[#allocation3 + $0x88] sm:$0xff] %vm332_vm0, %v5556_v51 }
 0x50d   : > { %v6206_v15 = vld [vmem:[#allocation3 + $0x78] sm:$0xff]  ;;  %5259 = vst.msk [vmem:[#allocation3 + $0xf0] sm:$0xff] %vm332_vm0, %v5227_v50  ;;  %7684 = vmatmul.msk.f32.gmra.mxu1 %vm332_vm0, %v10082_v19  ;;  %v6149_v0 = vpop.f32.mrf.mxu0 }
 0x50e   : > { %5929 = vst.msk [vmem:[#allocation3 + $0x80] sm:$0xff] %vm332_vm0, %v5897_v30  ;;  %v6238_v21 = vadd.f32 %v6206_v15, %v6140_v40  ;;  %v5529_v15 = vld [vmem:[#allocation3 + $0xb0] sm:$0xff] }
 0x510   : > { %6270 = vst.msk [vmem:[#allocation3 + $0x78] sm:$0xff] %vm332_vm0, %v6238_v21 }
 0x511   : > { %v5465_v56 = vpop.f32.mrf.mxu2 }
 0x512   : > { %v5807_v57 = vpop.f32.mrf.mxu3  ;;  %v5162_v10 = vpop.f32.mrf.mxu1  ;;  %v5557_v38 = vadd.f32 %v5525_v41, %v5465_v56  ;;  %v6536_v41 = vld [vmem:[#allocation3 + $0x18] sm:$0xff] }
 0x513   : > { %v5866_v37 = vld [vmem:[#allocation3 + $0x88] sm:$0xff]  ;;  %v5228_v28 = vadd.f32 %v5196_v22, %v5162_v10 }
 0x514   : > { %v5898_v24 = vadd.f32 %v5866_v37, %v5804_v63  ;;  %5589 = vst.msk [vmem:[#allocation3 + $0x90] sm:$0xff] %vm332_vm0, %v5557_v38 }
 0x515   : > { %v6207_v29 = vld [vmem:[#allocation3 + $0x80] sm:$0xff]  ;;  %5260 = vst.msk [vmem:[#allocation3 + $0xf8] sm:$0xff] %vm332_vm0, %v5228_v28  ;;  %7685 = vmatmul.msk.f32.gmra.mxu1 %vm332_vm0, %v10097_v17  ;;  %v6152_v19 = vpop.f32.mrf.mxu0 }
 0x516   : > { %5930 = vst.msk [vmem:[#allocation3 + $0x88] sm:$0xff] %vm332_vm0, %v5898_v24  ;;  %v6239_v40 = vadd.f32 %v6207_v29, %v6143_v47  ;;  %v5530_v24 = vld [vmem:[#allocation3 + $0xb8] sm:$0xff] }
 0x518   : > { %6271 = vst.msk [vmem:[#allocation3 + $0x80] sm:$0xff] %vm332_vm0, %v6239_v40 }
 0x519   : > { %v5468_v58 = vpop.f32.mrf.mxu2 }
 0x51a   : > { %v5810_v9 = vpop.f32.mrf.mxu3  ;;  %v5558_v16 = vadd.f32 %v5526_v44, %v5468_v58  ;;  %v6437_v32 = vpop.f32.mrf.mxu1 }
 0x51b   : > { %v5867_v48 = vld [vmem:[#allocation3 + $0x90] sm:$0xff]  ;;  %v6565_v39 = vadd.f32 %v6533_v26, %v6437_v32 }
 0x51c   : > { %v5899_v17 = vadd.f32 %v5867_v48, %v5807_v57  ;;  %5590 = vst.msk [vmem:[#allocation3 + $0x98] sm:$0xff] %vm332_vm0, %v5558_v16  ;;  %v5531_v48 = vld [vmem:[#allocation3 + $0xc0] sm:$0xff] }
 0x51d   : > { %v6208_v11 = vld [vmem:[#allocation3 + $0x88] sm:$0xff]  ;;  %6597 = vst.msk [vmem:[#allocation3] sm:$0xff] %vm332_vm0, %v6565_v39  ;;  %7686 = vmatmul.msk.f32.gmra.mxu1 %vm332_vm0, %v10114_v46  ;;  %v6155_v47 = vpop.f32.mrf.mxu0 }
 0x51e   : > { %5931 = vst.msk [vmem:[#allocation3 + $0x90] sm:$0xff] %vm332_vm0, %v5899_v17  ;;  %v6240_v25 = vadd.f32 %v6208_v11, %v6146_v14 }
 0x520   : > { %6272 = vst.msk [vmem:[#allocation3 + $0x88] sm:$0xff] %vm332_vm0, %v6240_v25  ;;  %v6538_v25 = vld [vmem:[#allocation3 + $0x28] sm:$0xff] }
 0x521   : > { %v5471_v49 = vpop.f32.mrf.mxu2 }
 0x522   : > { %v5813_v45 = vpop.f32.mrf.mxu3  ;;  %v5559_v61 = vadd.f32 %v5527_v59, %v5471_v49  ;;  %v6440_v18 = vpop.f32.mrf.mxu1 }
 0x523   : > { %v5868_v2 = vld [vmem:[#allocation3 + $0x98] sm:$0xff]  ;;  %v6566_v35 = vadd.f32 %v6534_v5, %v6440_v18  ;;  %v5532_v5 = vld [vmem:[#allocation3 + $0xc8] sm:$0xff] }
 0x524   : > { %v5900_v33 = vadd.f32 %v5868_v2, %v5810_v9  ;;  %5591 = vst.msk [vmem:[#allocation3 + $0xa0] sm:$0xff] %vm332_vm0, %v5559_v61 }
 0x525   : > { %v6209_v55 = vld [vmem:[#allocation3 + $0x90] sm:$0xff]  ;;  %6598 = vst.msk [vmem:[#allocation3 + $0x8] sm:$0xff] %vm332_vm0, %v6566_v35  ;;  %7687 = vmatmul.msk.f32.gmra.mxu1 %vm332_vm0, %v10131_v4  ;;  %v6158_v36 = vpop.f32.mrf.mxu0 }
 0x526   : > { %5932 = vst.msk [vmem:[#allocation3 + $0x98] sm:$0xff] %vm332_vm0, %v5900_v33  ;;  %v6241_v46 = vadd.f32 %v6209_v55, %v6149_v0  ;;  %v6539_v55 = vld [vmem:[#allocation3 + $0x30] sm:$0xff] }
 0x528   : > { %6273 = vst.msk [vmem:[#allocation3 + $0x90] sm:$0xff] %vm332_vm0, %v6241_v46 }
 0x529   : > { %v5474_v14 = vpop.f32.mrf.mxu2 }
 0x52a   : > { %v5816_v12 = vpop.f32.mrf.mxu3  ;;  %v5560_v42 = vadd.f32 %v5528_v62, %v5474_v14  ;;  %v6443_v63 = vpop.f32.mrf.mxu1 }
 0x52b   : > { %v5869_v13 = vld [vmem:[#allocation3 + $0xa0] sm:$0xff]  ;;  %v6567_v51 = vadd.f32 %v6535_v20, %v6443_v63  ;;  %v5533_v63 = vld [vmem:[#allocation3 + $0xd0] sm:$0xff] }
 0x52c   : > { %v5901_v27 = vadd.f32 %v5869_v13, %v5813_v45  ;;  %5592 = vst.msk [vmem:[#allocation3 + $0xa8] sm:$0xff] %vm332_vm0, %v5560_v42 }
 0x52d   : > { %v6210_v50 = vld [vmem:[#allocation3 + $0x98] sm:$0xff]  ;;  %6599 = vst.msk [vmem:[#allocation3 + $0x10] sm:$0xff] %vm332_vm0, %v6567_v51  ;;  %7688 = vmatmul.msk.f32.gmra.mxu1 %vm332_vm0, %v10146_v1  ;;  %v6161_v57 = vpop.f32.mrf.mxu0 }
 0x52e   : > { %5933 = vst.msk [vmem:[#allocation3 + $0xa0] sm:$0xff] %vm332_vm0, %v5901_v27  ;;  %v6242_v4 = vadd.f32 %v6210_v50, %v6152_v19  ;;  %v6540_v27 = vld [vmem:[#allocation3 + $0x38] sm:$0xff] }
 0x530   : > { %6274 = vst.msk [vmem:[#allocation3 + $0x98] sm:$0xff] %vm332_vm0, %v6242_v4 }
 0x531   : > { %v5477_v30 = vpop.f32.mrf.mxu2 }
 0x532   : > { %v5819_v0 = vpop.f32.mrf.mxu3  ;;  %v5561_v21 = vadd.f32 %v5529_v15, %v5477_v30  ;;  %v6446_v56 = vpop.f32.mrf.mxu1 }
 0x533   : > { %v5870_v10 = vld [vmem:[#allocation3 + $0xa8] sm:$0xff]  ;;  %v6568_v22 = vadd.f32 %v6536_v41, %v6446_v56  ;;  %v5534_v56 = vld [vmem:[#allocation3 + $0xd8] sm:$0xff] }
 0x534   : > { %v5902_v38 = vadd.f32 %v5870_v10, %v5816_v12  ;;  %5593 = vst.msk [vmem:[#allocation3 + $0xb0] sm:$0xff] %vm332_vm0, %v5561_v21  ;;  %v6541_v10 = vld [vmem:[#allocation3 + $0x40] sm:$0xff] }
 0x535   : > { %v6211_v37 = vld [vmem:[#allocation3 + $0xa0] sm:$0xff]  ;;  %6600 = vst.msk [vmem:[#allocation3 + $0x18] sm:$0xff] %vm332_vm0, %v6568_v22  ;;  %7689 = vmatmul.msk.f32.gmra.mxu1 %vm332_vm0, %v10161_v31  ;;  %v6164_v16 = vpop.f32.mrf.mxu0 }
 0x536   : > { %5934 = vst.msk [vmem:[#allocation3 + $0xa8] sm:$0xff] %vm332_vm0, %v5902_v38  ;;  %v6243_v1 = vadd.f32 %v6211_v37, %v6155_v47 }
 0x538   : > { %6275 = vst.msk [vmem:[#allocation3 + $0xa0] sm:$0xff] %vm332_vm0, %v6243_v1 }
 0x539   : > { %v5480_v28 = vpop.f32.mrf.mxu2 }
 0x53a   : > { %v5822_v29 = vpop.f32.mrf.mxu3  ;;  %v5562_v19 = vadd.f32 %v5530_v24, %v5480_v28  ;;  %v6449_v40 = vpop.f32.mrf.mxu1 }
 0x53b   : > { %v5871_v58 = vld [vmem:[#allocation3 + $0xb0] sm:$0xff]  ;;  %v6569_v44 = vadd.f32 %v6537_v54, %v6449_v40 }
 0x53c   : > { %v5903_v9 = vadd.f32 %v5871_v58, %v5819_v0  ;;  %5594 = vst.msk [vmem:[#allocation3 + $0xb8] sm:$0xff] %vm332_vm0, %v5562_v19  ;;  %v6735_v0 = vld [vmem:[%s10841_s5 + $0x10] sm:$0xff]  ;;  %v5535_v19 = vld [vmem:[#allocation3 + $0xe0] sm:$0xff]  ;;  %v6542_v58 = vld [vmem:[#allocation3 + $0x48] sm:$0xff] }
 0x53d   : > { %v6212_v32 = vld [vmem:[#allocation3 + $0xa8] sm:$0xff]  ;;  %6601 = vst.msk [vmem:[#allocation3 + $0x20] sm:$0xff] %vm332_vm0, %v6569_v44  ;;  %7690 = vmatmul.msk.f32.gmra.mxu1 %vm332_vm0, %v10176_v8  ;;  %v6167_v61 = vpop.f32.mrf.mxu0  ;;  %6753 = vmatpush.msrb.mxu2 %v6735_v0 }
 0x53e   : > { %5935 = vst.msk [vmem:[#allocation3 + $0xb0] sm:$0xff] %vm332_vm0, %v5903_v9  ;;  %v6244_v31 = vadd.f32 %v6212_v32, %v6158_v36  ;;  %v6546_v0 = vld [vmem:[#allocation3 + $0x68] sm:$0xff] }
 0x540   : > { %6276 = vst.msk [vmem:[#allocation3 + $0xa8] sm:$0xff] %vm332_vm0, %v6244_v31 }
 0x541   : > { %v5483_v26 = vpop.f32.mrf.mxu2 }
 0x542   : > { %v5825_v39 = vpop.f32.mrf.mxu3  ;;  %v5563_v17 = vadd.f32 %v5531_v48, %v5483_v26  ;;  %v6452_v11 = vpop.f32.mrf.mxu1 }
 0x543   : > { %v5872_v47 = vld [vmem:[#allocation3 + $0xb8] sm:$0xff]  ;;  %v6570_v49 = vadd.f32 %v6538_v25, %v6452_v11  ;;  %v6543_v25 = vld [vmem:[#allocation3 + $0x50] sm:$0xff] }
 0x544   : > { %v5904_v59 = vadd.f32 %v5872_v47, %v5822_v29  ;;  %5595 = vst.msk [vmem:[#allocation3 + $0xc0] sm:$0xff] %vm332_vm0, %v5563_v17 }
 0x545   : > { %v6213_v45 = vld [vmem:[#allocation3 + $0xb0] sm:$0xff]  ;;  %6602 = vst.msk [vmem:[#allocation3 + $0x28] sm:$0xff] %vm332_vm0, %v6570_v49  ;;  %7691 = vmatmul.msk.f32.gmra.mxu1 %vm332_vm0, %v10191_v34  ;;  %v6170_v12 = vpop.f32.mrf.mxu0 }
 0x546   : > { %5936 = vst.msk [vmem:[#allocation3 + $0xb8] sm:$0xff] %vm332_vm0, %v5904_v59  ;;  %v6245_v8 = vadd.f32 %v6213_v45, %v6161_v57 }
 0x548   : > { %6277 = vst.msk [vmem:[#allocation3 + $0xb0] sm:$0xff] %vm332_vm0, %v6245_v8 }
 0x549   : > { %v5486_v18 = vpop.f32.mrf.mxu2 }
 0x54a   : > { %v5828_v2 = vpop.f32.mrf.mxu3  ;;  %v5564_v35 = vadd.f32 %v5532_v5, %v5486_v18  ;;  %v6455_v33 = vpop.f32.mrf.mxu1  ;;  %v5537_v5 = vld [vmem:[#allocation3 + $0xf0] sm:$0xff] }
 0x54b   : > { %v5873_v46 = vld [vmem:[#allocation3 + $0xc0] sm:$0xff]  ;;  %v6571_v36 = vadd.f32 %v6539_v55, %v6455_v33  ;;  %v6544_v33 = vld [vmem:[#allocation3 + $0x58] sm:$0xff] }
 0x54c   : > { %v5905_v14 = vadd.f32 %v5873_v46, %v5825_v39  ;;  %5596 = vst.msk [vmem:[#allocation3 + $0xc8] sm:$0xff] %vm332_vm0, %v5564_v35  ;;  %v5536_v39 = vld [vmem:[#allocation3 + $0xe8] sm:$0xff] }
 0x54d   : > { %v6214_v62 = vld [vmem:[#allocation3 + $0xb8] sm:$0xff]  ;;  %6603 = vst.msk [vmem:[#allocation3 + $0x30] sm:$0xff] %vm332_vm0, %v6571_v36  ;;  %7692 = vmatmul.msk.f32.gmra.mxu1 %vm332_vm0, %v10206_v3  ;;  %v6173_v1 = vpop.f32.mrf.mxu0 }
 0x54e   : > { %5937 = vst.msk [vmem:[#allocation3 + $0xc0] sm:$0xff] %vm332_vm0, %v5905_v14  ;;  %v6246_v34 = vadd.f32 %v6214_v62, %v6164_v16 }
 0x550   : > { %6278 = vst.msk [vmem:[#allocation3 + $0xb8] sm:$0xff] %vm332_vm0, %v6246_v34 }
 0x551   : > { %v5489_v42 = vpop.f32.mrf.mxu2 }
 0x552   : > { %v5831_v20 = vpop.f32.mrf.mxu3  ;;  %v5565_v13 = vadd.f32 %v5533_v63, %v5489_v42  ;;  %v6458_v51 = vpop.f32.mrf.mxu1  ;;  %v5538_v42 = vld [vmem:[#allocation3 + $0xf8] sm:$0xff] }
 0x553   : > { %v5874_v50 = vld [vmem:[#allocation3 + $0xc8] sm:$0xff]  ;;  %v6572_v4 = vadd.f32 %v6540_v27, %v6458_v51 }
 0x554   : > { %v5906_v30 = vadd.f32 %v5874_v50, %v5828_v2  ;;  %5597 = vst.msk [vmem:[#allocation3 + $0xd0] sm:$0xff] %vm332_vm0, %v5565_v13  ;;  %v6545_v13 = vld [vmem:[#allocation3 + $0x60] sm:$0xff] }
 0x555   : > { %v6215_v15 = vld [vmem:[#allocation3 + $0xc0] sm:$0xff]  ;;  %6604 = vst.msk [vmem:[#allocation3 + $0x38] sm:$0xff] %vm332_vm0, %v6572_v4  ;;  %7693 = vmatmul.msk.f32.gmra.mxu1 %vm332_vm0, %v10221_v43 }
 0x556   : > { %5938 = vst.msk [vmem:[#allocation3 + $0xc8] sm:$0xff] %vm332_vm0, %v5906_v30  ;;  %v6247_v3 = vadd.f32 %v6215_v15, %v6167_v61 }
 0x558   : > { %6279 = vst.msk [vmem:[#allocation3 + $0xc0] sm:$0xff] %vm332_vm0, %v6247_v3 }
 0x559   : > { %v5492_v21 = vpop.f32.mrf.mxu2 }
 0x55a   : > { %v5566_v41 = vadd.f32 %v5534_v56, %v5492_v21  ;;  %v6461_v57 = vpop.f32.mrf.mxu1  ;;  %v5834_v38 = vpop.f32.mrf.mxu3 }
 0x55b   : > { %v5875_v22 = vld [vmem:[#allocation3 + $0xd0] sm:$0xff]  ;;  %v6573_v37 = vadd.f32 %v6541_v10, %v6461_v57 }
 0x55c   : > { %v5907_v43 = vadd.f32 %v5875_v22, %v5831_v20  ;;  %5598 = vst.msk [vmem:[#allocation3 + $0xd8] sm:$0xff] %vm332_vm0, %v5566_v41  ;;  %v6547_v22 = vld [vmem:[#allocation3 + $0x70] sm:$0xff] }
 0x55d   : > { %v6216_v28 = vld [vmem:[#allocation3 + $0xc8] sm:$0xff]  ;;  %6605 = vst.msk [vmem:[#allocation3 + $0x40] sm:$0xff] %vm332_vm0, %v6573_v37  ;;  %7694 = vmatmul.msk.f32.gmra.mxu1 %vm332_vm0, %v10236_v7  ;;  %v6176_v7 = vpop.f32.mrf.mxu0 }
 0x55e   : > { %5939 = vst.msk [vmem:[#allocation3 + $0xd0] sm:$0xff] %vm332_vm0, %v5907_v43  ;;  %v6248_v24 = vadd.f32 %v6216_v28, %v6170_v12 }
 0x560   : > { %6280 = vst.msk [vmem:[#allocation3 + $0xc8] sm:$0xff] %vm332_vm0, %v6248_v24  ;;  %v6548_v24 = vld [vmem:[#allocation3 + $0x78] sm:$0xff] }
 0x561   : > { %v5495_v29 = vpop.f32.mrf.mxu2 }
 0x562   : > { %v5567_v40 = vadd.f32 %v5535_v19, %v5495_v29  ;;  %v6464_v54 = vpop.f32.mrf.mxu1  ;;  %v5837_v31 = vpop.f32.mrf.mxu3  ;;  %v6318_v29 = vld [vmem:[#allocation2 + $0x231] sm:$0xff] }
 0x563   : > { %v5876_v44 = vld [vmem:[#allocation3 + $0xd8] sm:$0xff]  ;;  %v6574_v9 = vadd.f32 %v6542_v58, %v6464_v54  ;;  %v6549_v58 = vld [vmem:[#allocation3 + $0x80] sm:$0xff] }
 0x564   : > { %v5908_v16 = vadd.f32 %v5876_v44, %v5834_v38  ;;  %5599 = vst.msk [vmem:[#allocation3 + $0xe0] sm:$0xff] %vm332_vm0, %v5567_v40  ;;  %v6317_v38 = vld [vmem:[#allocation2 + $0x229] sm:$0xff] }
 0x565   : > { %v6217_v32 = vld [vmem:[#allocation3 + $0xd0] sm:$0xff]  ;;  %6606 = vst.msk [vmem:[#allocation3 + $0x48] sm:$0xff] %vm332_vm0, %v6574_v9  ;;  %7695 = vmatmul.msk.f32.gmra.mxu1 %vm332_vm0, %v10251_v52  ;;  %v6179_v61 = vpop.f32.mrf.mxu0  ;;  %v6734_v40 = vld [vmem:[%s10841_s5 + $0x8] sm:$0xff]  ;;  %v6761_v9 = vld [vmem:[%s10842_s6] sm:$0x3] }
 0x566   : > { %5940 = vst.msk [vmem:[#allocation3 + $0xd8] sm:$0xff] %vm332_vm0, %v5908_v16  ;;  %v6249_v26 = vadd.f32 %v6217_v32, %v6173_v1  ;;  %6754 = vmatpush.msrb.mxu2 %v6734_v40  ;;  %7703 = vmatpush.msk.msrb.mxu3 %vm6766_vm1, %v6761_v9  ;;  %v6550_v32 = vld [vmem:[#allocation3 + $0x88] sm:$0xff] }
 0x568   : > { %6281 = vst.msk [vmem:[#allocation3 + $0xd0] sm:$0xff] %vm332_vm0, %v6249_v26  ;;  %v6551_v26 = vld [vmem:[#allocation3 + $0x90] sm:$0xff] }
 0x569   : > { %v5498_v48 = vpop.f32.mrf.mxu2 }
 0x56a   : > { %v5568_v17 = vadd.f32 %v5536_v39, %v5498_v48  ;;  %v6467_v11 = vpop.f32.mrf.mxu1  ;;  %v5840_v8 = vpop.f32.mrf.mxu3 }
 0x56b   : > { %v5877_v47 = vld [vmem:[#allocation3 + $0xe0] sm:$0xff]  ;;  %v6575_v49 = vadd.f32 %v6543_v25, %v6467_v11 }
 0x56c   : > { %v5909_v59 = vadd.f32 %v5877_v47, %v5837_v31  ;;  %5600 = vst.msk [vmem:[#allocation3 + $0xe8] sm:$0xff] %vm332_vm0, %v5568_v17  ;;  %v6552_v17 = vld [vmem:[#allocation3 + $0x98] sm:$0xff]  ;;  %v6553_v47 = vld [vmem:[#allocation3 + $0xa0] sm:$0xff] }
 0x56d   : > { %v6218_v45 = vld [vmem:[#allocation3 + $0xd8] sm:$0xff]  ;;  %6607 = vst.msk [vmem:[#allocation3 + $0x50] sm:$0xff] %vm332_vm0, %v6575_v49  ;;  %7696 = vmatmul.msk.f32.gmra.mxu1 %vm332_vm0, %v10266_v53  ;;  %v6182_v34 = vpop.f32.mrf.mxu0 }
 0x56e   : > { %5941 = vst.msk [vmem:[#allocation3 + $0xe0] sm:$0xff] %vm332_vm0, %v5909_v59  ;;  %v6250_v52 = vadd.f32 %v6218_v45, %v6176_v7  ;;  %v6554_v45 = vld [vmem:[#allocation3 + $0xa8] sm:$0xff] }
 0x570   : > { %6282 = vst.msk [vmem:[#allocation3 + $0xd8] sm:$0xff] %vm332_vm0, %v6250_v52 }
 0x571   : > { %v5501_v18 = vpop.f32.mrf.mxu2 }
 0x572   : > { %v5569_v2 = vadd.f32 %v5537_v5, %v5501_v18  ;;  %v6470_v35 = vpop.f32.mrf.mxu1  ;;  %v5843_v62 = vpop.f32.mrf.mxu3  ;;  %v6733_v5 = vld [vmem:[%s10841_s5] sm:$0xff] }
 0x573   : > { %v5878_v55 = vld [vmem:[#allocation3 + $0xe8] sm:$0xff]  ;;  %v6576_v46 = vadd.f32 %v6544_v33, %v6470_v35  ;;  %6755 = vmatpush.msrb.mxu2 %v6733_v5  ;;  %v6556_v35 = vld [vmem:[#allocation3 + $0xb8] sm:$0xff] }
 0x574   : > { %v5910_v36 = vadd.f32 %v5878_v55, %v5840_v8  ;;  %5601 = vst.msk [vmem:[#allocation3 + $0xf0] sm:$0xff] %vm332_vm0, %v5569_v2 }
 0x575   : > { %v6219_v14 = vld [vmem:[#allocation3 + $0xe0] sm:$0xff]  ;;  %6608 = vst.msk [vmem:[#allocation3 + $0x58] sm:$0xff] %vm332_vm0, %v6576_v46  ;;  %7697 = vmatmul.msk.f32.gmra.mxu1 %vm332_vm0, %v10282_v6  ;;  %v6185_v15 = vpop.f32.mrf.mxu0 }
 0x576   : > { %5942 = vst.msk [vmem:[#allocation3 + $0xe8] sm:$0xff] %vm332_vm0, %v5910_v36  ;;  %v6251_v53 = vadd.f32 %v6219_v14, %v6179_v61  ;;  %v6555_v61 = vld [vmem:[#allocation3 + $0xb0] sm:$0xff]  ;;  %v6557_v46 = vld [vmem:[#allocation3 + $0xc0] sm:$0xff]  ;;  %v10459_v14 = vld [vmem:[#allocation3 + $0x8] sm:$0xff] }
 0x578   : > { %6283 = vst.msk [vmem:[#allocation3 + $0xe0] sm:$0xff] %vm332_vm0, %v6251_v53  ;;  %v10462_v53 = vld [vmem:[#allocation3] sm:$0xff] }
 0x579   : > { %v5504_v12 = vpop.f32.mrf.mxu2 }
 0x57a   : > { %v5570_v63 = vadd.f32 %v5538_v42, %v5504_v12  ;;  %v6473_v20 = vpop.f32.mrf.mxu1  ;;  %v5846_v30 = vpop.f32.mrf.mxu3  ;;  %v10468_v12 = vld [vmem:[#allocation3 + $0x18] sm:$0xff]  ;;  %v6661_v42 = vsel %vm332_vm0, %v10462_v53, 0.0 }
 0x57b   : > { %v6577_v51 = vadd.f32 %v6545_v13, %v6473_v20  ;;  %v5879_v27 = vld [vmem:[#allocation3 + $0xf0] sm:$0xff]  ;;  %v10474_v13 = vld [vmem:[#allocation3 + $0x20] sm:$0xff] }
 0x57c   : > { %5602 = vst.msk [vmem:[#allocation3 + $0xf8] sm:$0xff] %vm332_vm0, %v5570_v63  ;;  %v5911_v50 = vadd.f32 %v5879_v27, %v5843_v62  ;;  %v10464_v62 = vld [vmem:[#allocation3 + $0x10] sm:$0xff]  ;;  %v6558_v27 = vld [vmem:[#allocation3 + $0xc8] sm:$0xff] }
 0x57d   : > { %v6220_v4 = vld [vmem:[#allocation3 + $0xe8] sm:$0xff]  ;;  %6609 = vst.msk [vmem:[#allocation3 + $0x60] sm:$0xff] %vm332_vm0, %v6577_v51  ;;  %7698 = vmatmul.msk.f32.gmra.mxu1 %vm332_vm0, %v10298_v60  ;;  %v6188_v1 = vpop.f32.mrf.mxu0  ;;  %v6664_v63 = vsel %vm332_vm0, %v10464_v62, 0.0 }
 0x57e   : > { %v6252_v6 = vadd.f32 %v6220_v4, %v6182_v34  ;;  %5943 = vst.msk [vmem:[#allocation3 + $0xf0] sm:$0xff] %vm332_vm0, %v5911_v50  ;;  %v6662_v34 = vsel %vm332_vm0, %v10459_v14, 0.0  ;;  %v6666_v50 = vsel %vm332_vm0, %v10468_v12, 0.0 }
 0x57f   : > { %v6663_v20 = vadd.f32 %v6662_v34, %v6661_v42 }
 0x580   : > { %6284 = vst.msk [vmem:[#allocation3 + $0xe8] sm:$0xff] %vm332_vm0, %v6252_v6 }
 0x581   : > { %v6665_v6 = vadd.f32 %v6664_v63, %v6663_v20 }
 0x582   : > { %v6476_v3 = vpop.f32.mrf.mxu1 }
 0x583   : > { %v6578_v21 = vadd.f32 %v6546_v0, %v6476_v3  ;;  %v5880_v56 = vld [vmem:[#allocation3 + $0xf8] sm:$0xff]  ;;  %v6667_v3 = vadd.f32 %v6666_v50, %v6665_v6  ;;  %v10483_v0 = vld [vmem:[#allocation3 + $0x30] sm:$0xff] }
 0x584   : > { %v5912_v41 = vadd.f32 %v5880_v56, %v5846_v30  ;;  %v10478_v30 = vld [vmem:[#allocation3 + $0x28] sm:$0xff]  ;;  %v10508_v9 = vld [vmem:[#allocation3 + $0x60] sm:$0xff] }
 0x585   : > { %6610 = vst.msk [vmem:[#allocation3 + $0x68] sm:$0xff] %vm332_vm0, %v6578_v21  ;;  %7699 = vmatmul.msk.f32.gmra.mxu1 %vm332_vm0, %v10313_v23  ;;  %v6221_v57 = vld [vmem:[#allocation3 + $0xf0] sm:$0xff]  ;;  %v6670_v21 = vsel %vm332_vm0, %v10478_v30, 0.0 }
 0x586   : > { %5944 = vst.msk [vmem:[#allocation3 + $0xf8] sm:$0xff] %vm332_vm0, %v5912_v41  ;;  %v6253_v60 = vadd.f32 %v6221_v57, %v6185_v15  ;;  %v6668_v15 = vsel %vm332_vm0, %v10474_v13, 0.0  ;;  %v10487_v41 = vld [vmem:[#allocation3 + $0x38] sm:$0xff]  ;;  %v6672_v57 = vsel %vm332_vm0, %v10483_v0, 0.0 }
 0x587   : > { %v6669_v56 = vadd.f32 %v6668_v15, %v6667_v3  ;;  %v6562_v50 = vld [vmem:[#allocation3 + $0xe8] sm:$0xff] }
 0x588   : > { %6285 = vst.msk [vmem:[#allocation3 + $0xf0] sm:$0xff] %vm332_vm0, %v6253_v60 }
 0x589   : > { %v6671_v60 = vadd.f32 %v6670_v21, %v6669_v56 }
 0x58a   : > { %v6479_v10 = vpop.f32.mrf.mxu1 }
 0x58b   : > { %v6579_v37 = vadd.f32 %v6547_v22, %v6479_v10  ;;  %v10491_v10 = vld [vmem:[#allocation3 + $0x40] sm:$0xff] }
 0x58d   : > { %6611 = vst.msk [vmem:[#allocation3 + $0x70] sm:$0xff] %vm332_vm0, %v6579_v37  ;;  %7700 = vmatmul.msk.f32.gmra.mxu1 %vm332_vm0, %v6317_v38  ;;  %v6222_v43 = vld [vmem:[#allocation3 + $0xf8] sm:$0xff]  ;;  %v6559_v38 = vld [vmem:[#allocation3 + $0xd0] sm:$0xff]  ;;  %v6674_v37 = vsel %vm332_vm0, %v10487_v41, 0.0 }
 0x58e   : > { %v6254_v28 = vadd.f32 %v6222_v43, %v6188_v1  ;;  %v6673_v43 = vadd.f32 %v6672_v57, %v6671_v60 }
 0x590   : > { %6286 = vst.msk [vmem:[#allocation3 + $0xf8] sm:$0xff] %vm332_vm0, %v6254_v28  ;;  %v10495_v28 = vld [vmem:[#allocation3 + $0x48] sm:$0xff] }
 0x592   : > { %v6482_v23 = vpop.f32.mrf.mxu1 }
 0x593   : > { %v6580_v19 = vadd.f32 %v6548_v24, %v6482_v23  ;;  %v6676_v23 = vsel %vm332_vm0, %v10491_v10, 0.0  ;;  %v6675_v24 = vadd.f32 %v6674_v37, %v6673_v43 }
 0x595   : > { %6612 = vst.msk [vmem:[#allocation3 + $0x78] sm:$0xff] %vm332_vm0, %v6580_v19  ;;  %7701 = vmatmul.msk.f32.gmra.mxu1 %vm332_vm0, %v6318_v29  ;;  %v10500_v29 = vld [vmem:[#allocation3 + $0x50] sm:$0xff]  ;;  %v6678_v19 = vsel %vm332_vm0, %v10495_v28, 0.0  ;;  %v6677_v40 = vadd.f32 %v6676_v23, %v6675_v24 }
 0x596   : > { %v6563_v24 = vld [vmem:[#allocation3 + $0xf0] sm:$0xff] }
 0x59a   : > { %v6485_v54 = vpop.f32.mrf.mxu1 }
 0x59b   : > { %v6581_v44 = vadd.f32 %v6549_v58, %v6485_v54  ;;  %v10504_v54 = vld [vmem:[#allocation3 + $0x58] sm:$0xff]  ;;  %v6680_v58 = vsel %vm332_vm0, %v10500_v29, 0.0 }
 0x59d   : > { %6613 = vst.msk [vmem:[#allocation3 + $0x80] sm:$0xff] %vm332_vm0, %v6581_v44  ;;  %v6679_v44 = vadd.f32 %v6678_v19, %v6677_v40 }
 0x5a2   : > { %v6488_v16 = vpop.f32.mrf.mxu1 }
 0x5a3   : > { %v6582_v31 = vadd.f32 %v6550_v32, %v6488_v16  ;;  %v6560_v32 = vld [vmem:[#allocation3 + $0xd8] sm:$0xff] }
 0x5a5   : > { %6614 = vst.msk [vmem:[#allocation3 + $0x88] sm:$0xff] %vm332_vm0, %v6582_v31  ;;  %v6682_v31 = vsel %vm332_vm0, %v10504_v54, 0.0 }
 0x5aa   : > { %v6491_v7 = vpop.f32.mrf.mxu1 }
 0x5ab   : > { %v6583_v48 = vadd.f32 %v6551_v26, %v6491_v7  ;;  %v6681_v26 = vadd.f32 %v6680_v58, %v6679_v44 }
 0x5ad   : > { %6615 = vst.msk [vmem:[#allocation3 + $0x90] sm:$0xff] %vm332_vm0, %v6583_v48  ;;  %v10512_v48 = vld [vmem:[#allocation3 + $0x68] sm:$0xff] }
 0x5b2   : > { %v6494_v39 = vpop.f32.mrf.mxu1 }
 0x5b3   : > { %v6584_v11 = vadd.f32 %v6552_v17, %v6494_v39  ;;  %v6684_v39 = vsel %vm332_vm0, %v10508_v9, 0.0  ;;  %v6683_v17 = vadd.f32 %v6682_v31, %v6681_v26 }
 0x5b5   : > { %6616 = vst.msk [vmem:[#allocation3 + $0x98] sm:$0xff] %vm332_vm0, %v6584_v11  ;;  %v10517_v11 = vld [vmem:[#allocation3 + $0x70] sm:$0xff] }
 0x5ba   : > { %v6497_v25 = vpop.f32.mrf.mxu1 }
 0x5bb   : > { %v6585_v49 = vadd.f32 %v6553_v47, %v6497_v25  ;;  %v6686_v25 = vsel %vm332_vm0, %v10512_v48, 0.0  ;;  %v6685_v47 = vadd.f32 %v6684_v39, %v6683_v17 }
 0x5bc   : > { %v10538_v42 = vld [vmem:[#allocation3 + $0x98] sm:$0xff] }
 0x5bd   : > { %6617 = vst.msk [vmem:[#allocation3 + $0xa0] sm:$0xff] %vm332_vm0, %v6585_v49  ;;  %v10521_v49 = vld [vmem:[#allocation3 + $0x78] sm:$0xff] }
 0x5c2   : > { %v6500_v59 = vpop.f32.mrf.mxu1 }
 0x5c3   : > { %v6586_v52 = vadd.f32 %v6554_v45, %v6500_v59  ;;  %v6688_v59 = vsel %vm332_vm0, %v10517_v11, 0.0  ;;  %v6687_v45 = vadd.f32 %v6686_v25, %v6685_v47  ;;  %v6564_v47 = vld [vmem:[#allocation3 + $0xf8] sm:$0xff] }
 0x5c5   : > { %6618 = vst.msk [vmem:[#allocation3 + $0xa8] sm:$0xff] %vm332_vm0, %v6586_v52  ;;  %v10525_v52 = vld [vmem:[#allocation3 + $0x80] sm:$0xff] }
 0x5ca   : > { %v6503_v8 = vpop.f32.mrf.mxu1 }
 0x5cb   : > { %v6587_v18 = vadd.f32 %v6555_v61, %v6503_v8  ;;  %v6561_v61 = vld [vmem:[#allocation3 + $0xe0] sm:$0xff] }
 0x5cc   : > { %v10546_v3 = vld [vmem:[#allocation3 + $0xa8] sm:$0xff] }
 0x5cd   : > { %6619 = vst.msk [vmem:[#allocation3 + $0xb0] sm:$0xff] %vm332_vm0, %v6587_v18  ;;  %v6690_v18 = vsel %vm332_vm0, %v10521_v49, 0.0  ;;  %v6702_v60 = vsel %vm332_vm0, %v10546_v3, 0.0 }
 0x5d2   : > { %v6506_v2 = vpop.f32.mrf.mxu1 }
 0x5d3   : > { %v6588_v33 = vadd.f32 %v6556_v35, %v6506_v2  ;;  %v6689_v2 = vadd.f32 %v6688_v59, %v6687_v45  ;;  %v10529_v35 = vld [vmem:[#allocation3 + $0x88] sm:$0xff] }
 0x5d4   : > { %v10551_v57 = vld [vmem:[#allocation3 + $0xb0] sm:$0xff] }
 0x5d5   : > { %6620 = vst.msk [vmem:[#allocation3 + $0xb8] sm:$0xff] %vm332_vm0, %v6588_v33  ;;  %v6692_v33 = vsel %vm332_vm0, %v10525_v52, 0.0  ;;  %v6704_v37 = vsel %vm332_vm0, %v10551_v57, 0.0 }
 0x5da   : > { %v6509_v55 = vpop.f32.mrf.mxu1 }
 0x5db   : > { %v6589_v36 = vadd.f32 %v6557_v46, %v6509_v55  ;;  %v6691_v55 = vadd.f32 %v6690_v18, %v6689_v2  ;;  %v10534_v46 = vld [vmem:[#allocation3 + $0x90] sm:$0xff] }
 0x5dc   : > { %v6696_v63 = vsel %vm332_vm0, %v10534_v46, 0.0 }
 0x5dd   : > { %6621 = vst.msk [vmem:[#allocation3 + $0xc0] sm:$0xff] %vm332_vm0, %v6589_v36  ;;  %v6694_v36 = vsel %vm332_vm0, %v10529_v35, 0.0  ;;  %v6693_v34 = vadd.f32 %v6692_v33, %v6691_v55 }
 0x5df   : > { %v6695_v20 = vadd.f32 %v6694_v36, %v6693_v34 }
 0x5e1   : > { %v6697_v15 = vadd.f32 %v6696_v63, %v6695_v20 }
 0x5e2   : > { %v6512_v51 = vpop.f32.mrf.mxu1 }
 0x5e3   : > { %v6590_v4 = vadd.f32 %v6558_v27, %v6512_v51  ;;  %v10542_v51 = vld [vmem:[#allocation3 + $0xa0] sm:$0xff] }
 0x5e4   : > { %v6700_v21 = vsel %vm332_vm0, %v10542_v51, 0.0  ;;  %v10559_v43 = vld [vmem:[#allocation3 + $0xc0] sm:$0xff] }
 0x5e5   : > { %6622 = vst.msk [vmem:[#allocation3 + $0xc8] sm:$0xff] %vm332_vm0, %v6590_v4  ;;  %v6698_v4 = vsel %vm332_vm0, %v10538_v42, 0.0 }
 0x5e6   : > { %v6699_v56 = vadd.f32 %v6698_v4, %v6697_v15 }
 0x5ea   : > { %v6515_v22 = vpop.f32.mrf.mxu1 }
 0x5eb   : > { %v6591_v1 = vadd.f32 %v6559_v38, %v6515_v22  ;;  %v6701_v22 = vadd.f32 %v6700_v21, %v6699_v56  ;;  %v10555_v38 = vld [vmem:[#allocation3 + $0xb8] sm:$0xff] }
 0x5ec   : > { %v6706_v19 = vsel %vm332_vm0, %v10555_v38, 0.0  ;;  %v10563_v44 = vld [vmem:[#allocation3 + $0xc8] sm:$0xff] }
 0x5ed   : > { %6623 = vst.msk [vmem:[#allocation3 + $0xd0] sm:$0xff] %vm332_vm0, %v6591_v1  ;;  %v6703_v1 = vadd.f32 %v6702_v60, %v6701_v22 }
 0x5ef   : > { %v6705_v58 = vadd.f32 %v6704_v37, %v6703_v1  ;;  %v6731_v1 = vld [vmem:[%s10840_s4] sm:$0x1] }
 0x5f2   : > { %v6518_v16 = vpop.f32.mrf.mxu1 }
 0x5f3   : > { %v6592_v7 = vadd.f32 %v6560_v32, %v6518_v16  ;;  %v6708_v16 = vsel %vm332_vm0, %v10559_v43, 0.0  ;;  %v6707_v32 = vadd.f32 %v6706_v19, %v6705_v58 }
 0x5f4   : > { %v10568_v31 = vld [vmem:[#allocation3 + $0xd0] sm:$0xff] }
 0x5f5   : > { %6624 = vst.msk [vmem:[#allocation3 + $0xd8] sm:$0xff] %vm332_vm0, %v6592_v7  ;;  %v6710_v7 = vsel %vm332_vm0, %v10563_v44, 0.0  ;;  %v6709_v39 = vadd.f32 %v6708_v16, %v6707_v32  ;;  %v6712_v17 = vsel %vm332_vm0, %v10568_v31, 0.0 }
 0x5f7   : > { %v6711_v45 = vadd.f32 %v6710_v7, %v6709_v39 }
 0x5fa   : > { %v6521_v8 = vpop.f32.mrf.mxu1 }
 0x5fb   : > { %v6593_v5 = vadd.f32 %v6561_v61, %v6521_v8 }
 0x5fc   : > { %v10572_v26 = vld [vmem:[#allocation3 + $0xd8] sm:$0xff] }
 0x5fd   : > { %6625 = vst.msk [vmem:[#allocation3 + $0xe0] sm:$0xff] %vm332_vm0, %v6593_v5  ;;  %v6714_v61 = vsel %vm332_vm0, %v10572_v26, 0.0  ;;  %v6713_v5 = vadd.f32 %v6712_v17, %v6711_v45 }
 0x5ff   : > { %v6715_v55 = vadd.f32 %v6714_v61, %v6713_v5 }
 0x602   : > { %v6524_v27 = vpop.f32.mrf.mxu1 }
 0x603   : > { %v6594_v6 = vadd.f32 %v6562_v50, %v6524_v27 }
 0x604   : > { %v10576_v59 = vld [vmem:[#allocation3 + $0xe0] sm:$0xff] }
 0x605   : > { %6626 = vst.msk [vmem:[#allocation3 + $0xe8] sm:$0xff] %vm332_vm0, %v6594_v6  ;;  %v6716_v2 = vsel %vm332_vm0, %v10576_v59, 0.0 }
 0x606   : > { %v6717_v34 = vadd.f32 %v6716_v2, %v6715_v55 }
 0x60a   : > { %v6527_v23 = vpop.f32.mrf.mxu1 }
 0x60b   : > { %v6595_v40 = vadd.f32 %v6563_v24, %v6527_v23 }
 0x60c   : > { %v10580_v18 = vld [vmem:[#allocation3 + $0xe8] sm:$0xff] }
 0x60d   : > { %6627 = vst.msk [vmem:[#allocation3 + $0xf0] sm:$0xff] %vm332_vm0, %v6595_v40  ;;  %v6718_v36 = vsel %vm332_vm0, %v10580_v18, 0.0 }
 0x60e   : > { %v6719_v20 = vadd.f32 %v6718_v36, %v6717_v34  ;;  %v10602_v36 = vld [vmem:[%s10840_s4] ss:$0 sm:$0xff] }
 0x612   : > { %v6530_v25 = vpop.f32.mrf.mxu1 }
 0x613   : > { %v6596_v8 = vadd.f32 %v6564_v47, %v6530_v25 }
 0x614   : > { %v10585_v33 = vld [vmem:[#allocation3 + $0xf0] sm:$0xff] }
 0x615   : > { %6628 = vst.msk [vmem:[#allocation3 + $0xf8] sm:$0xff] %vm332_vm0, %v6596_v8  ;;  %v6720_v63 = vsel %vm332_vm0, %v10585_v33, 0.0 }
 0x616   : > { %v6721_v50 = vadd.f32 %v6720_v63, %v6719_v20  ;;  %v6812_v63 = vadd.f32 %v10602_v36, %v10462_v53  ;;  %v6813_v20 = vadd.f32 %v10602_v36, %v10459_v14  ;;  %v6879_v14 = vld [vmem:[%s8120_s13 + $0x10] sm:$0xff] }
 0x61c   : > { %v10591_v27 = vld [vmem:[#allocation3 + $0xf8] sm:$0xff] }
 0x61d   : > { %v6722_v4 = vsel %vm332_vm0, %v10591_v27, 0.0 }
 0x61e   : > { %v6723_v6 = vadd.f32 %v6722_v4, %v6721_v50  ;;  %v6814_v50 = vadd.f32 %v10602_v36, %v10464_v62  ;;  %v6815_v4 = vadd.f32 %v10602_v36, %v10468_v12  ;;  %v6817_v62 = vadd.f32 %v10602_v36, %v10478_v30  ;;  %v6880_v12 = vld [vmem:[%s8120_s13 + $0x18] sm:$0xff]  ;;  %v6882_v30 = vld [vmem:[%s8120_s13 + $0x28] sm:$0xff] }
 0x620   : > { %v6724_v15 = vrot.slane %v6723_v6, 4 }
 0x622   : > { %v6725_v21 = vadd.f32 %v6724_v15, %v6723_v6  ;;  %v6816_v6 = vadd.f32 %v10602_v36, %v10474_v13  ;;  %v6818_v13 = vadd.f32 %v10602_v36, %v10483_v0 }
 0x624   : > { %v6726_v56 = vrot.slane %v6725_v21, 2 }
 0x626   : > { %v6727_v60 = vadd.f32 %v6726_v56, %v6725_v21  ;;  %v6877_v56 = vld [vmem:[%s8120_s13] sm:$0xff] }
 0x628   : > { %v6728_v22 = vrot.slane %v6727_v60, 1 }
 0x62a   : > { %v6729_v37 = vadd.f32 %v6728_v22, %v6727_v60  ;;  %v6878_v60 = vld [vmem:[%s8120_s13 + $0x8] sm:$0xff] }
 0x62c   : > { %v6730_v23 = vmul.f32 0.00390625, %v6729_v37 }
 0x62e   : > { %v6732_v24 = vadd.f32 %v6731_v1, %v6730_v23  ;;  %v6881_v1 = vld [vmem:[%s8120_s13 + $0x20] sm:$0xff]  ;;  %v6819_v23 = vadd.f32 %v10602_v36, %v10487_v41  ;;  %v6822_v41 = vadd.f32 %v10602_v36, %v10500_v29 }
 0x630   : > { %7702 = vmatmul.msk.f32.vlgmr.msrb.gmra.mxu2 %vm332_vm0, %v6732_v24  ;;  %v6820_v24 = vadd.f32 %v10602_v36, %v10491_v10 }
 0x6b3   : > { %v6757_v19 = vpop.f32.mrf.mxu2 }
 0x6b4   : > { %v6760_v40 = vmax.f32 %v6757_v19, 0.0 }
 0x6b6   : > { %7704 = vmatmul.msk.f32.vlgmr.msrb.gmra.mxu3 %vm6762_vm2, %v6760_v40 }
 0x739   : > { %v6787_v58 = vpop.f32.mrf.mxu3 }
 0x73a   : > { %v7705_v16 = vmul.f32 -1.442695, %v6787_v58 }
 0x73c   : > { %7795 = vpow2.f32 %v7705_v16 }
 0x742   : > { %v7796_v32 = vpop.eup %7795 }
 0x743   : > { %v6793_v7 = vadd.f32 1.0, %v7796_v32  ;;  %v6883_v32 = vld [vmem:[%s8120_s13 + $0x30] sm:$0xff] }
 0x745   : > { %7797 = vrcp.f32 %v6793_v7  ;;  %v6805_v8 = vand.u32 2147483648, %v6793_v7  ;;  %vm6799_vm4 = vweird.f32 %v6793_v7  ;;  %v6803_v61 = vand.u32 2147483647, %v6793_v7 }
 0x747   : > { %v6806_v2 = vor.u32 1.1754944e-38, %v6805_v8  ;;  %vm6804_vm6 = vcmp.eq.f32.partialorder %v6803_v61, 8.507059e+37  ;;  %v6885_v8 = vld [vmem:[%s8120_s13 + $0x40] sm:$0xff]  ;;  %v6824_v61 = vadd.f32 %v10602_v36, %v10508_v9 }
 0x74b   : > { %v7798_v39 = vpop.eup %7797 }
 0x74c   : > { %v6795_v17 = vmul.f32 %v7798_v39, %v6793_v7  ;;  %vm6800_vm3 = vweird.f32 %v7798_v39  ;;  %v6821_v7 = vadd.f32 %v10602_v36, %v10495_v28 }
 0x74d   : > { %vm6801_vm5 = vmor %vm6799_vm4, %vm6800_vm3 }
 0x74e   : > { %v6796_v25 = vsub.f32 1.0, %v6795_v17  ;;  %v6884_v17 = vld [vmem:[%s8120_s13 + $0x38] sm:$0xff] }
 0x750   : > { %v6797_v47 = vmul.f32 %v7798_v39, %v6796_v25  ;;  %v6823_v25 = vadd.f32 %v10602_v36, %v10504_v54 }
 0x752   : > { %v6798_v45 = vadd.f32 %v7798_v39, %v6797_v47 }
 0x754   : > { %v6802_v5 = vsel %vm6801_vm5, %v7798_v39, %v6798_v45 }
 0x755   : > { %v6807_v55 = vsel %vm6804_vm6, %v6806_v2, %v6802_v5  ;;  %v6886_v2 = vld [vmem:[%s8120_s13 + $0x48] sm:$0xff] }
 0x756   : > { %v10604_v34 = vperm.slane %v6807_v55, 0 }
 0x758   : > { %v6845_v15 = vmul.f32 %v10604_v34, %v6812_v63  ;;  %v6846_v21 = vmul.f32 %v10604_v34, %v6813_v20  ;;  %v6847_v53 = vmul.f32 %v10604_v34, %v6814_v50  ;;  %v6848_v22 = vmul.f32 %v10604_v34, %v6815_v4  ;;  %v6887_v50 = vld [vmem:[%s8120_s13 + $0x50] sm:$0xff] }
 0x759   : > { %v6849_v37 = vmul.f32 %v10604_v34, %v6816_v6  ;;  %v6850_v19 = vmul.f32 %v10604_v34, %v6817_v62  ;;  %v6851_v40 = vmul.f32 %v10604_v34, %v6818_v13  ;;  %v6852_v39 = vmul.f32 %v10604_v34, %v6819_v23  ;;  %v6890_v13 = vld [vmem:[%s8120_s13 + $0x68] sm:$0xff] }
 0x75a   : > { %v6909_v58 = vadd.f32 %v6877_v56, %v6845_v15  ;;  %v6910_v16 = vadd.f32 %v6878_v60, %v6846_v21  ;;  %v6911_v0 = vadd.f32 %v6879_v14, %v6847_v53  ;;  %v6912_v10 = vadd.f32 %v6880_v12, %v6848_v22  ;;  %v6888_v21 = vld [vmem:[%s8120_s13 + $0x58] sm:$0xff] }
 0x75b   : > { %v6853_v47 = vmul.f32 %v10604_v34, %v6820_v24  ;;  %v6913_v45 = vadd.f32 %v6881_v1, %v6849_v37  ;;  %v6854_v28 = vmul.f32 %v10604_v34, %v6821_v7  ;;  %v6855_v29 = vmul.f32 %v10604_v34, %v6822_v41 }
 0x75c   : > { %v6914_v5 = vadd.f32 %v6882_v30, %v6850_v19  ;;  %v6915_v55 = vadd.f32 %v6883_v32, %v6851_v40  ;;  %v6941_v63 = vmax.f32 %v6909_v58, 0.0  ;;  %v6942_v20 = vmax.f32 %v6910_v16, 0.0 }
 0x75d   : > { %v6943_v54 = vmax.f32 %v6911_v0, 0.0  ;;  %v6825_v4 = vadd.f32 %v10602_v36, %v10512_v48  ;;  %v6856_v6 = vmul.f32 %v10604_v34, %v6823_v25  ;;  %v6916_v9 = vadd.f32 %v6884_v17, %v6852_v39  ;;  %v6889_v48 = vld [vmem:[%s8120_s13 + $0x60] sm:$0xff] }
 0x75e   : > { %v6944_v15 = vmax.f32 %v6912_v10, 0.0  ;;  %v6826_v53 = vadd.f32 %v10602_v36, %v10517_v11  ;;  %v6857_v56 = vmul.f32 %v10604_v34, %v6824_v61  ;;  %v6917_v60 = vadd.f32 %v6885_v8, %v6853_v47  ;;  %6973 = vst.msk [vmem:[%s10663_s15] sm:$0xff] %vm332_vm0, %v6941_v63 }
 0x75f   : > { %v6945_v14 = vmax.f32 %v6913_v45, 0.0  ;;  %v6827_v62 = vadd.f32 %v10602_v36, %v10521_v49  ;;  %v6858_v11 = vmul.f32 %v10604_v34, %v6825_v4  ;;  %v6918_v22 = vadd.f32 %v6886_v2, %v6854_v28  ;;  %6974 = vst.msk [vmem:[%s10663_s15 + $0x8] sm:$0xff] %vm332_vm0, %v6942_v20  ;;  %v6891_v49 = vld [vmem:[%s8120_s13 + $0x70] sm:$0xff] }
 0x760   : > { %v6946_v12 = vmax.f32 %v6914_v5, 0.0  ;;  %v6828_v37 = vadd.f32 %v10602_v36, %v10525_v52  ;;  %v6859_v1 = vmul.f32 %v10604_v34, %v6826_v53  ;;  %v6919_v23 = vadd.f32 %v6887_v50, %v6855_v29  ;;  %6975 = vst.msk [vmem:[%s10663_s15 + $0x10] sm:$0xff] %vm332_vm0, %v6943_v54  ;;  %v6892_v52 = vld [vmem:[%s8120_s13 + $0x78] sm:$0xff] }
 0x761   : > { %v6947_v24 = vmax.f32 %v6915_v55, 0.0  ;;  %v6829_v19 = vadd.f32 %v10602_v36, %v10529_v35  ;;  %v6860_v30 = vmul.f32 %v10604_v34, %v6827_v62  ;;  %v6920_v40 = vadd.f32 %v6888_v21, %v6856_v6  ;;  %6976 = vst.msk [vmem:[%s10663_s15 + $0x18] sm:$0xff] %vm332_vm0, %v6944_v15  ;;  %v6893_v35 = vld [vmem:[%s8120_s13 + $0x80] sm:$0xff] }
 0x762   : > { %v6948_v58 = vmax.f32 %v6916_v9, 0.0  ;;  %v6830_v16 = vadd.f32 %v10602_v36, %v10534_v46  ;;  %v6861_v0 = vmul.f32 %v10604_v34, %v6828_v37  ;;  %v6921_v32 = vadd.f32 %v6889_v48, %v6857_v56  ;;  %6977 = vst.msk [vmem:[%s10663_s15 + $0x20] sm:$0xff] %vm332_vm0, %v6945_v14  ;;  %v6894_v46 = vld [vmem:[%s8120_s13 + $0x88] sm:$0xff] }
 0x763   : > { %v6949_v7 = vmax.f32 %v6917_v60, 0.0  ;;  %v6831_v41 = vadd.f32 %v10602_v36, %v10538_v42  ;;  %v6862_v39 = vmul.f32 %v10604_v34, %v6829_v19  ;;  %v6922_v10 = vadd.f32 %v6890_v13, %v6858_v11  ;;  %6978 = vst.msk [vmem:[%s10663_s15 + $0x28] sm:$0xff] %vm332_vm0, %v6946_v12  ;;  %v6895_v42 = vld [vmem:[%s8120_s13 + $0x90] sm:$0xff] }
 0x764   : > { %v6950_v17 = vmax.f32 %v6918_v22, 0.0  ;;  %v6832_v25 = vadd.f32 %v10602_v36, %v10542_v51  ;;  %v6863_v47 = vmul.f32 %v10604_v34, %v6830_v16  ;;  %v6923_v45 = vadd.f32 %v6891_v49, %v6859_v1  ;;  %6979 = vst.msk [vmem:[%s10663_s15 + $0x30] sm:$0xff] %vm332_vm0, %v6947_v24  ;;  %v6896_v51 = vld [vmem:[%s8120_s13 + $0x98] sm:$0xff] }
 0x765   : > { %v6951_v8 = vmax.f32 %v6919_v23, 0.0  ;;  %v6833_v61 = vadd.f32 %v10602_v36, %v10546_v3  ;;  %v6864_v28 = vmul.f32 %v10604_v34, %v6831_v41  ;;  %v6924_v29 = vadd.f32 %v6892_v52, %v6860_v30  ;;  %6980 = vst.msk [vmem:[%s10663_s15 + $0x38] sm:$0xff] %vm332_vm0, %v6948_v58  ;;  %v6897_v3 = vld [vmem:[%s8120_s13 + $0xa0] sm:$0xff] }
 0x766   : > { %v6952_v5 = vmax.f32 %v6920_v40, 0.0  ;;  %v6834_v2 = vadd.f32 %v10602_v36, %v10551_v57  ;;  %v6865_v55 = vmul.f32 %v10604_v34, %v6832_v25  ;;  %v6925_v63 = vadd.f32 %v6893_v35, %v6861_v0  ;;  %6981 = vst.msk [vmem:[%s10663_s15 + $0x40] sm:$0xff] %vm332_vm0, %v6949_v7  ;;  %v6898_v57 = vld [vmem:[%s8120_s13 + $0xa8] sm:$0xff]  ;;  %v6903_v40 = vld [vmem:[%s8120_s13 + $0xd0] sm:$0xff]  ;;  %v6904_v0 = vld [vmem:[%s8120_s13 + $0xd8] sm:$0xff] }
 0x767   : > { %v6953_v20 = vmax.f32 %v6921_v32, 0.0  ;;  %v6835_v54 = vadd.f32 %v10602_v36, %v10555_v38  ;;  %v6866_v50 = vmul.f32 %v10604_v34, %v6833_v61  ;;  %v6926_v4 = vadd.f32 %v6894_v46, %v6862_v39  ;;  %6982 = vst.msk [vmem:[%s10663_s15 + $0x48] sm:$0xff] %vm332_vm0, %v6950_v17  ;;  %v6899_v38 = vld [vmem:[%s8120_s13 + $0xb0] sm:$0xff]  ;;  %v6905_v41 = vld [vmem:[%s8120_s13 + $0xe0] sm:$0xff]  ;;  %v6906_v17 = vld [vmem:[%s8120_s13 + $0xe8] sm:$0xff] }
 0x768   : > { %v6954_v6 = vmax.f32 %v6922_v10, 0.0  ;;  %v6836_v9 = vadd.f32 %v10602_v36, %v10559_v43  ;;  %v6867_v15 = vmul.f32 %v10604_v34, %v6834_v2  ;;  %v6927_v21 = vadd.f32 %v6895_v42, %v6863_v47  ;;  %6983 = vst.msk [vmem:[%s10663_s15 + $0x50] sm:$0xff] %vm332_vm0, %v6951_v8  ;;  %v6900_v43 = vld [vmem:[%s8120_s13 + $0xb8] sm:$0xff] }
 0x769   : > { %v6955_v53 = vmax.f32 %v6923_v45, 0.0  ;;  %v6837_v56 = vadd.f32 %v10602_v36, %v10563_v44  ;;  %v6868_v60 = vmul.f32 %v10604_v34, %v6835_v54  ;;  %v6928_v14 = vadd.f32 %v6896_v51, %v6864_v28  ;;  %6984 = vst.msk [vmem:[%s10663_s15 + $0x58] sm:$0xff] %vm332_vm0, %v6952_v5  ;;  %v6901_v44 = vld [vmem:[%s8120_s13 + $0xc0] sm:$0xff]  ;;  %v6908_v42 = vld [vmem:[%s8120_s13 + $0xf8] sm:$0xff] }
 0x76a   : > { %v6956_v48 = vmax.f32 %v6924_v29, 0.0  ;;  %v6838_v62 = vadd.f32 %v10602_v36, %v10568_v31  ;;  %v6869_v11 = vmul.f32 %v10604_v34, %v6836_v9  ;;  %v6929_v22 = vadd.f32 %v6897_v3, %v6865_v55  ;;  %6985 = vst.msk [vmem:[%s10663_s15 + $0x60] sm:$0xff] %vm332_vm0, %v6953_v20  ;;  %v6902_v31 = vld [vmem:[%s8120_s13 + $0xc8] sm:$0xff] }
 0x76b   : > { %v6957_v12 = vmax.f32 %v6925_v63, 0.0  ;;  %v6839_v13 = vadd.f32 %v10602_v36, %v10572_v26  ;;  %v6870_v37 = vmul.f32 %v10604_v34, %v6837_v56  ;;  %v6930_v1 = vadd.f32 %v6898_v57, %v6866_v50  ;;  %6986 = vst.msk [vmem:[%s10663_s15 + $0x68] sm:$0xff] %vm332_vm0, %v6954_v6 }
 0x76c   : > { %v6958_v23 = vmax.f32 %v6926_v4, 0.0  ;;  %v6840_v24 = vadd.f32 %v10602_v36, %v10576_v59  ;;  %v6871_v49 = vmul.f32 %v10604_v34, %v6838_v62  ;;  %v6931_v19 = vadd.f32 %v6899_v38, %v6867_v15  ;;  %6987 = vst.msk [vmem:[%s10663_s15 + $0x70] sm:$0xff] %vm332_vm0, %v6955_v53 }
 0x76d   : > { %v6959_v30 = vmax.f32 %v6927_v21, 0.0  ;;  %v6841_v26 = vadd.f32 %v10602_v36, %v10580_v18  ;;  %v6872_v58 = vmul.f32 %v10604_v34, %v6839_v13  ;;  %v6932_v52 = vadd.f32 %v6900_v43, %v6868_v60  ;;  %6988 = vst.msk [vmem:[%s10663_s15 + $0x78] sm:$0xff] %vm332_vm0, %v6956_v48 }
 0x76e   : > { %v6960_v16 = vmax.f32 %v6928_v14, 0.0  ;;  %v6842_v59 = vadd.f32 %v10602_v36, %v10585_v33  ;;  %v6873_v32 = vmul.f32 %v10604_v34, %v6840_v24  ;;  %v6933_v7 = vadd.f32 %v6901_v44, %v6869_v11  ;;  %6989 = vst.msk [vmem:[%s10663_s15 + $0x80] sm:$0xff] %vm332_vm0, %v6957_v12 }
 0x76f   : > { %v6961_v35 = vmax.f32 %v6929_v22, 0.0  ;;  %v6843_v18 = vadd.f32 %v10602_v36, %v10591_v27  ;;  %v6874_v39 = vmul.f32 %v10604_v34, %v6841_v26  ;;  %v6934_v10 = vadd.f32 %v6902_v31, %v6870_v37  ;;  %6990 = vst.msk [vmem:[%s10663_s15 + $0x88] sm:$0xff] %vm332_vm0, %v6958_v23  ;;  %v6907_v27 = vld [vmem:[%s8120_s13 + $0xf0] sm:$0xff]  ;;  %s7017_s13 = scalar_lea.hbm %s10843_s7, %s7712_s1 }
 0x770   : > { %v6962_v33 = vmax.f32 %v6930_v1, 0.0  ;;  %v6875_v46 = vmul.f32 %v10604_v34, %v6842_v59  ;;  %v6935_v25 = vadd.f32 %v6903_v40, %v6871_v49  ;;  %v6963_v47 = vmax.f32 %v6931_v19, 0.0  ;;  %6991 = vst.msk [vmem:[%s10663_s15 + $0x90] sm:$0xff] %vm332_vm0, %v6959_v30  ;;  %s7020_s11 = sshll.u32 %s7017_s13, 4  ;;  %s7021_s11 = int_to_ptr.hbm [resolvable:$true] %s7020_s11 }
 0x771   : > { %v6876_v36 = vmul.f32 %v10604_v34, %v6843_v18  ;;  %v6936_v45 = vadd.f32 %v6904_v0, %v6872_v58  ;;  %v6964_v8 = vmax.f32 %v6932_v52, 0.0  ;;  %6992 = vst.msk [vmem:[%s10663_s15 + $0x98] sm:$0xff] %vm332_vm0, %v6960_v16  ;;  %v6937_v61 = vadd.f32 %v6905_v41, %v6873_v32  ;;  %s7904_s19 = sshra.s32 %s7021_s11, 4  ;;  %s7905_s19 = int_to_ptr.hbm [resolvable:$true] %s7904_s19 }
 0x772   : > { %v6965_v28 = vmax.f32 %v6933_v7, 0.0  ;;  %6993 = vst.msk [vmem:[%s10663_s15 + $0xa0] sm:$0xff] %vm332_vm0, %v6961_v35  ;;  %v6938_v29 = vadd.f32 %v6906_v17, %v6874_v39  ;;  %v6966_v5 = vmax.f32 %v6934_v10, 0.0  ;;  %v6939_v34 = vadd.f32 %v6907_v27, %v6875_v46  ;;  %s7906_s30 = scalar_lea.hbm %s7905_s19, 256  ;;  %p7911_p11 = scmp.lt.s32.totalorder %s7905_s19, %s10843_s7 }
 0x773   : > { %6994 = vst.msk [vmem:[%s10663_s15 + $0xa8] sm:$0xff] %vm332_vm0, %v6962_v33  ;;  %v6967_v51 = vmax.f32 %v6935_v25, 0.0  ;;  %v6940_v2 = vadd.f32 %v6908_v42, %v6876_v36  ;;  %v6968_v55 = vmax.f32 %v6936_v45, 0.0  ;;  %v6969_v63 = vmax.f32 %v6937_v61, 0.0  ;;  %p7907_p1 = scmp.ne.s32.totalorder %s7905_s19, %s7906_s30  ;;  %p7912_p2 = scmp.lt.s32.totalorder %s7910_s21, %s7906_s30 }
 0x774   : > { %6995 = vst.msk [vmem:[%s10663_s15 + $0xb0] sm:$0xff] %vm332_vm0, %v6963_v47  ;;  %v6970_v20 = vmax.f32 %v6938_v29, 0.0  ;;  %v6971_v3 = vmax.f32 %v6939_v34, 0.0 }
 0x775   : > { %6996 = vst.msk [vmem:[%s10663_s15 + $0xb8] sm:$0xff] %vm332_vm0, %v6964_v8  ;;  %v6972_v54 = vmax.f32 %v6940_v2, 0.0  ;;  %p7908_p4 = pnand %p7907_p1, %p8081_p3  ;;  %p7913_p9 = por %p7912_p2, %p7911_p11 }
 0x776   : > { %6997 = vst.msk [vmem:[%s10663_s15 + $0xc0] sm:$0xff] %vm332_vm0, %v6965_v28 }
 0x777   : > { %6998 = vst.msk [vmem:[%s10663_s15 + $0xc8] sm:$0xff] %vm332_vm0, %v6966_v5  ;;  %p7909_p8 = pneg %p7908_p4 }
 0x778   : > { %6999 = vst.msk [vmem:[%s10663_s15 + $0xd0] sm:$0xff] %vm332_vm0, %v6967_v51 }
 0x779   : > { %7000 = vst.msk [vmem:[%s10663_s15 + $0xd8] sm:$0xff] %vm332_vm0, %v6968_v55  ;;  %p7914_p10 = pnand %p7913_p9, %p7909_p8 }
 0x77a   : > { %7001 = vst.msk [vmem:[%s10663_s15 + $0xe0] sm:$0xff] %vm332_vm0, %v6969_v63 }
 0x77b   : > { %7002 = vst.msk [vmem:[%s10663_s15 + $0xe8] sm:$0xff] %vm332_vm0, %v6970_v20 }
 0x77c   : > { %7003 = vst.msk [vmem:[%s10663_s15 + $0xf0] sm:$0xff] %vm332_vm0, %v6971_v3 }
 0x77d   : > { %7004 = vst.msk [vmem:[%s10663_s15 + $0xf8] sm:$0xff] %vm332_vm0, %v6972_v54 }
 0x77e   : > { %7917 = shalt.err (!%p7914_p10)
}
 0x77f   : > { %s7967_s14 = smov 128   ;;  %s7968_s15 = smov 8  }
 0x780   : > { %7731 = dma.vmem_to_hbm [thread:$0]  (%p8081_p3), %s7019_s17, 4096, %s7021_s11, %s7006_s20, %s7967_s14, %s7967_s14, %s7968_s15  }
 0x781 PF: > { %s7035_s1 = sand.u32 1, %s7948_s24   ;;  %p10855_p12 = scmp.ge.s32.totalorder %s7960_s27, 2 }
 0x782   : > { %s7036_s28 = scalar_lea.sflag [#allocation6], %s7035_s1 }
 0x783   : > { %p7745_p13 = pnand %p10855_p12, %p8044_p6 }
 0x785   : > { %p7746_p0 = pneg %p7745_p13 }
 0x787   : > { %7943 = dma.done.wait (%p7746_p0), %s7036_s28, 4096  }
 0x788   : > { %7945 = vsyncadd (%p7746_p0), %s7036_s28, 4294963200  ;;  %p21_p5 = scmp.ge.s32.totalorder %s8071_s22, 4   ;;  %s10856_s24 = smov %s7952_s25 }
 0x789   : > { %s10857_s25 = smov %s7956_s26  ;;  %s10858_s26 = smov %s8087_s10 }
 0x78a   : > { %s10859_s27 = smov %s8071_s22  ;;  %23 = sbr.rel (!%p21_p5) target bundleno = 8 (0x8), region = 119 }
 0x78f   :  { %7042 = vsyncpa [#allocation5], 1 }
 0x790   :  { %7044 = vsyncpa [#allocation5 + $0x1], 1 }
 0x791   :  { %7045 = vsyncpa [#allocation8], 1 }
 0x792   :  { %7046 = vsyncpa [#allocation6], 1 }
 0x793   :  { %7048 = vsyncpa [#allocation6 + $0x1], 1 }

</bundles_post_ra>
